<compile_context>
chip_gen: v5e
topology: v5e:2x2
jax: 0.10.0
libtpu: 0.0.40
codegen_flags: <defaults>
</compile_context>

<pallas_src>
import functools

import jax
import jax.numpy as jnp
from jax.experimental import pallas as pl
from jax.experimental.pallas import tpu as pltpu


# ---------------------------------------------------------------------------------
# Fused Pallas kernel
# ---------------------------------------------------------------------------------
def _downsample_rows(a, stride, n_out):
    # Rows 0, stride, 2*stride, ... selected via a tiny selection matmul: keeps the
    # operation on the MXU / lane-dense path instead of a sublane-strided relayout.
    rows = a.shape[0]
    row_ids = jax.lax.broadcasted_iota(jnp.int32, (n_out, rows), 1)
    want = stride * jax.lax.broadcasted_iota(jnp.int32, (n_out, rows), 0)
    sel = (row_ids == want).astype(a.dtype)
    return jnp.dot(sel, a, preferred_element_type=jnp.float32)


def fused_fx_kernel(*refs, metas):
    # refs: [x, bn_sc, bn_sh, <per-block folded operators...>, out_mid, out_last]
    it = iter(refs)
    x_ref = next(it)
    bnsc_ref = next(it)
    bnsh_ref = next(it)
    blk_refs = []
    for m in metas:
        names = ["B", "s1", "Wt", "s2"] + (["R", "sr"] if m["resconv"] else [])
        blk_refs.append({nm: next(it) for nm in names})
    out_mid_ref = next(it)
    out_last_ref = next(it)

    # input BatchNorm1d(V*C) (eval, folded); activation layout (T, V*C), lane = v*C + c
    x = x_ref[0] * bnsc_ref[...] + bnsh_ref[...]

    for m, ops in zip(metas, blk_refs):                    # static unroll over 10 blocks
        Kt, stride = m["Kt"], m["stride"]
        pad = (Kt - 1) // 2
        t_in, t_out = m["t_in"], m["t_out"]

        # ---- spatial graph conv (A*M, conv bias, BN1 pre-folded) + ReLU ----
        y = jnp.dot(x, ops["B"][...], preferred_element_type=jnp.float32)
        y = jnp.maximum(y + ops["s1"][...], 0.0)           # (t_in, V*cout)
        vc = y.shape[-1]

        # ---- residual branch ----
        if not m["residual"]:
            res = None
        elif m["resconv"]:
            xs = x if stride == 1 else _downsample_rows(x, stride, t_out)
            res = (jnp.dot(xs, ops["R"][...], preferred_element_type=jnp.float32)
                   + ops["sr"][...])                        # 1x1 conv + BN (folded)
        else:
            res = x                                         # identity residual

        # ---- temporal conv (Kt taps as per-vertex block-diag matmuls) + BN2 + ReLU ----
        ypad = jnp.concatenate(
            [jnp.zeros((pad, vc), jnp.float32), y, jnp.zeros((pad, vc), jnp.float32)],
            axis=0)                                         # in-kernel halo, no HBM pad
        acc = jnp.zeros((t_in, vc), jnp.float32)
        for dt in range(Kt):                                # static unroll over taps
            x_dt = jax.lax.slice_in_dim(ypad, dt, dt + t_in, axis=0)
            acc = acc + jnp.dot(x_dt, ops["Wt"][dt],
                                preferred_element_type=jnp.float32)
        y2 = jnp.maximum(acc + ops["s2"][...], 0.0)         # BN2 (folded) + ReLU
        if stride > 1:
            y2 = _downsample_rows(y2, stride, t_out)        # temporal stride
        x = y2 if res is None else y2 + res

        if m["emit_mid"]:
            out_mid_ref[0] = x.astype(out_mid_ref.dtype)

    out_last_ref[0] = x.astype(out_last_ref.dtype)


# ---------------------------------------------------------------------------------
# Static metadata + one-time parameter folding (outside the jitted forward)
# ---------------------------------------------------------------------------------
def build_metas(config, Kt, T0):
    metas, t = [], T0
    for i, (cin, cout, stride) in enumerate(config):
        pad = (Kt - 1) // 2
        t_out = (t + 2 * pad - Kt) // stride + 1
        residual = (i != 0)
        resconv = residual and not (cin == cout and stride == 1)
        metas.append(dict(cin=cin, cout=cout, stride=stride, Kt=Kt,
                          t_in=t, t_out=t_out, residual=residual,
                          resconv=resconv, emit_mid=(i == 4)))
        t = t_out
    return metas


def fold_params(params, A, config, Kt, V):
    """Precompute folded, lane-dense operators. Run ONCE for inference."""
    eyeV = jnp.eye(V, dtype=jnp.float32)
    folded = {"bn_sc": params["bn_scale"].reshape(1, -1).astype(jnp.float32),
              "bn_sh": params["bn_shift"].reshape(1, -1).astype(jnp.float32),
              "blocks": []}
    for i, (cin, cout, stride) in enumerate(config):
        p = params["blocks"][i]
        am = A * p["M"]                                                   # (K, V, V)
        # spatial graph conv folded: rows (v, cin), cols (w, cout)
        B = jnp.einsum("kvw,kio->viwo", am, p["w_sgc"]).reshape(V * cin, V * cout)
        bias2 = jnp.einsum("kw,ko->wo", am.sum(axis=1), p["b_sgc"]).reshape(1, V * cout)
        sc1 = jnp.tile(p["bn1_scale"], (1, V))
        sh1 = jnp.tile(p["bn1_shift"], (1, V))
        blk = {"B": B * sc1, "s1": bias2 * sc1 + sh1}

        # temporal conv taps -> per-vertex block-diagonal operators, BN2 folded in
        Wbig = jnp.einsum("vw,kio->kviwo", eyeV, p["w_t"]).reshape(Kt, V * cout, V * cout)
        sc2 = jnp.tile(p["bn2_scale"], (1, V))
        sh2 = jnp.tile(p["bn2_shift"], (1, V))
        blk["Wt"] = Wbig * sc2[None]
        blk["s2"] = jnp.tile(p["b_t"], (1, V)) * sc2 + sh2

        residual = (i != 0)
        resconv = residual and not (cin == cout and stride == 1)
        if resconv:
            Rbig = jnp.einsum("vw,io->viwo", eyeV, p["w_res"]).reshape(V * cin, V * cout)
            scr = jnp.tile(p["bnr_scale"], (1, V))
            shr = jnp.tile(p["bnr_shift"], (1, V))
            blk["R"] = Rbig * scr
            blk["sr"] = jnp.tile(p["b_res"], (1, V)) * scr + shr
        folded["blocks"].append(blk)
    return folded


# ---------------------------------------------------------------------------------
# pallas_call wrapper (single fused kernel for the whole forward)
# ---------------------------------------------------------------------------------
def _whole_array_spec(arr):
    zeros = (0,) * arr.ndim
    return pl.BlockSpec(arr.shape, lambda n: zeros)


def feature_extractor_forward(x_nctv, folded, metas, V):
    N, C0, T0, _ = x_nctv.shape
    x = jnp.transpose(x_nctv, (0, 2, 3, 1)).reshape(N, T0, V * C0).astype(jnp.float32)

    operands = [x, folded["bn_sc"], folded["bn_sh"]]
    in_specs = [pl.BlockSpec((1, T0, V * C0), lambda n: (n, 0, 0)),
                _whole_array_spec(folded["bn_sc"]),
                _whole_array_spec(folded["bn_sh"])]
    for m, blk in zip(metas, folded["blocks"]):
        names = ["B", "s1", "Wt", "s2"] + (["R", "sr"] if m["resconv"] else [])
        for nm in names:
            operands.append(blk[nm])
            in_specs.append(_whole_array_spec(blk[nm]))

    m_mid, m_last = metas[4], metas[-1]
    Tm, Cm = m_mid["t_out"], m_mid["cout"]
    Tl, Cl = m_last["t_out"], m_last["cout"]
    out_shape = (jax.ShapeDtypeStruct((N, Tm, V * Cm), jnp.float32),
                 jax.ShapeDtypeStruct((N, Tl, V * Cl), jnp.float32))
    out_specs = (pl.BlockSpec((1, Tm, V * Cm), lambda n: (n, 0, 0)),
                 pl.BlockSpec((1, Tl, V * Cl), lambda n: (n, 0, 0)))

    # advisory cost hint for the XLA scheduler
    flops = 0
    for m in metas:
        vci, vco = V * m["cin"], V * m["cout"]
        flops += 2 * m["t_in"] * vci * vco                 # spatial graph conv
        flops += 2 * m["Kt"] * m["t_in"] * vco * vco       # temporal conv (full res)
        if m["resconv"]:
            flops += 2 * m["t_out"] * vci * vco
    flops *= N
    bytes_accessed = (sum(int(a.size) * 4 for a in operands)
                      + N * (Tm * V * Cm + Tl * V * Cl) * 4)
    cost = pl.CostEstimate(flops=flops, transcendentals=0, bytes_accessed=bytes_accessed)

    kern = functools.partial(fused_fx_kernel, metas=metas)
    x_mid, x_last = pl.pallas_call(
        kern,
        out_shape=out_shape,
        grid=(N,),
        in_specs=in_specs,
        out_specs=out_specs,
        compiler_params=pltpu.CompilerParams(
            dimension_semantics=("parallel",),            # v7x: 2 TCs split the batch
            vmem_limit_bytes=32 * 1024 * 1024),
        cost_estimate=cost,
    )(*operands)

    # back to PyTorch (N, C, T, V)
    x_mid = jnp.transpose(x_mid.reshape(N, Tm, V, Cm), (0, 3, 1, 2))
    x_last = jnp.transpose(x_last.reshape(N, Tl, V, Cl), (0, 3, 1, 2))
    return x_mid, x_last


# ---------------------------------------------------------------------------------
# Deterministic parameter construction (eval-mode BN folded to scale/shift)
# ---------------------------------------------------------------------------------
def bn_affine(key, c, eps=1e-5):
    k1, k2, k3, k4 = jax.random.split(key, 4)
    gamma = 1.0 + 0.1 * jax.random.normal(k1, (c,), jnp.float32)
    beta = 0.1 * jax.random.normal(k2, (c,), jnp.float32)
    mean = 0.1 * jax.random.normal(k3, (c,), jnp.float32)
    var = 1.0 + 0.1 * jax.random.uniform(k4, (c,), jnp.float32)
    scale = gamma / jnp.sqrt(var + eps)
    shift = beta - mean * scale
    return scale.reshape(1, c), shift.reshape(1, c)


def init_block(key, cin, cout, K, Kt, stride, A_size, residual):
    ks = jax.random.split(key, 8)
    p = {
        "w_sgc": 0.2 * jax.random.normal(ks[0], (K, cin, cout), jnp.float32),
        "b_sgc": 0.05 * jax.random.normal(ks[1], (K, cout), jnp.float32),
        "M": jnp.ones(A_size, jnp.float32),               # nn.Parameter(torch.ones(A_size))
        "w_t": 0.2 * jax.random.normal(ks[3], (Kt, cout, cout), jnp.float32),
        "b_t": 0.05 * jax.random.normal(ks[4], (1, cout), jnp.float32),
    }
    p["bn1_scale"], p["bn1_shift"] = bn_affine(ks[2], cout)
    p["bn2_scale"], p["bn2_shift"] = bn_affine(ks[5], cout)
    if residual and not (cin == cout and stride == 1):
        p["w_res"] = 0.2 * jax.random.normal(ks[6], (cin, cout), jnp.float32)
        p["b_res"] = 0.05 * jax.random.normal(ks[7], (1, cout), jnp.float32)
        p["bnr_scale"], p["bnr_shift"] = bn_affine(jax.random.fold_in(key, 99), cout)
    return p


# ---------------------------------------------------------------------------------
if __name__ == "__main__":
    key = jax.random.PRNGKey(0)
    N, C_in, T, V = 2, 3, 16, 8
    K = 3                      # s_kernel_size (adjacency subsets)
    Kt = 3                     # t_kernel_size
    A_size = (K, V, V)
    # config[i] = [in_channels, out_channels, stride]
    config = [[3, 8, 1], [8, 8, 1], [8, 8, 1], [8, 8, 1], [8, 16, 2],
              [16, 16, 1], [16, 16, 1], [16, 32, 2], [32, 32, 1], [32, 32, 1]]

    keys = jax.random.split(key, 20)
    x_nctv = jax.random.normal(keys[0], (N, C_in, T, V), jnp.float32)
    A = 0.3 * jnp.abs(jax.random.normal(keys[1], A_size, jnp.float32))

    # input BatchNorm1d(C_in * V): channel index is v*C + c (matches permute+view)
    bn_scale, bn_shift = bn_affine(keys[2], V * C_in)
    params = {
        "bn_scale": bn_scale,                              # (1, V*C_in)
        "bn_shift": bn_shift,
        "blocks": [init_block(keys[3 + i], ci, co, K, Kt, s, A_size, residual=(i != 0))
                   for i, (ci, co, s) in enumerate(config)],
    }

    metas = build_metas(config, Kt, T)
    folded = fold_params(params, A, config, Kt, V)         # precomputed once (inference)

    fwd = jax.jit(functools.partial(feature_extractor_forward, metas=metas, V=V))
    x_mid, x_last = fwd(x_nctv, folded)
    jax.block_until_ready((x_mid, x_last))

    assert x_mid.shape == (N, 16, 8, V), x_mid.shape
    assert x_last.shape == (N, 32, 4, V), x_last.shape
    print("KERNEL_OK")
</pallas_src>

<mosaic_0001>
module attributes {stable_mosaic.version = 11 : i64} {
  func.func @fused_fx_kernel(%arg0: i32, %arg1: memref<1x16x24xf32, #tpu.memory_space<vmem>>, %arg2: memref<1x24xf32, #tpu.memory_space<vmem>>, %arg3: memref<1x24xf32, #tpu.memory_space<vmem>>, %arg4: memref<24x64xf32, #tpu.memory_space<vmem>>, %arg5: memref<1x64xf32, #tpu.memory_space<vmem>>, %arg6: memref<3x64x64xf32, #tpu.memory_space<vmem>>, %arg7: memref<1x64xf32, #tpu.memory_space<vmem>>, %arg8: memref<64x64xf32, #tpu.memory_space<vmem>>, %arg9: memref<1x64xf32, #tpu.memory_space<vmem>>, %arg10: memref<3x64x64xf32, #tpu.memory_space<vmem>>, %arg11: memref<1x64xf32, #tpu.memory_space<vmem>>, %arg12: memref<64x64xf32, #tpu.memory_space<vmem>>, %arg13: memref<1x64xf32, #tpu.memory_space<vmem>>, %arg14: memref<3x64x64xf32, #tpu.memory_space<vmem>>, %arg15: memref<1x64xf32, #tpu.memory_space<vmem>>, %arg16: memref<64x64xf32, #tpu.memory_space<vmem>>, %arg17: memref<1x64xf32, #tpu.memory_space<vmem>>, %arg18: memref<3x64x64xf32, #tpu.memory_space<vmem>>, %arg19: memref<1x64xf32, #tpu.memory_space<vmem>>, %arg20: memref<64x128xf32, #tpu.memory_space<vmem>>, %arg21: memref<1x128xf32, #tpu.memory_space<vmem>>, %arg22: memref<3x128x128xf32, #tpu.memory_space<vmem>>, %arg23: memref<1x128xf32, #tpu.memory_space<vmem>>, %arg24: memref<64x128xf32, #tpu.memory_space<vmem>>, %arg25: memref<1x128xf32, #tpu.memory_space<vmem>>, %arg26: memref<128x128xf32, #tpu.memory_space<vmem>>, %arg27: memref<1x128xf32, #tpu.memory_space<vmem>>, %arg28: memref<3x128x128xf32, #tpu.memory_space<vmem>>, %arg29: memref<1x128xf32, #tpu.memory_space<vmem>>, %arg30: memref<128x128xf32, #tpu.memory_space<vmem>>, %arg31: memref<1x128xf32, #tpu.memory_space<vmem>>, %arg32: memref<3x128x128xf32, #tpu.memory_space<vmem>>, %arg33: memref<1x128xf32, #tpu.memory_space<vmem>>, %arg34: memref<128x256xf32, #tpu.memory_space<vmem>>, %arg35: memref<1x256xf32, #tpu.memory_space<vmem>>, %arg36: memref<3x256x256xf32, #tpu.memory_space<vmem>>, %arg37: memref<1x256xf32, #tpu.memory_space<vmem>>, %arg38: memref<128x256xf32, #tpu.memory_space<vmem>>, %arg39: memref<1x256xf32, #tpu.memory_space<vmem>>, %arg40: memref<256x256xf32, #tpu.memory_space<vmem>>, %arg41: memref<1x256xf32, #tpu.memory_space<vmem>>, %arg42: memref<3x256x256xf32, #tpu.memory_space<vmem>>, %arg43: memref<1x256xf32, #tpu.memory_space<vmem>>, %arg44: memref<256x256xf32, #tpu.memory_space<vmem>>, %arg45: memref<1x256xf32, #tpu.memory_space<vmem>>, %arg46: memref<3x256x256xf32, #tpu.memory_space<vmem>>, %arg47: memref<1x256xf32, #tpu.memory_space<vmem>>, %arg48: memref<1x8x128xf32, #tpu.memory_space<vmem>>, %arg49: memref<1x4x256xf32, #tpu.memory_space<vmem>>) attributes {dimension_semantics = [#tpu.dimension_semantics<parallel>], iteration_bounds = array<i64: 2>, scalar_prefetch = 0 : i64, scratch_operands = 0 : i64, tpu.core_type = #tpu.core_type<tc>, window_params = [{transform_indices = @transform_0, window_bounds = array<i64: 1, 16, 24>}, {pipeline_mode = #tpu.pipeline_mode<synchronous>, transform_indices = @transform_1, window_bounds = array<i64: 1, 24>}, {pipeline_mode = #tpu.pipeline_mode<synchronous>, transform_indices = @transform_2, window_bounds = array<i64: 1, 24>}, {pipeline_mode = #tpu.pipeline_mode<synchronous>, transform_indices = @transform_3, window_bounds = array<i64: 24, 64>}, {pipeline_mode = #tpu.pipeline_mode<synchronous>, transform_indices = @transform_4, window_bounds = array<i64: 1, 64>}, {pipeline_mode = #tpu.pipeline_mode<synchronous>, transform_indices = @transform_5, window_bounds = array<i64: 3, 64, 64>}, {pipeline_mode = #tpu.pipeline_mode<synchronous>, transform_indices = @transform_6, window_bounds = array<i64: 1, 64>}, {pipeline_mode = #tpu.pipeline_mode<synchronous>, transform_indices = @transform_7, window_bounds = array<i64: 64, 64>}, {pipeline_mode = #tpu.pipeline_mode<synchronous>, transform_indices = @transform_8, window_bounds = array<i64: 1, 64>}, {pipeline_mode = #tpu.pipeline_mode<synchronous>, transform_indices = @transform_9, window_bounds = array<i64: 3, 64, 64>}, {pipeline_mode = #tpu.pipeline_mode<synchronous>, transform_indices = @transform_10, window_bounds = array<i64: 1, 64>}, {pipeline_mode = #tpu.pipeline_mode<synchronous>, transform_indices = @transform_11, window_bounds = array<i64: 64, 64>}, {pipeline_mode = #tpu.pipeline_mode<synchronous>, transform_indices = @transform_12, window_bounds = array<i64: 1, 64>}, {pipeline_mode = #tpu.pipeline_mode<synchronous>, transform_indices = @transform_13, window_bounds = array<i64: 3, 64, 64>}, {pipeline_mode = #tpu.pipeline_mode<synchronous>, transform_indices = @transform_14, window_bounds = array<i64: 1, 64>}, {pipeline_mode = #tpu.pipeline_mode<synchronous>, transform_indices = @transform_15, window_bounds = array<i64: 64, 64>}, {pipeline_mode = #tpu.pipeline_mode<synchronous>, transform_indices = @transform_16, window_bounds = array<i64: 1, 64>}, {pipeline_mode = #tpu.pipeline_mode<synchronous>, transform_indices = @transform_17, window_bounds = array<i64: 3, 64, 64>}, {pipeline_mode = #tpu.pipeline_mode<synchronous>, transform_indices = @transform_18, window_bounds = array<i64: 1, 64>}, {pipeline_mode = #tpu.pipeline_mode<synchronous>, transform_indices = @transform_19, window_bounds = array<i64: 64, 128>}, {pipeline_mode = #tpu.pipeline_mode<synchronous>, transform_indices = @transform_20, window_bounds = array<i64: 1, 128>}, {pipeline_mode = #tpu.pipeline_mode<synchronous>, transform_indices = @transform_21, window_bounds = array<i64: 3, 128, 128>}, {pipeline_mode = #tpu.pipeline_mode<synchronous>, transform_indices = @transform_22, window_bounds = array<i64: 1, 128>}, {pipeline_mode = #tpu.pipeline_mode<synchronous>, transform_indices = @transform_23, window_bounds = array<i64: 64, 128>}, {pipeline_mode = #tpu.pipeline_mode<synchronous>, transform_indices = @transform_24, window_bounds = array<i64: 1, 128>}, {pipeline_mode = #tpu.pipeline_mode<synchronous>, transform_indices = @transform_25, window_bounds = array<i64: 128, 128>}, {pipeline_mode = #tpu.pipeline_mode<synchronous>, transform_indices = @transform_26, window_bounds = array<i64: 1, 128>}, {pipeline_mode = #tpu.pipeline_mode<synchronous>, transform_indices = @transform_27, window_bounds = array<i64: 3, 128, 128>}, {pipeline_mode = #tpu.pipeline_mode<synchronous>, transform_indices = @transform_28, window_bounds = array<i64: 1, 128>}, {pipeline_mode = #tpu.pipeline_mode<synchronous>, transform_indices = @transform_29, window_bounds = array<i64: 128, 128>}, {pipeline_mode = #tpu.pipeline_mode<synchronous>, transform_indices = @transform_30, window_bounds = array<i64: 1, 128>}, {pipeline_mode = #tpu.pipeline_mode<synchronous>, transform_indices = @transform_31, window_bounds = array<i64: 3, 128, 128>}, {pipeline_mode = #tpu.pipeline_mode<synchronous>, transform_indices = @transform_32, window_bounds = array<i64: 1, 128>}, {pipeline_mode = #tpu.pipeline_mode<synchronous>, transform_indices = @transform_33, window_bounds = array<i64: 128, 256>}, {pipeline_mode = #tpu.pipeline_mode<synchronous>, transform_indices = @transform_34, window_bounds = array<i64: 1, 256>}, {pipeline_mode = #tpu.pipeline_mode<synchronous>, transform_indices = @transform_35, window_bounds = array<i64: 3, 256, 256>}, {pipeline_mode = #tpu.pipeline_mode<synchronous>, transform_indices = @transform_36, window_bounds = array<i64: 1, 256>}, {pipeline_mode = #tpu.pipeline_mode<synchronous>, transform_indices = @transform_37, window_bounds = array<i64: 128, 256>}, {pipeline_mode = #tpu.pipeline_mode<synchronous>, transform_indices = @transform_38, window_bounds = array<i64: 1, 256>}, {pipeline_mode = #tpu.pipeline_mode<synchronous>, transform_indices = @transform_39, window_bounds = array<i64: 256, 256>}, {pipeline_mode = #tpu.pipeline_mode<synchronous>, transform_indices = @transform_40, window_bounds = array<i64: 1, 256>}, {pipeline_mode = #tpu.pipeline_mode<synchronous>, transform_indices = @transform_41, window_bounds = array<i64: 3, 256, 256>}, {pipeline_mode = #tpu.pipeline_mode<synchronous>, transform_indices = @transform_42, window_bounds = array<i64: 1, 256>}, {pipeline_mode = #tpu.pipeline_mode<synchronous>, transform_indices = @transform_43, window_bounds = array<i64: 256, 256>}, {pipeline_mode = #tpu.pipeline_mode<synchronous>, transform_indices = @transform_44, window_bounds = array<i64: 1, 256>}, {pipeline_mode = #tpu.pipeline_mode<synchronous>, transform_indices = @transform_45, window_bounds = array<i64: 3, 256, 256>}, {pipeline_mode = #tpu.pipeline_mode<synchronous>, transform_indices = @transform_46, window_bounds = array<i64: 1, 256>}, {transform_indices = @transform_47, window_bounds = array<i64: 1, 8, 128>}, {transform_indices = @transform_48, window_bounds = array<i64: 1, 4, 256>}]} {
    %c0 = arith.constant 0 : index
    %c0_0 = arith.constant 0 : index
    %c0_1 = arith.constant 0 : index
    %0 = vector.load %arg1[%c0, %c0_0, %c0_1] : memref<1x16x24xf32, #tpu.memory_space<vmem>>, vector<1x16x24xf32>
    %1 = vector.shape_cast %0 : vector<1x16x24xf32> to vector<16x24xf32>
    %c0_2 = arith.constant 0 : index
    %c0_3 = arith.constant 0 : index
    %2 = vector.load %arg2[%c0_2, %c0_3] : memref<1x24xf32, #tpu.memory_space<vmem>>, vector<1x24xf32>
    %3 = vector.broadcast %2 : vector<1x24xf32> to vector<16x24xf32>
    %4 = arith.mulf %1, %3 : vector<16x24xf32>
    %c0_4 = arith.constant 0 : index
    %c0_5 = arith.constant 0 : index
    %5 = vector.load %arg3[%c0_4, %c0_5] : memref<1x24xf32, #tpu.memory_space<vmem>>, vector<1x24xf32>
    %6 = vector.broadcast %5 : vector<1x24xf32> to vector<16x24xf32>
    %7 = arith.addf %4, %6 : vector<16x24xf32>
    %c0_6 = arith.constant 0 : index
    %c0_7 = arith.constant 0 : index
    %8 = vector.load %arg4[%c0_6, %c0_7] : memref<24x64xf32, #tpu.memory_space<vmem>>, vector<24x64xf32>
    %cst = arith.constant dense<0.000000e+00> : vector<16x64xf32>
    %9 = tpu.matmul %7, %8, %cst {dimension_numbers = #tpu.dot_dimension_numbers<[1], [0], [0], [1], [0, 0, 1, 1], [], []>} : vector<16x24xf32>, vector<24x64xf32>, vector<16x64xf32> -> vector<16x64xf32>
    %c0_8 = arith.constant 0 : index
    %c0_9 = arith.constant 0 : index
    %10 = vector.load %arg5[%c0_8, %c0_9] : memref<1x64xf32, #tpu.memory_space<vmem>>, vector<1x64xf32>
    %11 = vector.broadcast %10 : vector<1x64xf32> to vector<16x64xf32>
    %12 = arith.addf %9, %11 : vector<16x64xf32>
    %cst_10 = arith.constant 0.000000e+00 : f32
    %13 = vector.broadcast %cst_10 : f32 to vector<16x64xf32>
    %14 = arith.maximumf %12, %13 : vector<16x64xf32>
    %cst_11 = arith.constant 0.000000e+00 : f32
    %15 = vector.broadcast %cst_11 : f32 to vector<1x64xf32>
    %cst_12 = arith.constant 0.000000e+00 : f32
    %16 = vector.broadcast %cst_12 : f32 to vector<1x64xf32>
    %17 = tpu.concatenate %15, %14, %16 in 0 : vector<1x64xf32>, vector<16x64xf32>, vector<1x64xf32> -> vector<18x64xf32>
    %cst_13 = arith.constant 0.000000e+00 : f32
    %18 = vector.broadcast %cst_13 : f32 to vector<16x64xf32>
    %19 = vector.extract_strided_slice %17 {offsets = [0, 0], sizes = [16, 64], strides = [1, 1]} : vector<18x64xf32> to vector<16x64xf32>
    %c0_14 = arith.constant 0 : index
    %c0_15 = arith.constant 0 : index
    %c0_16 = arith.constant 0 : index
    %20 = vector.load %arg6[%c0_14, %c0_15, %c0_16] : memref<3x64x64xf32, #tpu.memory_space<vmem>>, vector<1x64x64xf32>
    %21 = vector.shape_cast %20 : vector<1x64x64xf32> to vector<64x64xf32>
    %cst_17 = arith.constant dense<0.000000e+00> : vector<16x64xf32>
    %22 = tpu.matmul %19, %21, %cst_17 {dimension_numbers = #tpu.dot_dimension_numbers<[1], [0], [0], [1], [0, 0, 1, 1], [], []>} : vector<16x64xf32>, vector<64x64xf32>, vector<16x64xf32> -> vector<16x64xf32>
    %23 = arith.addf %18, %22 : vector<16x64xf32>
    %24 = vector.extract_strided_slice %17 {offsets = [1, 0], sizes = [16, 64], strides = [1, 1]} : vector<18x64xf32> to vector<16x64xf32>
    %c1 = arith.constant 1 : index
    %c0_18 = arith.constant 0 : index
    %c0_19 = arith.constant 0 : index
    %25 = vector.load %arg6[%c1, %c0_18, %c0_19] : memref<3x64x64xf32, #tpu.memory_space<vmem>>, vector<1x64x64xf32>
    %26 = vector.shape_cast %25 : vector<1x64x64xf32> to vector<64x64xf32>
    %cst_20 = arith.constant dense<0.000000e+00> : vector<16x64xf32>
    %27 = tpu.matmul %24, %26, %cst_20 {dimension_numbers = #tpu.dot_dimension_numbers<[1], [0], [0], [1], [0, 0, 1, 1], [], []>} : vector<16x64xf32>, vector<64x64xf32>, vector<16x64xf32> -> vector<16x64xf32>
    %28 = arith.addf %23, %27 : vector<16x64xf32>
    %29 = vector.extract_strided_slice %17 {offsets = [2, 0], sizes = [16, 64], strides = [1, 1]} : vector<18x64xf32> to vector<16x64xf32>
    %c2 = arith.constant 2 : index
    %c0_21 = arith.constant 0 : index
    %c0_22 = arith.constant 0 : index
    %30 = vector.load %arg6[%c2, %c0_21, %c0_22] : memref<3x64x64xf32, #tpu.memory_space<vmem>>, vector<1x64x64xf32>
    %31 = vector.shape_cast %30 : vector<1x64x64xf32> to vector<64x64xf32>
    %cst_23 = arith.constant dense<0.000000e+00> : vector<16x64xf32>
    %32 = tpu.matmul %29, %31, %cst_23 {dimension_numbers = #tpu.dot_dimension_numbers<[1], [0], [0], [1], [0, 0, 1, 1], [], []>} : vector<16x64xf32>, vector<64x64xf32>, vector<16x64xf32> -> vector<16x64xf32>
    %33 = arith.addf %28, %32 : vector<16x64xf32>
    %c0_24 = arith.constant 0 : index
    %c0_25 = arith.constant 0 : index
    %34 = vector.load %arg7[%c0_24, %c0_25] : memref<1x64xf32, #tpu.memory_space<vmem>>, vector<1x64xf32>
    %35 = vector.broadcast %34 : vector<1x64xf32> to vector<16x64xf32>
    %36 = arith.addf %33, %35 : vector<16x64xf32>
    %cst_26 = arith.constant 0.000000e+00 : f32
    %37 = vector.broadcast %cst_26 : f32 to vector<16x64xf32>
    %38 = arith.maximumf %36, %37 : vector<16x64xf32>
    %c0_27 = arith.constant 0 : index
    %c0_28 = arith.constant 0 : index
    %39 = vector.load %arg8[%c0_27, %c0_28] : memref<64x64xf32, #tpu.memory_space<vmem>>, vector<64x64xf32>
    %cst_29 = arith.constant dense<0.000000e+00> : vector<16x64xf32>
    %40 = tpu.matmul %38, %39, %cst_29 {dimension_numbers = #tpu.dot_dimension_numbers<[1], [0], [0], [1], [0, 0, 1, 1], [], []>} : vector<16x64xf32>, vector<64x64xf32>, vector<16x64xf32> -> vector<16x64xf32>
    %c0_30 = arith.constant 0 : index
    %c0_31 = arith.constant 0 : index
    %41 = vector.load %arg9[%c0_30, %c0_31] : memref<1x64xf32, #tpu.memory_space<vmem>>, vector<1x64xf32>
    %42 = vector.broadcast %41 : vector<1x64xf32> to vector<16x64xf32>
    %43 = arith.addf %40, %42 : vector<16x64xf32>
    %cst_32 = arith.constant 0.000000e+00 : f32
    %44 = vector.broadcast %cst_32 : f32 to vector<16x64xf32>
    %45 = arith.maximumf %43, %44 : vector<16x64xf32>
    %cst_33 = arith.constant 0.000000e+00 : f32
    %46 = vector.broadcast %cst_33 : f32 to vector<1x64xf32>
    %cst_34 = arith.constant 0.000000e+00 : f32
    %47 = vector.broadcast %cst_34 : f32 to vector<1x64xf32>
    %48 = tpu.concatenate %46, %45, %47 in 0 : vector<1x64xf32>, vector<16x64xf32>, vector<1x64xf32> -> vector<18x64xf32>
    %cst_35 = arith.constant 0.000000e+00 : f32
    %49 = vector.broadcast %cst_35 : f32 to vector<16x64xf32>
    %50 = vector.extract_strided_slice %48 {offsets = [0, 0], sizes = [16, 64], strides = [1, 1]} : vector<18x64xf32> to vector<16x64xf32>
    %c0_36 = arith.constant 0 : index
    %c0_37 = arith.constant 0 : index
    %c0_38 = arith.constant 0 : index
    %51 = vector.load %arg10[%c0_36, %c0_37, %c0_38] : memref<3x64x64xf32, #tpu.memory_space<vmem>>, vector<1x64x64xf32>
    %52 = vector.shape_cast %51 : vector<1x64x64xf32> to vector<64x64xf32>
    %cst_39 = arith.constant dense<0.000000e+00> : vector<16x64xf32>
    %53 = tpu.matmul %50, %52, %cst_39 {dimension_numbers = #tpu.dot_dimension_numbers<[1], [0], [0], [1], [0, 0, 1, 1], [], []>} : vector<16x64xf32>, vector<64x64xf32>, vector<16x64xf32> -> vector<16x64xf32>
    %54 = arith.addf %49, %53 : vector<16x64xf32>
    %55 = vector.extract_strided_slice %48 {offsets = [1, 0], sizes = [16, 64], strides = [1, 1]} : vector<18x64xf32> to vector<16x64xf32>
    %c1_40 = arith.constant 1 : index
    %c0_41 = arith.constant 0 : index
    %c0_42 = arith.constant 0 : index
    %56 = vector.load %arg10[%c1_40, %c0_41, %c0_42] : memref<3x64x64xf32, #tpu.memory_space<vmem>>, vector<1x64x64xf32>
    %57 = vector.shape_cast %56 : vector<1x64x64xf32> to vector<64x64xf32>
    %cst_43 = arith.constant dense<0.000000e+00> : vector<16x64xf32>
    %58 = tpu.matmul %55, %57, %cst_43 {dimension_numbers = #tpu.dot_dimension_numbers<[1], [0], [0], [1], [0, 0, 1, 1], [], []>} : vector<16x64xf32>, vector<64x64xf32>, vector<16x64xf32> -> vector<16x64xf32>
    %59 = arith.addf %54, %58 : vector<16x64xf32>
    %60 = vector.extract_strided_slice %48 {offsets = [2, 0], sizes = [16, 64], strides = [1, 1]} : vector<18x64xf32> to vector<16x64xf32>
    %c2_44 = arith.constant 2 : index
    %c0_45 = arith.constant 0 : index
    %c0_46 = arith.constant 0 : index
    %61 = vector.load %arg10[%c2_44, %c0_45, %c0_46] : memref<3x64x64xf32, #tpu.memory_space<vmem>>, vector<1x64x64xf32>
    %62 = vector.shape_cast %61 : vector<1x64x64xf32> to vector<64x64xf32>
    %cst_47 = arith.constant dense<0.000000e+00> : vector<16x64xf32>
    %63 = tpu.matmul %60, %62, %cst_47 {dimension_numbers = #tpu.dot_dimension_numbers<[1], [0], [0], [1], [0, 0, 1, 1], [], []>} : vector<16x64xf32>, vector<64x64xf32>, vector<16x64xf32> -> vector<16x64xf32>
    %64 = arith.addf %59, %63 : vector<16x64xf32>
    %c0_48 = arith.constant 0 : index
    %c0_49 = arith.constant 0 : index
    %65 = vector.load %arg11[%c0_48, %c0_49] : memref<1x64xf32, #tpu.memory_space<vmem>>, vector<1x64xf32>
    %66 = vector.broadcast %65 : vector<1x64xf32> to vector<16x64xf32>
    %67 = arith.addf %64, %66 : vector<16x64xf32>
    %cst_50 = arith.constant 0.000000e+00 : f32
    %68 = vector.broadcast %cst_50 : f32 to vector<16x64xf32>
    %69 = arith.maximumf %67, %68 : vector<16x64xf32>
    %70 = arith.addf %69, %38 : vector<16x64xf32>
    %c0_51 = arith.constant 0 : index
    %c0_52 = arith.constant 0 : index
    %71 = vector.load %arg12[%c0_51, %c0_52] : memref<64x64xf32, #tpu.memory_space<vmem>>, vector<64x64xf32>
    %cst_53 = arith.constant dense<0.000000e+00> : vector<16x64xf32>
    %72 = tpu.matmul %70, %71, %cst_53 {dimension_numbers = #tpu.dot_dimension_numbers<[1], [0], [0], [1], [0, 0, 1, 1], [], []>} : vector<16x64xf32>, vector<64x64xf32>, vector<16x64xf32> -> vector<16x64xf32>
    %c0_54 = arith.constant 0 : index
    %c0_55 = arith.constant 0 : index
    %73 = vector.load %arg13[%c0_54, %c0_55] : memref<1x64xf32, #tpu.memory_space<vmem>>, vector<1x64xf32>
    %74 = vector.broadcast %73 : vector<1x64xf32> to vector<16x64xf32>
    %75 = arith.addf %72, %74 : vector<16x64xf32>
    %cst_56 = arith.constant 0.000000e+00 : f32
    %76 = vector.broadcast %cst_56 : f32 to vector<16x64xf32>
    %77 = arith.maximumf %75, %76 : vector<16x64xf32>
    %cst_57 = arith.constant 0.000000e+00 : f32
    %78 = vector.broadcast %cst_57 : f32 to vector<1x64xf32>
    %cst_58 = arith.constant 0.000000e+00 : f32
    %79 = vector.broadcast %cst_58 : f32 to vector<1x64xf32>
    %80 = tpu.concatenate %78, %77, %79 in 0 : vector<1x64xf32>, vector<16x64xf32>, vector<1x64xf32> -> vector<18x64xf32>
    %cst_59 = arith.constant 0.000000e+00 : f32
    %81 = vector.broadcast %cst_59 : f32 to vector<16x64xf32>
    %82 = vector.extract_strided_slice %80 {offsets = [0, 0], sizes = [16, 64], strides = [1, 1]} : vector<18x64xf32> to vector<16x64xf32>
    %c0_60 = arith.constant 0 : index
    %c0_61 = arith.constant 0 : index
    %c0_62 = arith.constant 0 : index
    %83 = vector.load %arg14[%c0_60, %c0_61, %c0_62] : memref<3x64x64xf32, #tpu.memory_space<vmem>>, vector<1x64x64xf32>
    %84 = vector.shape_cast %83 : vector<1x64x64xf32> to vector<64x64xf32>
    %cst_63 = arith.constant dense<0.000000e+00> : vector<16x64xf32>
    %85 = tpu.matmul %82, %84, %cst_63 {dimension_numbers = #tpu.dot_dimension_numbers<[1], [0], [0], [1], [0, 0, 1, 1], [], []>} : vector<16x64xf32>, vector<64x64xf32>, vector<16x64xf32> -> vector<16x64xf32>
    %86 = arith.addf %81, %85 : vector<16x64xf32>
    %87 = vector.extract_strided_slice %80 {offsets = [1, 0], sizes = [16, 64], strides = [1, 1]} : vector<18x64xf32> to vector<16x64xf32>
    %c1_64 = arith.constant 1 : index
    %c0_65 = arith.constant 0 : index
    %c0_66 = arith.constant 0 : index
    %88 = vector.load %arg14[%c1_64, %c0_65, %c0_66] : memref<3x64x64xf32, #tpu.memory_space<vmem>>, vector<1x64x64xf32>
    %89 = vector.shape_cast %88 : vector<1x64x64xf32> to vector<64x64xf32>
    %cst_67 = arith.constant dense<0.000000e+00> : vector<16x64xf32>
    %90 = tpu.matmul %87, %89, %cst_67 {dimension_numbers = #tpu.dot_dimension_numbers<[1], [0], [0], [1], [0, 0, 1, 1], [], []>} : vector<16x64xf32>, vector<64x64xf32>, vector<16x64xf32> -> vector<16x64xf32>
    %91 = arith.addf %86, %90 : vector<16x64xf32>
    %92 = vector.extract_strided_slice %80 {offsets = [2, 0], sizes = [16, 64], strides = [1, 1]} : vector<18x64xf32> to vector<16x64xf32>
    %c2_68 = arith.constant 2 : index
    %c0_69 = arith.constant 0 : index
    %c0_70 = arith.constant 0 : index
    %93 = vector.load %arg14[%c2_68, %c0_69, %c0_70] : memref<3x64x64xf32, #tpu.memory_space<vmem>>, vector<1x64x64xf32>
    %94 = vector.shape_cast %93 : vector<1x64x64xf32> to vector<64x64xf32>
    %cst_71 = arith.constant dense<0.000000e+00> : vector<16x64xf32>
    %95 = tpu.matmul %92, %94, %cst_71 {dimension_numbers = #tpu.dot_dimension_numbers<[1], [0], [0], [1], [0, 0, 1, 1], [], []>} : vector<16x64xf32>, vector<64x64xf32>, vector<16x64xf32> -> vector<16x64xf32>
    %96 = arith.addf %91, %95 : vector<16x64xf32>
    %c0_72 = arith.constant 0 : index
    %c0_73 = arith.constant 0 : index
    %97 = vector.load %arg15[%c0_72, %c0_73] : memref<1x64xf32, #tpu.memory_space<vmem>>, vector<1x64xf32>
    %98 = vector.broadcast %97 : vector<1x64xf32> to vector<16x64xf32>
    %99 = arith.addf %96, %98 : vector<16x64xf32>
    %cst_74 = arith.constant 0.000000e+00 : f32
    %100 = vector.broadcast %cst_74 : f32 to vector<16x64xf32>
    %101 = arith.maximumf %99, %100 : vector<16x64xf32>
    %102 = arith.addf %101, %70 : vector<16x64xf32>
    %c0_75 = arith.constant 0 : index
    %c0_76 = arith.constant 0 : index
    %103 = vector.load %arg16[%c0_75, %c0_76] : memref<64x64xf32, #tpu.memory_space<vmem>>, vector<64x64xf32>
    %cst_77 = arith.constant dense<0.000000e+00> : vector<16x64xf32>
    %104 = tpu.matmul %102, %103, %cst_77 {dimension_numbers = #tpu.dot_dimension_numbers<[1], [0], [0], [1], [0, 0, 1, 1], [], []>} : vector<16x64xf32>, vector<64x64xf32>, vector<16x64xf32> -> vector<16x64xf32>
    %c0_78 = arith.constant 0 : index
    %c0_79 = arith.constant 0 : index
    %105 = vector.load %arg17[%c0_78, %c0_79] : memref<1x64xf32, #tpu.memory_space<vmem>>, vector<1x64xf32>
    %106 = vector.broadcast %105 : vector<1x64xf32> to vector<16x64xf32>
    %107 = arith.addf %104, %106 : vector<16x64xf32>
    %cst_80 = arith.constant 0.000000e+00 : f32
    %108 = vector.broadcast %cst_80 : f32 to vector<16x64xf32>
    %109 = arith.maximumf %107, %108 : vector<16x64xf32>
    %cst_81 = arith.constant 0.000000e+00 : f32
    %110 = vector.broadcast %cst_81 : f32 to vector<1x64xf32>
    %cst_82 = arith.constant 0.000000e+00 : f32
    %111 = vector.broadcast %cst_82 : f32 to vector<1x64xf32>
    %112 = tpu.concatenate %110, %109, %111 in 0 : vector<1x64xf32>, vector<16x64xf32>, vector<1x64xf32> -> vector<18x64xf32>
    %cst_83 = arith.constant 0.000000e+00 : f32
    %113 = vector.broadcast %cst_83 : f32 to vector<16x64xf32>
    %114 = vector.extract_strided_slice %112 {offsets = [0, 0], sizes = [16, 64], strides = [1, 1]} : vector<18x64xf32> to vector<16x64xf32>
    %c0_84 = arith.constant 0 : index
    %c0_85 = arith.constant 0 : index
    %c0_86 = arith.constant 0 : index
    %115 = vector.load %arg18[%c0_84, %c0_85, %c0_86] : memref<3x64x64xf32, #tpu.memory_space<vmem>>, vector<1x64x64xf32>
    %116 = vector.shape_cast %115 : vector<1x64x64xf32> to vector<64x64xf32>
    %cst_87 = arith.constant dense<0.000000e+00> : vector<16x64xf32>
    %117 = tpu.matmul %114, %116, %cst_87 {dimension_numbers = #tpu.dot_dimension_numbers<[1], [0], [0], [1], [0, 0, 1, 1], [], []>} : vector<16x64xf32>, vector<64x64xf32>, vector<16x64xf32> -> vector<16x64xf32>
    %118 = arith.addf %113, %117 : vector<16x64xf32>
    %119 = vector.extract_strided_slice %112 {offsets = [1, 0], sizes = [16, 64], strides = [1, 1]} : vector<18x64xf32> to vector<16x64xf32>
    %c1_88 = arith.constant 1 : index
    %c0_89 = arith.constant 0 : index
    %c0_90 = arith.constant 0 : index
    %120 = vector.load %arg18[%c1_88, %c0_89, %c0_90] : memref<3x64x64xf32, #tpu.memory_space<vmem>>, vector<1x64x64xf32>
    %121 = vector.shape_cast %120 : vector<1x64x64xf32> to vector<64x64xf32>
    %cst_91 = arith.constant dense<0.000000e+00> : vector<16x64xf32>
    %122 = tpu.matmul %119, %121, %cst_91 {dimension_numbers = #tpu.dot_dimension_numbers<[1], [0], [0], [1], [0, 0, 1, 1], [], []>} : vector<16x64xf32>, vector<64x64xf32>, vector<16x64xf32> -> vector<16x64xf32>
    %123 = arith.addf %118, %122 : vector<16x64xf32>
    %124 = vector.extract_strided_slice %112 {offsets = [2, 0], sizes = [16, 64], strides = [1, 1]} : vector<18x64xf32> to vector<16x64xf32>
    %c2_92 = arith.constant 2 : index
    %c0_93 = arith.constant 0 : index
    %c0_94 = arith.constant 0 : index
    %125 = vector.load %arg18[%c2_92, %c0_93, %c0_94] : memref<3x64x64xf32, #tpu.memory_space<vmem>>, vector<1x64x64xf32>
    %126 = vector.shape_cast %125 : vector<1x64x64xf32> to vector<64x64xf32>
    %cst_95 = arith.constant dense<0.000000e+00> : vector<16x64xf32>
    %127 = tpu.matmul %124, %126, %cst_95 {dimension_numbers = #tpu.dot_dimension_numbers<[1], [0], [0], [1], [0, 0, 1, 1], [], []>} : vector<16x64xf32>, vector<64x64xf32>, vector<16x64xf32> -> vector<16x64xf32>
    %128 = arith.addf %123, %127 : vector<16x64xf32>
    %c0_96 = arith.constant 0 : index
    %c0_97 = arith.constant 0 : index
    %129 = vector.load %arg19[%c0_96, %c0_97] : memref<1x64xf32, #tpu.memory_space<vmem>>, vector<1x64xf32>
    %130 = vector.broadcast %129 : vector<1x64xf32> to vector<16x64xf32>
    %131 = arith.addf %128, %130 : vector<16x64xf32>
    %cst_98 = arith.constant 0.000000e+00 : f32
    %132 = vector.broadcast %cst_98 : f32 to vector<16x64xf32>
    %133 = arith.maximumf %131, %132 : vector<16x64xf32>
    %134 = arith.addf %133, %102 : vector<16x64xf32>
    %c0_99 = arith.constant 0 : index
    %c0_100 = arith.constant 0 : index
    %135 = vector.load %arg20[%c0_99, %c0_100] : memref<64x128xf32, #tpu.memory_space<vmem>>, vector<64x128xf32>
    %cst_101 = arith.constant dense<0.000000e+00> : vector<16x128xf32>
    %136 = tpu.matmul %134, %135, %cst_101 {dimension_numbers = #tpu.dot_dimension_numbers<[1], [0], [0], [1], [0, 0, 1, 1], [], []>} : vector<16x64xf32>, vector<64x128xf32>, vector<16x128xf32> -> vector<16x128xf32>
    %c0_102 = arith.constant 0 : index
    %c0_103 = arith.constant 0 : index
    %137 = vector.load %arg21[%c0_102, %c0_103] : memref<1x128xf32, #tpu.memory_space<vmem>>, vector<1x128xf32>
    %138 = vector.broadcast %137 : vector<1x128xf32> to vector<16x128xf32>
    %139 = arith.addf %136, %138 : vector<16x128xf32>
    %cst_104 = arith.constant 0.000000e+00 : f32
    %140 = vector.broadcast %cst_104 : f32 to vector<16x128xf32>
    %141 = arith.maximumf %139, %140 : vector<16x128xf32>
    %142 = tpu.iota {dimensions = array<i32: 1>} : vector<8x16xi32>
    %143 = tpu.iota {dimensions = array<i32: 0>} : vector<8x16xi32>
    %c2_i32 = arith.constant 2 : i32
    %144 = vector.broadcast %c2_i32 : i32 to vector<8x16xi32>
    %145 = arith.muli %144, %143 : vector<8x16xi32>
    %146 = arith.cmpi eq, %142, %145 : vector<8x16xi32>
    %147 = arith.extui %146 : vector<8x16xi1> to vector<8x16xi32>
    %148 = arith.sitofp %147 : vector<8x16xi32> to vector<8x16xf32>
    %cst_105 = arith.constant dense<0.000000e+00> : vector<8x64xf32>
    %149 = tpu.matmul %148, %134, %cst_105 {dimension_numbers = #tpu.dot_dimension_numbers<[1], [0], [0], [1], [0, 0, 1, 1], [], []>} : vector<8x16xf32>, vector<16x64xf32>, vector<8x64xf32> -> vector<8x64xf32>
    %c0_106 = arith.constant 0 : index
    %c0_107 = arith.constant 0 : index
    %150 = vector.load %arg24[%c0_106, %c0_107] : memref<64x128xf32, #tpu.memory_space<vmem>>, vector<64x128xf32>
    %cst_108 = arith.constant dense<0.000000e+00> : vector<8x128xf32>
    %151 = tpu.matmul %149, %150, %cst_108 {dimension_numbers = #tpu.dot_dimension_numbers<[1], [0], [0], [1], [0, 0, 1, 1], [], []>} : vector<8x64xf32>, vector<64x128xf32>, vector<8x128xf32> -> vector<8x128xf32>
    %c0_109 = arith.constant 0 : index
    %c0_110 = arith.constant 0 : index
    %152 = vector.load %arg25[%c0_109, %c0_110] : memref<1x128xf32, #tpu.memory_space<vmem>>, vector<1x128xf32>
    %153 = vector.broadcast %152 : vector<1x128xf32> to vector<8x128xf32>
    %154 = arith.addf %151, %153 : vector<8x128xf32>
    %cst_111 = arith.constant 0.000000e+00 : f32
    %155 = vector.broadcast %cst_111 : f32 to vector<1x128xf32>
    %cst_112 = arith.constant 0.000000e+00 : f32
    %156 = vector.broadcast %cst_112 : f32 to vector<1x128xf32>
    %157 = tpu.concatenate %155, %141, %156 in 0 : vector<1x128xf32>, vector<16x128xf32>, vector<1x128xf32> -> vector<18x128xf32>
    %cst_113 = arith.constant 0.000000e+00 : f32
    %158 = vector.broadcast %cst_113 : f32 to vector<16x128xf32>
    %159 = vector.extract_strided_slice %157 {offsets = [0, 0], sizes = [16, 128], strides = [1, 1]} : vector<18x128xf32> to vector<16x128xf32>
    %c0_114 = arith.constant 0 : index
    %c0_115 = arith.constant 0 : index
    %c0_116 = arith.constant 0 : index
    %160 = vector.load %arg22[%c0_114, %c0_115, %c0_116] : memref<3x128x128xf32, #tpu.memory_space<vmem>>, vector<1x128x128xf32>
    %161 = vector.shape_cast %160 : vector<1x128x128xf32> to vector<128x128xf32>
    %cst_117 = arith.constant dense<0.000000e+00> : vector<16x128xf32>
    %162 = tpu.matmul %159, %161, %cst_117 {dimension_numbers = #tpu.dot_dimension_numbers<[1], [0], [0], [1], [0, 0, 1, 1], [], []>} : vector<16x128xf32>, vector<128x128xf32>, vector<16x128xf32> -> vector<16x128xf32>
    %163 = arith.addf %158, %162 : vector<16x128xf32>
    %164 = vector.extract_strided_slice %157 {offsets = [1, 0], sizes = [16, 128], strides = [1, 1]} : vector<18x128xf32> to vector<16x128xf32>
    %c1_118 = arith.constant 1 : index
    %c0_119 = arith.constant 0 : index
    %c0_120 = arith.constant 0 : index
    %165 = vector.load %arg22[%c1_118, %c0_119, %c0_120] : memref<3x128x128xf32, #tpu.memory_space<vmem>>, vector<1x128x128xf32>
    %166 = vector.shape_cast %165 : vector<1x128x128xf32> to vector<128x128xf32>
    %cst_121 = arith.constant dense<0.000000e+00> : vector<16x128xf32>
    %167 = tpu.matmul %164, %166, %cst_121 {dimension_numbers = #tpu.dot_dimension_numbers<[1], [0], [0], [1], [0, 0, 1, 1], [], []>} : vector<16x128xf32>, vector<128x128xf32>, vector<16x128xf32> -> vector<16x128xf32>
    %168 = arith.addf %163, %167 : vector<16x128xf32>
    %169 = vector.extract_strided_slice %157 {offsets = [2, 0], sizes = [16, 128], strides = [1, 1]} : vector<18x128xf32> to vector<16x128xf32>
    %c2_122 = arith.constant 2 : index
    %c0_123 = arith.constant 0 : index
    %c0_124 = arith.constant 0 : index
    %170 = vector.load %arg22[%c2_122, %c0_123, %c0_124] : memref<3x128x128xf32, #tpu.memory_space<vmem>>, vector<1x128x128xf32>
    %171 = vector.shape_cast %170 : vector<1x128x128xf32> to vector<128x128xf32>
    %cst_125 = arith.constant dense<0.000000e+00> : vector<16x128xf32>
    %172 = tpu.matmul %169, %171, %cst_125 {dimension_numbers = #tpu.dot_dimension_numbers<[1], [0], [0], [1], [0, 0, 1, 1], [], []>} : vector<16x128xf32>, vector<128x128xf32>, vector<16x128xf32> -> vector<16x128xf32>
    %173 = arith.addf %168, %172 : vector<16x128xf32>
    %c0_126 = arith.constant 0 : index
    %c0_127 = arith.constant 0 : index
    %174 = vector.load %arg23[%c0_126, %c0_127] : memref<1x128xf32, #tpu.memory_space<vmem>>, vector<1x128xf32>
    %175 = vector.broadcast %174 : vector<1x128xf32> to vector<16x128xf32>
    %176 = arith.addf %173, %175 : vector<16x128xf32>
    %cst_128 = arith.constant 0.000000e+00 : f32
    %177 = vector.broadcast %cst_128 : f32 to vector<16x128xf32>
    %178 = arith.maximumf %176, %177 : vector<16x128xf32>
    %179 = tpu.iota {dimensions = array<i32: 1>} : vector<8x16xi32>
    %180 = tpu.iota {dimensions = array<i32: 0>} : vector<8x16xi32>
    %c2_i32_129 = arith.constant 2 : i32
    %181 = vector.broadcast %c2_i32_129 : i32 to vector<8x16xi32>
    %182 = arith.muli %181, %180 : vector<8x16xi32>
    %183 = arith.cmpi eq, %179, %182 : vector<8x16xi32>
    %184 = arith.extui %183 : vector<8x16xi1> to vector<8x16xi32>
    %185 = arith.sitofp %184 : vector<8x16xi32> to vector<8x16xf32>
    %cst_130 = arith.constant dense<0.000000e+00> : vector<8x128xf32>
    %186 = tpu.matmul %185, %178, %cst_130 {dimension_numbers = #tpu.dot_dimension_numbers<[1], [0], [0], [1], [0, 0, 1, 1], [], []>} : vector<8x16xf32>, vector<16x128xf32>, vector<8x128xf32> -> vector<8x128xf32>
    %187 = arith.addf %186, %154 : vector<8x128xf32>
    %c0_131 = arith.constant 0 : index
    %c0_132 = arith.constant 0 : index
    %c0_133 = arith.constant 0 : index
    %188 = vector.load %arg48[%c0_131, %c0_132, %c0_133] : memref<1x8x128xf32, #tpu.memory_space<vmem>>, vector<1x8x128xf32>
    %189 = vector.shape_cast %188 : vector<1x8x128xf32> to vector<8x128xf32>
    %190 = vector.shape_cast %187 : vector<8x128xf32> to vector<1x8x128xf32>
    tpu.vector_store %arg48[%c0_131, %c0_132, %c0_133], %190 {strides = array<i32>} : memref<1x8x128xf32, #tpu.memory_space<vmem>>, vector<1x8x128xf32>,
    %c0_134 = arith.constant 0 : index
    %c0_135 = arith.constant 0 : index
    %191 = vector.load %arg26[%c0_134, %c0_135] : memref<128x128xf32, #tpu.memory_space<vmem>>, vector<128x128xf32>
    %cst_136 = arith.constant dense<0.000000e+00> : vector<8x128xf32>
    %192 = tpu.matmul %187, %191, %cst_136 {dimension_numbers = #tpu.dot_dimension_numbers<[1], [0], [0], [1], [0, 0, 1, 1], [], []>} : vector<8x128xf32>, vector<128x128xf32>, vector<8x128xf32> -> vector<8x128xf32>
    %c0_137 = arith.constant 0 : index
    %c0_138 = arith.constant 0 : index
    %193 = vector.load %arg27[%c0_137, %c0_138] : memref<1x128xf32, #tpu.memory_space<vmem>>, vector<1x128xf32>
    %194 = vector.broadcast %193 : vector<1x128xf32> to vector<8x128xf32>
    %195 = arith.addf %192, %194 : vector<8x128xf32>
    %cst_139 = arith.constant 0.000000e+00 : f32
    %196 = vector.broadcast %cst_139 : f32 to vector<8x128xf32>
    %197 = arith.maximumf %195, %196 : vector<8x128xf32>
    %cst_140 = arith.constant 0.000000e+00 : f32
    %198 = vector.broadcast %cst_140 : f32 to vector<1x128xf32>
    %cst_141 = arith.constant 0.000000e+00 : f32
    %199 = vector.broadcast %cst_141 : f32 to vector<1x128xf32>
    %200 = tpu.concatenate %198, %197, %199 in 0 : vector<1x128xf32>, vector<8x128xf32>, vector<1x128xf32> -> vector<10x128xf32>
    %cst_142 = arith.constant 0.000000e+00 : f32
    %201 = vector.broadcast %cst_142 : f32 to vector<8x128xf32>
    %202 = vector.extract_strided_slice %200 {offsets = [0, 0], sizes = [8, 128], strides = [1, 1]} : vector<10x128xf32> to vector<8x128xf32>
    %c0_143 = arith.constant 0 : index
    %c0_144 = arith.constant 0 : index
    %c0_145 = arith.constant 0 : index
    %203 = vector.load %arg28[%c0_143, %c0_144, %c0_145] : memref<3x128x128xf32, #tpu.memory_space<vmem>>, vector<1x128x128xf32>
    %204 = vector.shape_cast %203 : vector<1x128x128xf32> to vector<128x128xf32>
    %cst_146 = arith.constant dense<0.000000e+00> : vector<8x128xf32>
    %205 = tpu.matmul %202, %204, %cst_146 {dimension_numbers = #tpu.dot_dimension_numbers<[1], [0], [0], [1], [0, 0, 1, 1], [], []>} : vector<8x128xf32>, vector<128x128xf32>, vector<8x128xf32> -> vector<8x128xf32>
    %206 = arith.addf %201, %205 : vector<8x128xf32>
    %207 = vector.extract_strided_slice %200 {offsets = [1, 0], sizes = [8, 128], strides = [1, 1]} : vector<10x128xf32> to vector<8x128xf32>
    %c1_147 = arith.constant 1 : index
    %c0_148 = arith.constant 0 : index
    %c0_149 = arith.constant 0 : index
    %208 = vector.load %arg28[%c1_147, %c0_148, %c0_149] : memref<3x128x128xf32, #tpu.memory_space<vmem>>, vector<1x128x128xf32>
    %209 = vector.shape_cast %208 : vector<1x128x128xf32> to vector<128x128xf32>
    %cst_150 = arith.constant dense<0.000000e+00> : vector<8x128xf32>
    %210 = tpu.matmul %207, %209, %cst_150 {dimension_numbers = #tpu.dot_dimension_numbers<[1], [0], [0], [1], [0, 0, 1, 1], [], []>} : vector<8x128xf32>, vector<128x128xf32>, vector<8x128xf32> -> vector<8x128xf32>
    %211 = arith.addf %206, %210 : vector<8x128xf32>
    %212 = vector.extract_strided_slice %200 {offsets = [2, 0], sizes = [8, 128], strides = [1, 1]} : vector<10x128xf32> to vector<8x128xf32>
    %c2_151 = arith.constant 2 : index
    %c0_152 = arith.constant 0 : index
    %c0_153 = arith.constant 0 : index
    %213 = vector.load %arg28[%c2_151, %c0_152, %c0_153] : memref<3x128x128xf32, #tpu.memory_space<vmem>>, vector<1x128x128xf32>
    %214 = vector.shape_cast %213 : vector<1x128x128xf32> to vector<128x128xf32>
    %cst_154 = arith.constant dense<0.000000e+00> : vector<8x128xf32>
    %215 = tpu.matmul %212, %214, %cst_154 {dimension_numbers = #tpu.dot_dimension_numbers<[1], [0], [0], [1], [0, 0, 1, 1], [], []>} : vector<8x128xf32>, vector<128x128xf32>, vector<8x128xf32> -> vector<8x128xf32>
    %216 = arith.addf %211, %215 : vector<8x128xf32>
    %c0_155 = arith.constant 0 : index
    %c0_156 = arith.constant 0 : index
    %217 = vector.load %arg29[%c0_155, %c0_156] : memref<1x128xf32, #tpu.memory_space<vmem>>, vector<1x128xf32>
    %218 = vector.broadcast %217 : vector<1x128xf32> to vector<8x128xf32>
    %219 = arith.addf %216, %218 : vector<8x128xf32>
    %cst_157 = arith.constant 0.000000e+00 : f32
    %220 = vector.broadcast %cst_157 : f32 to vector<8x128xf32>
    %221 = arith.maximumf %219, %220 : vector<8x128xf32>
    %222 = arith.addf %221, %187 : vector<8x128xf32>
    %c0_158 = arith.constant 0 : index
    %c0_159 = arith.constant 0 : index
    %223 = vector.load %arg30[%c0_158, %c0_159] : memref<128x128xf32, #tpu.memory_space<vmem>>, vector<128x128xf32>
    %cst_160 = arith.constant dense<0.000000e+00> : vector<8x128xf32>
    %224 = tpu.matmul %222, %223, %cst_160 {dimension_numbers = #tpu.dot_dimension_numbers<[1], [0], [0], [1], [0, 0, 1, 1], [], []>} : vector<8x128xf32>, vector<128x128xf32>, vector<8x128xf32> -> vector<8x128xf32>
    %c0_161 = arith.constant 0 : index
    %c0_162 = arith.constant 0 : index
    %225 = vector.load %arg31[%c0_161, %c0_162] : memref<1x128xf32, #tpu.memory_space<vmem>>, vector<1x128xf32>
    %226 = vector.broadcast %225 : vector<1x128xf32> to vector<8x128xf32>
    %227 = arith.addf %224, %226 : vector<8x128xf32>
    %cst_163 = arith.constant 0.000000e+00 : f32
    %228 = vector.broadcast %cst_163 : f32 to vector<8x128xf32>
    %229 = arith.maximumf %227, %228 : vector<8x128xf32>
    %cst_164 = arith.constant 0.000000e+00 : f32
    %230 = vector.broadcast %cst_164 : f32 to vector<1x128xf32>
    %cst_165 = arith.constant 0.000000e+00 : f32
    %231 = vector.broadcast %cst_165 : f32 to vector<1x128xf32>
    %232 = tpu.concatenate %230, %229, %231 in 0 : vector<1x128xf32>, vector<8x128xf32>, vector<1x128xf32> -> vector<10x128xf32>
    %cst_166 = arith.constant 0.000000e+00 : f32
    %233 = vector.broadcast %cst_166 : f32 to vector<8x128xf32>
    %234 = vector.extract_strided_slice %232 {offsets = [0, 0], sizes = [8, 128], strides = [1, 1]} : vector<10x128xf32> to vector<8x128xf32>
    %c0_167 = arith.constant 0 : index
    %c0_168 = arith.constant 0 : index
    %c0_169 = arith.constant 0 : index
    %235 = vector.load %arg32[%c0_167, %c0_168, %c0_169] : memref<3x128x128xf32, #tpu.memory_space<vmem>>, vector<1x128x128xf32>
    %236 = vector.shape_cast %235 : vector<1x128x128xf32> to vector<128x128xf32>
    %cst_170 = arith.constant dense<0.000000e+00> : vector<8x128xf32>
    %237 = tpu.matmul %234, %236, %cst_170 {dimension_numbers = #tpu.dot_dimension_numbers<[1], [0], [0], [1], [0, 0, 1, 1], [], []>} : vector<8x128xf32>, vector<128x128xf32>, vector<8x128xf32> -> vector<8x128xf32>
    %238 = arith.addf %233, %237 : vector<8x128xf32>
    %239 = vector.extract_strided_slice %232 {offsets = [1, 0], sizes = [8, 128], strides = [1, 1]} : vector<10x128xf32> to vector<8x128xf32>
    %c1_171 = arith.constant 1 : index
    %c0_172 = arith.constant 0 : index
    %c0_173 = arith.constant 0 : index
    %240 = vector.load %arg32[%c1_171, %c0_172, %c0_173] : memref<3x128x128xf32, #tpu.memory_space<vmem>>, vector<1x128x128xf32>
    %241 = vector.shape_cast %240 : vector<1x128x128xf32> to vector<128x128xf32>
    %cst_174 = arith.constant dense<0.000000e+00> : vector<8x128xf32>
    %242 = tpu.matmul %239, %241, %cst_174 {dimension_numbers = #tpu.dot_dimension_numbers<[1], [0], [0], [1], [0, 0, 1, 1], [], []>} : vector<8x128xf32>, vector<128x128xf32>, vector<8x128xf32> -> vector<8x128xf32>
    %243 = arith.addf %238, %242 : vector<8x128xf32>
    %244 = vector.extract_strided_slice %232 {offsets = [2, 0], sizes = [8, 128], strides = [1, 1]} : vector<10x128xf32> to vector<8x128xf32>
    %c2_175 = arith.constant 2 : index
    %c0_176 = arith.constant 0 : index
    %c0_177 = arith.constant 0 : index
    %245 = vector.load %arg32[%c2_175, %c0_176, %c0_177] : memref<3x128x128xf32, #tpu.memory_space<vmem>>, vector<1x128x128xf32>
    %246 = vector.shape_cast %245 : vector<1x128x128xf32> to vector<128x128xf32>
    %cst_178 = arith.constant dense<0.000000e+00> : vector<8x128xf32>
    %247 = tpu.matmul %244, %246, %cst_178 {dimension_numbers = #tpu.dot_dimension_numbers<[1], [0], [0], [1], [0, 0, 1, 1], [], []>} : vector<8x128xf32>, vector<128x128xf32>, vector<8x128xf32> -> vector<8x128xf32>
    %248 = arith.addf %243, %247 : vector<8x128xf32>
    %c0_179 = arith.constant 0 : index
    %c0_180 = arith.constant 0 : index
    %249 = vector.load %arg33[%c0_179, %c0_180] : memref<1x128xf32, #tpu.memory_space<vmem>>, vector<1x128xf32>
    %250 = vector.broadcast %249 : vector<1x128xf32> to vector<8x128xf32>
    %251 = arith.addf %248, %250 : vector<8x128xf32>
    %cst_181 = arith.constant 0.000000e+00 : f32
    %252 = vector.broadcast %cst_181 : f32 to vector<8x128xf32>
    %253 = arith.maximumf %251, %252 : vector<8x128xf32>
    %254 = arith.addf %253, %222 : vector<8x128xf32>
    %c0_182 = arith.constant 0 : index
    %c0_183 = arith.constant 0 : index
    %255 = vector.load %arg34[%c0_182, %c0_183] : memref<128x256xf32, #tpu.memory_space<vmem>>, vector<128x256xf32>
    %cst_184 = arith.constant dense<0.000000e+00> : vector<8x256xf32>
    %256 = tpu.matmul %254, %255, %cst_184 {dimension_numbers = #tpu.dot_dimension_numbers<[1], [0], [0], [1], [0, 0, 1, 1], [], []>} : vector<8x128xf32>, vector<128x256xf32>, vector<8x256xf32> -> vector<8x256xf32>
    %c0_185 = arith.constant 0 : index
    %c0_186 = arith.constant 0 : index
    %257 = vector.load %arg35[%c0_185, %c0_186] : memref<1x256xf32, #tpu.memory_space<vmem>>, vector<1x256xf32>
    %258 = vector.broadcast %257 : vector<1x256xf32> to vector<8x256xf32>
    %259 = arith.addf %256, %258 : vector<8x256xf32>
    %cst_187 = arith.constant 0.000000e+00 : f32
    %260 = vector.broadcast %cst_187 : f32 to vector<8x256xf32>
    %261 = arith.maximumf %259, %260 : vector<8x256xf32>
    %262 = tpu.iota {dimensions = array<i32: 1>} : vector<4x8xi32>
    %263 = tpu.iota {dimensions = array<i32: 0>} : vector<4x8xi32>
    %c2_i32_188 = arith.constant 2 : i32
    %264 = vector.broadcast %c2_i32_188 : i32 to vector<4x8xi32>
    %265 = arith.muli %264, %263 : vector<4x8xi32>
    %266 = arith.cmpi eq, %262, %265 : vector<4x8xi32>
    %267 = arith.extui %266 : vector<4x8xi1> to vector<4x8xi32>
    %268 = arith.sitofp %267 : vector<4x8xi32> to vector<4x8xf32>
    %cst_189 = arith.constant dense<0.000000e+00> : vector<4x128xf32>
    %269 = tpu.matmul %268, %254, %cst_189 {dimension_numbers = #tpu.dot_dimension_numbers<[1], [0], [0], [1], [0, 0, 1, 1], [], []>} : vector<4x8xf32>, vector<8x128xf32>, vector<4x128xf32> -> vector<4x128xf32>
    %c0_190 = arith.constant 0 : index
    %c0_191 = arith.constant 0 : index
    %270 = vector.load %arg38[%c0_190, %c0_191] : memref<128x256xf32, #tpu.memory_space<vmem>>, vector<128x256xf32>
    %cst_192 = arith.constant dense<0.000000e+00> : vector<4x256xf32>
    %271 = tpu.matmul %269, %270, %cst_192 {dimension_numbers = #tpu.dot_dimension_numbers<[1], [0], [0], [1], [0, 0, 1, 1], [], []>} : vector<4x128xf32>, vector<128x256xf32>, vector<4x256xf32> -> vector<4x256xf32>
    %c0_193 = arith.constant 0 : index
    %c0_194 = arith.constant 0 : index
    %272 = vector.load %arg39[%c0_193, %c0_194] : memref<1x256xf32, #tpu.memory_space<vmem>>, vector<1x256xf32>
    %273 = vector.broadcast %272 : vector<1x256xf32> to vector<4x256xf32>
    %274 = arith.addf %271, %273 : vector<4x256xf32>
    %cst_195 = arith.constant 0.000000e+00 : f32
    %275 = vector.broadcast %cst_195 : f32 to vector<1x256xf32>
    %cst_196 = arith.constant 0.000000e+00 : f32
    %276 = vector.broadcast %cst_196 : f32 to vector<1x256xf32>
    %277 = tpu.concatenate %275, %261, %276 in 0 : vector<1x256xf32>, vector<8x256xf32>, vector<1x256xf32> -> vector<10x256xf32>
    %cst_197 = arith.constant 0.000000e+00 : f32
    %278 = vector.broadcast %cst_197 : f32 to vector<8x256xf32>
    %279 = vector.extract_strided_slice %277 {offsets = [0, 0], sizes = [8, 256], strides = [1, 1]} : vector<10x256xf32> to vector<8x256xf32>
    %c0_198 = arith.constant 0 : index
    %c0_199 = arith.constant 0 : index
    %c0_200 = arith.constant 0 : index
    %280 = vector.load %arg36[%c0_198, %c0_199, %c0_200] : memref<3x256x256xf32, #tpu.memory_space<vmem>>, vector<1x256x256xf32>
    %281 = vector.shape_cast %280 : vector<1x256x256xf32> to vector<256x256xf32>
    %cst_201 = arith.constant dense<0.000000e+00> : vector<8x256xf32>
    %282 = tpu.matmul %279, %281, %cst_201 {dimension_numbers = #tpu.dot_dimension_numbers<[1], [0], [0], [1], [0, 0, 1, 1], [], []>} : vector<8x256xf32>, vector<256x256xf32>, vector<8x256xf32> -> vector<8x256xf32>
    %283 = arith.addf %278, %282 : vector<8x256xf32>
    %284 = vector.extract_strided_slice %277 {offsets = [1, 0], sizes = [8, 256], strides = [1, 1]} : vector<10x256xf32> to vector<8x256xf32>
    %c1_202 = arith.constant 1 : index
    %c0_203 = arith.constant 0 : index
    %c0_204 = arith.constant 0 : index
    %285 = vector.load %arg36[%c1_202, %c0_203, %c0_204] : memref<3x256x256xf32, #tpu.memory_space<vmem>>, vector<1x256x256xf32>
    %286 = vector.shape_cast %285 : vector<1x256x256xf32> to vector<256x256xf32>
    %cst_205 = arith.constant dense<0.000000e+00> : vector<8x256xf32>
    %287 = tpu.matmul %284, %286, %cst_205 {dimension_numbers = #tpu.dot_dimension_numbers<[1], [0], [0], [1], [0, 0, 1, 1], [], []>} : vector<8x256xf32>, vector<256x256xf32>, vector<8x256xf32> -> vector<8x256xf32>
    %288 = arith.addf %283, %287 : vector<8x256xf32>
    %289 = vector.extract_strided_slice %277 {offsets = [2, 0], sizes = [8, 256], strides = [1, 1]} : vector<10x256xf32> to vector<8x256xf32>
    %c2_206 = arith.constant 2 : index
    %c0_207 = arith.constant 0 : index
    %c0_208 = arith.constant 0 : index
    %290 = vector.load %arg36[%c2_206, %c0_207, %c0_208] : memref<3x256x256xf32, #tpu.memory_space<vmem>>, vector<1x256x256xf32>
    %291 = vector.shape_cast %290 : vector<1x256x256xf32> to vector<256x256xf32>
    %cst_209 = arith.constant dense<0.000000e+00> : vector<8x256xf32>
    %292 = tpu.matmul %289, %291, %cst_209 {dimension_numbers = #tpu.dot_dimension_numbers<[1], [0], [0], [1], [0, 0, 1, 1], [], []>} : vector<8x256xf32>, vector<256x256xf32>, vector<8x256xf32> -> vector<8x256xf32>
    %293 = arith.addf %288, %292 : vector<8x256xf32>
    %c0_210 = arith.constant 0 : index
    %c0_211 = arith.constant 0 : index
    %294 = vector.load %arg37[%c0_210, %c0_211] : memref<1x256xf32, #tpu.memory_space<vmem>>, vector<1x256xf32>
    %295 = vector.broadcast %294 : vector<1x256xf32> to vector<8x256xf32>
    %296 = arith.addf %293, %295 : vector<8x256xf32>
    %cst_212 = arith.constant 0.000000e+00 : f32
    %297 = vector.broadcast %cst_212 : f32 to vector<8x256xf32>
    %298 = arith.maximumf %296, %297 : vector<8x256xf32>
    %299 = tpu.iota {dimensions = array<i32: 1>} : vector<4x8xi32>
    %300 = tpu.iota {dimensions = array<i32: 0>} : vector<4x8xi32>
    %c2_i32_213 = arith.constant 2 : i32
    %301 = vector.broadcast %c2_i32_213 : i32 to vector<4x8xi32>
    %302 = arith.muli %301, %300 : vector<4x8xi32>
    %303 = arith.cmpi eq, %299, %302 : vector<4x8xi32>
    %304 = arith.extui %303 : vector<4x8xi1> to vector<4x8xi32>
    %305 = arith.sitofp %304 : vector<4x8xi32> to vector<4x8xf32>
    %cst_214 = arith.constant dense<0.000000e+00> : vector<4x256xf32>
    %306 = tpu.matmul %305, %298, %cst_214 {dimension_numbers = #tpu.dot_dimension_numbers<[1], [0], [0], [1], [0, 0, 1, 1], [], []>} : vector<4x8xf32>, vector<8x256xf32>, vector<4x256xf32> -> vector<4x256xf32>
    %307 = arith.addf %306, %274 : vector<4x256xf32>
    %c0_215 = arith.constant 0 : index
    %c0_216 = arith.constant 0 : index
    %308 = vector.load %arg40[%c0_215, %c0_216] : memref<256x256xf32, #tpu.memory_space<vmem>>, vector<256x256xf32>
    %cst_217 = arith.constant dense<0.000000e+00> : vector<4x256xf32>
    %309 = tpu.matmul %307, %308, %cst_217 {dimension_numbers = #tpu.dot_dimension_numbers<[1], [0], [0], [1], [0, 0, 1, 1], [], []>} : vector<4x256xf32>, vector<256x256xf32>, vector<4x256xf32> -> vector<4x256xf32>
    %c0_218 = arith.constant 0 : index
    %c0_219 = arith.constant 0 : index
    %310 = vector.load %arg41[%c0_218, %c0_219] : memref<1x256xf32, #tpu.memory_space<vmem>>, vector<1x256xf32>
    %311 = vector.broadcast %310 : vector<1x256xf32> to vector<4x256xf32>
    %312 = arith.addf %309, %311 : vector<4x256xf32>
    %cst_220 = arith.constant 0.000000e+00 : f32
    %313 = vector.broadcast %cst_220 : f32 to vector<4x256xf32>
    %314 = arith.maximumf %312, %313 : vector<4x256xf32>
    %cst_221 = arith.constant 0.000000e+00 : f32
    %315 = vector.broadcast %cst_221 : f32 to vector<1x256xf32>
    %cst_222 = arith.constant 0.000000e+00 : f32
    %316 = vector.broadcast %cst_222 : f32 to vector<1x256xf32>
    %317 = tpu.concatenate %315, %314, %316 in 0 : vector<1x256xf32>, vector<4x256xf32>, vector<1x256xf32> -> vector<6x256xf32>
    %cst_223 = arith.constant 0.000000e+00 : f32
    %318 = vector.broadcast %cst_223 : f32 to vector<4x256xf32>
    %319 = vector.extract_strided_slice %317 {offsets = [0, 0], sizes = [4, 256], strides = [1, 1]} : vector<6x256xf32> to vector<4x256xf32>
    %c0_224 = arith.constant 0 : index
    %c0_225 = arith.constant 0 : index
    %c0_226 = arith.constant 0 : index
    %320 = vector.load %arg42[%c0_224, %c0_225, %c0_226] : memref<3x256x256xf32, #tpu.memory_space<vmem>>, vector<1x256x256xf32>
    %321 = vector.shape_cast %320 : vector<1x256x256xf32> to vector<256x256xf32>
    %cst_227 = arith.constant dense<0.000000e+00> : vector<4x256xf32>
    %322 = tpu.matmul %319, %321, %cst_227 {dimension_numbers = #tpu.dot_dimension_numbers<[1], [0], [0], [1], [0, 0, 1, 1], [], []>} : vector<4x256xf32>, vector<256x256xf32>, vector<4x256xf32> -> vector<4x256xf32>
    %323 = arith.addf %318, %322 : vector<4x256xf32>
    %324 = vector.extract_strided_slice %317 {offsets = [1, 0], sizes = [4, 256], strides = [1, 1]} : vector<6x256xf32> to vector<4x256xf32>
    %c1_228 = arith.constant 1 : index
    %c0_229 = arith.constant 0 : index
    %c0_230 = arith.constant 0 : index
    %325 = vector.load %arg42[%c1_228, %c0_229, %c0_230] : memref<3x256x256xf32, #tpu.memory_space<vmem>>, vector<1x256x256xf32>
    %326 = vector.shape_cast %325 : vector<1x256x256xf32> to vector<256x256xf32>
    %cst_231 = arith.constant dense<0.000000e+00> : vector<4x256xf32>
    %327 = tpu.matmul %324, %326, %cst_231 {dimension_numbers = #tpu.dot_dimension_numbers<[1], [0], [0], [1], [0, 0, 1, 1], [], []>} : vector<4x256xf32>, vector<256x256xf32>, vector<4x256xf32> -> vector<4x256xf32>
    %328 = arith.addf %323, %327 : vector<4x256xf32>
    %329 = vector.extract_strided_slice %317 {offsets = [2, 0], sizes = [4, 256], strides = [1, 1]} : vector<6x256xf32> to vector<4x256xf32>
    %c2_232 = arith.constant 2 : index
    %c0_233 = arith.constant 0 : index
    %c0_234 = arith.constant 0 : index
    %330 = vector.load %arg42[%c2_232, %c0_233, %c0_234] : memref<3x256x256xf32, #tpu.memory_space<vmem>>, vector<1x256x256xf32>
    %331 = vector.shape_cast %330 : vector<1x256x256xf32> to vector<256x256xf32>
    %cst_235 = arith.constant dense<0.000000e+00> : vector<4x256xf32>
    %332 = tpu.matmul %329, %331, %cst_235 {dimension_numbers = #tpu.dot_dimension_numbers<[1], [0], [0], [1], [0, 0, 1, 1], [], []>} : vector<4x256xf32>, vector<256x256xf32>, vector<4x256xf32> -> vector<4x256xf32>
    %333 = arith.addf %328, %332 : vector<4x256xf32>
    %c0_236 = arith.constant 0 : index
    %c0_237 = arith.constant 0 : index
    %334 = vector.load %arg43[%c0_236, %c0_237] : memref<1x256xf32, #tpu.memory_space<vmem>>, vector<1x256xf32>
    %335 = vector.broadcast %334 : vector<1x256xf32> to vector<4x256xf32>
    %336 = arith.addf %333, %335 : vector<4x256xf32>
    %cst_238 = arith.constant 0.000000e+00 : f32
    %337 = vector.broadcast %cst_238 : f32 to vector<4x256xf32>
    %338 = arith.maximumf %336, %337 : vector<4x256xf32>
    %339 = arith.addf %338, %307 : vector<4x256xf32>
    %c0_239 = arith.constant 0 : index
    %c0_240 = arith.constant 0 : index
    %340 = vector.load %arg44[%c0_239, %c0_240] : memref<256x256xf32, #tpu.memory_space<vmem>>, vector<256x256xf32>
    %cst_241 = arith.constant dense<0.000000e+00> : vector<4x256xf32>
    %341 = tpu.matmul %339, %340, %cst_241 {dimension_numbers = #tpu.dot_dimension_numbers<[1], [0], [0], [1], [0, 0, 1, 1], [], []>} : vector<4x256xf32>, vector<256x256xf32>, vector<4x256xf32> -> vector<4x256xf32>
    %c0_242 = arith.constant 0 : index
    %c0_243 = arith.constant 0 : index
    %342 = vector.load %arg45[%c0_242, %c0_243] : memref<1x256xf32, #tpu.memory_space<vmem>>, vector<1x256xf32>
    %343 = vector.broadcast %342 : vector<1x256xf32> to vector<4x256xf32>
    %344 = arith.addf %341, %343 : vector<4x256xf32>
    %cst_244 = arith.constant 0.000000e+00 : f32
    %345 = vector.broadcast %cst_244 : f32 to vector<4x256xf32>
    %346 = arith.maximumf %344, %345 : vector<4x256xf32>
    %cst_245 = arith.constant 0.000000e+00 : f32
    %347 = vector.broadcast %cst_245 : f32 to vector<1x256xf32>
    %cst_246 = arith.constant 0.000000e+00 : f32
    %348 = vector.broadcast %cst_246 : f32 to vector<1x256xf32>
    %349 = tpu.concatenate %347, %346, %348 in 0 : vector<1x256xf32>, vector<4x256xf32>, vector<1x256xf32> -> vector<6x256xf32>
    %cst_247 = arith.constant 0.000000e+00 : f32
    %350 = vector.broadcast %cst_247 : f32 to vector<4x256xf32>
    %351 = vector.extract_strided_slice %349 {offsets = [0, 0], sizes = [4, 256], strides = [1, 1]} : vector<6x256xf32> to vector<4x256xf32>
    %c0_248 = arith.constant 0 : index
    %c0_249 = arith.constant 0 : index
    %c0_250 = arith.constant 0 : index
    %352 = vector.load %arg46[%c0_248, %c0_249, %c0_250] : memref<3x256x256xf32, #tpu.memory_space<vmem>>, vector<1x256x256xf32>
    %353 = vector.shape_cast %352 : vector<1x256x256xf32> to vector<256x256xf32>
    %cst_251 = arith.constant dense<0.000000e+00> : vector<4x256xf32>
    %354 = tpu.matmul %351, %353, %cst_251 {dimension_numbers = #tpu.dot_dimension_numbers<[1], [0], [0], [1], [0, 0, 1, 1], [], []>} : vector<4x256xf32>, vector<256x256xf32>, vector<4x256xf32> -> vector<4x256xf32>
    %355 = arith.addf %350, %354 : vector<4x256xf32>
    %356 = vector.extract_strided_slice %349 {offsets = [1, 0], sizes = [4, 256], strides = [1, 1]} : vector<6x256xf32> to vector<4x256xf32>
    %c1_252 = arith.constant 1 : index
    %c0_253 = arith.constant 0 : index
    %c0_254 = arith.constant 0 : index
    %357 = vector.load %arg46[%c1_252, %c0_253, %c0_254] : memref<3x256x256xf32, #tpu.memory_space<vmem>>, vector<1x256x256xf32>
    %358 = vector.shape_cast %357 : vector<1x256x256xf32> to vector<256x256xf32>
    %cst_255 = arith.constant dense<0.000000e+00> : vector<4x256xf32>
    %359 = tpu.matmul %356, %358, %cst_255 {dimension_numbers = #tpu.dot_dimension_numbers<[1], [0], [0], [1], [0, 0, 1, 1], [], []>} : vector<4x256xf32>, vector<256x256xf32>, vector<4x256xf32> -> vector<4x256xf32>
    %360 = arith.addf %355, %359 : vector<4x256xf32>
    %361 = vector.extract_strided_slice %349 {offsets = [2, 0], sizes = [4, 256], strides = [1, 1]} : vector<6x256xf32> to vector<4x256xf32>
    %c2_256 = arith.constant 2 : index
    %c0_257 = arith.constant 0 : index
    %c0_258 = arith.constant 0 : index
    %362 = vector.load %arg46[%c2_256, %c0_257, %c0_258] : memref<3x256x256xf32, #tpu.memory_space<vmem>>, vector<1x256x256xf32>
    %363 = vector.shape_cast %362 : vector<1x256x256xf32> to vector<256x256xf32>
    %cst_259 = arith.constant dense<0.000000e+00> : vector<4x256xf32>
    %364 = tpu.matmul %361, %363, %cst_259 {dimension_numbers = #tpu.dot_dimension_numbers<[1], [0], [0], [1], [0, 0, 1, 1], [], []>} : vector<4x256xf32>, vector<256x256xf32>, vector<4x256xf32> -> vector<4x256xf32>
    %365 = arith.addf %360, %364 : vector<4x256xf32>
    %c0_260 = arith.constant 0 : index
    %c0_261 = arith.constant 0 : index
    %366 = vector.load %arg47[%c0_260, %c0_261] : memref<1x256xf32, #tpu.memory_space<vmem>>, vector<1x256xf32>
    %367 = vector.broadcast %366 : vector<1x256xf32> to vector<4x256xf32>
    %368 = arith.addf %365, %367 : vector<4x256xf32>
    %cst_262 = arith.constant 0.000000e+00 : f32
    %369 = vector.broadcast %cst_262 : f32 to vector<4x256xf32>
    %370 = arith.maximumf %368, %369 : vector<4x256xf32>
    %371 = arith.addf %370, %339 : vector<4x256xf32>
    %c0_263 = arith.constant 0 : index
    %c0_264 = arith.constant 0 : index
    %c0_265 = arith.constant 0 : index
    %372 = vector.load %arg49[%c0_263, %c0_264, %c0_265] : memref<1x4x256xf32, #tpu.memory_space<vmem>>, vector<1x4x256xf32>
    %373 = vector.shape_cast %372 : vector<1x4x256xf32> to vector<4x256xf32>
    %374 = vector.shape_cast %371 : vector<4x256xf32> to vector<1x4x256xf32>
    tpu.vector_store %arg49[%c0_263, %c0_264, %c0_265], %374 {strides = array<i32>} : memref<1x4x256xf32, #tpu.memory_space<vmem>>, vector<1x4x256xf32>,
    return
  }
  func.func @transform_0(%arg0: i32) -> (i32, i32, i32) {
    %c0_i32 = arith.constant 0 : i32
    %c0_i32_0 = arith.constant 0 : i32
    %c0_i32_1 = arith.constant 0 : i32
    return %arg0, %c0_i32, %c0_i32_0 : i32, i32, i32
  }
  func.func @transform_1(%arg0: i32) -> (i32, i32) {
    %c0_i32 = arith.constant 0 : i32
    %c0_i32_0 = arith.constant 0 : i32
    %c0_i32_1 = arith.constant 0 : i32
    return %c0_i32, %c0_i32_0 : i32, i32
  }
  func.func @transform_2(%arg0: i32) -> (i32, i32) {
    %c0_i32 = arith.constant 0 : i32
    %c0_i32_0 = arith.constant 0 : i32
    %c0_i32_1 = arith.constant 0 : i32
    return %c0_i32, %c0_i32_0 : i32, i32
  }
  func.func @transform_3(%arg0: i32) -> (i32, i32) {
    %c0_i32 = arith.constant 0 : i32
    %c0_i32_0 = arith.constant 0 : i32
    %c0_i32_1 = arith.constant 0 : i32
    return %c0_i32, %c0_i32_0 : i32, i32
  }
  func.func @transform_4(%arg0: i32) -> (i32, i32) {
    %c0_i32 = arith.constant 0 : i32
    %c0_i32_0 = arith.constant 0 : i32
    %c0_i32_1 = arith.constant 0 : i32
    return %c0_i32, %c0_i32_0 : i32, i32
  }
  func.func @transform_5(%arg0: i32) -> (i32, i32, i32) {
    %c0_i32 = arith.constant 0 : i32
    %c0_i32_0 = arith.constant 0 : i32
    %c0_i32_1 = arith.constant 0 : i32
    %c0_i32_2 = arith.constant 0 : i32
    return %c0_i32, %c0_i32_0, %c0_i32_1 : i32, i32, i32
  }
  func.func @transform_6(%arg0: i32) -> (i32, i32) {
    %c0_i32 = arith.constant 0 : i32
    %c0_i32_0 = arith.constant 0 : i32
    %c0_i32_1 = arith.constant 0 : i32
    return %c0_i32, %c0_i32_0 : i32, i32
  }
  func.func @transform_7(%arg0: i32) -> (i32, i32) {
    %c0_i32 = arith.constant 0 : i32
    %c0_i32_0 = arith.constant 0 : i32
    %c0_i32_1 = arith.constant 0 : i32
    return %c0_i32, %c0_i32_0 : i32, i32
  }
  func.func @transform_8(%arg0: i32) -> (i32, i32) {
    %c0_i32 = arith.constant 0 : i32
    %c0_i32_0 = arith.constant 0 : i32
    %c0_i32_1 = arith.constant 0 : i32
    return %c0_i32, %c0_i32_0 : i32, i32
  }
  func.func @transform_9(%arg0: i32) -> (i32, i32, i32) {
    %c0_i32 = arith.constant 0 : i32
    %c0_i32_0 = arith.constant 0 : i32
    %c0_i32_1 = arith.constant 0 : i32
    %c0_i32_2 = arith.constant 0 : i32
    return %c0_i32, %c0_i32_0, %c0_i32_1 : i32, i32, i32
  }
  func.func @transform_10(%arg0: i32) -> (i32, i32) {
    %c0_i32 = arith.constant 0 : i32
    %c0_i32_0 = arith.constant 0 : i32
    %c0_i32_1 = arith.constant 0 : i32
    return %c0_i32, %c0_i32_0 : i32, i32
  }
  func.func @transform_11(%arg0: i32) -> (i32, i32) {
    %c0_i32 = arith.constant 0 : i32
    %c0_i32_0 = arith.constant 0 : i32
    %c0_i32_1 = arith.constant 0 : i32
    return %c0_i32, %c0_i32_0 : i32, i32
  }
  func.func @transform_12(%arg0: i32) -> (i32, i32) {
    %c0_i32 = arith.constant 0 : i32
    %c0_i32_0 = arith.constant 0 : i32
    %c0_i32_1 = arith.constant 0 : i32
    return %c0_i32, %c0_i32_0 : i32, i32
  }
  func.func @transform_13(%arg0: i32) -> (i32, i32, i32) {
    %c0_i32 = arith.constant 0 : i32
    %c0_i32_0 = arith.constant 0 : i32
    %c0_i32_1 = arith.constant 0 : i32
    %c0_i32_2 = arith.constant 0 : i32
    return %c0_i32, %c0_i32_0, %c0_i32_1 : i32, i32, i32
  }
  func.func @transform_14(%arg0: i32) -> (i32, i32) {
    %c0_i32 = arith.constant 0 : i32
    %c0_i32_0 = arith.constant 0 : i32
    %c0_i32_1 = arith.constant 0 : i32
    return %c0_i32, %c0_i32_0 : i32, i32
  }
  func.func @transform_15(%arg0: i32) -> (i32, i32) {
    %c0_i32 = arith.constant 0 : i32
    %c0_i32_0 = arith.constant 0 : i32
    %c0_i32_1 = arith.constant 0 : i32
    return %c0_i32, %c0_i32_0 : i32, i32
  }
  func.func @transform_16(%arg0: i32) -> (i32, i32) {
    %c0_i32 = arith.constant 0 : i32
    %c0_i32_0 = arith.constant 0 : i32
    %c0_i32_1 = arith.constant 0 : i32
    return %c0_i32, %c0_i32_0 : i32, i32
  }
  func.func @transform_17(%arg0: i32) -> (i32, i32, i32) {
    %c0_i32 = arith.constant 0 : i32
    %c0_i32_0 = arith.constant 0 : i32
    %c0_i32_1 = arith.constant 0 : i32
    %c0_i32_2 = arith.constant 0 : i32
    return %c0_i32, %c0_i32_0, %c0_i32_1 : i32, i32, i32
  }
  func.func @transform_18(%arg0: i32) -> (i32, i32) {
    %c0_i32 = arith.constant 0 : i32
    %c0_i32_0 = arith.constant 0 : i32
    %c0_i32_1 = arith.constant 0 : i32
    return %c0_i32, %c0_i32_0 : i32, i32
  }
  func.func @transform_19(%arg0: i32) -> (i32, i32) {
    %c0_i32 = arith.constant 0 : i32
    %c0_i32_0 = arith.constant 0 : i32
    %c0_i32_1 = arith.constant 0 : i32
    return %c0_i32, %c0_i32_0 : i32, i32
  }
  func.func @transform_20(%arg0: i32) -> (i32, i32) {
    %c0_i32 = arith.constant 0 : i32
    %c0_i32_0 = arith.constant 0 : i32
    %c0_i32_1 = arith.constant 0 : i32
    return %c0_i32, %c0_i32_0 : i32, i32
  }
  func.func @transform_21(%arg0: i32) -> (i32, i32, i32) {
    %c0_i32 = arith.constant 0 : i32
    %c0_i32_0 = arith.constant 0 : i32
    %c0_i32_1 = arith.constant 0 : i32
    %c0_i32_2 = arith.constant 0 : i32
    return %c0_i32, %c0_i32_0, %c0_i32_1 : i32, i32, i32
  }
  func.func @transform_22(%arg0: i32) -> (i32, i32) {
    %c0_i32 = arith.constant 0 : i32
    %c0_i32_0 = arith.constant 0 : i32
    %c0_i32_1 = arith.constant 0 : i32
    return %c0_i32, %c0_i32_0 : i32, i32
  }
  func.func @transform_23(%arg0: i32) -> (i32, i32) {
    %c0_i32 = arith.constant 0 : i32
    %c0_i32_0 = arith.constant 0 : i32
    %c0_i32_1 = arith.constant 0 : i32
    return %c0_i32, %c0_i32_0 : i32, i32
  }
  func.func @transform_24(%arg0: i32) -> (i32, i32) {
    %c0_i32 = arith.constant 0 : i32
    %c0_i32_0 = arith.constant 0 : i32
    %c0_i32_1 = arith.constant 0 : i32
    return %c0_i32, %c0_i32_0 : i32, i32
  }
  func.func @transform_25(%arg0: i32) -> (i32, i32) {
    %c0_i32 = arith.constant 0 : i32
    %c0_i32_0 = arith.constant 0 : i32
    %c0_i32_1 = arith.constant 0 : i32
    return %c0_i32, %c0_i32_0 : i32, i32
  }
  func.func @transform_26(%arg0: i32) -> (i32, i32) {
    %c0_i32 = arith.constant 0 : i32
    %c0_i32_0 = arith.constant 0 : i32
    %c0_i32_1 = arith.constant 0 : i32
    return %c0_i32, %c0_i32_0 : i32, i32
  }
  func.func @transform_27(%arg0: i32) -> (i32, i32, i32) {
    %c0_i32 = arith.constant 0 : i32
    %c0_i32_0 = arith.constant 0 : i32
    %c0_i32_1 = arith.constant 0 : i32
    %c0_i32_2 = arith.constant 0 : i32
    return %c0_i32, %c0_i32_0, %c0_i32_1 : i32, i32, i32
  }
  func.func @transform_28(%arg0: i32) -> (i32, i32) {
    %c0_i32 = arith.constant 0 : i32
    %c0_i32_0 = arith.constant 0 : i32
    %c0_i32_1 = arith.constant 0 : i32
    return %c0_i32, %c0_i32_0 : i32, i32
  }
  func.func @transform_29(%arg0: i32) -> (i32, i32) {
    %c0_i32 = arith.constant 0 : i32
    %c0_i32_0 = arith.constant 0 : i32
    %c0_i32_1 = arith.constant 0 : i32
    return %c0_i32, %c0_i32_0 : i32, i32
  }
  func.func @transform_30(%arg0: i32) -> (i32, i32) {
    %c0_i32 = arith.constant 0 : i32
    %c0_i32_0 = arith.constant 0 : i32
    %c0_i32_1 = arith.constant 0 : i32
    return %c0_i32, %c0_i32_0 : i32, i32
  }
  func.func @transform_31(%arg0: i32) -> (i32, i32, i32) {
    %c0_i32 = arith.constant 0 : i32
    %c0_i32_0 = arith.constant 0 : i32
    %c0_i32_1 = arith.constant 0 : i32
    %c0_i32_2 = arith.constant 0 : i32
    return %c0_i32, %c0_i32_0, %c0_i32_1 : i32, i32, i32
  }
  func.func @transform_32(%arg0: i32) -> (i32, i32) {
    %c0_i32 = arith.constant 0 : i32
    %c0_i32_0 = arith.constant 0 : i32
    %c0_i32_1 = arith.constant 0 : i32
    return %c0_i32, %c0_i32_0 : i32, i32
  }
  func.func @transform_33(%arg0: i32) -> (i32, i32) {
    %c0_i32 = arith.constant 0 : i32
    %c0_i32_0 = arith.constant 0 : i32
    %c0_i32_1 = arith.constant 0 : i32
    return %c0_i32, %c0_i32_0 : i32, i32
  }
  func.func @transform_34(%arg0: i32) -> (i32, i32) {
    %c0_i32 = arith.constant 0 : i32
    %c0_i32_0 = arith.constant 0 : i32
    %c0_i32_1 = arith.constant 0 : i32
    return %c0_i32, %c0_i32_0 : i32, i32
  }
  func.func @transform_35(%arg0: i32) -> (i32, i32, i32) {
    %c0_i32 = arith.constant 0 : i32
    %c0_i32_0 = arith.constant 0 : i32
    %c0_i32_1 = arith.constant 0 : i32
    %c0_i32_2 = arith.constant 0 : i32
    return %c0_i32, %c0_i32_0, %c0_i32_1 : i32, i32, i32
  }
  func.func @transform_36(%arg0: i32) -> (i32, i32) {
    %c0_i32 = arith.constant 0 : i32
    %c0_i32_0 = arith.constant 0 : i32
    %c0_i32_1 = arith.constant 0 : i32
    return %c0_i32, %c0_i32_0 : i32, i32
  }
  func.func @transform_37(%arg0: i32) -> (i32, i32) {
    %c0_i32 = arith.constant 0 : i32
    %c0_i32_0 = arith.constant 0 : i32
    %c0_i32_1 = arith.constant 0 : i32
    return %c0_i32, %c0_i32_0 : i32, i32
  }
  func.func @transform_38(%arg0: i32) -> (i32, i32) {
    %c0_i32 = arith.constant 0 : i32
    %c0_i32_0 = arith.constant 0 : i32
    %c0_i32_1 = arith.constant 0 : i32
    return %c0_i32, %c0_i32_0 : i32, i32
  }
  func.func @transform_39(%arg0: i32) -> (i32, i32) {
    %c0_i32 = arith.constant 0 : i32
    %c0_i32_0 = arith.constant 0 : i32
    %c0_i32_1 = arith.constant 0 : i32
    return %c0_i32, %c0_i32_0 : i32, i32
  }
  func.func @transform_40(%arg0: i32) -> (i32, i32) {
    %c0_i32 = arith.constant 0 : i32
    %c0_i32_0 = arith.constant 0 : i32
    %c0_i32_1 = arith.constant 0 : i32
    return %c0_i32, %c0_i32_0 : i32, i32
  }
  func.func @transform_41(%arg0: i32) -> (i32, i32, i32) {
    %c0_i32 = arith.constant 0 : i32
    %c0_i32_0 = arith.constant 0 : i32
    %c0_i32_1 = arith.constant 0 : i32
    %c0_i32_2 = arith.constant 0 : i32
    return %c0_i32, %c0_i32_0, %c0_i32_1 : i32, i32, i32
  }
  func.func @transform_42(%arg0: i32) -> (i32, i32) {
    %c0_i32 = arith.constant 0 : i32
    %c0_i32_0 = arith.constant 0 : i32
    %c0_i32_1 = arith.constant 0 : i32
    return %c0_i32, %c0_i32_0 : i32, i32
  }
  func.func @transform_43(%arg0: i32) -> (i32, i32) {
    %c0_i32 = arith.constant 0 : i32
    %c0_i32_0 = arith.constant 0 : i32
    %c0_i32_1 = arith.constant 0 : i32
    return %c0_i32, %c0_i32_0 : i32, i32
  }
  func.func @transform_44(%arg0: i32) -> (i32, i32) {
    %c0_i32 = arith.constant 0 : i32
    %c0_i32_0 = arith.constant 0 : i32
    %c0_i32_1 = arith.constant 0 : i32
    return %c0_i32, %c0_i32_0 : i32, i32
  }
  func.func @transform_45(%arg0: i32) -> (i32, i32, i32) {
    %c0_i32 = arith.constant 0 : i32
    %c0_i32_0 = arith.constant 0 : i32
    %c0_i32_1 = arith.constant 0 : i32
    %c0_i32_2 = arith.constant 0 : i32
    return %c0_i32, %c0_i32_0, %c0_i32_1 : i32, i32, i32
  }
  func.func @transform_46(%arg0: i32) -> (i32, i32) {
    %c0_i32 = arith.constant 0 : i32
    %c0_i32_0 = arith.constant 0 : i32
    %c0_i32_1 = arith.constant 0 : i32
    return %c0_i32, %c0_i32_0 : i32, i32
  }
  func.func @transform_47(%arg0: i32) -> (i32, i32, i32) {
    %c0_i32 = arith.constant 0 : i32
    %c0_i32_0 = arith.constant 0 : i32
    %c0_i32_1 = arith.constant 0 : i32
    return %arg0, %c0_i32, %c0_i32_0 : i32, i32, i32
  }
  func.func @transform_48(%arg0: i32) -> (i32, i32, i32) {
    %c0_i32 = arith.constant 0 : i32
    %c0_i32_0 = arith.constant 0 : i32
    %c0_i32_1 = arith.constant 0 : i32
    return %arg0, %c0_i32, %c0_i32_0 : i32, i32, i32
  }
}

</mosaic_0001>

<bundles_post_ra>
// kernel: feature_extractor_forward.1
= control target key start
LH: loop header
LB: loop body
LE: loop exit
PB: predicated region body
PF: predicated region fallthrough
CT: control target
= control target key end

     0   :  { %s7316_s6 = smov 1   ;;  %s7317_s10 = smov 2   ;;  %s8475_s0 = inlined_call_operand.smem [shape: u32[49], index: -1, kind: input, shape index: {}] }
   0x1   :  { %s7412_s5 = sld [smem:[%s8475_s0]]   ;;  %s7318_s14 = smov 3  }
   0x2   :  { %s7417_s9 = sld [smem:[%s8475_s0 + %s7316_s6]]   ;;  %s7319_s18 = smov 4  }
   0x3   :  { %s7422_s13 = sld [smem:[%s8475_s0 + %s7317_s10]]   ;;  %s7320_s22 = smov 5  }
   0x4   :  { %s7427_s17 = sld [smem:[%s8475_s0 + %s7318_s14]]   ;;  %s7321_s26 = smov 6  }
   0x5   :  { %s7432_s21 = sld [smem:[%s8475_s0 + %s7319_s18]]   ;;  %s7322_s30 = smov 7  }
   0x6   :  { %s7437_s25 = sld [smem:[%s8475_s0 + %s7320_s22]]   ;;  %s7323_s4 = smov 8  }
   0x7   :  { %8527 = sst [smem:[#allocation73_spill]] %s7412_s5  ;;  %s7324_s10 = smov 9  }
   0x8   :  { %8528 = sst [smem:[#allocation74_spill]] %s7417_s9  ;;  %s7325_s15 = smov 10  }
   0x9   :  { %8529 = sst [smem:[#allocation75_spill]] %s7422_s13  ;;  %s7326_s20 = smov 11  }
   0xa   :  { %8530 = sst [smem:[#allocation76_spill]] %s7427_s17  ;;  %s7328_s1 = smov 13  }
   0xb   :  { %s7442_s29 = sld [smem:[%s8475_s0 + %s7321_s26]]   ;;  %s7327_s26 = smov 12  }
   0xc   :  { %8531 = sst [smem:[#allocation77_spill]] %s7437_s25  ;;  %s7329_s7 = smov 14  }
   0xd   :  { %s7447_s3 = sld [smem:[%s8475_s0 + %s7322_s30]]   ;;  %s7331_s22 = smov 16  }
   0xe   :  { %s7452_s8 = sld [smem:[%s8475_s0 + %s7323_s4]]   ;;  %s7332_s28 = smov 17  }
   0xf   :  { %s7457_s14 = sld [smem:[%s8475_s0 + %s7324_s10]]  }
  0x10   :  { %s7462_s19 = sld [smem:[%s8475_s0 + %s7325_s15]]   ;;  %s7330_s15 = smov 15  }
  0x11   :  { %s7467_s24 = sld [smem:[%s8475_s0 + %s7326_s20]]  }
  0x12   :  { %s7472_s30 = sld [smem:[%s8475_s0 + %s7327_s26]]  }
  0x13   :  { %8532 = sst [smem:[#allocation78_spill]] %s7447_s3 }
  0x14   :  { %8533 = sst [smem:[#allocation79_spill]] %s7452_s8 }
  0x15   :  { %s7477_s6 = sld [smem:[%s8475_s0 + %s7328_s1]]  }
  0x16   :  { %8534 = sst [smem:[#allocation80_spill]] %s7462_s19 }
  0x17   :  { %s7482_s12 = sld [smem:[%s8475_s0 + %s7329_s7]]   ;;  %s7333_s7 = smov 18  }
  0x18   :  { %8535 = sst [smem:[#allocation81_spill]] %s7472_s30 }
  0x19   :  { %s7487_s20 = sld [smem:[%s8475_s0 + %s7330_s15]]   ;;  %s7334_s15 = smov 19  }
  0x1a   :  { %s7492_s27 = sld [smem:[%s8475_s0 + %s7331_s22]]   ;;  %s7335_s22 = smov 20  }
  0x1b   :  { %8536 = sst [smem:[#allocation82_spill]] %s7477_s6 }
  0x1c   :  { %s7497_s4 = sld [smem:[%s8475_s0 + %s7332_s28]]   ;;  %s7336_s28 = smov 21  }
  0x1d   :  { %8537 = sst [smem:[#allocation83_spill]] %s7482_s12 }
  0x1e   :  { %s7502_s3 = sld [smem:[%s8475_s0 + %s7333_s7]]   ;;  %s7337_s7 = smov 22  }
  0x1f   :  { %s7507_s13 = sld [smem:[%s8475_s0 + %s7334_s15]]   ;;  %s7338_s15 = smov 23  }
  0x20   :  { %8538 = sst [smem:[#allocation84_spill]] %s7492_s27 }
  0x21   :  { %s7512_s9 = sld [smem:[%s8475_s0 + %s7335_s22]]   ;;  %s7339_s22 = smov 24  }
  0x22   :  { %8539 = sst [smem:[#allocation85_spill]] %s7497_s4 }
  0x23   :  { %s7517_s5 = sld [smem:[%s8475_s0 + %s7336_s28]]   ;;  %s7340_s28 = smov 25  }
  0x24   :  { %8540 = sst [smem:[#allocation86_spill]] %s7502_s3 }
  0x25   :  { %8541 = sst [smem:[#allocation87_spill]] %s7507_s13 }
  0x26   :  { %s7522_s3 = sld [smem:[%s8475_s0 + %s7337_s7]]   ;;  %s7341_s7 = smov 26  }
  0x27   :  { %8542 = sst [smem:[#allocation88_spill]] %s7512_s9 }
  0x28   :  { %s7527_s27 = sld [smem:[%s8475_s0 + %s7338_s15]]   ;;  %s7342_s15 = smov 27  }
  0x29   :  { %8543 = sst [smem:[#allocation89_spill]] %s7517_s5 }
  0x2a   :  { %s7532_s9 = sld [smem:[%s8475_s0 + %s7339_s22]]   ;;  %s7343_s22 = smov 28  }
  0x2b   :  { %s7537_s12 = sld [smem:[%s8475_s0 + %s7340_s28]]   ;;  %s7344_s28 = smov 29  }
  0x2c   :  { %8544 = sst [smem:[#allocation90_spill]] %s7522_s3 }
  0x2d   :  { %s7542_s3 = sld [smem:[%s8475_s0 + %s7341_s7]]   ;;  %s7345_s7 = smov 30  }
  0x2e   :  { %s7547_s30 = sld [smem:[%s8475_s0 + %s7342_s15]]   ;;  %s7346_s15 = smov 31  }
  0x2f   :  { %s7562_s19 = sld [smem:[%s8475_s0 + %s7345_s7]]   ;;  %s7349_s7 = smov 34  }
  0x30   :  { %8545 = sst [smem:[#allocation91_spill]] %s7532_s9 }
  0x31   :  { %8546 = sst [smem:[#allocation92_spill]] %s7537_s12 }
  0x32   :  { %s7552_s9 = sld [smem:[%s8475_s0 + %s7343_s22]]   ;;  %s7347_s22 = smov 32  }
  0x33   :  { %8547 = sst [smem:[#allocation93_spill]] %s7542_s3 }
  0x34   :  { %8548 = sst [smem:[#allocation94_spill]] %s7547_s30 }
  0x35   :  { %s7557_s12 = sld [smem:[%s8475_s0 + %s7344_s28]]   ;;  %s7348_s28 = smov 33  }
  0x36   :  { %s7567_s30 = sld [smem:[%s8475_s0 + %s7346_s15]]   ;;  %s7350_s15 = smov 35  }
  0x37   :  { %s7572_s8 = sld [smem:[%s8475_s0 + %s7347_s22]]   ;;  %s7351_s22 = smov 36  }
  0x38   :  { %8549 = sst [smem:[#allocation95_spill]] %s7552_s9 }
  0x39   :  { %s7582_s25 = sld [smem:[%s8475_s0 + %s7349_s7]]   ;;  %s7353_s7 = smov 38  }
  0x3a   :  { %s7592_s17 = sld [smem:[%s8475_s0 + %s7351_s22]]   ;;  %s7355_s22 = smov 40  }
  0x3b   :  { %8550 = sst [smem:[#allocation96_spill]] %s7557_s12 }
  0x3c   :  { %8551 = sst [smem:[#allocation97_spill]] %s7567_s30 }
  0x3d   :  { %8552 = sst [smem:[#allocation98_spill]] %s7572_s8 }
  0x3e   :  { %s7577_s12 = sld [smem:[%s8475_s0 + %s7348_s28]]   ;;  %s7352_s28 = smov 37  }
  0x3f   :  { %8554 = sst [smem:[#allocation100_spill]] %s7582_s25 }
  0x40   :  { %s7587_s30 = sld [smem:[%s8475_s0 + %s7350_s15]]   ;;  %s7354_s15 = smov 39  }
  0x41   :  { %8556 = sst [smem:[#allocation102_spill]] %s7592_s17 }
  0x42   :  { %s7602_s25 = sld [smem:[%s8475_s0 + %s7353_s7]]   ;;  %s7357_s7 = smov 42  }
  0x43   :  { %s7612_s17 = sld [smem:[%s8475_s0 + %s7355_s22]]   ;;  %s7359_s22 = smov 44  }
  0x44   :  { %8553 = sst [smem:[#allocation99_spill]] %s7577_s12 }
  0x45   :  { %s7597_s12 = sld [smem:[%s8475_s0 + %s7352_s28]]   ;;  %s7356_s28 = smov 41  }
  0x46   :  { %8555 = sst [smem:[#allocation101_spill]] %s7587_s30 }
  0x47   :  { %s7607_s30 = sld [smem:[%s8475_s0 + %s7354_s15]]   ;;  %s7358_s15 = smov 43  }
  0x48   :  { %8558 = sst [smem:[#allocation104_spill]] %s7602_s25 }
  0x49   :  { %8560 = sst [smem:[#allocation106_spill]] %s7612_s17 }
  0x4a   :  { %s7622_s25 = sld [smem:[%s8475_s0 + %s7357_s7]]   ;;  %s7361_s7 = smov 46  }
  0x4b   :  { %8557 = sst [smem:[#allocation103_spill]] %s7597_s12 }
  0x4c   :  { %s7617_s12 = sld [smem:[%s8475_s0 + %s7356_s28]]   ;;  %s7360_s28 = smov 45  }
  0x4d   :  { %8559 = sst [smem:[#allocation105_spill]] %s7607_s30 }
  0x4e   :  { %s7627_s30 = sld [smem:[%s8475_s0 + %s7358_s15]]   ;;  %s7362_s15 = smov 47  }
  0x4f   :  { %s7632_s17 = sld [smem:[%s8475_s0 + %s7359_s22]]   ;;  %s7363_s22 = smov 48  }
  0x50   :  { %8562 = sst [smem:[#allocation108_spill]] %s7622_s25 }
  0x51   :  { %s7642_s25 = sld [smem:[%s8475_s0 + %s7361_s7]]  }
  0x52   :  { %8561 = sst [smem:[#allocation107_spill]] %s7617_s12 }
  0x53   :  { %s7637_s12 = sld [smem:[%s8475_s0 + %s7360_s28]]  }
  0x54   :  { %8563 = sst [smem:[#allocation109_spill]] %s7627_s30 }
  0x55   :  { %8564 = sst [smem:[#allocation110_spill]] %s7632_s17 }
  0x56   :  { %s7647_s30 = sld [smem:[%s8475_s0 + %s7362_s15]]  }
  0x57   :  { %s7652_s17 = sld [smem:[%s8475_s0 + %s7363_s22]]  }
  0x58   :  { %103 = vsyncpa [#allocation3], 0 }
  0x59   :  { %104 = vsyncpa [#allocation5], 0 }
  0x5a   :  { %105 = vsyncpa [#allocation8], 0 }
  0x5b   :  { %106 = vsyncpa [#allocation11], 0 }
  0x5c   :  { %107 = vsyncpa [#allocation14], 0 }
  0x5d   :  { %108 = vsyncpa [#allocation17], 0 }
  0x5e   :  { %109 = vsyncpa [#allocation20], 0 }
  0x5f   :  { %110 = vsyncpa [#allocation23], 0 }
  0x60   :  { %111 = vsyncpa [#allocation26], 0 }
  0x61   :  { %112 = vsyncpa [#allocation29], 0 }
  0x62   :  { %113 = vsyncpa [#allocation32], 0 }
  0x63   :  { %114 = vsyncpa [#allocation35], 0 }
  0x64   :  { %115 = vsyncpa [#allocation38], 0 }
  0x65   :  { %116 = vsyncpa [#allocation41], 0 }
  0x66   :  { %117 = vsyncpa [#allocation44], 0 }
  0x67   :  { %118 = vsyncpa [#allocation47], 0 }
  0x68   :  { %119 = vsyncpa [#allocation50], 0 }
  0x69   :  { %120 = vsyncpa [#allocation53], 0  ;;  %s7654_s0 = smov 0  }
  0x6a LB: > { %s8565_s13 = sld [smem:[#allocation87_spill]]  ;;  %s7660_s28 = sadd.s32 4294967295, %s7314_s0   ;;  %s7314_s0 = sphi %s7654_s0, %s126_s0  }
  0x6b   : > { %s8566_s9 = sld [smem:[#allocation95_spill]]  ;;  %p5788_p0 = scmp.ge.s32.totalorder %s7314_s0, 1 }
  0x6c   : > { %s8567_s8 = sld [smem:[#allocation98_spill]]  ;;  %p1175_p1 = scmp.lt.s32.totalorder %s7314_s0, 3 }
  0x6d   : > { %s8568_s6 = sld [smem:[#allocation82_spill]] }
  0x6e   : > { %s8569_s5 = sld [smem:[#allocation89_spill]]  ;;  %p7664_p2 = pnand %p5788_p0, %p1175_p1 }
  0x6f   : > { %s8570_s4 = sld [smem:[#allocation85_spill]]  ;;  %p6073_p3 = scmp.eq.s32.totalorder (!%p7664_p2), %s7660_s28, 0 }
  0x70   : > { %s8571_s3 = sld [smem:[#allocation93_spill]]  ;;  %1179 = sbr.rel (%p7664_p2) target bundleno = 572 (0x23c), region = 12 }
  0x71   : > { %8572 = sst [smem:[#allocation111_spill]] %s7314_s0  ;;  %s1207_s2 = sshll.u32 (!%p7664_p2), %s7432_s21, 4  ;;  %s1208_s2 = int_to_ptr.hbm [resolvable:$true] %s1207_s2 }
  0x72   : > { %s7364_s7 = smov (!%p7664_p2), [#allocation4]   ;;  %s1233_s11 = sshll.u32 (!%p7664_p2), %s7442_s29, 4  ;;  %s7673_s11 = int_to_ptr.hbm [resolvable:$true] %s1233_s11 }
  0x73   : > { %s1209_s10 = sshll.u32 (!%p7664_p2), %s7364_s7, 4  ;;  %s6256_s15 = sshra.s32 (!%p7664_p2), %s1208_s2, 4  ;;  %s1210_s10 = int_to_ptr.vmem [resolvable:$true] %s1209_s10  ;;  %s6257_s15 = int_to_ptr.hbm [resolvable:$true] %s6256_s15 }
  0x74   : > { %s6258_s16 = scalar_lea.hbm (!%p7664_p2), %s6257_s15, 1  ;;  %s6262_s18 = scalar_lea.hbm (!%p7664_p2), %s7432_s21, 1 }
  0x75   : > { %p6259_p4 = scmp.ne.s32.totalorder %s6257_s15, %s6258_s16  ;;  %p6263_p7 = scmp.lt.s32.totalorder %s6257_s15, %s7432_s21 }
  0x76   : > { %p6264_p8 = scmp.lt.s32.totalorder %s6262_s18, %s6258_s16 }
  0x77   : > { %p6260_p5 = pnand %p6259_p4, %p6073_p3 }
  0x78   : > { %p6265_p9 = por %p6264_p8, %p6263_p7 }
  0x79   : > { %p6261_p6 = pneg %p6260_p5 }
  0x7b   : > { %p6266_p10 = pnand %p6265_p9, %p6261_p6 }
  0x7d   : > { %6269 = shalt.err (!%p6266_p10)
}
  0x7e   : > { %5936 = dma.hbm_to_vmem [thread:$0]  (%p6073_p3), %s1208_s2, 16, %s1210_s10, [#allocation5]  }
  0x7f   : > { %s7365_s22 = smov [#allocation7]   ;;  %s1259_s26 = sshll.u32 %s7457_s14, 4  ;;  %s1260_s26 = int_to_ptr.hbm [resolvable:$true] %s1259_s26 }
  0x80   : > { %s1235_s23 = sshll.u32 %s7365_s22, 4  ;;  %s6284_s7 = sshra.s32 %s7673_s11, 4  ;;  %s1236_s23 = int_to_ptr.vmem [resolvable:$true] %s1235_s23  ;;  %s6285_s7 = int_to_ptr.hbm [resolvable:$true] %s6284_s7 }
  0x81   : > { %s6286_s0 = scalar_lea.hbm %s6285_s7, 1  ;;  %s6290_s15 = scalar_lea.hbm %s7442_s29, 1 }
  0x82   : > { %p6287_p11 = scmp.ne.s32.totalorder %s6285_s7, %s6286_s0  ;;  %p6291_p0 = scmp.lt.s32.totalorder %s6285_s7, %s7442_s29 }
  0x83   : > { %p6292_p1 = scmp.lt.s32.totalorder %s6290_s15, %s6286_s0 }
  0x84   : > { %p6288_p12 = pnand %p6287_p11, %p6073_p3 }
  0x85   : > { %p6293_p4 = por %p6292_p1, %p6291_p0 }
  0x86   : > { %p6289_p13 = pneg %p6288_p12 }
  0x88   : > { %p6294_p5 = pnand %p6293_p4, %p6289_p13 }
  0x8a   : > { %6297 = shalt.err (!%p6294_p5)
}
  0x8b   : > { %5940 = dma.hbm_to_vmem [thread:$0]  (%p6073_p3), %s7673_s11, 16, %s1236_s23, [#allocation8]  }
  0x8c   : > { %s7366_s2 = smov [#allocation10]   ;;  %s1285_s16 = sshll.u32 %s7467_s24, 4  ;;  %s7691_s16 = int_to_ptr.hbm [resolvable:$true] %s1285_s16 }
  0x8d   : > { %s1261_s10 = sshll.u32 %s7366_s2, 4  ;;  %s6312_s18 = sshra.s32 %s1260_s26, 4  ;;  %s1262_s10 = int_to_ptr.vmem [resolvable:$true] %s1261_s10  ;;  %s6313_s18 = int_to_ptr.hbm [resolvable:$true] %s6312_s18 }
  0x8e   : > { %s6314_s0 = scalar_lea.hbm %s6313_s18, 192  ;;  %s6318_s22 = scalar_lea.hbm %s7457_s14, 192 }
  0x8f   : > { %p6315_p6 = scmp.ne.s32.totalorder %s6313_s18, %s6314_s0  ;;  %p6319_p9 = scmp.lt.s32.totalorder %s6313_s18, %s7457_s14 }
  0x90   : > { %p6320_p10 = scmp.lt.s32.totalorder %s6318_s22, %s6314_s0 }
  0x91   : > { %p6316_p7 = pnand %p6315_p6, %p6073_p3 }
  0x92   : > { %p6321_p11 = por %p6320_p10, %p6319_p9 }
  0x93   : > { %p6317_p8 = pneg %p6316_p7 }
  0x95   : > { %p6322_p12 = pnand %p6321_p11, %p6317_p8 }
  0x97   : > { %6325 = shalt.err (!%p6322_p12)
}
  0x98   : > { %s8499_s11 = smov 128   ;;  %s8501_s23 = smov 8  }
  0x99   : > { %5944 = dma.hbm_to_vmem [thread:$0]  (%p6073_p3), %s1260_s26, 3072, %s1262_s10, [#allocation11], %s8499_s11, %s8499_s11, %s8501_s23  }
  0x9a   : > { %s1311_s7 = sshll.u32 %s8568_s6, 4  ;;  %s7369_s15 = smov [#allocation13]   ;;  %s7703_s7 = int_to_ptr.hbm [resolvable:$true] %s1311_s7 }
  0x9b   : > { %s1287_s2 = sshll.u32 %s7369_s15, 4  ;;  %s6340_s18 = sshra.s32 %s7691_s16, 4  ;;  %s1288_s2 = int_to_ptr.vmem [resolvable:$true] %s1287_s2  ;;  %s6341_s18 = int_to_ptr.hbm [resolvable:$true] %s6340_s18 }
  0x9c   : > { %s6342_s0 = scalar_lea.hbm %s6341_s18, 64  ;;  %s6346_s22 = scalar_lea.hbm %s7467_s24, 64 }
  0x9d   : > { %p6343_p13 = scmp.ne.s32.totalorder %s6341_s18, %s6342_s0  ;;  %p6347_p4 = scmp.lt.s32.totalorder %s6341_s18, %s7467_s24 }
  0x9e   : > { %p6348_p5 = scmp.lt.s32.totalorder %s6346_s22, %s6342_s0 }
  0x9f   : > { %p6344_p0 = pnand %p6343_p13, %p6073_p3 }
  0xa0   : > { %p6349_p6 = por %p6348_p5, %p6347_p4 }
  0xa1   : > { %p6345_p1 = pneg %p6344_p0 }
  0xa3   : > { %p6350_p7 = pnand %p6349_p6, %p6345_p1 }
  0xa5   : > { %6353 = shalt.err (!%p6350_p7)
}
  0xa6   : > { %5948 = dma.hbm_to_vmem [thread:$0]  (%p6073_p3), %s7691_s16, 1024, %s1288_s2, [#allocation14], %s8499_s11, %s8499_s11, %s8501_s23  }
  0xa7   : > { %s7370_s26 = smov [#allocation16]   ;;  %s1337_s15 = sshll.u32 %s7487_s20, 4  ;;  %s7717_s15 = int_to_ptr.hbm [resolvable:$true] %s1337_s15 }
  0xa8   : > { %s1313_s10 = sshll.u32 %s7370_s26, 4  ;;  %s6368_s18 = sshra.s32 %s7703_s7, 4  ;;  %s1314_s10 = int_to_ptr.vmem [resolvable:$true] %s1313_s10  ;;  %s6369_s18 = int_to_ptr.hbm [resolvable:$true] %s6368_s18 }
  0xa9   : > { %s6370_s0 = scalar_lea.hbm %s6369_s18, 192  ;;  %s6374_s22 = scalar_lea.hbm %s8568_s6, 192 }
  0xaa   : > { %p6371_p8 = scmp.ne.s32.totalorder %s6369_s18, %s6370_s0  ;;  %p6375_p11 = scmp.lt.s32.totalorder %s6369_s18, %s8568_s6 }
  0xab   : > { %p6376_p12 = scmp.lt.s32.totalorder %s6374_s22, %s6370_s0 }
  0xac   : > { %p6372_p9 = pnand %p6371_p8, %p6073_p3 }
  0xad   : > { %p6377_p13 = por %p6376_p12, %p6375_p11 }
  0xae   : > { %p6373_p10 = pneg %p6372_p9 }
  0xb0   : > { %p6378_p0 = pnand %p6377_p13, %p6373_p10 }
  0xb2   : > { %6381 = shalt.err (!%p6378_p0)
}
  0xb3   : > { %5952 = dma.hbm_to_vmem [thread:$0]  (%p6073_p3), %s7703_s7, 3072, %s1314_s10, [#allocation17], %s8499_s11, %s8499_s11, %s8501_s23  }
  0xb4   : > { %s1363_s16 = sshll.u32 %s8570_s4, 4  ;;  %s7371_s2 = smov [#allocation19]   ;;  %s7731_s16 = int_to_ptr.hbm [resolvable:$true] %s1363_s16 }
  0xb5   : > { %s1339_s26 = sshll.u32 %s7371_s2, 4  ;;  %s6396_s18 = sshra.s32 %s7717_s15, 4  ;;  %s1340_s26 = int_to_ptr.vmem [resolvable:$true] %s1339_s26  ;;  %s6397_s18 = int_to_ptr.hbm [resolvable:$true] %s6396_s18 }
  0xb6   : > { %s6398_s0 = scalar_lea.hbm %s6397_s18, 64  ;;  %s6402_s22 = scalar_lea.hbm %s7487_s20, 64 }
  0xb7   : > { %p6399_p1 = scmp.ne.s32.totalorder %s6397_s18, %s6398_s0  ;;  %p6403_p6 = scmp.lt.s32.totalorder %s6397_s18, %s7487_s20 }
  0xb8   : > { %p6404_p7 = scmp.lt.s32.totalorder %s6402_s22, %s6398_s0 }
  0xb9   : > { %p6400_p4 = pnand %p6399_p1, %p6073_p3 }
  0xba   : > { %p6405_p8 = por %p6404_p7, %p6403_p6 }
  0xbb   : > { %p6401_p5 = pneg %p6400_p4 }
  0xbd   : > { %p6406_p9 = pnand %p6405_p8, %p6401_p5 }
  0xbf   : > { %6409 = shalt.err (!%p6406_p9)
}
  0xc0   : > { %5956 = dma.hbm_to_vmem [thread:$0]  (%p6073_p3), %s7717_s15, 1024, %s1340_s26, [#allocation20], %s8499_s11, %s8499_s11, %s8501_s23  }
  0xc1   : > { %s7372_s7 = smov [#allocation22]   ;;  %s1389_s2 = sshll.u32 %s8565_s13, 4  ;;  %s7745_s2 = int_to_ptr.hbm [resolvable:$true] %s1389_s2 }
  0xc2   : > { %s1365_s10 = sshll.u32 %s7372_s7, 4  ;;  %s6424_s18 = sshra.s32 %s7731_s16, 4  ;;  %s1366_s10 = int_to_ptr.vmem [resolvable:$true] %s1365_s10  ;;  %s6425_s18 = int_to_ptr.hbm [resolvable:$true] %s6424_s18 }
  0xc3   : > { %s6426_s0 = scalar_lea.hbm %s6425_s18, 192  ;;  %s6430_s22 = scalar_lea.hbm %s8570_s4, 192 }
  0xc4   : > { %p6427_p10 = scmp.ne.s32.totalorder %s6425_s18, %s6426_s0  ;;  %p6431_p13 = scmp.lt.s32.totalorder %s6425_s18, %s8570_s4 }
  0xc5   : > { %p6432_p0 = scmp.lt.s32.totalorder %s6430_s22, %s6426_s0 }
  0xc6   : > { %p6428_p11 = pnand %p6427_p10, %p6073_p3 }
  0xc7   : > { %p6433_p1 = por %p6432_p0, %p6431_p13 }
  0xc8   : > { %p6429_p12 = pneg %p6428_p11 }
  0xca   : > { %p6434_p4 = pnand %p6433_p1, %p6429_p12 }
  0xcc   : > { %6437 = shalt.err (!%p6434_p4)
}
  0xcd   : > { %5960 = dma.hbm_to_vmem [thread:$0]  (%p6073_p3), %s7731_s16, 3072, %s1366_s10, [#allocation23], %s8499_s11, %s8499_s11, %s8501_s23  }
  0xce   : > { %s1415_s15 = sshll.u32 %s8569_s5, 4  ;;  %s7373_s26 = smov [#allocation25]   ;;  %s7759_s15 = int_to_ptr.hbm [resolvable:$true] %s1415_s15 }
  0xcf   : > { %s1391_s7 = sshll.u32 %s7373_s26, 4  ;;  %s6452_s18 = sshra.s32 %s7745_s2, 4  ;;  %s1392_s7 = int_to_ptr.vmem [resolvable:$true] %s1391_s7  ;;  %s6453_s18 = int_to_ptr.hbm [resolvable:$true] %s6452_s18 }
  0xd0   : > { %s6454_s0 = scalar_lea.hbm %s6453_s18, 64  ;;  %s6458_s22 = scalar_lea.hbm %s8565_s13, 64 }
  0xd1   : > { %p6455_p5 = scmp.ne.s32.totalorder %s6453_s18, %s6454_s0  ;;  %p6459_p8 = scmp.lt.s32.totalorder %s6453_s18, %s8565_s13 }
  0xd2   : > { %p6460_p9 = scmp.lt.s32.totalorder %s6458_s22, %s6454_s0 }
  0xd3   : > { %p6456_p6 = pnand %p6455_p5, %p6073_p3 }
  0xd4   : > { %p6461_p10 = por %p6460_p9, %p6459_p8 }
  0xd5   : > { %p6457_p7 = pneg %p6456_p6 }
  0xd7   : > { %p6462_p11 = pnand %p6461_p10, %p6457_p7 }
  0xd9   : > { %6465 = shalt.err (!%p6462_p11)
}
  0xda   : > { %5964 = dma.hbm_to_vmem [thread:$0]  (%p6073_p3), %s7745_s2, 1024, %s1392_s7, [#allocation26], %s8499_s11, %s8499_s11, %s8501_s23  }
  0xdb   : > { %s7374_s16 = smov [#allocation28]   ;;  %s1441_s26 = sshll.u32 %s7527_s27, 4  ;;  %s7773_s26 = int_to_ptr.hbm [resolvable:$true] %s1441_s26 }
  0xdc   : > { %s1417_s10 = sshll.u32 %s7374_s16, 4  ;;  %s6480_s18 = sshra.s32 %s7759_s15, 4  ;;  %s1418_s10 = int_to_ptr.vmem [resolvable:$true] %s1417_s10  ;;  %s6481_s18 = int_to_ptr.hbm [resolvable:$true] %s6480_s18 }
  0xdd   : > { %s6482_s0 = scalar_lea.hbm %s6481_s18, 384  ;;  %s6486_s22 = scalar_lea.hbm %s8569_s5, 384 }
  0xde   : > { %p6483_p12 = scmp.ne.s32.totalorder %s6481_s18, %s6482_s0  ;;  %p6487_p1 = scmp.lt.s32.totalorder %s6481_s18, %s8569_s5 }
  0xdf   : > { %p6488_p4 = scmp.lt.s32.totalorder %s6486_s22, %s6482_s0 }
  0xe0   : > { %p6484_p13 = pnand %p6483_p12, %p6073_p3 }
  0xe1   : > { %p6489_p5 = por %p6488_p4, %p6487_p1 }
  0xe2   : > { %p6485_p0 = pneg %p6484_p13 }
  0xe4   : > { %p6490_p6 = pnand %p6489_p5, %p6485_p0 }
  0xe6   : > { %6493 = shalt.err (!%p6490_p6)
}
  0xe7   : > { %5968 = dma.hbm_to_vmem [thread:$0]  (%p6073_p3), %s7759_s15, 6144, %s1418_s10, [#allocation29], %s8499_s11, %s8499_s11, %s8501_s23  }
  0xe8   : > { %s1471_s2 = sshll.u32 %s8571_s3, 4  ;;  %s7375_s7 = smov [#allocation31]   ;;  %s7787_s2 = int_to_ptr.hbm [resolvable:$true] %s1471_s2 }
  0xe9   : > { %s1443_s16 = sshll.u32 %s7375_s7, 4  ;;  %s6508_s18 = sshra.s32 %s7773_s26, 4  ;;  %s1444_s16 = int_to_ptr.vmem [resolvable:$true] %s1443_s16  ;;  %s6509_s18 = int_to_ptr.hbm [resolvable:$true] %s6508_s18 }
  0xea   : > { %s6510_s0 = scalar_lea.hbm %s6509_s18, 64  ;;  %s6514_s22 = scalar_lea.hbm %s7527_s27, 64 }
  0xeb   : > { %p6511_p7 = scmp.ne.s32.totalorder %s6509_s18, %s6510_s0  ;;  %p6515_p10 = scmp.lt.s32.totalorder %s6509_s18, %s7527_s27 }
  0xec   : > { %p6516_p11 = scmp.lt.s32.totalorder %s6514_s22, %s6510_s0 }
  0xed   : > { %p6512_p8 = pnand %p6511_p7, %p6073_p3 }
  0xee   : > { %p6517_p12 = por %p6516_p11, %p6515_p10 }
  0xef   : > { %p6513_p9 = pneg %p6512_p8 }
  0xf1   : > { %p6518_p13 = pnand %p6517_p12, %p6513_p9 }
  0xf3   : > { %6521 = shalt.err (!%p6518_p13)
}
  0xf4   : > { %5972 = dma.hbm_to_vmem [thread:$0]  (%p6073_p3), %s7773_s26, 1024, %s1444_s16, [#allocation32], %s8499_s11, %s8499_s11, %s8501_s23  }
  0xf5   : > { %s7376_s15 = smov [#allocation34]   ;;  %s1497_s7 = sshll.u32 %s8566_s9, 4  ;;  %s7801_s7 = int_to_ptr.hbm [resolvable:$true] %s1497_s7 }
  0xf6   : > { %s1473_s10 = sshll.u32 %s7376_s15, 4  ;;  %s6536_s18 = sshra.s32 %s7787_s2, 4  ;;  %s1474_s10 = int_to_ptr.vmem [resolvable:$true] %s1473_s10  ;;  %s6537_s18 = int_to_ptr.hbm [resolvable:$true] %s6536_s18 }
  0xf7   : > { %s6538_s0 = scalar_lea.hbm %s6537_s18, 1  ;;  %s6542_s22 = scalar_lea.hbm %s8571_s3, 1 }
  0xf8   : > { %p6539_p0 = scmp.ne.s32.totalorder %s6537_s18, %s6538_s0  ;;  %p6543_p5 = scmp.lt.s32.totalorder %s6537_s18, %s8571_s3 }
  0xf9   : > { %p6544_p6 = scmp.lt.s32.totalorder %s6542_s22, %s6538_s0 }
  0xfa   : > { %p6540_p1 = pnand %p6539_p0, %p6073_p3 }
  0xfb   : > { %p6545_p7 = por %p6544_p6, %p6543_p5 }
  0xfc   : > { %p6541_p4 = pneg %p6540_p1 }
  0xfe   : > { %p6546_p8 = pnand %p6545_p7, %p6541_p4 }
 0x100   : > { %6549 = shalt.err (!%p6546_p8)
}
 0x101   : > { %5976 = dma.hbm_to_vmem [thread:$0]  (%p6073_p3), %s7787_s2, 16, %s1474_s10, [#allocation35]  }
 0x102   : > { %s1523_s26 = sshll.u32 %s7562_s19, 4  ;;  %s7377_s16 = smov [#allocation37]   ;;  %s7812_s26 = int_to_ptr.hbm [resolvable:$true] %s1523_s26 }
 0x103   : > { %s1499_s15 = sshll.u32 %s7377_s16, 4  ;;  %s6564_s18 = sshra.s32 %s7801_s7, 4  ;;  %s1500_s15 = int_to_ptr.vmem [resolvable:$true] %s1499_s15  ;;  %s6565_s18 = int_to_ptr.hbm [resolvable:$true] %s6564_s18 }
 0x104   : > { %s6566_s0 = scalar_lea.hbm %s6565_s18, 1  ;;  %s6570_s22 = scalar_lea.hbm %s8566_s9, 1 }
 0x105   : > { %p6567_p9 = scmp.ne.s32.totalorder %s6565_s18, %s6566_s0  ;;  %p6571_p12 = scmp.lt.s32.totalorder %s6565_s18, %s8566_s9 }
 0x106   : > { %p6572_p13 = scmp.lt.s32.totalorder %s6570_s22, %s6566_s0 }
 0x107   : > { %p6568_p10 = pnand %p6567_p9, %p6073_p3 }
 0x108   : > { %p6573_p0 = por %p6572_p13, %p6571_p12 }
 0x109   : > { %p6569_p11 = pneg %p6568_p10 }
 0x10b   : > { %p6574_p1 = pnand %p6573_p0, %p6569_p11 }
 0x10d   : > { %6577 = shalt.err (!%p6574_p1)
}
 0x10e   : > { %5980 = dma.hbm_to_vmem [thread:$0]  (%p6073_p3), %s7801_s7, 16, %s1500_s15, [#allocation38]  }
 0x10f   : > { %s7378_s2 = smov [#allocation40]   ;;  %s1549_s16 = sshll.u32 %s8567_s8, 4  ;;  %s7823_s16 = int_to_ptr.hbm [resolvable:$true] %s1549_s16 }
 0x110   : > { %s1525_s10 = sshll.u32 %s7378_s2, 4  ;;  %s6592_s18 = sshra.s32 %s7812_s26, 4  ;;  %s1526_s10 = int_to_ptr.vmem [resolvable:$true] %s1525_s10  ;;  %s6593_s18 = int_to_ptr.hbm [resolvable:$true] %s6592_s18 }
 0x111   : > { %s6594_s0 = scalar_lea.hbm %s6593_s18, 1  ;;  %s6598_s22 = scalar_lea.hbm %s7562_s19, 1 }
 0x112   : > { %p6595_p4 = scmp.ne.s32.totalorder %s6593_s18, %s6594_s0  ;;  %p6599_p7 = scmp.lt.s32.totalorder %s6593_s18, %s7562_s19 }
 0x113   : > { %p6600_p8 = scmp.lt.s32.totalorder %s6598_s22, %s6594_s0 }
 0x114   : > { %p6596_p5 = pnand %p6595_p4, %p6073_p3 }
 0x115   : > { %p6601_p9 = por %p6600_p8, %p6599_p7 }
 0x116   : > { %p6597_p6 = pneg %p6596_p5 }
 0x118   : > { %p6602_p10 = pnand %p6601_p9, %p6597_p6 }
 0x11a   : > { %6605 = shalt.err (!%p6602_p10)
}
 0x11b   : > { %s8574_s7 = sld [smem:[#allocation101_spill]]  ;;  %s7379_s15 = smov [#allocation43]  }
 0x11c   : > { %5984 = dma.hbm_to_vmem [thread:$0]  (%p6073_p3), %s7812_s26, 16, %s1526_s10, [#allocation41]  }
 0x11d   : > { %s1551_s2 = sshll.u32 %s7379_s15, 4  ;;  %s6620_s23 = sshra.s32 %s7823_s16, 4  ;;  %s1552_s2 = int_to_ptr.vmem [resolvable:$true] %s1551_s2  ;;  %s6621_s23 = int_to_ptr.hbm [resolvable:$true] %s6620_s23 }
 0x11e   : > { %s6622_s18 = scalar_lea.hbm %s6621_s23, 1  ;;  %s6626_s0 = scalar_lea.hbm %s8567_s8, 1 }
 0x11f   : > { %p6623_p11 = scmp.ne.s32.totalorder %s6621_s23, %s6622_s18  ;;  %p6627_p0 = scmp.lt.s32.totalorder %s6621_s23, %s8567_s8 }
 0x120   : > { %p6628_p1 = scmp.lt.s32.totalorder %s6626_s0, %s6622_s18 }
 0x121   : > { %s1577_s11 = sshll.u32 %s8574_s7, 4  ;;  %p6624_p12 = pnand %p6623_p11, %p6073_p3  ;;  %s1578_s11 = int_to_ptr.hbm [resolvable:$true] %s1577_s11 }
 0x122   : > { %p6629_p4 = por %p6628_p1, %p6627_p0 }
 0x123   : > { %p6625_p13 = pneg %p6624_p12 }
 0x125   : > { %p6630_p5 = pnand %p6629_p4, %p6625_p13 }
 0x127   : > { %6633 = shalt.err (!%p6630_p5)
}
 0x128   : > { %s8575_s26 = sld [smem:[#allocation105_spill]]  ;;  %s7380_s10 = smov [#allocation46]  }
 0x129   : > { %5988 = dma.hbm_to_vmem [thread:$0]  (%p6073_p3), %s7823_s16, 16, %s1552_s2, [#allocation44]  }
 0x12a   : > { %s1579_s22 = sshll.u32 %s7380_s10, 4  ;;  %s6648_s23 = sshra.s32 %s1578_s11, 4  ;;  %s1580_s22 = int_to_ptr.vmem [resolvable:$true] %s1579_s22  ;;  %s6649_s23 = int_to_ptr.hbm [resolvable:$true] %s6648_s23 }
 0x12b   : > { %s6650_s18 = scalar_lea.hbm %s6649_s23, 1536  ;;  %s6654_s0 = scalar_lea.hbm %s8574_s7, 1536 }
 0x12c   : > { %p6651_p6 = scmp.ne.s32.totalorder %s6649_s23, %s6650_s18  ;;  %p6655_p9 = scmp.lt.s32.totalorder %s6649_s23, %s8574_s7 }
 0x12d   : > { %p6656_p10 = scmp.lt.s32.totalorder %s6654_s0, %s6650_s18 }
 0x12e   : > { %s1611_s15 = sshll.u32 %s8575_s26, 4  ;;  %p6652_p7 = pnand %p6651_p6, %p6073_p3  ;;  %s7843_s15 = int_to_ptr.hbm [resolvable:$true] %s1611_s15 }
 0x12f   : > { %p6657_p11 = por %p6656_p10, %p6655_p9 }
 0x130   : > { %p6653_p8 = pneg %p6652_p7 }
 0x132   : > { %p6658_p12 = pnand %p6657_p11, %p6653_p8 }
 0x134   : > { %6661 = shalt.err (!%p6658_p12)
}
 0x135   : > { %s8508_s16 = smov 256   ;;  %s8576_s2 = sld [smem:[#allocation109_spill]] }
 0x136   : > { %s8510_s10 = smov 16   ;;  %s7383_s4 = smov [#allocation49]  }
 0x137   : > { %5992 = dma.hbm_to_vmem [thread:$0]  (%p6073_p3), %s1578_s11, 24576, %s1580_s22, [#allocation47], %s8508_s16, %s8508_s16, %s8510_s10  }
 0x138   : > { %s1613_s23 = sshll.u32 %s7383_s4, 4  ;;  %s6676_s18 = sshra.s32 %s7843_s15, 4  ;;  %s1614_s23 = int_to_ptr.vmem [resolvable:$true] %s1613_s23  ;;  %s6677_s18 = int_to_ptr.hbm [resolvable:$true] %s6676_s18 }
 0x139   : > { %s6678_s0 = scalar_lea.hbm %s6677_s18, 512  ;;  %s6682_s5 = scalar_lea.hbm %s8575_s26, 512 }
 0x13a   : > { %p6679_p13 = scmp.ne.s32.totalorder %s6677_s18, %s6678_s0  ;;  %p6683_p4 = scmp.lt.s32.totalorder %s6677_s18, %s8575_s26 }
 0x13b   : > { %s1645_s3 = sshll.u32 %s8576_s2, 4  ;;  %p6684_p5 = scmp.lt.s32.totalorder %s6682_s5, %s6678_s0  ;;  %s7855_s3 = int_to_ptr.hbm [resolvable:$true] %s1645_s3 }
 0x13c   : > { %p6680_p0 = pnand %p6679_p13, %p6073_p3 }
 0x13d   : > { %p6685_p6 = por %p6684_p5, %p6683_p4 }
 0x13e   : > { %p6681_p1 = pneg %p6680_p0 }
 0x140   : > { %p6686_p7 = pnand %p6685_p6, %p6681_p1 }
 0x142   : > { %6689 = shalt.err (!%p6686_p7)
}
 0x143   : > { %s8577_s4 = sld [smem:[#allocation76_spill]]  ;;  %s7384_s11 = smov [#allocation52]  }
 0x144   : > { %5996 = dma.hbm_to_vmem [thread:$0]  (%p6073_p3), %s7843_s15, 8192, %s1614_s23, [#allocation50], %s8508_s16, %s8508_s16, %s8510_s10  }
 0x145   : > { %s1647_s22 = sshll.u32 %s7384_s11, 4  ;;  %s6704_s5 = sshra.s32 %s7855_s3, 4  ;;  %s1648_s22 = int_to_ptr.vmem [resolvable:$true] %s1647_s22  ;;  %s6705_s5 = int_to_ptr.hbm [resolvable:$true] %s6704_s5 }
 0x146   : > { %s6706_s0 = scalar_lea.hbm %s6705_s5, 512  ;;  %s6710_s6 = scalar_lea.hbm %s8576_s2, 512 }
 0x147   : > { %p6707_p8 = scmp.ne.s32.totalorder %s6705_s5, %s6706_s0  ;;  %p6711_p11 = scmp.lt.s32.totalorder %s6705_s5, %s8576_s2 }
 0x148   : > { %p6712_p12 = scmp.lt.s32.totalorder %s6710_s6, %s6706_s0 }
 0x149   : > { %s1192_s18 = sshll.u32 %s8577_s4, 4  ;;  %p6708_p9 = pnand %p6707_p8, %p6073_p3  ;;  %s1193_s18 = int_to_ptr.hbm [resolvable:$true] %s1192_s18 }
 0x14a   : > { %p6713_p13 = por %p6712_p12, %p6711_p11 }
 0x14b   : > { %p6709_p10 = pneg %p6708_p9 }
 0x14d   : > { %p6714_p0 = pnand %p6713_p13, %p6709_p10 }
 0x14f   : > { %6717 = shalt.err (!%p6714_p0)
}
 0x150   : > { %s8578_s15 = sld [smem:[#allocation77_spill]]  ;;  %s7385_s23 = smov [#allocation2]  }
 0x151   : > { %6000 = dma.hbm_to_vmem [thread:$0]  (%p6073_p3), %s7855_s3, 8192, %s1648_s22, [#allocation53], %s8508_s16, %s8508_s16, %s8510_s10  }
 0x152   : > { %s1194_s11 = sshll.u32 %s7385_s23, 4  ;;  %s6732_s6 = sshra.s32 %s1193_s18, 4  ;;  %s1195_s11 = int_to_ptr.vmem [resolvable:$true] %s1194_s11  ;;  %s6733_s6 = int_to_ptr.hbm [resolvable:$true] %s6732_s6 }
 0x153   : > { %s6734_s5 = scalar_lea.hbm %s6733_s6, 24  ;;  %s6738_s0 = scalar_lea.hbm %s8577_s4, 24 }
 0x154   : > { %p6735_p1 = scmp.ne.s32.totalorder %s6733_s6, %s6734_s5  ;;  %p6739_p6 = scmp.lt.s32.totalorder %s6733_s6, %s8577_s4 }
 0x155   : > { %p6740_p7 = scmp.lt.s32.totalorder %s6738_s0, %s6734_s5 }
 0x156   : > { %s1218_s7 = sshll.u32 %s8578_s15, 4  ;;  %p6736_p4 = pnand %p6735_p1, %p6073_p3  ;;  %s7881_s7 = int_to_ptr.hbm [resolvable:$true] %s1218_s7 }
 0x157   : > { %p6741_p8 = por %p6740_p7, %p6739_p6 }
 0x158   : > { %p6737_p5 = pneg %p6736_p4 }
 0x15a   : > { %p6742_p9 = pnand %p6741_p8, %p6737_p5 }
 0x15c   : > { %6745 = shalt.err (!%p6742_p9)
}
 0x15d   : > { %s8579_s3 = smov 8   ;;  %s8580_s22 = smov 128  }
 0x15e   : > { %s8581_s23 = sld [smem:[#allocation79_spill]]  ;;  %s7386_s10 = smov [#allocation6]  }
 0x15f   : > { %5934 = dma.hbm_to_vmem [thread:$0]  (%p6073_p3), %s1193_s18, 384, %s1195_s11, [#allocation3], %s8580_s22, %s8580_s22, %s8579_s3  }
 0x160   : > { %s1220_s2 = sshll.u32 %s7386_s10, 4  ;;  %s6760_s6 = sshra.s32 %s7881_s7, 4  ;;  %s1221_s2 = int_to_ptr.vmem [resolvable:$true] %s1220_s2  ;;  %s6761_s6 = int_to_ptr.hbm [resolvable:$true] %s6760_s6 }
 0x161   : > { %s6762_s5 = scalar_lea.hbm %s6761_s6, 192  ;;  %s6766_s0 = scalar_lea.hbm %s8578_s15, 192 }
 0x162   : > { %p6763_p10 = scmp.ne.s32.totalorder %s6761_s6, %s6762_s5  ;;  %p6767_p13 = scmp.lt.s32.totalorder %s6761_s6, %s8578_s15 }
 0x163   : > { %p6768_p0 = scmp.lt.s32.totalorder %s6766_s0, %s6762_s5 }
 0x164   : > { %s1248_s16 = sshll.u32 %s8581_s23, 4  ;;  %p6764_p11 = pnand %p6763_p10, %p6073_p3  ;;  %s7893_s16 = int_to_ptr.hbm [resolvable:$true] %s1248_s16 }
 0x165   : > { %p6769_p1 = por %p6768_p0, %p6767_p13 }
 0x166   : > { %p6765_p12 = pneg %p6764_p11 }
 0x168   : > { %p6770_p4 = pnand %p6769_p1, %p6765_p12 }
 0x16a   : > { %6773 = shalt.err (!%p6770_p4)
}
 0x16b   : > { %s8582_s10 = sld [smem:[#allocation80_spill]]  ;;  %s7387_s18 = smov [#allocation9]  }
 0x16c   : > { %5938 = dma.hbm_to_vmem [thread:$0]  (%p6073_p3), %s7881_s7, 3072, %s1221_s2, [#allocation5], %s8580_s22, %s8580_s22, %s8579_s3  }
 0x16d   : > { %s1250_s11 = sshll.u32 %s7387_s18, 4  ;;  %s6788_s6 = sshra.s32 %s7893_s16, 4  ;;  %s1251_s11 = int_to_ptr.vmem [resolvable:$true] %s1250_s11  ;;  %s6789_s6 = int_to_ptr.hbm [resolvable:$true] %s6788_s6 }
 0x16e   : > { %s6790_s5 = scalar_lea.hbm %s6789_s6, 1  ;;  %s6794_s0 = scalar_lea.hbm %s8581_s23, 1 }
 0x16f   : > { %p6791_p5 = scmp.ne.s32.totalorder %s6789_s6, %s6790_s5  ;;  %p6795_p8 = scmp.lt.s32.totalorder %s6789_s6, %s8581_s23 }
 0x170   : > { %p6796_p9 = scmp.lt.s32.totalorder %s6794_s0, %s6790_s5 }
 0x171   : > { %s1274_s4 = sshll.u32 %s8582_s10, 4  ;;  %p6792_p6 = pnand %p6791_p5, %p6073_p3  ;;  %s7907_s4 = int_to_ptr.hbm [resolvable:$true] %s1274_s4 }
 0x172   : > { %p6797_p10 = por %p6796_p9, %p6795_p8 }
 0x173   : > { %p6793_p7 = pneg %p6792_p6 }
 0x175   : > { %p6798_p11 = pnand %p6797_p10, %p6793_p7 }
 0x177   : > { %6801 = shalt.err (!%p6798_p11)
}
 0x178   : > { %s8583_s7 = sld [smem:[#allocation81_spill]]  ;;  %s7388_s18 = smov [#allocation12]  }
 0x179   : > { %5942 = dma.hbm_to_vmem [thread:$0]  (%p6073_p3), %s7893_s16, 16, %s1251_s11, [#allocation8]  }
 0x17a   : > { %s1276_s8 = sshll.u32 %s7388_s18, 4  ;;  %s6816_s6 = sshra.s32 %s7907_s4, 4  ;;  %s1277_s8 = int_to_ptr.vmem [resolvable:$true] %s1276_s8  ;;  %s6817_s6 = int_to_ptr.hbm [resolvable:$true] %s6816_s6 }
 0x17b   : > { %s6818_s5 = scalar_lea.hbm %s6817_s6, 1  ;;  %s6822_s0 = scalar_lea.hbm %s8582_s10, 1 }
 0x17c   : > { %p6819_p12 = scmp.ne.s32.totalorder %s6817_s6, %s6818_s5  ;;  %p6823_p1 = scmp.lt.s32.totalorder %s6817_s6, %s8582_s10 }
 0x17d   : > { %p6824_p4 = scmp.lt.s32.totalorder %s6822_s0, %s6818_s5 }
 0x17e   : > { %s1300_s2 = sshll.u32 %s8583_s7, 4  ;;  %p6820_p13 = pnand %p6819_p12, %p6073_p3  ;;  %s7918_s2 = int_to_ptr.hbm [resolvable:$true] %s1300_s2 }
 0x17f   : > { %p6825_p5 = por %p6824_p4, %p6823_p1 }
 0x180   : > { %p6821_p0 = pneg %p6820_p13 }
 0x182   : > { %p6826_p6 = pnand %p6825_p5, %p6821_p0 }
 0x184   : > { %6829 = shalt.err (!%p6826_p6)
}
 0x185   : > { %s8584_s16 = sld [smem:[#allocation83_spill]]  ;;  %s7389_s11 = smov [#allocation15]  }
 0x186   : > { %5946 = dma.hbm_to_vmem [thread:$0]  (%p6073_p3), %s7907_s4, 16, %s1277_s8, [#allocation11]  }
 0x187   : > { %s1302_s18 = sshll.u32 %s7389_s11, 4  ;;  %s6844_s6 = sshra.s32 %s7918_s2, 4  ;;  %s1303_s18 = int_to_ptr.vmem [resolvable:$true] %s1302_s18  ;;  %s6845_s6 = int_to_ptr.hbm [resolvable:$true] %s6844_s6 }
 0x188   : > { %s6846_s5 = scalar_lea.hbm %s6845_s6, 1  ;;  %s6850_s0 = scalar_lea.hbm %s8583_s7, 1 }
 0x189   : > { %p6847_p7 = scmp.ne.s32.totalorder %s6845_s6, %s6846_s5  ;;  %p6851_p10 = scmp.lt.s32.totalorder %s6845_s6, %s8583_s7 }
 0x18a   : > { %p6852_p11 = scmp.lt.s32.totalorder %s6850_s0, %s6846_s5 }
 0x18b   : > { %s1326_s9 = sshll.u32 %s8584_s16, 4  ;;  %p6848_p8 = pnand %p6847_p7, %p6073_p3  ;;  %s7929_s9 = int_to_ptr.hbm [resolvable:$true] %s1326_s9 }
 0x18c   : > { %p6853_p12 = por %p6852_p11, %p6851_p10 }
 0x18d   : > { %p6849_p9 = pneg %p6848_p8 }
 0x18f   : > { %p6854_p13 = pnand %p6853_p12, %p6849_p9 }
 0x191   : > { %6857 = shalt.err (!%p6854_p13)
}
 0x192   : > { %s8585_s8 = sld [smem:[#allocation84_spill]]  ;;  %s7390_s11 = smov [#allocation18]  }
 0x193   : > { %5950 = dma.hbm_to_vmem [thread:$0]  (%p6073_p3), %s7918_s2, 16, %s1303_s18, [#allocation14]  }
 0x194   : > { %s1328_s10 = sshll.u32 %s7390_s11, 4  ;;  %s6872_s6 = sshra.s32 %s7929_s9, 4  ;;  %s1329_s10 = int_to_ptr.vmem [resolvable:$true] %s1328_s10  ;;  %s6873_s6 = int_to_ptr.hbm [resolvable:$true] %s6872_s6 }
 0x195   : > { %s6874_s5 = scalar_lea.hbm %s6873_s6, 1  ;;  %s6878_s0 = scalar_lea.hbm %s8584_s16, 1 }
 0x196   : > { %p6875_p0 = scmp.ne.s32.totalorder %s6873_s6, %s6874_s5  ;;  %p6879_p5 = scmp.lt.s32.totalorder %s6873_s6, %s8584_s16 }
 0x197   : > { %p6880_p6 = scmp.lt.s32.totalorder %s6878_s0, %s6874_s5 }
 0x198   : > { %s1352_s4 = sshll.u32 %s8585_s8, 4  ;;  %p6876_p1 = pnand %p6875_p0, %p6073_p3  ;;  %s7940_s4 = int_to_ptr.hbm [resolvable:$true] %s1352_s4 }
 0x199   : > { %p6881_p7 = por %p6880_p6, %p6879_p5 }
 0x19a   : > { %p6877_p4 = pneg %p6876_p1 }
 0x19c   : > { %p6882_p8 = pnand %p6881_p7, %p6877_p4 }
 0x19e   : > { %6885 = shalt.err (!%p6882_p8)
}
 0x19f   : > { %s8586_s2 = sld [smem:[#allocation86_spill]]  ;;  %s7391_s18 = smov [#allocation21]  }
 0x1a0   : > { %5954 = dma.hbm_to_vmem [thread:$0]  (%p6073_p3), %s7929_s9, 16, %s1329_s10, [#allocation17]  }
 0x1a1   : > { %s1354_s11 = sshll.u32 %s7391_s18, 4  ;;  %s6900_s6 = sshra.s32 %s7940_s4, 4  ;;  %s1355_s11 = int_to_ptr.vmem [resolvable:$true] %s1354_s11  ;;  %s6901_s6 = int_to_ptr.hbm [resolvable:$true] %s6900_s6 }
 0x1a2   : > { %s6902_s5 = scalar_lea.hbm %s6901_s6, 1  ;;  %s6906_s0 = scalar_lea.hbm %s8585_s8, 1 }
 0x1a3   : > { %p6903_p9 = scmp.ne.s32.totalorder %s6901_s6, %s6902_s5  ;;  %p6907_p12 = scmp.lt.s32.totalorder %s6901_s6, %s8585_s8 }
 0x1a4   : > { %p6908_p13 = scmp.lt.s32.totalorder %s6906_s0, %s6902_s5 }
 0x1a5   : > { %s1378_s7 = sshll.u32 %s8586_s2, 4  ;;  %p6904_p10 = pnand %p6903_p9, %p6073_p3  ;;  %s7951_s7 = int_to_ptr.hbm [resolvable:$true] %s1378_s7 }
 0x1a6   : > { %p6909_p0 = por %p6908_p13, %p6907_p12 }
 0x1a7   : > { %p6905_p11 = pneg %p6904_p10 }
 0x1a9   : > { %p6910_p1 = pnand %p6909_p0, %p6905_p11 }
 0x1ab   : > { %6913 = shalt.err (!%p6910_p1)
}
 0x1ac   : > { %s8587_s9 = sld [smem:[#allocation88_spill]]  ;;  %s7392_s18 = smov [#allocation24]  }
 0x1ad   : > { %5958 = dma.hbm_to_vmem [thread:$0]  (%p6073_p3), %s7940_s4, 16, %s1355_s11, [#allocation20]  }
 0x1ae   : > { %s1380_s13 = sshll.u32 %s7392_s18, 4  ;;  %s6928_s6 = sshra.s32 %s7951_s7, 4  ;;  %s1381_s13 = int_to_ptr.vmem [resolvable:$true] %s1380_s13  ;;  %s6929_s6 = int_to_ptr.hbm [resolvable:$true] %s6928_s6 }
 0x1af   : > { %s6930_s5 = scalar_lea.hbm %s6929_s6, 1  ;;  %s6934_s0 = scalar_lea.hbm %s8586_s2, 1 }
 0x1b0   : > { %p6931_p4 = scmp.ne.s32.totalorder %s6929_s6, %s6930_s5  ;;  %p6935_p7 = scmp.lt.s32.totalorder %s6929_s6, %s8586_s2 }
 0x1b1   : > { %p6936_p8 = scmp.lt.s32.totalorder %s6934_s0, %s6930_s5 }
 0x1b2   : > { %s1404_s10 = sshll.u32 %s8587_s9, 4  ;;  %p6932_p5 = pnand %p6931_p4, %p6073_p3  ;;  %s7962_s10 = int_to_ptr.hbm [resolvable:$true] %s1404_s10 }
 0x1b3   : > { %p6937_p9 = por %p6936_p8, %p6935_p7 }
 0x1b4   : > { %p6933_p6 = pneg %p6932_p5 }
 0x1b6   : > { %p6938_p10 = pnand %p6937_p9, %p6933_p6 }
 0x1b8   : > { %6941 = shalt.err (!%p6938_p10)
}
 0x1b9   : > { %s8588_s4 = sld [smem:[#allocation90_spill]]  ;;  %s7393_s11 = smov [#allocation27]  }
 0x1ba   : > { %5962 = dma.hbm_to_vmem [thread:$0]  (%p6073_p3), %s7951_s7, 16, %s1381_s13, [#allocation23]  }
 0x1bb   : > { %s1406_s18 = sshll.u32 %s7393_s11, 4  ;;  %s6956_s6 = sshra.s32 %s7962_s10, 4  ;;  %s1407_s18 = int_to_ptr.vmem [resolvable:$true] %s1406_s18  ;;  %s6957_s6 = int_to_ptr.hbm [resolvable:$true] %s6956_s6 }
 0x1bc   : > { %s6958_s5 = scalar_lea.hbm %s6957_s6, 1  ;;  %s6962_s0 = scalar_lea.hbm %s8587_s9, 1 }
 0x1bd   : > { %p6959_p11 = scmp.ne.s32.totalorder %s6957_s6, %s6958_s5  ;;  %p6963_p0 = scmp.lt.s32.totalorder %s6957_s6, %s8587_s9 }
 0x1be   : > { %p6964_p1 = scmp.lt.s32.totalorder %s6962_s0, %s6958_s5 }
 0x1bf   : > { %s1430_s8 = sshll.u32 %s8588_s4, 4  ;;  %p6960_p12 = pnand %p6959_p11, %p6073_p3  ;;  %s7973_s8 = int_to_ptr.hbm [resolvable:$true] %s1430_s8 }
 0x1c0   : > { %p6965_p4 = por %p6964_p1, %p6963_p0 }
 0x1c1   : > { %p6961_p13 = pneg %p6960_p12 }
 0x1c3   : > { %p6966_p5 = pnand %p6965_p4, %p6961_p13 }
 0x1c5   : > { %6969 = shalt.err (!%p6966_p5)
}
 0x1c6   : > { %s8589_s13 = sld [smem:[#allocation91_spill]]  ;;  %s7394_s11 = smov [#allocation30]  }
 0x1c7   : > { %5966 = dma.hbm_to_vmem [thread:$0]  (%p6073_p3), %s7962_s10, 16, %s1407_s18, [#allocation26]  }
 0x1c8   : > { %s1432_s2 = sshll.u32 %s7394_s11, 4  ;;  %s6984_s6 = sshra.s32 %s7973_s8, 4  ;;  %s1433_s2 = int_to_ptr.vmem [resolvable:$true] %s1432_s2  ;;  %s6985_s6 = int_to_ptr.hbm [resolvable:$true] %s6984_s6 }
 0x1c9   : > { %s6986_s5 = scalar_lea.hbm %s6985_s6, 1  ;;  %s6990_s0 = scalar_lea.hbm %s8588_s4, 1 }
 0x1ca   : > { %p6987_p6 = scmp.ne.s32.totalorder %s6985_s6, %s6986_s5  ;;  %p6991_p9 = scmp.lt.s32.totalorder %s6985_s6, %s8588_s4 }
 0x1cb   : > { %p6992_p10 = scmp.lt.s32.totalorder %s6990_s0, %s6986_s5 }
 0x1cc   : > { %s1456_s7 = sshll.u32 %s8589_s13, 4  ;;  %p6988_p7 = pnand %p6987_p6, %p6073_p3  ;;  %s7984_s7 = int_to_ptr.hbm [resolvable:$true] %s1456_s7 }
 0x1cd   : > { %p6993_p11 = por %p6992_p10, %p6991_p9 }
 0x1ce   : > { %p6989_p8 = pneg %p6988_p7 }
 0x1d0   : > { %p6994_p12 = pnand %p6993_p11, %p6989_p8 }
 0x1d2   : > { %6997 = shalt.err (!%p6994_p12)
}
 0x1d3   : > { %s8590_s10 = sld [smem:[#allocation94_spill]]  ;;  %s7395_s18 = smov [#allocation33]  }
 0x1d4   : > { %5970 = dma.hbm_to_vmem [thread:$0]  (%p6073_p3), %s7973_s8, 16, %s1433_s2, [#allocation29]  }
 0x1d5   : > { %s1458_s11 = sshll.u32 %s7395_s18, 4  ;;  %s7012_s6 = sshra.s32 %s7984_s7, 4  ;;  %s1459_s11 = int_to_ptr.vmem [resolvable:$true] %s1458_s11  ;;  %s7013_s6 = int_to_ptr.hbm [resolvable:$true] %s7012_s6 }
 0x1d6   : > { %s7014_s5 = scalar_lea.hbm %s7013_s6, 1  ;;  %s7018_s0 = scalar_lea.hbm %s8589_s13, 1 }
 0x1d7   : > { %p7015_p13 = scmp.ne.s32.totalorder %s7013_s6, %s7014_s5  ;;  %p7019_p4 = scmp.lt.s32.totalorder %s7013_s6, %s8589_s13 }
 0x1d8   : > { %p7020_p5 = scmp.lt.s32.totalorder %s7018_s0, %s7014_s5 }
 0x1d9   : > { %s1482_s9 = sshll.u32 %s8590_s10, 4  ;;  %p7016_p0 = pnand %p7015_p13, %p6073_p3  ;;  %s7995_s9 = int_to_ptr.hbm [resolvable:$true] %s1482_s9 }
 0x1da   : > { %p7021_p6 = por %p7020_p5, %p7019_p4 }
 0x1db   : > { %p7017_p1 = pneg %p7016_p0 }
 0x1dd   : > { %p7022_p7 = pnand %p7021_p6, %p7017_p1 }
 0x1df   : > { %7025 = shalt.err (!%p7022_p7)
}
 0x1e0   : > { %s8591_s8 = sld [smem:[#allocation96_spill]]  ;;  %s7396_s18 = smov [#allocation36]  }
 0x1e1   : > { %5974 = dma.hbm_to_vmem [thread:$0]  (%p6073_p3), %s7984_s7, 16, %s1459_s11, [#allocation32]  }
 0x1e2   : > { %s1484_s4 = sshll.u32 %s7396_s18, 4  ;;  %s7040_s6 = sshra.s32 %s7995_s9, 4  ;;  %s1485_s4 = int_to_ptr.vmem [resolvable:$true] %s1484_s4  ;;  %s7041_s6 = int_to_ptr.hbm [resolvable:$true] %s7040_s6 }
 0x1e3   : > { %s7042_s5 = scalar_lea.hbm %s7041_s6, 384  ;;  %s7046_s0 = scalar_lea.hbm %s8590_s10, 384 }
 0x1e4   : > { %p7043_p8 = scmp.ne.s32.totalorder %s7041_s6, %s7042_s5  ;;  %p7047_p11 = scmp.lt.s32.totalorder %s7041_s6, %s8590_s10 }
 0x1e5   : > { %p7048_p12 = scmp.lt.s32.totalorder %s7046_s0, %s7042_s5 }
 0x1e6   : > { %s1508_s2 = sshll.u32 %s8591_s8, 4  ;;  %p7044_p9 = pnand %p7043_p8, %p6073_p3  ;;  %s8006_s2 = int_to_ptr.hbm [resolvable:$true] %s1508_s2 }
 0x1e7   : > { %p7049_p13 = por %p7048_p12, %p7047_p11 }
 0x1e8   : > { %p7045_p10 = pneg %p7044_p9 }
 0x1ea   : > { %p7050_p0 = pnand %p7049_p13, %p7045_p10 }
 0x1ec   : > { %7053 = shalt.err (!%p7050_p0)
}
 0x1ed   : > { %s8592_s7 = sld [smem:[#allocation97_spill]]  ;;  %s7397_s11 = smov [#allocation39]  }
 0x1ee   : > { %5978 = dma.hbm_to_vmem [thread:$0]  (%p6073_p3), %s7995_s9, 6144, %s1485_s4, [#allocation35], %s8580_s22, %s8580_s22, %s8579_s3  }
 0x1ef   : > { %s1510_s18 = sshll.u32 %s7397_s11, 4  ;;  %s7068_s6 = sshra.s32 %s8006_s2, 4  ;;  %s1511_s18 = int_to_ptr.vmem [resolvable:$true] %s1510_s18  ;;  %s7069_s6 = int_to_ptr.hbm [resolvable:$true] %s7068_s6 }
 0x1f0   : > { %s7070_s5 = scalar_lea.hbm %s7069_s6, 128  ;;  %s7074_s0 = scalar_lea.hbm %s8591_s8, 128 }
 0x1f1   : > { %p7071_p1 = scmp.ne.s32.totalorder %s7069_s6, %s7070_s5  ;;  %p7075_p6 = scmp.lt.s32.totalorder %s7069_s6, %s8591_s8 }
 0x1f2   : > { %p7076_p7 = scmp.lt.s32.totalorder %s7074_s0, %s7070_s5 }
 0x1f3   : > { %s1534_s13 = sshll.u32 %s8592_s7, 4  ;;  %p7072_p4 = pnand %p7071_p1, %p6073_p3  ;;  %s8020_s13 = int_to_ptr.hbm [resolvable:$true] %s1534_s13 }
 0x1f4   : > { %p7077_p8 = por %p7076_p7, %p7075_p6 }
 0x1f5   : > { %p7073_p5 = pneg %p7072_p4 }
 0x1f7   : > { %p7078_p9 = pnand %p7077_p8, %p7073_p5 }
 0x1f9   : > { %7081 = shalt.err (!%p7078_p9)
}
 0x1fa   : > { %s8593_s9 = sld [smem:[#allocation99_spill]]  ;;  %s7398_s11 = smov [#allocation42]  }
 0x1fb   : > { %5982 = dma.hbm_to_vmem [thread:$0]  (%p6073_p3), %s8006_s2, 2048, %s1511_s18, [#allocation38], %s8580_s22, %s8580_s22, %s8579_s3  }
 0x1fc   : > { %s1536_s10 = sshll.u32 %s7398_s11, 4  ;;  %s7096_s6 = sshra.s32 %s8020_s13, 4  ;;  %s1537_s10 = int_to_ptr.vmem [resolvable:$true] %s1536_s10  ;;  %s7097_s6 = int_to_ptr.hbm [resolvable:$true] %s7096_s6 }
 0x1fd   : > { %s7098_s5 = scalar_lea.hbm %s7097_s6, 384  ;;  %s7102_s0 = scalar_lea.hbm %s8592_s7, 384 }
 0x1fe   : > { %p7099_p10 = scmp.ne.s32.totalorder %s7097_s6, %s7098_s5  ;;  %p7103_p13 = scmp.lt.s32.totalorder %s7097_s6, %s8592_s7 }
 0x1ff   : > { %p7104_p0 = scmp.lt.s32.totalorder %s7102_s0, %s7098_s5 }
 0x200   : > { %s1560_s4 = sshll.u32 %s8593_s9, 4  ;;  %p7100_p11 = pnand %p7099_p10, %p6073_p3  ;;  %s8034_s4 = int_to_ptr.hbm [resolvable:$true] %s1560_s4 }
 0x201   : > { %p7105_p1 = por %p7104_p0, %p7103_p13 }
 0x202   : > { %p7101_p12 = pneg %p7100_p11 }
 0x204   : > { %p7106_p4 = pnand %p7105_p1, %p7101_p12 }
 0x206   : > { %7109 = shalt.err (!%p7106_p4)
}
 0x207   : > { %s8594_s2 = sld [smem:[#allocation103_spill]]  ;;  %s7399_s18 = smov [#allocation45]  }
 0x208   : > { %5986 = dma.hbm_to_vmem [thread:$0]  (%p6073_p3), %s8020_s13, 6144, %s1537_s10, [#allocation41], %s8580_s22, %s8580_s22, %s8579_s3  }
 0x209   : > { %s1562_s11 = sshll.u32 %s7399_s18, 4  ;;  %s7124_s6 = sshra.s32 %s8034_s4, 4  ;;  %s1563_s11 = int_to_ptr.vmem [resolvable:$true] %s1562_s11  ;;  %s7125_s6 = int_to_ptr.hbm [resolvable:$true] %s7124_s6 }
 0x20a   : > { %s7126_s5 = scalar_lea.hbm %s7125_s6, 256  ;;  %s7130_s0 = scalar_lea.hbm %s8593_s9, 256 }
 0x20b   : > { %p7127_p5 = scmp.ne.s32.totalorder %s7125_s6, %s7126_s5  ;;  %p7131_p8 = scmp.lt.s32.totalorder %s7125_s6, %s8593_s9 }
 0x20c   : > { %p7132_p9 = scmp.lt.s32.totalorder %s7130_s0, %s7126_s5 }
 0x20d   : > { %s1594_s8 = sshll.u32 %s8594_s2, 4  ;;  %p7128_p6 = pnand %p7127_p5, %p6073_p3  ;;  %s8048_s8 = int_to_ptr.hbm [resolvable:$true] %s1594_s8 }
 0x20e   : > { %p7133_p10 = por %p7132_p9, %p7131_p8 }
 0x20f   : > { %p7129_p7 = pneg %p7128_p6 }
 0x211   : > { %p7134_p11 = pnand %p7133_p10, %p7129_p7 }
 0x213   : > { %7137 = shalt.err (!%p7134_p11)
}
 0x214   : > { %s8595_s3 = smov 16   ;;  %s8596_s22 = smov 256  }
 0x215   : > { %s8597_s13 = sld [smem:[#allocation107_spill]]  ;;  %s7400_s18 = smov [#allocation48]  }
 0x216   : > { %5990 = dma.hbm_to_vmem [thread:$0]  (%p6073_p3), %s8034_s4, 4096, %s1563_s11, [#allocation44], %s8596_s22, %s8596_s22, %s8595_s3  }
 0x217   : > { %s1596_s7 = sshll.u32 %s7400_s18, 4  ;;  %s7152_s6 = sshra.s32 %s8048_s8, 4  ;;  %s1597_s7 = int_to_ptr.vmem [resolvable:$true] %s1596_s7  ;;  %s7153_s6 = int_to_ptr.hbm [resolvable:$true] %s7152_s6 }
 0x218   : > { %s7154_s5 = scalar_lea.hbm %s7153_s6, 256  ;;  %s7158_s0 = scalar_lea.hbm %s8594_s2, 256 }
 0x219   : > { %p7155_p12 = scmp.ne.s32.totalorder %s7153_s6, %s7154_s5  ;;  %p7159_p1 = scmp.lt.s32.totalorder %s7153_s6, %s8594_s2 }
 0x21a   : > { %p7160_p4 = scmp.lt.s32.totalorder %s7158_s0, %s7154_s5 }
 0x21b   : > { %s1628_s10 = sshll.u32 %s8597_s13, 4  ;;  %p7156_p13 = pnand %p7155_p12, %p6073_p3  ;;  %s8062_s10 = int_to_ptr.hbm [resolvable:$true] %s1628_s10 }
 0x21c   : > { %p7161_p5 = por %p7160_p4, %p7159_p1 }
 0x21d   : > { %p7157_p0 = pneg %p7156_p13 }
 0x21f   : > { %p7162_p6 = pnand %p7161_p5, %p7157_p0 }
 0x221   : > { %7165 = shalt.err (!%p7162_p6)
}
 0x222   : > { %5994 = dma.hbm_to_vmem [thread:$0]  (%p6073_p3), %s8048_s8, 4096, %s1597_s7, [#allocation47], %s8596_s22, %s8596_s22, %s8595_s3  }
 0x223   : > { %s7401_s4 = smov [#allocation51]   ;;  %s1662_s18 = sshll.u32 %s7637_s12, 4  ;;  %s1663_s18 = int_to_ptr.hbm [resolvable:$true] %s1662_s18 }
 0x224   : > { %s1630_s11 = sshll.u32 %s7401_s4, 4  ;;  %s7180_s6 = sshra.s32 %s8062_s10, 4  ;;  %s1631_s11 = int_to_ptr.vmem [resolvable:$true] %s1630_s11  ;;  %s7181_s6 = int_to_ptr.hbm [resolvable:$true] %s7180_s6 }
 0x225   : > { %s7182_s5 = scalar_lea.hbm %s7181_s6, 1536  ;;  %s7186_s0 = scalar_lea.hbm %s8597_s13, 1536 }
 0x226   : > { %p7183_p7 = scmp.ne.s32.totalorder %s7181_s6, %s7182_s5  ;;  %p7187_p10 = scmp.lt.s32.totalorder %s7181_s6, %s8597_s13 }
 0x227   : > { %p7188_p11 = scmp.lt.s32.totalorder %s7186_s0, %s7182_s5 }
 0x228   : > { %p7184_p8 = pnand %p7183_p7, %p6073_p3 }
 0x229   : > { %p7189_p12 = por %p7188_p11, %p7187_p10 }
 0x22a   : > { %p7185_p9 = pneg %p7184_p8 }
 0x22c   : > { %p7190_p13 = pnand %p7189_p12, %p7185_p9 }
 0x22e   : > { %7193 = shalt.err (!%p7190_p13)
}
 0x22f   : > { %5998 = dma.hbm_to_vmem [thread:$0]  (%p6073_p3), %s8062_s10, 24576, %s1631_s11, [#allocation50], %s8596_s22, %s8596_s22, %s8595_s3  }
 0x230   : > { %s7402_s8 = smov [#allocation54]   ;;  %s7208_s4 = sshra.s32 %s1663_s18, 4  ;;  %s7209_s4 = int_to_ptr.hbm [resolvable:$true] %s7208_s4 }
 0x231   : > { %s1664_s7 = sshll.u32 %s7402_s8, 4  ;;  %s7210_s6 = scalar_lea.hbm %s7209_s4, 1536  ;;  %s1665_s7 = int_to_ptr.vmem [resolvable:$true] %s1664_s7 }
 0x232   : > { %p7211_p0 = scmp.ne.s32.totalorder %s7209_s4, %s7210_s6  ;;  %s7214_s5 = scalar_lea.hbm %s7637_s12, 1536 }
 0x233   : > { %p7215_p5 = scmp.lt.s32.totalorder %s7209_s4, %s7637_s12  ;;  %p7216_p6 = scmp.lt.s32.totalorder %s7214_s5, %s7210_s6 }
 0x234   : > { %p7212_p1 = pnand %p7211_p0, %p6073_p3 }
 0x235   : > { %p7217_p7 = por %p7216_p6, %p7215_p5 }
 0x236   : > { %p7213_p4 = pneg %p7212_p1 }
 0x238   : > { %p7218_p8 = pnand %p7217_p7, %p7213_p4 }
 0x23a   : > { %7221 = shalt.err (!%p7218_p8)
}
 0x23b   : > { %6002 = dma.hbm_to_vmem [thread:$0]  (%p6073_p3), %s1663_s18, 24576, %s1665_s7, [#allocation53], %s8596_s22, %s8596_s22, %s8595_s3  }
 0x23c PF: > { %1691 = sbr.rel (%p7664_p2) target bundleno = 3862 (0xf16), region = 208  ;;  %p6108_p9 = scmp.eq.s32.totalorder (!%p7664_p2), %s7660_s28, 0 }
 0x241   : > { %7241 = dma.done.wait (%p6108_p9), [#allocation3], 384  }
 0x242   : > { %7243 = vsyncadd (%p6108_p9), [#allocation3], 4294966912 }
 0x243   : > { %7245 = dma.done.wait (%p6108_p9), [#allocation5], 3088  }
 0x244   : > { %7247 = vsyncadd (%p6108_p9), [#allocation5], 4294964208 }
 0x245   : > { %7249 = dma.done.wait (%p6108_p9), [#allocation8], 32  }
 0x246   : > { %7251 = vsyncadd (%p6108_p9), [#allocation8], 4294967264 }
 0x247   : > { %7253 = dma.done.wait (%p6108_p9), [#allocation11], 3088  }
 0x248   : > { %7255 = vsyncadd (%p6108_p9), [#allocation11], 4294964208 }
 0x249   : > { %7257 = dma.done.wait (%p6108_p9), [#allocation14], 1040  }
 0x24a   : > { %7259 = vsyncadd (%p6108_p9), [#allocation14], 4294966256 }
 0x24b   : > { %7261 = dma.done.wait (%p6108_p9), [#allocation17], 3088  }
 0x24c   : > { %7263 = vsyncadd (%p6108_p9), [#allocation17], 4294964208 }
 0x24d   : > { %7265 = dma.done.wait (%p6108_p9), [#allocation20], 1040  }
 0x24e   : > { %7267 = vsyncadd (%p6108_p9), [#allocation20], 4294966256 }
 0x24f   : > { %7269 = dma.done.wait (%p6108_p9), [#allocation23], 3088  }
 0x250   : > { %7271 = vsyncadd (%p6108_p9), [#allocation23], 4294964208 }
 0x251   : > { %7273 = dma.done.wait (%p6108_p9), [#allocation26], 1040  }
 0x252   : > { %7275 = vsyncadd (%p6108_p9), [#allocation26], 4294966256 }
 0x253   : > { %7277 = dma.done.wait (%p6108_p9), [#allocation29], 6160  }
 0x254   : > { %7279 = vsyncadd (%p6108_p9), [#allocation29], 4294961136 }
 0x255   : > { %7281 = dma.done.wait (%p6108_p9), [#allocation32], 1040  }
 0x256   : > { %7283 = vsyncadd (%p6108_p9), [#allocation32], 4294966256 }
 0x257   : > { %7285 = dma.done.wait (%p6108_p9), [#allocation35], 6160  }
 0x258   : > { %7287 = vsyncadd (%p6108_p9), [#allocation35], 4294961136 }
 0x259   : > { %7289 = dma.done.wait (%p6108_p9), [#allocation38], 2064  }
 0x25a   : > { %7291 = vsyncadd (%p6108_p9), [#allocation38], 4294965232 }
 0x25b   : > { %7293 = dma.done.wait (%p6108_p9), [#allocation41], 6160  }
 0x25c   : > { %7295 = vsyncadd (%p6108_p9), [#allocation41], 4294961136 }
 0x25d   : > { %7297 = dma.done.wait (%p6108_p9), [#allocation44], 4112  }
 0x25e   : > { %7299 = vsyncadd (%p6108_p9), [#allocation44], 4294963184 }
 0x25f   : > { %7301 = dma.done.wait (%p6108_p9), [#allocation47], 28672  }
 0x260   : > { %7303 = vsyncadd (%p6108_p9), [#allocation47], 4294938624 }
 0x261   : > { %7305 = dma.done.wait (%p6108_p9), [#allocation50], 32768  }
 0x262   : > { %7307 = vsyncadd (%p6108_p9), [#allocation50], 4294934528 }
 0x263   : > { %7309 = dma.done.wait (%p6108_p9), [#allocation53], 32768  }
 0x264   : > { %7311 = vsyncadd (%p6108_p9), [#allocation53], 4294934528  ;;  %s8598_s1 = sld [smem:[#allocation73_spill]]  ;;  %p1980_p2 = scmp.lt.s32.totalorder %s7660_s28, 1  ;;  %v2010_v0 = vld [vmem:[#allocation2 + $0x10] sm:$0xff]  ;;  %v2009_v1 = vld [vmem:[#allocation2 + $0x8] sm:$0xff] }
 0x265   : > { %s8599_s3 = sld [smem:[#allocation74_spill]]  ;;  %2035 = vmatpush.msra.mxu0 %v2010_v0  ;;  %v2008_v4 = vld [vmem:[#allocation2] sm:$0xff]  ;;  %v2064_v7 = vld [vmem:[#allocation6 + $0x38] sm:$0xff]  ;;  %v2063_v8 = vld [vmem:[#allocation6 + $0x30] sm:$0xff]  ;;  %vm2015_vm0 = vcmask 195584   ;;  %vm2049_vm1 = vcmask 1040384  }
 0x266   : > { %s8600_s22 = sld [smem:[#allocation75_spill]]  ;;  %s8614_s28 = smov (!%p1980_p2, %s7660_s28), 1  ;;  %2122 = vmatpush.msra.mxu2 %v2064_v7  ;;  %v2062_v10 = vld [vmem:[#allocation6 + $0x28] sm:$0xff]  ;;  %v2061_v12 = vld [vmem:[#allocation6 + $0x20] sm:$0xff]  ;;  %v2060_v15 = vld [vmem:[#allocation6 + $0x18] sm:$0xff]  ;;  %vm2082_vm2 = vcmask 523264  }
 0x267   : > { %s5931_s10 = sshll.u32 %s8614_s28, 4  ;;  %2036 = vmatpush.msra.mxu0 %v2009_v1  ;;  %v2059_v16 = vld [vmem:[#allocation6 + $0x10] sm:$0xff]  ;;  %v2073_v17 = vld [vmem:[#allocation6 + $0x78] sm:$0xff]  ;;  %v2058_v19 = vld [vmem:[#allocation6 + $0x8] sm:$0xff]  ;;  %vm2076_vm3 = vcmask 1046528   ;;  %vm2146_vm4 = vcmask 1045504  }
 0x268   : > { %2123 = vmatpush.msra.mxu2 %v2063_v8  ;;  %v2145_v18 = vld [vmem:[#allocation6 + $0xb8] sm:$0xff]  ;;  %2095 = vmatpush.msra.mxu1 %v2073_v17  ;;  %v2072_v20 = vld [vmem:[#allocation6 + $0x70] sm:$0xff]  ;;  %v2057_v22 = vld [vmem:[#allocation6] sm:$0xff]  ;;  %s8601_s18 = sld [smem:[#allocation78_spill]]  ;;  %vm2789_vm6 = vcmask 130048   ;;  %s5863_s7 = sshll.u32 %s8614_s28, 3 }
 0x269   : > { %2037 = vmatpush.msra.mxu0 %v2008_v4  ;;  %2164 = vmatpush.msra.mxu3 %v2145_v18  ;;  %v2144_v21 = vld [vmem:[#allocation6 + $0xb0] sm:$0xff]  ;;  %v2071_v23 = vld [vmem:[#allocation6 + $0x68] sm:$0xff]  ;;  %v2070_v25 = vld [vmem:[#allocation6 + $0x60] sm:$0xff]  ;;  %s8604_s0 = sld [smem:[#allocation92_spill]]  ;;  %s1988_s4 = scalar_lea.vmem %s7647_s30, %s5863_s7  ;;  %vm3452_vm8 = vcmask 64512   ;;  %vm4229_vm9 = vcmask 1044480  }
 0x26a   : > { %s1984_s11 = scalar_lea.vmem %s8598_s1, %s5931_s10  ;;  %2124 = vmatpush.msra.mxu2 %v2062_v10  ;;  %2096 = vmatpush.msra.mxu1 %v2072_v20  ;;  %v2143_v24 = vld [vmem:[#allocation6 + $0xa8] sm:$0xff]  ;;  %v2142_v26 = vld [vmem:[#allocation6 + $0xa0] sm:$0xff]  ;;  %v2069_v27 = vld [vmem:[#allocation6 + $0x58] sm:$0xff]  ;;  %s8606_s6 = sld [smem:[#allocation100_spill]]  ;;  %vm5313_vm10 = vcmask 1043456  }
 0x26b   : > { %v1994_v2 = vld [vmem:[%s1984_s11] sm:$0xff]  ;;  %v1995_v9 = vld [vmem:[%s1984_s11 + $0x8] sm:$0xff]  ;;  %2165 = vmatpush.msra.mxu3 %v2144_v21  ;;  %v2141_v28 = vld [vmem:[#allocation6 + $0x98] sm:$0xff]  ;;  %s8607_s5 = sld [smem:[#allocation102_spill]]  ;;  %s1993_s11 = scalar_lea.vmem %s7652_s17, %s5863_s7 }
 0x26c   : > { %v6239_v3 = vld [vmem:[%s8599_s3] ss:$0 sm:$0xff]  ;;  %2125 = vmatpush.msra.mxu2 %v2061_v12  ;;  %2097 = vmatpush.msra.mxu1 %v2071_v23  ;;  %v2068_v29 = vld [vmem:[#allocation6 + $0x50] sm:$0xff]  ;;  %v2067_v31 = vld [vmem:[#allocation6 + $0x48] sm:$0xff]  ;;  %s8608_s1 = sld [smem:[#allocation104_spill]] }
 0x26d   : > { %v6240_v5 = vld [vmem:[%s8600_s22] ss:$0 sm:$0xff]  ;;  %v2000_v6 = vmul.f32 %v6239_v3, %v1994_v2  ;;  %v2001_v13 = vmul.f32 %v6239_v3, %v1995_v9  ;;  %2166 = vmatpush.msra.mxu3 %v2143_v24  ;;  %v2140_v30 = vld [vmem:[#allocation6 + $0x90] sm:$0xff]  ;;  %v2139_v32 = vld [vmem:[#allocation6 + $0x88] sm:$0xff]  ;;  %s8609_s3 = sld [smem:[#allocation106_spill]] }
 0x26e   : > { %2126 = vmatpush.msra.mxu2 %v2060_v15  ;;  %2098 = vmatpush.msra.mxu1 %v2070_v25  ;;  %v2066_v33 = vld [vmem:[#allocation6 + $0x40] sm:$0xff]  ;;  %v6241_v35 = vld [vmem:[#allocation4] ss:$0 sm:$0xff]  ;;  %v2195_v58 = vld [vmem:[%s8601_s18 + $0x30] sm:$0xff]  ;;  %s8610_s22 = sld [smem:[#allocation108_spill]] }
 0x26f   : > { %v2006_v11 = vadd.f32 %v6240_v5, %v2000_v6  ;;  %v2007_v14 = vadd.f32 %v6240_v5, %v2001_v13  ;;  %2167 = vmatpush.msra.mxu3 %v2142_v26  ;;  %v2138_v34 = vld [vmem:[#allocation6 + $0x80] sm:$0xff]  ;;  %v2194_v59 = vld [vmem:[%s8601_s18 + $0x28] sm:$0xff]  ;;  %v2191_v62 = vld [vmem:[%s8601_s18 + $0x10] sm:$0xff]  ;;  %s8605_s8 = smov %s8604_s0  ;;  %s8611_s10 = sld [smem:[#allocation110_spill]] }
 0x270   : > { %2127 = vmatpush.msra.mxu2 %v2059_v16  ;;  %2099 = vmatpush.msra.mxu1 %v2069_v27  ;;  %v2196_v57 = vld [vmem:[%s8601_s18 + $0x38] sm:$0xff]  ;;  %v2193_v60 = vld [vmem:[%s8601_s18 + $0x20] sm:$0xff]  ;;  %v2190_v63 = vld [vmem:[%s8601_s18 + $0x8] sm:$0xff] }
 0x271   : > { %5866 = vmatmul.msk.f32.vlgmr.msra.gmra.mxu0 %vm2015_vm0, %v2006_v11  ;;  %2168 = vmatpush.msra.mxu3 %v2141_v28  ;;  %v2192_v61 = vld [vmem:[%s8601_s18 + $0x18] sm:$0xff]  ;;  %v2189_v0 = vld [vmem:[%s8601_s18] sm:$0xff]  ;;  %v2247_v2 = vld [vmem:[#allocation10 + $0x30] sm:$0xff] }
 0x272   : > { %2128 = vmatpush.msra.mxu2 %v2058_v19  ;;  %2100 = vmatpush.msra.mxu1 %v2068_v29  ;;  %v2248_v1 = vld [vmem:[#allocation10 + $0x38] sm:$0xff]  ;;  %v2246_v3 = vld [vmem:[#allocation10 + $0x28] sm:$0xff]  ;;  %v2245_v4 = vld [vmem:[#allocation10 + $0x20] sm:$0xff] }
 0x273   : > { %2169 = vmatpush.msra.mxu3 %v2140_v30  ;;  %2215 = vmatpush.msrb.mxu0 %v2196_v57  ;;  %v6242_v8 = vld [vmem:[#allocation7] ss:$0 sm:$0xff]  ;;  %v2243_v21 = vld [vmem:[#allocation10 + $0x10] sm:$0xff]  ;;  %v2242_v24 = vld [vmem:[#allocation10 + $0x8] sm:$0xff] }
 0x274   : > { %2129 = vmatpush.msra.mxu2 %v2057_v22  ;;  %2101 = vmatpush.msra.mxu1 %v2067_v31  ;;  %v2244_v20 = vld [vmem:[#allocation10 + $0x18] sm:$0xff]  ;;  %v2256_v25 = vld [vmem:[#allocation10 + $0x70] sm:$0xff]  ;;  %v2241_v27 = vld [vmem:[#allocation10] sm:$0xff] }
 0x275   : > { %2170 = vmatpush.msra.mxu3 %v2139_v32  ;;  %2216 = vmatpush.msrb.mxu0 %v2195_v58  ;;  %v2257_v22 = vld [vmem:[#allocation10 + $0x78] sm:$0xff]  ;;  %v2326_v26 = vld [vmem:[#allocation10 + $0xb0] sm:$0xff]  ;;  %v2255_v28 = vld [vmem:[#allocation10 + $0x68] sm:$0xff] }
 0x276   : > { %2102 = vmatpush.msra.mxu1 %v2066_v33  ;;  %2304 = vmatpush.msrb.mxu2 %v2248_v1  ;;  %v2327_v23 = vld [vmem:[#allocation10 + $0xb8] sm:$0xff]  ;;  %v2325_v29 = vld [vmem:[#allocation10 + $0xa8] sm:$0xff]  ;;  %v2254_v30 = vld [vmem:[#allocation10 + $0x60] sm:$0xff] }
 0x277   : > { %2171 = vmatpush.msra.mxu3 %v2138_v34  ;;  %2217 = vmatpush.msrb.mxu0 %v2194_v59  ;;  %v2324_v31 = vld [vmem:[#allocation10 + $0xa0] sm:$0xff]  ;;  %v2253_v32 = vld [vmem:[#allocation10 + $0x58] sm:$0xff]  ;;  %v2252_v34 = vld [vmem:[#allocation10 + $0x50] sm:$0xff] }
 0x278   : > { %2305 = vmatpush.msrb.mxu2 %v2247_v2  ;;  %2277 = vmatpush.msrb.mxu1 %v2257_v22  ;;  %v2323_v33 = vld [vmem:[#allocation10 + $0x98] sm:$0xff]  ;;  %v2376_v1 = vld [vmem:[#allocation13 + $0x20] sm:$0xff]  ;;  %vm8282_vm7 = vmneg %vm2049_vm1 }
 0x279   : > { %5867 = vmatmul.msk.f32.gmra.mxu0 %vm2015_vm0, %v2007_v14  ;;  %2345 = vmatpush.msrb.mxu3 %v2327_v23  ;;  %v2375_v2 = vld [vmem:[#allocation13 + $0x18] sm:$0xff] }
 0x27a   : > { %2218 = vmatpush.msrb.mxu0 %v2193_v60  ;;  %2306 = vmatpush.msrb.mxu2 %v2246_v3  ;;  %v2374_v3 = vld [vmem:[#allocation13 + $0x10] sm:$0xff] }
 0x27b   : > { %2278 = vmatpush.msrb.mxu1 %v2256_v25  ;;  %2346 = vmatpush.msrb.mxu3 %v2326_v26 }
 0x27c   : > { %2219 = vmatpush.msrb.mxu0 %v2192_v61  ;;  %2307 = vmatpush.msrb.mxu2 %v2245_v4  ;;  %v2373_v4 = vld [vmem:[#allocation13 + $0x8] sm:$0xff] }
 0x27d   : > { %2279 = vmatpush.msrb.mxu1 %v2255_v28  ;;  %2347 = vmatpush.msrb.mxu3 %v2325_v29 }
 0x27e   : > { %2220 = vmatpush.msrb.mxu0 %v2191_v62  ;;  %2308 = vmatpush.msrb.mxu2 %v2244_v20  ;;  %v2379_v62 = vld [vmem:[#allocation13 + $0x38] sm:$0xff] }
 0x27f   : > { %2280 = vmatpush.msrb.mxu1 %v2254_v30  ;;  %2348 = vmatpush.msrb.mxu3 %v2324_v31  ;;  %v2427_v31 = vld [vmem:[#allocation16 + $0x18] sm:$0xff] }
 0x280   : > { %2221 = vmatpush.msrb.mxu0 %v2190_v63  ;;  %2309 = vmatpush.msrb.mxu2 %v2243_v21  ;;  %v2378_v63 = vld [vmem:[#allocation13 + $0x30] sm:$0xff] }
 0x281   : > { %2281 = vmatpush.msrb.mxu1 %v2253_v32  ;;  %2349 = vmatpush.msrb.mxu3 %v2323_v33  ;;  %v2510_v32 = vld [vmem:[#allocation16 + $0xb8] sm:$0xff]  ;;  %v2425_v33 = vld [vmem:[#allocation16 + $0x8] sm:$0xff] }
 0x282   : > { %2222 = vmatpush.msrb.mxu0 %v2189_v0  ;;  %2310 = vmatpush.msrb.mxu2 %v2242_v24  ;;  %v2377_v0 = vld [vmem:[#allocation13 + $0x28] sm:$0xff] }
 0x283   : > { %2282 = vmatpush.msrb.mxu1 %v2252_v34  ;;  %v2439_v34 = vld [vmem:[#allocation16 + $0x70] sm:$0xff] }
 0x284   : > { %2311 = vmatpush.msrb.mxu2 %v2241_v27  ;;  %2398 = vmatpush.msra.mxu0 %v2379_v62 }
 0x286   : > { %2399 = vmatpush.msra.mxu0 %v2378_v63 }
 0x288   : > { %2400 = vmatpush.msra.mxu0 %v2377_v0 }
 0x28a   : > { %2401 = vmatpush.msra.mxu0 %v2376_v1 }
 0x28c   : > { %2402 = vmatpush.msra.mxu0 %v2375_v2 }
 0x28e   : > { %2403 = vmatpush.msra.mxu0 %v2374_v3 }
 0x290   : > { %2404 = vmatpush.msra.mxu0 %v2373_v4 }
 0x2ee   : > { %v2039_v36 = vpop.f32.mrf.mxu0 }
 0x2ef   : > { %v2040_v37 = vadd.f32 %v6241_v35, %v2039_v36  ;;  %v2251_v36 = vld [vmem:[#allocation10 + $0x48] sm:$0xff] }
 0x2f0   : > { %2283 = vmatpush.msrb.mxu1 %v2251_v36  ;;  %v2508_v36 = vld [vmem:[#allocation16 + $0xa8] sm:$0xff] }
 0x2f1   : > { %v2045_v38 = vmax.f32 %v2040_v37, 0.0  ;;  %v2321_v37 = vld [vmem:[#allocation10 + $0x88] sm:$0xff] }
 0x2f3   : > { %v2050_v39 = vrot.slane %v2045_v38, 7  ;;  %v2250_v38 = vld [vmem:[#allocation10 + $0x40] sm:$0xff] }
 0x2f4   : > { %2284 = vmatpush.msrb.mxu1 %v2250_v38  ;;  %v2507_v38 = vld [vmem:[#allocation16 + $0xa0] sm:$0xff] }
 0x2f5   : > { %v2055_v40 = vsel %vm2049_vm1, 0.0, %v2050_v39 }
 0x2f6   : > { %v2042_v41 = vpop.f32.mrf.mxu0  ;;  %5870 = vmatmul.msk.f32.vlgmr.msra.gmra.mxu2 %vm2082_vm2, %v2055_v40  ;;  %v2077_v46 = vrot.slane %v2055_v40, 1  ;;  %v2147_v47 = vrot.slane %v2055_v40, 2  ;;  %v6243_v40 = vld [vmem:[#allocation9] ss:$0 sm:$0xff] }
 0x2f7   : > { %v2043_v42 = vadd.f32 %v6241_v35, %v2042_v41  ;;  %v2322_v35 = vld [vmem:[#allocation10 + $0x90] sm:$0xff] }
 0x2f8   : > { %2350 = vmatpush.msrb.mxu3 %v2322_v35  ;;  %v2509_v35 = vld [vmem:[#allocation16 + $0xb0] sm:$0xff] }
 0x2f9   : > { %v2046_v43 = vmax.f32 %v2043_v42, 0.0 }
 0x2fa   : > { %2351 = vmatpush.msrb.mxu3 %v2321_v37  ;;  %v2437_v37 = vld [vmem:[#allocation16 + $0x60] sm:$0xff] }
 0x2fb   : > { %v2051_v44 = vrot.slane %v2046_v43, 7 }
 0x2fd   : > { %v2052_v45 = vsel %vm2049_vm1, %v2050_v39, %v2051_v44  ;;  %v2056_v52 = vsel %vm2049_vm1, %v2051_v44, 0.0  ;;  %v2320_v39 = vld [vmem:[#allocation10 + $0x80] sm:$0xff] }
 0x2fe   : > { %v2078_v48 = vrot.slane %v2052_v45, 1  ;;  %5871 = vmatmul.msk.f32.gmra.mxu2 %vm2082_vm2, %v2052_v45  ;;  %v2148_v49 = vrot.slane %v2052_v45, 2  ;;  %v2080_v53 = vrot.slane %v2056_v52, 1  ;;  %v2150_v54 = vrot.slane %v2056_v52, 2  ;;  %2352 = vmatpush.msrb.mxu3 %v2320_v39  ;;  %v2436_v39 = vld [vmem:[#allocation16 + $0x58] sm:$0xff] }
 0x300   : > { %v2079_v50 = vsel %vm2076_vm3, %v2077_v46, %v2078_v48  ;;  %v2149_v51 = vsel %vm2146_vm4, %v2147_v47, %v2148_v49  ;;  %v2081_v55 = vsel %vm2076_vm3, %v2078_v48, %v2080_v53  ;;  %v2151_v56 = vsel %vm2146_vm4, %v2148_v49, %v2150_v54 }
 0x301   : > { %5868 = vmatmul.msk.f32.vlgmr.msra.gmra.mxu1 %vm2082_vm2, %v2079_v50  ;;  %5872 = vmatmul.msk.f32.vlgmr.msra.gmra.mxu3 %vm2082_vm2, %v2149_v51 }
 0x302   : > { %2528 = vmatpush.msra.mxu3 %v2510_v32 }
 0x304   : > { %2529 = vmatpush.msra.mxu3 %v2509_v35 }
 0x306   : > { %2530 = vmatpush.msra.mxu3 %v2508_v36  ;;  %v2610_v36 = vld [vmem:[#allocation22 + $0x18] sm:$0xff] }
 0x308   : > { %2531 = vmatpush.msra.mxu3 %v2507_v38  ;;  %v2693_v38 = vld [vmem:[#allocation22 + $0xb8] sm:$0xff] }
 0x309   : > { %5869 = vmatmul.msk.f32.gmra.mxu1 %vm2082_vm2, %v2081_v55  ;;  %5873 = vmatmul.msk.f32.gmra.mxu3 %vm2082_vm2, %v2151_v56 }
 0x379   : > { %v2131_v6 = vpop.f32.mrf.mxu2 }
 0x37e   : > { %v2104_v5 = vpop.f32.mrf.mxu1 }
 0x37f   : > { %v2132_v7 = vadd.f32 %v2131_v6, %v2104_v5  ;;  %v2372_v5 = vld [vmem:[#allocation13] sm:$0xff] }
 0x380   : > { %2405 = vmatpush.msra.mxu0 %v2372_v5  ;;  %v2431_v6 = vld [vmem:[#allocation16 + $0x38] sm:$0xff] }
 0x381   : > { %v2134_v14 = vpop.f32.mrf.mxu2  ;;  %2487 = vmatpush.msra.mxu2 %v2431_v6  ;;  %v2562_v5 = vld [vmem:[#allocation19 + $0x38] sm:$0xff]  ;;  %v2561_v6 = vld [vmem:[#allocation19 + $0x30] sm:$0xff] }
 0x384   : > { %v2173_v9 = vpop.f32.mrf.mxu3 }
 0x385   : > { %v2179_v10 = vadd.f32 %v2173_v9, %v2132_v7  ;;  %v2430_v7 = vld [vmem:[#allocation16 + $0x30] sm:$0xff]  ;;  %v2428_v9 = vld [vmem:[#allocation16 + $0x20] sm:$0xff] }
 0x386   : > { %v2107_v12 = vpop.f32.mrf.mxu1  ;;  %2488 = vmatpush.msra.mxu2 %v2430_v7  ;;  %v2560_v7 = vld [vmem:[#allocation19 + $0x28] sm:$0xff] }
 0x387   : > { %v8200_v11 = vadd.f32 %v6242_v8, %v2179_v10  ;;  %v2135_v15 = vadd.f32 %v2134_v14, %v2107_v12 }
 0x389   : > { %v2187_v13 = vmax.f32 %v8200_v11, 0.0  ;;  %v2426_v11 = vld [vmem:[#allocation16 + $0x10] sm:$0xff] }
 0x38b   : > { %5874 = vmatmul.msk.f32.vlgmr.msrb.gmra.mxu0 %vm2082_vm2, %v2187_v13 }
 0x38c   : > { %v2176_v16 = vpop.f32.mrf.mxu3  ;;  %2581 = vmatpush.msrb.mxu0 %v2562_v5 }
 0x38d   : > { %v2180_v17 = vadd.f32 %v2176_v16, %v2135_v15  ;;  %v6244_v15 = vld [vmem:[#allocation12] ss:$0 sm:$0xff] }
 0x38e   : > { %2582 = vmatpush.msrb.mxu0 %v2561_v6 }
 0x38f   : > { %v8206_v18 = vadd.f32 %v6242_v8, %v2180_v17  ;;  %v2429_v8 = vld [vmem:[#allocation16 + $0x28] sm:$0xff] }
 0x390   : > { %2489 = vmatpush.msra.mxu2 %v2429_v8  ;;  %2583 = vmatpush.msrb.mxu0 %v2560_v7  ;;  %v2559_v8 = vld [vmem:[#allocation19 + $0x20] sm:$0xff] }
 0x391   : > { %v2188_v19 = vmax.f32 %v8206_v18, 0.0  ;;  %v2424_v18 = vld [vmem:[#allocation16] sm:$0xff] }
 0x392   : > { %2490 = vmatpush.msra.mxu2 %v2428_v9  ;;  %2584 = vmatpush.msrb.mxu0 %v2559_v8  ;;  %v2558_v9 = vld [vmem:[#allocation19 + $0x18] sm:$0xff] }
 0x393   : > { %5875 = vmatmul.msk.f32.gmra.mxu0 %vm2082_vm2, %v2188_v19 }
 0x394   : > { %2491 = vmatpush.msra.mxu2 %v2427_v31  ;;  %2585 = vmatpush.msrb.mxu0 %v2558_v9 }
 0x396   : > { %2492 = vmatpush.msra.mxu2 %v2426_v11 }
 0x398   : > { %2493 = vmatpush.msra.mxu2 %v2425_v33 }
 0x39a   : > { %2494 = vmatpush.msra.mxu2 %v2424_v18 }
 0x408   : > { %v2224_v41 = vpop.f32.mrf.mxu0 }
 0x409   : > { %v2225_v42 = vadd.f32 %v6243_v40, %v2224_v41  ;;  %v2435_v41 = vld [vmem:[#allocation16 + $0x50] sm:$0xff] }
 0x40b   : > { %v2230_v43 = vmax.f32 %v2225_v42, 0.0  ;;  %v2505_v42 = vld [vmem:[#allocation16 + $0x90] sm:$0xff] }
 0x40d   : > { %v2234_v44 = vrot.slane %v2230_v43, 7  ;;  %v2434_v43 = vld [vmem:[#allocation16 + $0x48] sm:$0xff] }
 0x40f   : > { %v2239_v45 = vsel %vm2049_vm1, 0.0, %v2234_v44 }
 0x410   : > { %v2227_v46 = vpop.f32.mrf.mxu0  ;;  %5878 = vmatmul.msk.f32.vlgmr.msrb.gmra.mxu2 %vm2082_vm2, %v2239_v45  ;;  %v2260_v51 = vrot.slane %v2239_v45, 1  ;;  %v2328_v52 = vrot.slane %v2239_v45, 2  ;;  %v2433_v45 = vld [vmem:[#allocation16 + $0x40] sm:$0xff] }
 0x411   : > { %v2228_v47 = vadd.f32 %v6243_v40, %v2227_v46  ;;  %v2506_v40 = vld [vmem:[#allocation16 + $0x98] sm:$0xff]  ;;  %v2503_v46 = vld [vmem:[#allocation16 + $0x80] sm:$0xff] }
 0x412   : > { %2532 = vmatpush.msra.mxu3 %v2506_v40  ;;  %v2622_v40 = vld [vmem:[#allocation22 + $0x70] sm:$0xff] }
 0x413   : > { %v2231_v48 = vmax.f32 %v2228_v47, 0.0  ;;  %v6245_v47 = vld [vmem:[#allocation15] ss:$0 sm:$0xff] }
 0x414   : > { %2533 = vmatpush.msra.mxu3 %v2505_v42  ;;  %v2607_v42 = vld [vmem:[#allocation22] sm:$0xff] }
 0x415   : > { %v2235_v49 = vrot.slane %v2231_v48, 7 }
 0x417   : > { %v2236_v50 = vsel %vm2049_vm1, %v2234_v44, %v2235_v49  ;;  %v2240_v57 = vsel %vm2049_vm1, %v2235_v49, 0.0  ;;  %v2504_v44 = vld [vmem:[#allocation16 + $0x88] sm:$0xff] }
 0x418   : > { %v2261_v53 = vrot.slane %v2236_v50, 1  ;;  %5879 = vmatmul.msk.f32.gmra.mxu2 %vm2082_vm2, %v2236_v50  ;;  %v2329_v54 = vrot.slane %v2236_v50, 2  ;;  %v2263_v58 = vrot.slane %v2240_v57, 1  ;;  %v2331_v59 = vrot.slane %v2240_v57, 2  ;;  %2534 = vmatpush.msra.mxu3 %v2504_v44  ;;  %v2620_v44 = vld [vmem:[#allocation22 + $0x60] sm:$0xff] }
 0x41a   : > { %v2262_v55 = vsel %vm2076_vm3, %v2260_v51, %v2261_v53  ;;  %v2330_v56 = vsel %vm2146_vm4, %v2328_v52, %v2329_v54  ;;  %v2264_v60 = vsel %vm2076_vm3, %v2261_v53, %v2263_v58  ;;  %v2332_v61 = vsel %vm2146_vm4, %v2329_v54, %v2331_v59  ;;  %2535 = vmatpush.msra.mxu3 %v2503_v46  ;;  %v2619_v46 = vld [vmem:[#allocation22 + $0x58] sm:$0xff] }
 0x41b   : > { %5876 = vmatmul.msk.f32.vlgmr.msrb.gmra.mxu1 %vm2082_vm2, %v2262_v55  ;;  %5880 = vmatmul.msk.f32.vlgmr.msrb.gmra.mxu3 %vm2082_vm2, %v2330_v56 }
 0x41c   : > { %2711 = vmatpush.msrb.mxu3 %v2693_v38 }
 0x423   : > { %5877 = vmatmul.msk.f32.gmra.mxu1 %vm2082_vm2, %v2264_v60  ;;  %5881 = vmatmul.msk.f32.gmra.mxu3 %vm2082_vm2, %v2332_v61 }
 0x493   : > { %v2313_v12 = vpop.f32.mrf.mxu2 }
 0x498   : > { %v2286_v10 = vpop.f32.mrf.mxu1 }
 0x499   : > { %v2314_v14 = vadd.f32 %v2313_v12, %v2286_v10  ;;  %v2557_v10 = vld [vmem:[#allocation19 + $0x10] sm:$0xff]  ;;  %v2556_v12 = vld [vmem:[#allocation19 + $0x8] sm:$0xff] }
 0x49a   : > { %2586 = vmatpush.msrb.mxu0 %v2557_v10 }
 0x49b   : > { %v2316_v23 = vpop.f32.mrf.mxu2 }
 0x49c   : > { %2587 = vmatpush.msrb.mxu0 %v2556_v12 }
 0x49e   : > { %v2354_v16 = vpop.f32.mrf.mxu3 }
 0x49f   : > { %v2360_v17 = vadd.f32 %v2354_v16, %v2314_v14  ;;  %v2555_v14 = vld [vmem:[#allocation19] sm:$0xff]  ;;  %v2613_v16 = vld [vmem:[#allocation22 + $0x30] sm:$0xff] }
 0x4a0   : > { %v2289_v21 = vpop.f32.mrf.mxu1  ;;  %2588 = vmatpush.msrb.mxu0 %v2555_v14  ;;  %v2745_v14 = vld [vmem:[#allocation25 + $0x38] sm:$0xff] }
 0x4a1   : > { %v2366_v20 = vadd.f32 %v6244_v15, %v2360_v17  ;;  %v2317_v25 = vadd.f32 %v2316_v23, %v2289_v21  ;;  %v2612_v17 = vld [vmem:[#allocation22 + $0x28] sm:$0xff] }
 0x4a3   : > { %v2368_v22 = vmax.f32 %v2366_v20, 0.0  ;;  %v2611_v20 = vld [vmem:[#allocation22 + $0x20] sm:$0xff] }
 0x4a5   : > { %v8227_v24 = vadd.f32 %v2368_v22, %v2187_v13  ;;  %v2440_v13 = vld [vmem:[#allocation16 + $0x78] sm:$0xff] }
 0x4a6   : > { %v2357_v26 = vpop.f32.mrf.mxu3  ;;  %2460 = vmatpush.msra.mxu1 %v2440_v13 }
 0x4a7   : > { %v2361_v27 = vadd.f32 %v2357_v26, %v2317_v25  ;;  %5882 = vmatmul.msk.f32.vlgmr.msra.gmra.mxu0 %vm2082_vm2, %v8227_v24  ;;  %v6246_v25 = vld [vmem:[#allocation18] ss:$0 sm:$0xff] }
 0x4a8   : > { %2461 = vmatpush.msra.mxu1 %v2439_v34  ;;  %2764 = vmatpush.msra.mxu0 %v2745_v14  ;;  %v2952_v14 = vld [vmem:[#allocation28 + $0x128] sm:$0xff] }
 0x4a9   : > { %v2367_v28 = vadd.f32 %v6244_v15, %v2361_v27  ;;  %v2614_v15 = vld [vmem:[#allocation22 + $0x38] sm:$0xff] }
 0x4aa   : > { %2670 = vmatpush.msrb.mxu2 %v2614_v15  ;;  %v2744_v15 = vld [vmem:[#allocation25 + $0x30] sm:$0xff] }
 0x4ab   : > { %v2369_v29 = vmax.f32 %v2367_v28, 0.0  ;;  %2765 = vmatpush.msra.mxu0 %v2744_v15 }
 0x4ac   : > { %2671 = vmatpush.msrb.mxu2 %v2613_v16  ;;  %v2743_v16 = vld [vmem:[#allocation25 + $0x28] sm:$0xff] }
 0x4ad   : > { %v8233_v30 = vadd.f32 %v2369_v29, %v2188_v19  ;;  %v2438_v19 = vld [vmem:[#allocation16 + $0x68] sm:$0xff]  ;;  %2766 = vmatpush.msra.mxu0 %v2743_v16 }
 0x4ae   : > { %2462 = vmatpush.msra.mxu1 %v2438_v19  ;;  %2672 = vmatpush.msrb.mxu2 %v2612_v17  ;;  %v2742_v17 = vld [vmem:[#allocation25 + $0x20] sm:$0xff] }
 0x4af   : > { %5883 = vmatmul.msk.f32.gmra.mxu0 %vm2082_vm2, %v8233_v30 }
 0x4b0   : > { %2463 = vmatpush.msra.mxu1 %v2437_v37  ;;  %2673 = vmatpush.msrb.mxu2 %v2611_v20  ;;  %v2609_v37 = vld [vmem:[#allocation22 + $0x10] sm:$0xff]  ;;  %v2741_v20 = vld [vmem:[#allocation25 + $0x18] sm:$0xff] }
 0x4b1   : > { %2767 = vmatpush.msra.mxu0 %v2742_v17  ;;  %v2879_v17 = vld [vmem:[#allocation28 + $0xa0] sm:$0xff] }
 0x4b2   : > { %2464 = vmatpush.msra.mxu1 %v2436_v39  ;;  %2674 = vmatpush.msrb.mxu2 %v2610_v36  ;;  %v2608_v39 = vld [vmem:[#allocation22 + $0x8] sm:$0xff] }
 0x4b3   : > { %2768 = vmatpush.msra.mxu0 %v2741_v20  ;;  %v2951_v20 = vld [vmem:[#allocation28 + $0x120] sm:$0xff] }
 0x4b4   : > { %2465 = vmatpush.msra.mxu1 %v2435_v41  ;;  %2675 = vmatpush.msrb.mxu2 %v2609_v37  ;;  %v2692_v41 = vld [vmem:[#allocation22 + $0xb0] sm:$0xff] }
 0x4b5   : > { %2712 = vmatpush.msrb.mxu3 %v2692_v41  ;;  %v2867_v37 = vld [vmem:[#allocation28 + $0x48] sm:$0xff] }
 0x4b6   : > { %2466 = vmatpush.msra.mxu1 %v2434_v43  ;;  %2676 = vmatpush.msrb.mxu2 %v2608_v39  ;;  %v2691_v43 = vld [vmem:[#allocation22 + $0xa8] sm:$0xff]  ;;  %v6248_v39 = vld [vmem:[#allocation24] ss:$0 sm:$0xff] }
 0x4b7   : > { %2713 = vmatpush.msrb.mxu3 %v2691_v43 }
 0x4b8   : > { %2467 = vmatpush.msra.mxu1 %v2433_v45  ;;  %2677 = vmatpush.msrb.mxu2 %v2607_v42  ;;  %v2690_v45 = vld [vmem:[#allocation22 + $0xa0] sm:$0xff] }
 0x4b9   : > { %2714 = vmatpush.msrb.mxu3 %v2690_v45 }
 0x524   : > { %v2407_v48 = vpop.f32.mrf.mxu0 }
 0x525   : > { %v2408_v49 = vadd.f32 %v6245_v47, %v2407_v48  ;;  %v2618_v48 = vld [vmem:[#allocation22 + $0x50] sm:$0xff] }
 0x527   : > { %v2413_v50 = vmax.f32 %v2408_v49, 0.0  ;;  %v2688_v49 = vld [vmem:[#allocation22 + $0x90] sm:$0xff] }
 0x529   : > { %v2417_v51 = vrot.slane %v2413_v50, 7  ;;  %v2617_v50 = vld [vmem:[#allocation22 + $0x48] sm:$0xff] }
 0x52b   : > { %v2422_v52 = vsel %vm2049_vm1, 0.0, %v2417_v51 }
 0x52c   : > { %v2410_v53 = vpop.f32.mrf.mxu0  ;;  %5886 = vmatmul.msk.f32.vlgmr.msra.gmra.mxu2 %vm2082_vm2, %v2422_v52  ;;  %v2443_v58 = vrot.slane %v2422_v52, 1  ;;  %v2511_v59 = vrot.slane %v2422_v52, 2  ;;  %v2616_v52 = vld [vmem:[#allocation22 + $0x40] sm:$0xff] }
 0x52d   : > { %v2411_v54 = vadd.f32 %v6245_v47, %v2410_v53  ;;  %v2689_v47 = vld [vmem:[#allocation22 + $0x98] sm:$0xff]  ;;  %v2686_v53 = vld [vmem:[#allocation22 + $0x80] sm:$0xff] }
 0x52e   : > { %2715 = vmatpush.msrb.mxu3 %v2689_v47  ;;  %v2863_v47 = vld [vmem:[#allocation28 + $0x28] sm:$0xff] }
 0x52f   : > { %v2414_v55 = vmax.f32 %v2411_v54, 0.0  ;;  %v6247_v54 = vld [vmem:[#allocation21] ss:$0 sm:$0xff] }
 0x530   : > { %2716 = vmatpush.msrb.mxu3 %v2688_v49 }
 0x531   : > { %v2418_v56 = vrot.slane %v2414_v55, 7 }
 0x533   : > { %v2419_v57 = vsel %vm2049_vm1, %v2417_v51, %v2418_v56  ;;  %v2423_v0 = vsel %vm2049_vm1, %v2418_v56, 0.0  ;;  %v2687_v51 = vld [vmem:[#allocation22 + $0x88] sm:$0xff] }
 0x534   : > { %v2444_v60 = vrot.slane %v2419_v57, 1  ;;  %5887 = vmatmul.msk.f32.gmra.mxu2 %vm2082_vm2, %v2419_v57  ;;  %v2512_v61 = vrot.slane %v2419_v57, 2  ;;  %v2446_v1 = vrot.slane %v2423_v0, 1  ;;  %v2514_v2 = vrot.slane %v2423_v0, 2  ;;  %2717 = vmatpush.msrb.mxu3 %v2687_v51  ;;  %v2862_v51 = vld [vmem:[#allocation28 + $0x20] sm:$0xff] }
 0x536   : > { %v2445_v62 = vsel %vm2076_vm3, %v2443_v58, %v2444_v60  ;;  %v2513_v63 = vsel %vm2146_vm4, %v2511_v59, %v2512_v61  ;;  %v2447_v3 = vsel %vm2076_vm3, %v2444_v60, %v2446_v1  ;;  %v2515_v4 = vsel %vm2146_vm4, %v2512_v61, %v2514_v2  ;;  %2718 = vmatpush.msrb.mxu3 %v2686_v53 }
 0x537   : > { %5884 = vmatmul.msk.f32.vlgmr.msra.gmra.mxu1 %vm2082_vm2, %v2445_v62  ;;  %5888 = vmatmul.msk.f32.vlgmr.msra.gmra.mxu3 %vm2082_vm2, %v2513_v63 }
 0x53f   : > { %5885 = vmatmul.msk.f32.gmra.mxu1 %vm2082_vm2, %v2447_v3  ;;  %5889 = vmatmul.msk.f32.gmra.mxu3 %vm2082_vm2, %v2515_v4 }
 0x5af   : > { %v2496_v22 = vpop.f32.mrf.mxu2 }
 0x5b4   : > { %v2469_v21 = vpop.f32.mrf.mxu1 }
 0x5b5   : > { %v2497_v23 = vadd.f32 %v2496_v22, %v2469_v21  ;;  %v2740_v21 = vld [vmem:[#allocation25 + $0x10] sm:$0xff]  ;;  %v2739_v22 = vld [vmem:[#allocation25 + $0x8] sm:$0xff] }
 0x5b6   : > { %2769 = vmatpush.msra.mxu0 %v2740_v21  ;;  %v7403_v21 = vmov 0.0  }
 0x5b7   : > { %v2499_v11 = vpop.f32.mrf.mxu2 }
 0x5b8   : > { %2770 = vmatpush.msra.mxu0 %v2739_v22 }
 0x5ba   : > { %v2537_v26 = vpop.f32.mrf.mxu3 }
 0x5bb   : > { %v2543_v27 = vadd.f32 %v2537_v26, %v2497_v23  ;;  %v2738_v23 = vld [vmem:[#allocation25] sm:$0xff]  ;;  %v2872_v26 = vld [vmem:[#allocation28 + $0x70] sm:$0xff] }
 0x5bc   : > { %v2472_v29 = vpop.f32.mrf.mxu1  ;;  %2771 = vmatpush.msra.mxu0 %v2738_v23  ;;  %v2878_v23 = vld [vmem:[#allocation28 + $0x98] sm:$0xff] }
 0x5bd   : > { %v2549_v28 = vadd.f32 %v6246_v25, %v2543_v27  ;;  %v2500_v32 = vadd.f32 %v2499_v11, %v2472_v29  ;;  %v2871_v27 = vld [vmem:[#allocation28 + $0x68] sm:$0xff]  ;;  %v2889_v29 = vld [vmem:[#allocation28 + $0xf0] sm:$0xff] }
 0x5be   : > { %v2888_v11 = vld [vmem:[#allocation28 + $0xe8] sm:$0xff] }
 0x5bf   : > { %v2551_v31 = vmax.f32 %v2549_v28, 0.0  ;;  %v2890_v28 = vld [vmem:[#allocation28 + $0xf8] sm:$0xff] }
 0x5c0   : > { %2900 = vmatpush.msra.mxu3 %v2890_v28  ;;  %v2876_v28 = vld [vmem:[#allocation28 + $0x88] sm:$0xff] }
 0x5c1   : > { %v8251_v13 = vadd.f32 %v2551_v31, %v8227_v24  ;;  %v2623_v24 = vld [vmem:[#allocation22 + $0x78] sm:$0xff]  ;;  %v2870_v31 = vld [vmem:[#allocation28 + $0x60] sm:$0xff] }
 0x5c2   : > { %v2540_v33 = vpop.f32.mrf.mxu3  ;;  %2643 = vmatpush.msrb.mxu1 %v2623_v24  ;;  %2901 = vmatpush.msra.mxu3 %v2889_v29  ;;  %v2885_v24 = vld [vmem:[#allocation28 + $0xd0] sm:$0xff]  ;;  %v2948_v29 = vld [vmem:[#allocation28 + $0x108] sm:$0xff] }
 0x5c3   : > { %v2544_v34 = vadd.f32 %v2540_v33, %v2500_v32  ;;  %5890 = vmatmul.msk.f32.vlgmr.msrb.gmra.mxu0 %vm2082_vm2, %v8251_v13  ;;  %v2869_v32 = vld [vmem:[#allocation28 + $0x58] sm:$0xff]  ;;  %v2887_v33 = vld [vmem:[#allocation28 + $0xe0] sm:$0xff] }
 0x5c4   : > { %2644 = vmatpush.msrb.mxu1 %v2622_v40  ;;  %2902 = vmatpush.msra.mxu3 %v2888_v11  ;;  %v2866_v40 = vld [vmem:[#allocation28 + $0x40] sm:$0xff] }
 0x5c5   : > { %v2550_v35 = vadd.f32 %v6246_v25, %v2544_v34  ;;  %v2873_v25 = vld [vmem:[#allocation28 + $0x78] sm:$0xff]  ;;  %v2947_v11 = vld [vmem:[#allocation28 + $0x100] sm:$0xff] }
 0x5c6   : > { %2923 = vmatpush.msrb.mxu0 %v2873_v25  ;;  %2903 = vmatpush.msra.mxu3 %v2887_v33  ;;  %v2950_v25 = vld [vmem:[#allocation28 + $0x118] sm:$0xff] }
 0x5c7   : > { %v2552_v18 = vmax.f32 %v2550_v35, 0.0  ;;  %v2868_v35 = vld [vmem:[#allocation28 + $0x50] sm:$0xff] }
 0x5c8   : > { %2924 = vmatpush.msrb.mxu0 %v2872_v26  ;;  %v2877_v26 = vld [vmem:[#allocation28 + $0x90] sm:$0xff] }
 0x5c9   : > { %v8256_v19 = vadd.f32 %v2552_v18, %v8233_v30  ;;  %v2621_v30 = vld [vmem:[#allocation22 + $0x68] sm:$0xff]  ;;  %v2886_v18 = vld [vmem:[#allocation28 + $0xd8] sm:$0xff] }
 0x5ca   : > { %2645 = vmatpush.msrb.mxu1 %v2621_v30  ;;  %2925 = vmatpush.msrb.mxu0 %v2871_v27  ;;  %v2865_v30 = vld [vmem:[#allocation28 + $0x38] sm:$0xff]  ;;  %v2949_v27 = vld [vmem:[#allocation28 + $0x110] sm:$0xff] }
 0x5cb   : > { %5891 = vmatmul.msk.f32.gmra.mxu0 %vm2082_vm2, %v8256_v19  ;;  %2904 = vmatpush.msra.mxu3 %v2886_v18  ;;  %v2819_v33 = vld [vmem:[#allocation31 + $0x30] sm:$0xff] }
 0x5cc   : > { %2646 = vmatpush.msrb.mxu1 %v2620_v44  ;;  %2926 = vmatpush.msrb.mxu0 %v2870_v31  ;;  %v2864_v44 = vld [vmem:[#allocation28 + $0x30] sm:$0xff]  ;;  %v2875_v31 = vld [vmem:[#allocation28 + $0x80] sm:$0xff] }
 0x5cd   : > { %2905 = vmatpush.msra.mxu3 %v2885_v24 }
 0x5ce   : > { %2647 = vmatpush.msrb.mxu1 %v2619_v46  ;;  %2927 = vmatpush.msrb.mxu0 %v2869_v32  ;;  %v2820_v32 = vld [vmem:[#allocation31 + $0x38] sm:$0xff] }
 0x5cf   : > { %2836 = vmatpush.msra.mxu2 %v2820_v32  ;;  %v3085_v32 = vld [vmem:[#allocation36 + $0x78] sm:$0xff] }
 0x5d0   : > { %2648 = vmatpush.msrb.mxu1 %v2618_v48  ;;  %2928 = vmatpush.msrb.mxu0 %v2868_v35 }
 0x5d1   : > { %2837 = vmatpush.msra.mxu2 %v2819_v33  ;;  %v3084_v33 = vld [vmem:[#allocation36 + $0x70] sm:$0xff] }
 0x5d2   : > { %2649 = vmatpush.msrb.mxu1 %v2617_v50  ;;  %2929 = vmatpush.msrb.mxu0 %v2867_v37  ;;  %v3890_v37 = vld [vmem:[#allocation46 + $0x4c8] sm:$0xff] }
 0x5d4   : > { %2650 = vmatpush.msrb.mxu1 %v2616_v52  ;;  %2930 = vmatpush.msrb.mxu0 %v2866_v40 }
 0x5d6   : > { %2931 = vmatpush.msrb.mxu0 %v2865_v30 }
 0x5d8   : > { %2932 = vmatpush.msrb.mxu0 %v2864_v44 }
 0x5da   : > { %2933 = vmatpush.msrb.mxu0 %v2863_v47 }
 0x5dc   : > { %2934 = vmatpush.msrb.mxu0 %v2862_v51 }
 0x640   : > { %v2590_v55 = vpop.f32.mrf.mxu0 }
 0x641   : > { %v2591_v56 = vadd.f32 %v6247_v54, %v2590_v55 }
 0x643   : > { %v2596_v57 = vmax.f32 %v2591_v56, 0.0 }
 0x645   : > { %v2600_v58 = vrot.slane %v2596_v57, 7  ;;  %v2962_v57 = vld [vmem:[#allocation28 + $0x178] sm:$0xff] }
 0x647   : > { %v2605_v59 = vsel %vm2049_vm1, 0.0, %v2600_v58 }
 0x648   : > { %v2593_v60 = vpop.f32.mrf.mxu0  ;;  %5894 = vmatmul.msk.f32.vlgmr.msrb.gmra.mxu2 %vm2082_vm2, %v2605_v59  ;;  %v2626_v1 = vrot.slane %v2605_v59, 1  ;;  %v2694_v2 = vrot.slane %v2605_v59, 2  ;;  %v2959_v59 = vld [vmem:[#allocation28 + $0x160] sm:$0xff] }
 0x649   : > { %v2594_v61 = vadd.f32 %v6247_v54, %v2593_v60  ;;  %v2958_v60 = vld [vmem:[#allocation28 + $0x158] sm:$0xff] }
 0x64b   : > { %v2597_v62 = vmax.f32 %v2594_v61, 0.0  ;;  %v2957_v61 = vld [vmem:[#allocation28 + $0x150] sm:$0xff] }
 0x64d   : > { %v2601_v63 = vrot.slane %v2597_v62, 7  ;;  %v2884_v62 = vld [vmem:[#allocation28 + $0xc8] sm:$0xff] }
 0x64e   : > { %2906 = vmatpush.msra.mxu3 %v2884_v62 }
 0x64f   : > { %v2602_v0 = vsel %vm2049_vm1, %v2600_v58, %v2601_v63  ;;  %v2606_v7 = vsel %vm2049_vm1, %v2601_v63, 0.0  ;;  %v2961_v58 = vld [vmem:[#allocation28 + $0x170] sm:$0xff]  ;;  %v2861_v63 = vld [vmem:[#allocation28 + $0x18] sm:$0xff] }
 0x650   : > { %v2627_v3 = vrot.slane %v2602_v0, 1  ;;  %5895 = vmatmul.msk.f32.gmra.mxu2 %vm2082_vm2, %v2602_v0  ;;  %v2695_v4 = vrot.slane %v2602_v0, 2  ;;  %v2629_v8 = vrot.slane %v2606_v7, 1  ;;  %v2697_v9 = vrot.slane %v2606_v7, 2  ;;  %v2956_v0 = vld [vmem:[#allocation28 + $0x148] sm:$0xff]  ;;  %2935 = vmatpush.msrb.mxu0 %v2861_v63  ;;  %v2881_v7 = vld [vmem:[#allocation28 + $0xb0] sm:$0xff] }
 0x652   : > { %v2628_v5 = vsel %vm2076_vm3, %v2626_v1, %v2627_v3  ;;  %v2696_v6 = vsel %vm2146_vm4, %v2694_v2, %v2695_v4  ;;  %v2630_v10 = vsel %vm2076_vm3, %v2627_v3, %v2629_v8  ;;  %v2698_v12 = vsel %vm2146_vm4, %v2695_v4, %v2697_v9  ;;  %v2860_v1 = vld [vmem:[#allocation28 + $0x10] sm:$0xff]  ;;  %v2955_v2 = vld [vmem:[#allocation28 + $0x140] sm:$0xff]  ;;  %v2882_v3 = vld [vmem:[#allocation28 + $0xb8] sm:$0xff] }
 0x653   : > { %5892 = vmatmul.msk.f32.vlgmr.msrb.gmra.mxu1 %vm2082_vm2, %v2628_v5  ;;  %5896 = vmatmul.msk.f32.vlgmr.msrb.gmra.mxu3 %vm2082_vm2, %v2696_v6  ;;  %v2859_v4 = vld [vmem:[#allocation28 + $0x8] sm:$0xff]  ;;  %v2954_v5 = vld [vmem:[#allocation28 + $0x138] sm:$0xff]  ;;  %v2781_v6 = vlaneseq  ;;  %v2858_v8 = vld [vmem:[#allocation28] sm:$0xff] }
 0x654   : > { %2936 = vmatpush.msrb.mxu0 %v2860_v1  ;;  %v2953_v9 = vld [vmem:[#allocation28 + $0x130] sm:$0xff] }
 0x655   : > { %v2782_v15 = vand.u32 127, %v2781_v6 }
 0x656   : > { %2937 = vmatpush.msrb.mxu0 %v2859_v4 }
 0x658   : > { %2938 = vmatpush.msrb.mxu0 %v2858_v8 }
 0x65b   : > { %5893 = vmatmul.msk.f32.gmra.mxu1 %vm2082_vm2, %v2630_v10  ;;  %5897 = vmatmul.msk.f32.gmra.mxu3 %vm2082_vm2, %v2698_v12  ;;  %v2784_v10 = vshrl.u32 %v2781_v6, 7  ;;  %v2880_v12 = vld [vmem:[#allocation28 + $0xa8] sm:$0xff] }
 0x65d   : > { %v2785_v16 = vmul.u32 2, %v2784_v10  ;;  %v3039_v10 = vld [vmem:[%s8604_s0 + $0x78] sm:$0xff] }
 0x65f   : > { %vm2786_vm5 = vcmp.eq.s32.totalorder %v2782_v15, %v2785_v16  ;;  %v3036_v15 = vld [vmem:[%s8605_s8 + $0x60] sm:$0xff]  ;;  %v3035_v16 = vld [vmem:[%s8605_s8 + $0x58] sm:$0xff] }
 0x660   : > { %v8277_v22 = vsel %vm2786_vm5, 1.0, %v7403_v21  ;;  %v3032_v21 = vld [vmem:[%s8605_s8 + $0x40] sm:$0xff] }
 0x6cb   : > { %v2679_v36 = vpop.f32.mrf.mxu2 }
 0x6d0   : > { %v2652_v34 = vpop.f32.mrf.mxu1 }
 0x6d1   : > { %v2680_v38 = vadd.f32 %v2679_v36, %v2652_v34  ;;  %v6249_v34 = vld [vmem:[#allocation27] ss:$0 sm:$0xff] }
 0x6d3   : > { %v2682_v48 = vpop.f32.mrf.mxu2 }
 0x6d6   : > { %v2720_v41 = vpop.f32.mrf.mxu3 }
 0x6d7   : > { %v2726_v42 = vadd.f32 %v2720_v41, %v2680_v38 }
 0x6d8   : > { %v2655_v45 = vpop.f32.mrf.mxu1 }
 0x6d9   : > { %v2732_v43 = vadd.f32 %v6248_v39, %v2726_v42  ;;  %v2683_v50 = vadd.f32 %v2682_v48, %v2655_v45 }
 0x6db   : > { %v2734_v46 = vmax.f32 %v2732_v43, 0.0 }
 0x6dd   : > { %v2736_v49 = vadd.f32 %v2734_v46, %v8251_v13  ;;  %v2960_v13 = vld [vmem:[#allocation28 + $0x168] sm:$0xff] }
 0x6de   : > { %v2723_v52 = vpop.f32.mrf.mxu3 }
 0x6df   : > { %v2727_v53 = vadd.f32 %v2723_v52, %v2683_v50  ;;  %5898 = vmatmul.msk.f32.vlgmr.msra.gmra.mxu0 %vm2082_vm2, %v2736_v49 }
 0x6e0   : > { %3129 = vmatpush.msra.mxu0 %v3085_v32 }
 0x6e1   : > { %v2733_v54 = vadd.f32 %v6248_v39, %v2727_v53 }
 0x6e2   : > { %3130 = vmatpush.msra.mxu0 %v3084_v33 }
 0x6e3   : > { %v2735_v55 = vmax.f32 %v2733_v54, 0.0  ;;  %v2818_v54 = vld [vmem:[#allocation31 + $0x28] sm:$0xff] }
 0x6e4   : > { %2838 = vmatpush.msra.mxu2 %v2818_v54  ;;  %v3077_v54 = vld [vmem:[#allocation36 + $0x38] sm:$0xff] }
 0x6e5   : > { %v2737_v56 = vadd.f32 %v2735_v55, %v8256_v19  ;;  %v2883_v19 = vld [vmem:[#allocation28 + $0xc0] sm:$0xff] }
 0x6e6   : > { %2907 = vmatpush.msra.mxu3 %v2883_v19  ;;  %v2817_v55 = vld [vmem:[#allocation31 + $0x20] sm:$0xff] }
 0x6e7   : > { %5899 = vmatmul.msk.f32.gmra.mxu0 %vm2082_vm2, %v2737_v56  ;;  %2807 = vmatpush.msra.mxu1 %v2737_v56  ;;  %v2816_v56 = vld [vmem:[#allocation31 + $0x18] sm:$0xff] }
 0x6e8   : > { %2908 = vmatpush.msra.mxu3 %v2882_v3  ;;  %2839 = vmatpush.msra.mxu2 %v2817_v55  ;;  %v6250_v3 = vld [vmem:[#allocation30] ss:$0 sm:$0xff] }
 0x6e9   : > { %2808 = vmatpush.msra.mxu1 %v2736_v49  ;;  %v3094_v55 = vld [vmem:[#allocation36 + $0xb8] sm:$0xff] }
 0x6ea   : > { %2909 = vmatpush.msra.mxu3 %v2881_v7  ;;  %5901 = vmatmul.msk.f32.vlgmr.msra.gmra.mxu1 %vm2789_vm6, %v8277_v22 }
 0x6eb   : > { %2970 = vmatpush.msrb.mxu1 %v2962_v57  ;;  %v2815_v57 = vld [vmem:[#allocation31 + $0x10] sm:$0xff]  ;;  %2840 = vmatpush.msra.mxu2 %v2816_v56  ;;  %v3157_v56 = vld [vmem:[#allocation36 + $0x138] sm:$0xff] }
 0x6ec   : > { %2910 = vmatpush.msra.mxu3 %v2880_v12  ;;  %v3038_v12 = vld [vmem:[%s8605_s8 + $0x70] sm:$0xff] }
 0x6ed   : > { %2971 = vmatpush.msrb.mxu1 %v2961_v58  ;;  %2841 = vmatpush.msra.mxu2 %v2815_v57  ;;  %v2814_v58 = vld [vmem:[#allocation31 + $0x8] sm:$0xff]  ;;  %v3076_v57 = vld [vmem:[#allocation36 + $0x30] sm:$0xff] }
 0x6ee   : > { %2911 = vmatpush.msra.mxu3 %v2879_v17  ;;  %v3034_v17 = vld [vmem:[%s8605_s8 + $0x50] sm:$0xff] }
 0x6ef   : > { %2972 = vmatpush.msrb.mxu1 %v2960_v13  ;;  %v2813_v13 = vld [vmem:[#allocation31] sm:$0xff]  ;;  %2842 = vmatpush.msra.mxu2 %v2814_v58  ;;  %v3093_v58 = vld [vmem:[#allocation36 + $0xb0] sm:$0xff] }
 0x6f0   : > { %2912 = vmatpush.msra.mxu3 %v2878_v23  ;;  %v3031_v23 = vld [vmem:[%s8605_s8 + $0x38] sm:$0xff] }
 0x6f1   : > { %2973 = vmatpush.msrb.mxu1 %v2959_v59  ;;  %2843 = vmatpush.msra.mxu2 %v2813_v13  ;;  %v3156_v13 = vld [vmem:[#allocation36 + $0x130] sm:$0xff] }
 0x6f2   : > { %2913 = vmatpush.msra.mxu3 %v2877_v26  ;;  %v3029_v26 = vld [vmem:[%s8605_s8 + $0x28] sm:$0xff] }
 0x6f3   : > { %2974 = vmatpush.msrb.mxu1 %v2958_v60 }
 0x6f4   : > { %2914 = vmatpush.msra.mxu3 %v2876_v28  ;;  %v3027_v28 = vld [vmem:[%s8605_s8 + $0x18] sm:$0xff] }
 0x6f5   : > { %2975 = vmatpush.msrb.mxu1 %v2957_v61 }
 0x6f6   : > { %2915 = vmatpush.msra.mxu3 %v2875_v31  ;;  %v3025_v31 = vld [vmem:[%s8605_s8 + $0x8] sm:$0xff] }
 0x6f7   : > { %2976 = vmatpush.msrb.mxu1 %v2956_v0 }
 0x6f9   : > { %2977 = vmatpush.msrb.mxu1 %v2955_v2 }
 0x6fb   : > { %2978 = vmatpush.msrb.mxu1 %v2954_v5 }
 0x6fd   : > { %2979 = vmatpush.msrb.mxu1 %v2953_v9 }
 0x6ff   : > { %2980 = vmatpush.msrb.mxu1 %v2952_v14  ;;  %v3037_v14 = vld [vmem:[%s8605_s8 + $0x68] sm:$0xff] }
 0x701   : > { %2981 = vmatpush.msrb.mxu1 %v2951_v20  ;;  %v3033_v20 = vld [vmem:[%s8605_s8 + $0x48] sm:$0xff] }
 0x703   : > { %2982 = vmatpush.msrb.mxu1 %v2950_v25  ;;  %v3030_v25 = vld [vmem:[%s8605_s8 + $0x30] sm:$0xff] }
 0x705   : > { %2983 = vmatpush.msrb.mxu1 %v2949_v27  ;;  %v3028_v27 = vld [vmem:[%s8605_s8 + $0x20] sm:$0xff] }
 0x707   : > { %2984 = vmatpush.msrb.mxu1 %v2948_v29  ;;  %v3026_v29 = vld [vmem:[%s8605_s8 + $0x10] sm:$0xff] }
 0x709   : > { %2985 = vmatpush.msrb.mxu1 %v2947_v11  ;;  %v3024_v11 = vld [vmem:[%s8605_s8] sm:$0xff] }
 0x75c   : > { %v2773_v35 = vpop.f32.mrf.mxu0 }
 0x75d   : > { %v2774_v18 = vadd.f32 %v6249_v34, %v2773_v35  ;;  %v3165_v35 = vld [vmem:[#allocation36 + $0x178] sm:$0xff] }
 0x75e   : > { %3170 = vmatpush.msra.mxu1 %v3165_v35 }
 0x75f   : > { %v2779_v36 = vmax.f32 %v2774_v18, 0.0  ;;  %v3101_v18 = vld [vmem:[#allocation36 + $0xf0] sm:$0xff] }
 0x761   : > { %v2850_v24 = vrot.slane %v2779_v36, 7  ;;  %v3083_v36 = vld [vmem:[#allocation36 + $0x68] sm:$0xff] }
 0x762   : > { %3131 = vmatpush.msra.mxu0 %v3083_v36 }
 0x763   : > { %5904 = vmatmul.msk.f32.vlgmr.msrb.gmra.mxu0 %vm8282_vm7, %v2850_v24  ;;  %v2856_v41 = vsel %vm2049_vm1, 0.0, %v2850_v24 }
 0x764   : > { %v2776_v38 = vpop.f32.mrf.mxu0  ;;  %v2893_v43 = vrot.slane %v2856_v41, 1  ;;  %v2963_v44 = vrot.slane %v2856_v41, 2  ;;  %v3099_v41 = vld [vmem:[#allocation36 + $0xe0] sm:$0xff] }
 0x765   : > { %v2777_v39 = vadd.f32 %v6249_v34, %v2776_v38  ;;  %v3102_v34 = vld [vmem:[#allocation36 + $0xf8] sm:$0xff]  ;;  %v3100_v38 = vld [vmem:[#allocation36 + $0xe8] sm:$0xff] }
 0x766   : > { %3109 = vmatpush.msrb.mxu3 %v3102_v34 }
 0x767   : > { %v2780_v40 = vmax.f32 %v2777_v39, 0.0  ;;  %v2810_v59 = vpop.f32.mrf.mxu1  ;;  %v3163_v39 = vld [vmem:[#allocation36 + $0x168] sm:$0xff] }
 0x768   : > { %5902 = vmatmul.msk.f32.vlgmr.msra.gmra.mxu2 %vm2082_vm2, %v2810_v59  ;;  %3110 = vmatpush.msrb.mxu3 %v3101_v18  ;;  %v3075_v59 = vld [vmem:[#allocation36 + $0x28] sm:$0xff] }
 0x769   : > { %v2851_v42 = vrot.slane %v2780_v40, 7  ;;  %v3082_v40 = vld [vmem:[#allocation36 + $0x60] sm:$0xff] }
 0x76a   : > { %3111 = vmatpush.msrb.mxu3 %v3100_v38  ;;  %3132 = vmatpush.msra.mxu0 %v3082_v40  ;;  %v3208_v40 = vld [vmem:[#allocation39 + $0x50] sm:$0xff] }
 0x76b   : > { %v2852_v30 = vsel %vm2049_vm1, %v2850_v24, %v2851_v42  ;;  %v2857_v49 = vsel %vm2049_vm1, %v2851_v42, 0.0  ;;  %v3164_v24 = vld [vmem:[#allocation36 + $0x170] sm:$0xff]  ;;  %v3162_v42 = vld [vmem:[#allocation36 + $0x160] sm:$0xff] }
 0x76c   : > { %v2894_v45 = vrot.slane %v2852_v30, 1  ;;  %2942 = vmatmul.f32.gmra.mxu0 %v2852_v30  ;;  %v2964_v46 = vrot.slane %v2852_v30, 2  ;;  %v2896_v50 = vrot.slane %v2857_v49, 1  ;;  %v2966_v51 = vrot.slane %v2857_v49, 2  ;;  %3171 = vmatpush.msra.mxu1 %v3164_v24  ;;  %v3081_v30 = vld [vmem:[#allocation36 + $0x58] sm:$0xff]  ;;  %v3096_v49 = vld [vmem:[#allocation36 + $0xc8] sm:$0xff] }
 0x76d   : > { %3112 = vmatpush.msrb.mxu3 %v3099_v41  ;;  %3133 = vmatpush.msra.mxu0 %v3081_v30  ;;  %v3207_v41 = vld [vmem:[#allocation39 + $0x48] sm:$0xff]  ;;  %v3205_v30 = vld [vmem:[#allocation39 + $0x38] sm:$0xff] }
 0x76e   : > { %v2895_v47 = vsel %vm2076_vm3, %v2893_v43, %v2894_v45  ;;  %v2965_v48 = vsel %vm2146_vm4, %v2963_v44, %v2964_v46  ;;  %v2897_v52 = vsel %vm2076_vm3, %v2894_v45, %v2896_v50  ;;  %v2967_v53 = vsel %vm2146_vm4, %v2964_v46, %v2966_v51  ;;  %3172 = vmatpush.msra.mxu1 %v3163_v39  ;;  %v3098_v43 = vld [vmem:[#allocation36 + $0xd8] sm:$0xff]  ;;  %v3080_v45 = vld [vmem:[#allocation36 + $0x50] sm:$0xff]  ;;  %v3159_v50 = vld [vmem:[#allocation36 + $0x148] sm:$0xff] }
 0x76f   : > { %2916 = vmatmul.f32.vlgmr.msra.gmra.mxu3 %v2895_v47  ;;  %2986 = vmatmul.f32.vlgmr.msrb.gmra.mxu1 %v2965_v48  ;;  %v3161_v44 = vld [vmem:[#allocation36 + $0x158] sm:$0xff]  ;;  %v3097_v46 = vld [vmem:[#allocation36 + $0xd0] sm:$0xff]  ;;  %v3079_v48 = vld [vmem:[#allocation36 + $0x48] sm:$0xff] }
 0x770   : > { %3173 = vmatpush.msra.mxu1 %v3162_v42  ;;  %3113 = vmatpush.msrb.mxu3 %v3098_v43  ;;  %v3160_v47 = vld [vmem:[#allocation36 + $0x150] sm:$0xff]  ;;  %v3078_v51 = vld [vmem:[#allocation36 + $0x40] sm:$0xff] }
 0x771   : > { %3134 = vmatpush.msra.mxu0 %v3080_v45  ;;  %v3206_v42 = vld [vmem:[#allocation39 + $0x40] sm:$0xff]  ;;  %v3204_v43 = vld [vmem:[#allocation39 + $0x30] sm:$0xff] }
 0x772   : > { %3174 = vmatpush.msra.mxu1 %v3161_v44  ;;  %3114 = vmatpush.msrb.mxu3 %v3097_v46  ;;  %v3203_v44 = vld [vmem:[#allocation39 + $0x28] sm:$0xff]  ;;  %v3202_v45 = vld [vmem:[#allocation39 + $0x20] sm:$0xff]  ;;  %v3201_v46 = vld [vmem:[#allocation39 + $0x18] sm:$0xff] }
 0x773   : > { %3135 = vmatpush.msra.mxu0 %v3079_v48  ;;  %v3199_v48 = vld [vmem:[#allocation39 + $0x8] sm:$0xff] }
 0x774   : > { %3175 = vmatpush.msra.mxu1 %v3160_v47  ;;  %3115 = vmatpush.msrb.mxu3 %v3096_v49  ;;  %v3200_v47 = vld [vmem:[#allocation39 + $0x10] sm:$0xff]  ;;  %v3198_v49 = vld [vmem:[#allocation39] sm:$0xff] }
 0x775   : > { %3136 = vmatpush.msra.mxu0 %v3078_v51  ;;  %v3258_v51 = vld [vmem:[#allocation42 + $0x70] sm:$0xff] }
 0x776   : > { %3176 = vmatpush.msra.mxu1 %v3159_v50  ;;  %v3259_v50 = vld [vmem:[#allocation42 + $0x78] sm:$0xff] }
 0x777   : > { %2919 = vmatmul.f32.gmra.mxu3 %v2897_v52  ;;  %2989 = vmatmul.f32.gmra.mxu1 %v2967_v53  ;;  %v3095_v52 = vld [vmem:[#allocation36 + $0xc0] sm:$0xff] }
 0x778   : > { %v3158_v53 = vld [vmem:[#allocation36 + $0x140] sm:$0xff]  ;;  %3116 = vmatpush.msrb.mxu3 %v3095_v52  ;;  %3137 = vmatpush.msra.mxu0 %v3077_v54  ;;  %v3275_v54 = vld [vmem:[#allocation42 + $0xf0] sm:$0xff] }
 0x779   : > { %3177 = vmatpush.msra.mxu1 %v3158_v53  ;;  %v3276_v52 = vld [vmem:[#allocation42 + $0xf8] sm:$0xff] }
 0x77a   : > { %3117 = vmatpush.msrb.mxu3 %v3094_v55  ;;  %3138 = vmatpush.msra.mxu0 %v3076_v57  ;;  %v3339_v53 = vld [vmem:[#allocation42 + $0x178] sm:$0xff]  ;;  %v3257_v55 = vld [vmem:[#allocation42 + $0x68] sm:$0xff] }
 0x77b   : > { %3178 = vmatpush.msra.mxu1 %v3157_v56  ;;  %v3338_v56 = vld [vmem:[#allocation42 + $0x170] sm:$0xff]  ;;  %v3274_v57 = vld [vmem:[#allocation42 + $0xe8] sm:$0xff] }
 0x77c   : > { %3118 = vmatpush.msrb.mxu3 %v3093_v58  ;;  %3139 = vmatpush.msra.mxu0 %v3075_v59  ;;  %v3337_v58 = vld [vmem:[#allocation42 + $0x168] sm:$0xff]  ;;  %v3273_v59 = vld [vmem:[#allocation42 + $0xe0] sm:$0xff] }
 0x77d   : > { %3179 = vmatpush.msra.mxu1 %v3156_v13  ;;  %v3256_v13 = vld [vmem:[#allocation42 + $0x60] sm:$0xff] }
 0x7e0   : > { %v2940_v60 = vpop.f32.mrf.mxu0 }
 0x7e9   : > { %v2943_v0 = vpop.f32.mrf.mxu0 }
 0x7ec   : > { %v2987_v61 = vpop.f32.mrf.mxu1 }
 0x7f2   : > { %v2917_v62 = vpop.f32.mrf.mxu3 }
 0x7f3   : > { %v2941_v63 = vadd.f32 %v2940_v60, %v2917_v62  ;;  %v3074_v60 = vld [vmem:[#allocation36 + $0x20] sm:$0xff]  ;;  %v6251_v62 = vld [vmem:[#allocation33] ss:$0 sm:$0xff] }
 0x7f4   : > { %v2990_v4 = vpop.f32.mrf.mxu1  ;;  %3140 = vmatpush.msra.mxu0 %v3074_v60  ;;  %v3336_v60 = vld [vmem:[#allocation42 + $0x160] sm:$0xff] }
 0x7f5   : > { %v2993_v1 = vadd.f32 %v2987_v61, %v2941_v63  ;;  %v2845_v61 = vpop.f32.mrf.mxu2 }
 0x7f6   : > { %v2846_v63 = vadd.f32 %v6251_v62, %v2845_v61  ;;  %v3255_v61 = vld [vmem:[#allocation42 + $0x58] sm:$0xff] }
 0x7f7   : > { %v2999_v7 = vadd.f32 %v6250_v3, %v2993_v1  ;;  %v3092_v1 = vld [vmem:[#allocation36 + $0xa8] sm:$0xff]  ;;  %v3272_v62 = vld [vmem:[#allocation42 + $0xd8] sm:$0xff] }
 0x7f8   : > { %3119 = vmatpush.msrb.mxu3 %v3092_v1  ;;  %v3271_v1 = vld [vmem:[#allocation42 + $0xd0] sm:$0xff] }
 0x7f9   : > { %v3001_v9 = vmax.f32 %v2999_v7, 0.0  ;;  %v3090_v7 = vld [vmem:[#allocation36 + $0x98] sm:$0xff] }
 0x7fa   : > { %v2920_v19 = vpop.f32.mrf.mxu3 }
 0x7fb   : > { %v2944_v2 = vadd.f32 %v2943_v0, %v2920_v19 }
 0x7fd   : > { %v2994_v5 = vadd.f32 %v2990_v4, %v2944_v2  ;;  %v3073_v2 = vld [vmem:[#allocation36 + $0x18] sm:$0xff]  ;;  %v3091_v4 = vld [vmem:[#allocation36 + $0xa0] sm:$0xff] }
 0x7fe   : > { %3141 = vmatpush.msra.mxu0 %v3073_v2  ;;  %3120 = vmatpush.msrb.mxu3 %v3091_v4  ;;  %v3334_v2 = vld [vmem:[#allocation42 + $0x150] sm:$0xff]  ;;  %v3270_v4 = vld [vmem:[#allocation42 + $0xc8] sm:$0xff] }
 0x7ff   : > { %v3000_v6 = vadd.f32 %v6250_v3, %v2994_v5  ;;  %v3155_v3 = vld [vmem:[#allocation36 + $0x128] sm:$0xff]  ;;  %v3072_v5 = vld [vmem:[#allocation36 + $0x10] sm:$0xff] }
 0x800   : > { %3180 = vmatpush.msra.mxu1 %v3155_v3  ;;  %3142 = vmatpush.msra.mxu0 %v3072_v5  ;;  %v3253_v3 = vld [vmem:[#allocation42 + $0x48] sm:$0xff] }
 0x801   : > { %v3002_v8 = vmax.f32 %v3000_v6, 0.0  ;;  %v3154_v6 = vld [vmem:[#allocation36 + $0x120] sm:$0xff]  ;;  %3121 = vmatpush.msrb.mxu3 %v3090_v7  ;;  %v3333_v5 = vld [vmem:[#allocation42 + $0x148] sm:$0xff] }
 0x802   : > { %3181 = vmatpush.msra.mxu1 %v3154_v6  ;;  %v3252_v6 = vld [vmem:[#allocation42 + $0x40] sm:$0xff] }
 0x803   : > { %3017 = vmatpush.msrb.mxu2 %v3002_v8  ;;  %v3071_v8 = vld [vmem:[#allocation36 + $0x8] sm:$0xff] }
 0x804   : > { %3143 = vmatpush.msra.mxu0 %v3071_v8  ;;  %v3269_v7 = vld [vmem:[#allocation42 + $0xc0] sm:$0xff] }
 0x805   : > { %3018 = vmatpush.msrb.mxu2 %v3001_v9  ;;  %v3153_v9 = vld [vmem:[#allocation36 + $0x118] sm:$0xff]  ;;  %v3332_v8 = vld [vmem:[#allocation42 + $0x140] sm:$0xff] }
 0x806   : > { %5905 = vmatmul.msk.f32.vlgmr.msrb.gmra.mxu2 %vm2789_vm6, %v8277_v22  ;;  %3182 = vmatpush.msra.mxu1 %v3153_v9  ;;  %v3251_v9 = vld [vmem:[#allocation42 + $0x38] sm:$0xff] }
 0x807   : > { %3044 = vmatpush.msra.mxu2 %v3039_v10  ;;  %v3089_v10 = vld [vmem:[#allocation36 + $0x90] sm:$0xff] }
 0x808   : > { %3122 = vmatpush.msrb.mxu3 %v3089_v10  ;;  %v3268_v10 = vld [vmem:[#allocation42 + $0xb8] sm:$0xff] }
 0x809   : > { %3045 = vmatpush.msra.mxu2 %v3038_v12  ;;  %v3070_v12 = vld [vmem:[#allocation36] sm:$0xff] }
 0x80a   : > { %3144 = vmatpush.msra.mxu0 %v3070_v12  ;;  %v3331_v12 = vld [vmem:[#allocation42 + $0x138] sm:$0xff] }
 0x80b   : > { %3046 = vmatpush.msra.mxu2 %v3037_v14  ;;  %v3152_v14 = vld [vmem:[#allocation36 + $0x110] sm:$0xff] }
 0x80c   : > { %3183 = vmatpush.msra.mxu1 %v3152_v14  ;;  %3303 = vmatpush.msrb.mxu0 %v3259_v50  ;;  %v3250_v14 = vld [vmem:[#allocation42 + $0x30] sm:$0xff]  ;;  %v3399_v50 = vld [vmem:[#allocation45 + $0xd8] sm:$0xff] }
 0x80d   : > { %3047 = vmatpush.msra.mxu2 %v3036_v15  ;;  %v3088_v15 = vld [vmem:[#allocation36 + $0x88] sm:$0xff] }
 0x80e   : > { %3123 = vmatpush.msrb.mxu3 %v3088_v15  ;;  %3304 = vmatpush.msrb.mxu0 %v3258_v51  ;;  %v3267_v15 = vld [vmem:[#allocation42 + $0xb0] sm:$0xff]  ;;  %v3396_v51 = vld [vmem:[#allocation45 + $0xc0] sm:$0xff] }
 0x80f   : > { %3048 = vmatpush.msra.mxu2 %v3035_v16  ;;  %v3151_v16 = vld [vmem:[#allocation36 + $0x108] sm:$0xff] }
 0x810   : > { %3184 = vmatpush.msra.mxu1 %v3151_v16  ;;  %3305 = vmatpush.msrb.mxu0 %v3257_v55  ;;  %v3330_v16 = vld [vmem:[#allocation42 + $0x130] sm:$0xff]  ;;  %v6254_v55 = vld [vmem:[#allocation40] ss:$0 sm:$0xff] }
 0x811   : > { %3049 = vmatpush.msra.mxu2 %v3034_v17  ;;  %v3087_v17 = vld [vmem:[#allocation36 + $0x80] sm:$0xff] }
 0x812   : > { %3124 = vmatpush.msrb.mxu3 %v3087_v17  ;;  %3306 = vmatpush.msrb.mxu0 %v3256_v13  ;;  %v3249_v17 = vld [vmem:[#allocation42 + $0x28] sm:$0xff] }
 0x813   : > { %3050 = vmatpush.msra.mxu2 %v3033_v20  ;;  %v3150_v20 = vld [vmem:[#allocation36 + $0x100] sm:$0xff] }
 0x814   : > { %3185 = vmatpush.msra.mxu1 %v3150_v20  ;;  %3283 = vmatpush.msra.mxu3 %v3276_v52  ;;  %v3248_v20 = vld [vmem:[#allocation42 + $0x20] sm:$0xff]  ;;  %v3397_v52 = vld [vmem:[#allocation45 + $0xc8] sm:$0xff] }
 0x815   : > { %3051 = vmatpush.msra.mxu2 %v3032_v21  ;;  %v3213_v21 = vld [vmem:[#allocation39 + $0x78] sm:$0xff]  ;;  %3307 = vmatpush.msrb.mxu0 %v3255_v61 }
 0x816   : > { %3344 = vmatpush.msrb.mxu1 %v3339_v53  ;;  %3284 = vmatpush.msra.mxu3 %v3275_v54  ;;  %v3394_v53 = vld [vmem:[#allocation45 + $0xb0] sm:$0xff]  ;;  %v3395_v54 = vld [vmem:[#allocation45 + $0xb8] sm:$0xff] }
 0x817   : > { %3052 = vmatpush.msra.mxu2 %v3031_v23  ;;  %v3212_v23 = vld [vmem:[#allocation39 + $0x70] sm:$0xff] }
 0x818   : > { %3345 = vmatpush.msrb.mxu1 %v3338_v56  ;;  %3285 = vmatpush.msra.mxu3 %v3274_v57 }
 0x819   : > { %3053 = vmatpush.msra.mxu2 %v3030_v25  ;;  %v3211_v25 = vld [vmem:[#allocation39 + $0x68] sm:$0xff] }
 0x81a   : > { %3346 = vmatpush.msrb.mxu1 %v3337_v58  ;;  %3286 = vmatpush.msra.mxu3 %v3273_v59 }
 0x81b   : > { %3054 = vmatpush.msra.mxu2 %v3029_v26  ;;  %v3210_v26 = vld [vmem:[#allocation39 + $0x60] sm:$0xff] }
 0x81c   : > { %3347 = vmatpush.msrb.mxu1 %v3336_v60  ;;  %3287 = vmatpush.msra.mxu3 %v3272_v62 }
 0x81d   : > { %3055 = vmatpush.msra.mxu2 %v3028_v27  ;;  %v3209_v27 = vld [vmem:[#allocation39 + $0x58] sm:$0xff] }
 0x81e   : > { %3288 = vmatpush.msra.mxu3 %v3271_v1 }
 0x81f   : > { %3056 = vmatpush.msra.mxu2 %v3027_v28  ;;  %v6252_v28 = vld [vmem:[#allocation34] ss:$0 sm:$0xff] }
 0x820   : > { %3289 = vmatpush.msra.mxu3 %v3270_v4  ;;  %v3393_v4 = vld [vmem:[#allocation45 + $0xa8] sm:$0xff] }
 0x821   : > { %3057 = vmatpush.msra.mxu2 %v3026_v29 }
 0x822   : > { %3290 = vmatpush.msra.mxu3 %v3269_v7  ;;  %v3388_v7 = vld [vmem:[#allocation45 + $0x80] sm:$0xff] }
 0x823   : > { %3058 = vmatpush.msra.mxu2 %v3025_v31 }
 0x824   : > { %3291 = vmatpush.msra.mxu3 %v3268_v10  ;;  %v3387_v10 = vld [vmem:[#allocation45 + $0x78] sm:$0xff] }
 0x825   : > { %3059 = vmatpush.msra.mxu2 %v3024_v11 }
 0x826   : > { %3292 = vmatpush.msra.mxu3 %v3267_v15  ;;  %v3382_v15 = vld [vmem:[#allocation45 + $0x50] sm:$0xff] }
 0x827   : > { %3218 = vmatpush.msrb.mxu2 %v3213_v21 }
 0x829   : > { %3219 = vmatpush.msrb.mxu2 %v3212_v23 }
 0x82b   : > { %3220 = vmatpush.msrb.mxu2 %v3211_v25 }
 0x82d   : > { %3221 = vmatpush.msrb.mxu2 %v3210_v26  ;;  %v6253_v26 = vld [vmem:[#allocation37] ss:$0 sm:$0xff] }
 0x82f   : > { %3222 = vmatpush.msrb.mxu2 %v3209_v27 }
 0x831   : > { %3223 = vmatpush.msrb.mxu2 %v3208_v40  ;;  %v3244_v40 = vld [vmem:[#allocation42] sm:$0xff] }
 0x833   : > { %3224 = vmatpush.msrb.mxu2 %v3207_v41  ;;  %v3326_v41 = vld [vmem:[#allocation42 + $0x110] sm:$0xff] }
 0x835   : > { %3225 = vmatpush.msrb.mxu2 %v3206_v42  ;;  %v3262_v42 = vld [vmem:[#allocation42 + $0x88] sm:$0xff] }
 0x837   : > { %3226 = vmatpush.msrb.mxu2 %v3205_v30  ;;  %v3325_v30 = vld [vmem:[#allocation42 + $0x108] sm:$0xff] }
 0x839   : > { %3227 = vmatpush.msrb.mxu2 %v3204_v43  ;;  %v3261_v43 = vld [vmem:[#allocation42 + $0x80] sm:$0xff] }
 0x83b   : > { %3228 = vmatpush.msrb.mxu2 %v3203_v44  ;;  %v3324_v44 = vld [vmem:[#allocation42 + $0x100] sm:$0xff] }
 0x83d   : > { %3229 = vmatpush.msrb.mxu2 %v3202_v45  ;;  %v3402_v45 = vld [vmem:[#allocation45 + $0xf0] sm:$0xff] }
 0x83f   : > { %3230 = vmatpush.msrb.mxu2 %v3201_v46  ;;  %v3403_v46 = vld [vmem:[#allocation45 + $0xf8] sm:$0xff] }
 0x841   : > { %3231 = vmatpush.msrb.mxu2 %v3200_v47  ;;  %v3400_v47 = vld [vmem:[#allocation45 + $0xe0] sm:$0xff] }
 0x843   : > { %3232 = vmatpush.msrb.mxu2 %v3199_v48  ;;  %v3401_v48 = vld [vmem:[#allocation45 + $0xe8] sm:$0xff] }
 0x845   : > { %3233 = vmatpush.msrb.mxu2 %v3198_v49  ;;  %v3398_v49 = vld [vmem:[#allocation45 + $0xd0] sm:$0xff] }
 0x889   : > { %v3020_v0 = vpop.f32.mrf.mxu2 }
 0x88a   : > { %v8318_v19 = vadd.f32 %v3020_v0, %v2846_v63  ;;  %v3335_v63 = vld [vmem:[#allocation42 + $0x158] sm:$0xff]  ;;  %v3254_v0 = vld [vmem:[#allocation42 + $0x50] sm:$0xff] }
 0x88b   : > { %3348 = vmatpush.msrb.mxu1 %v3335_v63  ;;  %3308 = vmatpush.msrb.mxu0 %v3254_v0 }
 0x88c   : > { %3023 = vst [vmem:[%s1988_s4] sm:$0xff] %v8318_v19  ;;  %3060 = vmatmul.f32.vlgmr.msra.gmra.mxu2 %v8318_v19 }
 0x88d   : > { %3349 = vmatpush.msrb.mxu1 %v3334_v2  ;;  %3309 = vmatpush.msrb.mxu0 %v3253_v3  ;;  %v3392_v3 = vld [vmem:[#allocation45 + $0xa0] sm:$0xff] }
 0x88e   : > { %3410 = vmatpush.msra.mxu2 %v3402_v45  ;;  %v3654_v45 = vld [vmem:[#allocation46 + $0x2d0] sm:$0xff] }
 0x88f   : > { %3350 = vmatpush.msrb.mxu1 %v3333_v5  ;;  %3310 = vmatpush.msrb.mxu0 %v3252_v6  ;;  %v3390_v5 = vld [vmem:[#allocation45 + $0x90] sm:$0xff]  ;;  %v3391_v6 = vld [vmem:[#allocation45 + $0x98] sm:$0xff] }
 0x890   : > { %3411 = vmatpush.msra.mxu2 %v3400_v47 }
 0x891   : > { %3351 = vmatpush.msrb.mxu1 %v3332_v8  ;;  %3311 = vmatpush.msrb.mxu0 %v3251_v9  ;;  %v3389_v8 = vld [vmem:[#allocation45 + $0x88] sm:$0xff]  ;;  %v3386_v9 = vld [vmem:[#allocation45 + $0x70] sm:$0xff] }
 0x892   : > { %3412 = vmatpush.msra.mxu2 %v3398_v49 }
 0x893   : > { %3352 = vmatpush.msrb.mxu1 %v3331_v12  ;;  %3312 = vmatpush.msrb.mxu0 %v3250_v14  ;;  %v3384_v12 = vld [vmem:[#allocation45 + $0x60] sm:$0xff]  ;;  %v3385_v14 = vld [vmem:[#allocation45 + $0x68] sm:$0xff] }
 0x894   : > { %3413 = vmatpush.msra.mxu2 %v3396_v51  ;;  %v3652_v51 = vld [vmem:[#allocation46 + $0x2c0] sm:$0xff] }
 0x895   : > { %3353 = vmatpush.msrb.mxu1 %v3330_v16  ;;  %3313 = vmatpush.msrb.mxu0 %v3249_v17  ;;  %v3383_v16 = vld [vmem:[#allocation45 + $0x58] sm:$0xff]  ;;  %v3380_v17 = vld [vmem:[#allocation45 + $0x40] sm:$0xff] }
 0x896   : > { %3414 = vmatpush.msra.mxu2 %v3394_v53 }
 0x897   : > { %3314 = vmatpush.msrb.mxu0 %v3248_v20  ;;  %v3381_v20 = vld [vmem:[#allocation45 + $0x48] sm:$0xff] }
 0x898   : > { %3415 = vmatpush.msra.mxu2 %v3392_v3  ;;  %v3505_v3 = vld [vmem:[#allocation48 + $0xf0] sm:$0xff] }
 0x89a   : > { %3416 = vmatpush.msra.mxu2 %v3390_v5  ;;  %v3476_v5 = vld [vmem:[#allocation48 + $0x8] sm:$0xff] }
 0x89c   : > { %3417 = vmatpush.msra.mxu2 %v3388_v7  ;;  %v3503_v7 = vld [vmem:[#allocation48 + $0xe0] sm:$0xff] }
 0x89e   : > { %3418 = vmatpush.msra.mxu2 %v3386_v9  ;;  %v3640_v9 = vld [vmem:[#allocation46 + $0x260] sm:$0xff] }
 0x8a0   : > { %3419 = vmatpush.msra.mxu2 %v3384_v12  ;;  %v3672_v12 = vld [vmem:[#allocation46 + $0x360] sm:$0xff] }
 0x8a2   : > { %3420 = vmatpush.msra.mxu2 %v3382_v15  ;;  %v3638_v15 = vld [vmem:[#allocation46 + $0x250] sm:$0xff] }
 0x8a4   : > { %3421 = vmatpush.msra.mxu2 %v3380_v17  ;;  %v3670_v17 = vld [vmem:[#allocation46 + $0x350] sm:$0xff] }
 0x90f   : > { %v3061_v29 = vpop.f32.mrf.mxu2 }
 0x910   : > { %v3062_v31 = vadd.f32 %v6252_v28, %v3061_v29 }
 0x912   : > { %v3064_v11 = vmax.f32 %v3062_v31, 0.0 }
 0x914   : > { %v3066_v32 = vrot.slane %v3064_v11, 7 }
 0x916   : > { %v3068_v33 = vsel %vm2049_vm1, 0.0, %v3066_v32  ;;  %v3069_v34 = vsel %vm2049_vm1, %v3066_v32, 0.0  ;;  %5907 = vmatmul.msk.f32.vlgmr.msra.gmra.mxu0 %vm8282_vm7, %v3066_v32  ;;  %v3266_v32 = vld [vmem:[#allocation42 + $0xa8] sm:$0xff] }
 0x917   : > { %v3105_v35 = vrot.slane %v3068_v33, 1  ;;  %v3106_v18 = vrot.slane %v3069_v34, 1  ;;  %v3166_v36 = vrot.slane %v3068_v33, 2  ;;  %v3167_v24 = vrot.slane %v3069_v34, 2  ;;  %v3247_v33 = vld [vmem:[#allocation42 + $0x18] sm:$0xff]  ;;  %v3329_v34 = vld [vmem:[#allocation42 + $0x128] sm:$0xff]  ;;  %3293 = vmatpush.msra.mxu3 %v3266_v32 }
 0x918   : > { %3315 = vmatpush.msrb.mxu0 %v3247_v33  ;;  %3354 = vmatpush.msrb.mxu1 %v3329_v34  ;;  %v3506_v32 = vld [vmem:[#allocation48 + $0xf8] sm:$0xff]  ;;  %v3504_v33 = vld [vmem:[#allocation48 + $0xe8] sm:$0xff] }
 0x919   : > { %v3107_v38 = vsel %vm2076_vm3, %v3105_v35, %v3106_v18  ;;  %v3168_v39 = vsel %vm2146_vm4, %v3166_v36, %v3167_v24  ;;  %v3265_v35 = vld [vmem:[#allocation42 + $0xa0] sm:$0xff]  ;;  %v3246_v18 = vld [vmem:[#allocation42 + $0x10] sm:$0xff]  ;;  %v3264_v24 = vld [vmem:[#allocation42 + $0x98] sm:$0xff] }
 0x91a   : > { %3125 = vmatmul.f32.vlgmr.msrb.gmra.mxu3 %v3107_v38  ;;  %3186 = vmatmul.f32.vlgmr.msra.gmra.mxu1 %v3168_v39  ;;  %v3328_v36 = vld [vmem:[#allocation42 + $0x120] sm:$0xff]  ;;  %v3245_v38 = vld [vmem:[#allocation42 + $0x8] sm:$0xff]  ;;  %v3327_v39 = vld [vmem:[#allocation42 + $0x118] sm:$0xff] }
 0x91b   : > { %3294 = vmatpush.msra.mxu3 %v3265_v35  ;;  %3316 = vmatpush.msrb.mxu0 %v3246_v18  ;;  %v3502_v34 = vld [vmem:[#allocation48 + $0xd8] sm:$0xff]  ;;  %v3500_v35 = vld [vmem:[#allocation48 + $0xc8] sm:$0xff] }
 0x91c   : > { %3355 = vmatpush.msrb.mxu1 %v3328_v36  ;;  %v3498_v18 = vld [vmem:[#allocation48 + $0xb8] sm:$0xff]  ;;  %v3496_v36 = vld [vmem:[#allocation48 + $0xa8] sm:$0xff] }
 0x91d   : > { %3295 = vmatpush.msra.mxu3 %v3264_v24  ;;  %3317 = vmatpush.msrb.mxu0 %v3245_v38  ;;  %v3494_v24 = vld [vmem:[#allocation48 + $0x98] sm:$0xff]  ;;  %v3492_v38 = vld [vmem:[#allocation48 + $0x88] sm:$0xff] }
 0x91e   : > { %3356 = vmatpush.msrb.mxu1 %v3327_v39  ;;  %v3658_v39 = vld [vmem:[#allocation46 + $0x2f0] sm:$0xff] }
 0x91f   : > { %3318 = vmatpush.msrb.mxu0 %v3244_v40  ;;  %v3490_v40 = vld [vmem:[#allocation48 + $0x78] sm:$0xff] }
 0x920   : > { %3357 = vmatpush.msrb.mxu1 %v3326_v41  ;;  %v3656_v41 = vld [vmem:[#allocation46 + $0x2e0] sm:$0xff] }
 0x922   : > { %3358 = vmatpush.msrb.mxu1 %v3325_v30 }
 0x924   : > { %3359 = vmatpush.msrb.mxu1 %v3324_v44  ;;  %v3488_v44 = vld [vmem:[#allocation48 + $0x68] sm:$0xff] }
 0x926   : > { %3533 = vmatpush.msra.mxu1 %v3506_v32  ;;  %v3632_v32 = vld [vmem:[#allocation46 + $0x220] sm:$0xff] }
 0x928   : > { %3534 = vmatpush.msra.mxu1 %v3504_v33  ;;  %v3493_v33 = vld [vmem:[#allocation48 + $0x90] sm:$0xff] }
 0x92a   : > { %3535 = vmatpush.msra.mxu1 %v3502_v34  ;;  %v3664_v34 = vld [vmem:[#allocation46 + $0x320] sm:$0xff] }
 0x92c   : > { %3536 = vmatpush.msra.mxu1 %v3500_v35  ;;  %v3681_v35 = vld [vmem:[#allocation46 + $0x3a8] sm:$0xff] }
 0x92e   : > { %3537 = vmatpush.msra.mxu1 %v3498_v18  ;;  %v3630_v18 = vld [vmem:[#allocation46 + $0x210] sm:$0xff] }
 0x930   : > { %3538 = vmatpush.msra.mxu1 %v3496_v36  ;;  %v3491_v36 = vld [vmem:[#allocation48 + $0x80] sm:$0xff] }
 0x932   : > { %3539 = vmatpush.msra.mxu1 %v3494_v24  ;;  %v3662_v24 = vld [vmem:[#allocation46 + $0x310] sm:$0xff] }
 0x934   : > { %3540 = vmatpush.msra.mxu1 %v3492_v38  ;;  %v3679_v38 = vld [vmem:[#allocation46 + $0x398] sm:$0xff] }
 0x936   : > { %3541 = vmatpush.msra.mxu1 %v3490_v40  ;;  %v3660_v40 = vld [vmem:[#allocation46 + $0x300] sm:$0xff] }
 0x938   : > { %3542 = vmatpush.msra.mxu1 %v3488_v44  ;;  %v3675_v44 = vld [vmem:[#allocation46 + $0x378] sm:$0xff] }
 0x993   : > { %v3146_v21 = vpop.f32.mrf.mxu0 }
 0x997   : > { %v3187_v27 = vpop.f32.mrf.mxu1 }
 0x99d   : > { %v3126_v23 = vpop.f32.mrf.mxu3 }
 0x99e   : > { %v3147_v25 = vadd.f32 %v3146_v21, %v3126_v23  ;;  %v3378_v21 = vld [vmem:[#allocation45 + $0x30] sm:$0xff]  ;;  %v3379_v23 = vld [vmem:[#allocation45 + $0x38] sm:$0xff] }
 0x99f   : > { %3422 = vmatpush.msra.mxu2 %v3378_v21  ;;  %v3636_v21 = vld [vmem:[#allocation46 + $0x240] sm:$0xff] }
 0x9a0   : > { %v3190_v28 = vadd.f32 %v3187_v27, %v3147_v25  ;;  %v3376_v25 = vld [vmem:[#allocation45 + $0x20] sm:$0xff]  ;;  %v3374_v27 = vld [vmem:[#allocation45 + $0x10] sm:$0xff] }
 0x9a1   : > { %3423 = vmatpush.msra.mxu2 %v3376_v25  ;;  %v3668_v25 = vld [vmem:[#allocation46 + $0x340] sm:$0xff] }
 0x9a2   : > { %v3195_v29 = vadd.f32 %v6253_v26, %v3190_v28  ;;  %v3377_v26 = vld [vmem:[#allocation45 + $0x28] sm:$0xff]  ;;  %v3375_v28 = vld [vmem:[#allocation45 + $0x18] sm:$0xff] }
 0x9a3   : > { %3424 = vmatpush.msra.mxu2 %v3374_v27  ;;  %v3634_v27 = vld [vmem:[#allocation46 + $0x230] sm:$0xff] }
 0x9a4   : > { %v3196_v31 = vmax.f32 %v3195_v29, 0.0  ;;  %v3372_v29 = vld [vmem:[#allocation45] sm:$0xff] }
 0x9a5   : > { %3425 = vmatpush.msra.mxu2 %v3372_v29  ;;  %v3666_v29 = vld [vmem:[#allocation46 + $0x330] sm:$0xff] }
 0x9a6   : > { %v8329_v11 = vadd.f32 %v3196_v31, %v8318_v19  ;;  %v3263_v19 = vld [vmem:[#allocation42 + $0x90] sm:$0xff] }
 0x9a7   : > { %3296 = vmatpush.msra.mxu3 %v3263_v19  ;;  %v3373_v31 = vld [vmem:[#allocation45 + $0x8] sm:$0xff]  ;;  %v3690_v19 = vld [vmem:[#allocation46 + $0x3f0] sm:$0xff] }
 0x9a8   : > { %3234 = vmatmul.f32.vlgmr.msrb.gmra.mxu2 %v8329_v11 }
 0x9a9   : > { %3297 = vmatpush.msra.mxu3 %v3262_v42  ;;  %3704 = vmatpush.msrb.mxu2 %v3658_v39  ;;  %v3688_v42 = vld [vmem:[#allocation46 + $0x3e0] sm:$0xff] }
 0x9aa   : > { %v3628_v39 = vld [vmem:[#allocation46 + $0x200] sm:$0xff] }
 0x9ab   : > { %3298 = vmatpush.msra.mxu3 %v3261_v43  ;;  %3705 = vmatpush.msrb.mxu2 %v3656_v41  ;;  %v3677_v41 = vld [vmem:[#allocation46 + $0x388] sm:$0xff] }
 0x9ad   : > { %3430 = vmatpush.msrb.mxu3 %v3403_v46  ;;  %v3686_v46 = vld [vmem:[#allocation46 + $0x3d0] sm:$0xff]  ;;  %3706 = vmatpush.msrb.mxu2 %v3654_v45  ;;  %v3591_v45 = vld [vmem:[#allocation46 + $0xe0] sm:$0xff] }
 0x9af   : > { %3431 = vmatpush.msrb.mxu3 %v3401_v48  ;;  %v6255_v48 = vld [vmem:[#allocation43] ss:$0 sm:$0xff]  ;;  %3707 = vmatpush.msrb.mxu2 %v3652_v51  ;;  %v3621_v51 = vld [vmem:[#allocation46 + $0x1d0] sm:$0xff] }
 0x9b1   : > { %3432 = vmatpush.msrb.mxu3 %v3399_v50  ;;  %v3486_v50 = vld [vmem:[#allocation48 + $0x58] sm:$0xff] }
 0x9b2   : > { %3543 = vmatpush.msra.mxu1 %v3486_v50  ;;  %v3483_v50 = vld [vmem:[#allocation48 + $0x40] sm:$0xff] }
 0x9b3   : > { %3433 = vmatpush.msrb.mxu3 %v3397_v52  ;;  %v3684_v52 = vld [vmem:[#allocation46 + $0x3c0] sm:$0xff] }
 0x9b5   : > { %3434 = vmatpush.msrb.mxu3 %v3395_v54  ;;  %v3484_v54 = vld [vmem:[#allocation48 + $0x48] sm:$0xff] }
 0x9b6   : > { %3544 = vmatpush.msra.mxu1 %v3484_v54  ;;  %v3481_v54 = vld [vmem:[#allocation48 + $0x30] sm:$0xff] }
 0x9b7   : > { %3435 = vmatpush.msrb.mxu3 %v3393_v4  ;;  %v3676_v4 = vld [vmem:[#allocation46 + $0x380] sm:$0xff] }
 0x9b9   : > { %3436 = vmatpush.msrb.mxu3 %v3391_v6  ;;  %v3642_v6 = vld [vmem:[#allocation46 + $0x270] sm:$0xff] }
 0x9bb   : > { %3437 = vmatpush.msrb.mxu3 %v3389_v8  ;;  %v3691_v8 = vld [vmem:[#allocation46 + $0x3f8] sm:$0xff] }
 0x9bd   : > { %3438 = vmatpush.msrb.mxu3 %v3387_v10  ;;  %v3501_v10 = vld [vmem:[#allocation48 + $0xd0] sm:$0xff] }
 0x9bf   : > { %3439 = vmatpush.msrb.mxu3 %v3385_v14  ;;  %v3689_v14 = vld [vmem:[#allocation46 + $0x3e8] sm:$0xff] }
 0x9c1   : > { %3440 = vmatpush.msrb.mxu3 %v3383_v16  ;;  %v3499_v16 = vld [vmem:[#allocation48 + $0xc0] sm:$0xff] }
 0x9c3   : > { %3441 = vmatpush.msrb.mxu3 %v3381_v20  ;;  %v3687_v20 = vld [vmem:[#allocation46 + $0x3d8] sm:$0xff] }
 0x9c5   : > { %3442 = vmatpush.msrb.mxu3 %v3379_v23  ;;  %v3497_v23 = vld [vmem:[#allocation48 + $0xb0] sm:$0xff] }
 0x9c7   : > { %3443 = vmatpush.msrb.mxu3 %v3377_v26  ;;  %v3685_v26 = vld [vmem:[#allocation46 + $0x3c8] sm:$0xff] }
 0x9c9   : > { %3444 = vmatpush.msrb.mxu3 %v3375_v28  ;;  %v3495_v28 = vld [vmem:[#allocation48 + $0xa0] sm:$0xff] }
 0x9cb   : > { %3445 = vmatpush.msrb.mxu3 %v3373_v31  ;;  %v3683_v31 = vld [vmem:[#allocation46 + $0x3b8] sm:$0xff] }
 0xa2b   : > { %v3235_v56 = vpop.f32.mrf.mxu2 }
 0xa2c   : > { %v3236_v57 = vadd.f32 %v6254_v55, %v3235_v56  ;;  %v3650_v55 = vld [vmem:[#allocation46 + $0x2b0] sm:$0xff] }
 0xa2d   : > { %v3682_v56 = vld [vmem:[#allocation46 + $0x3b0] sm:$0xff]  ;;  %3708 = vmatpush.msrb.mxu2 %v3650_v55  ;;  %v3619_v55 = vld [vmem:[#allocation46 + $0x1c0] sm:$0xff] }
 0xa2e   : > { %v3238_v58 = vmax.f32 %v3236_v57, 0.0 }
 0xa30   : > { %v3240_v13 = vrot.slane %v3238_v58, 7  ;;  %v3482_v58 = vld [vmem:[#allocation48 + $0x38] sm:$0xff] }
 0xa31   : > { %3545 = vmatpush.msra.mxu1 %v3482_v58  ;;  %v3479_v58 = vld [vmem:[#allocation48 + $0x20] sm:$0xff] }
 0xa32   : > { %v3242_v59 = vsel %vm2049_vm1, 0.0, %v3240_v13  ;;  %v3243_v60 = vsel %vm2049_vm1, %v3240_v13, 0.0  ;;  %5909 = vmatmul.msk.f32.vlgmr.msrb.gmra.mxu0 %vm8282_vm7, %v3240_v13  ;;  %v3648_v13 = vld [vmem:[#allocation46 + $0x2a0] sm:$0xff] }
 0xa33   : > { %v3279_v61 = vrot.slane %v3242_v59, 1  ;;  %v3280_v62 = vrot.slane %v3243_v60, 1  ;;  %v3340_v63 = vrot.slane %v3242_v59, 2  ;;  %v3341_v0 = vrot.slane %v3243_v60, 2  ;;  %v3680_v59 = vld [vmem:[#allocation46 + $0x3a0] sm:$0xff]  ;;  %3709 = vmatpush.msrb.mxu2 %v3648_v13  ;;  %v3617_v13 = vld [vmem:[#allocation46 + $0x1b0] sm:$0xff] }
 0xa35   : > { %v3281_v1 = vsel %vm2076_vm3, %v3279_v61, %v3280_v62  ;;  %v3342_v2 = vsel %vm2146_vm4, %v3340_v63, %v3341_v0  ;;  %v3480_v61 = vld [vmem:[#allocation48 + $0x28] sm:$0xff]  ;;  %v3646_v62 = vld [vmem:[#allocation46 + $0x290] sm:$0xff] }
 0xa36   : > { %3299 = vmatmul.f32.vlgmr.msra.gmra.mxu3 %v3281_v1  ;;  %3360 = vmatmul.f32.vlgmr.msrb.gmra.mxu1 %v3342_v2  ;;  %v3678_v63 = vld [vmem:[#allocation46 + $0x390] sm:$0xff]  ;;  %v3478_v1 = vld [vmem:[#allocation48 + $0x18] sm:$0xff]  ;;  %v3644_v2 = vld [vmem:[#allocation46 + $0x280] sm:$0xff] }
 0xa37   : > { %3724 = vmatpush.msra.mxu3 %v3690_v19  ;;  %3546 = vmatpush.msra.mxu1 %v3480_v61  ;;  %v3489_v19 = vld [vmem:[#allocation48 + $0x70] sm:$0xff] }
 0xa38   : > { %3710 = vmatpush.msrb.mxu2 %v3646_v62  ;;  %v3477_v61 = vld [vmem:[#allocation48 + $0x10] sm:$0xff]  ;;  %v3615_v62 = vld [vmem:[#allocation46 + $0x1a0] sm:$0xff] }
 0xa39   : > { %3725 = vmatpush.msra.mxu3 %v3688_v42  ;;  %3547 = vmatpush.msra.mxu1 %v3478_v1  ;;  %v3593_v42 = vld [vmem:[#allocation46 + $0xf0] sm:$0xff]  ;;  %v3475_v1 = vld [vmem:[#allocation48] sm:$0xff] }
 0xa3a   : > { %3711 = vmatpush.msrb.mxu2 %v3644_v2  ;;  %v3613_v2 = vld [vmem:[#allocation46 + $0x190] sm:$0xff] }
 0xa3b   : > { %3726 = vmatpush.msra.mxu3 %v3686_v46  ;;  %3548 = vmatpush.msra.mxu1 %v3476_v5  ;;  %v3485_v46 = vld [vmem:[#allocation48 + $0x50] sm:$0xff]  ;;  %v3579_v5 = vld [vmem:[#allocation46 + $0x80] sm:$0xff] }
 0xa3c   : > { %3712 = vmatpush.msrb.mxu2 %v3642_v6  ;;  %v3611_v6 = vld [vmem:[#allocation46 + $0x180] sm:$0xff] }
 0xa3d   : > { %3727 = vmatpush.msra.mxu3 %v3684_v52  ;;  %3764 = vmatpush.msrb.mxu1 %v3691_v8  ;;  %v3671_v52 = vld [vmem:[#allocation46 + $0x358] sm:$0xff]  ;;  %v3653_v8 = vld [vmem:[#allocation46 + $0x2c8] sm:$0xff] }
 0xa3e   : > { %3713 = vmatpush.msrb.mxu2 %v3640_v9  ;;  %v3651_v9 = vld [vmem:[#allocation46 + $0x2b8] sm:$0xff] }
 0xa3f   : > { %3728 = vmatpush.msra.mxu3 %v3682_v56  ;;  %3765 = vmatpush.msrb.mxu1 %v3689_v14  ;;  %v3669_v56 = vld [vmem:[#allocation46 + $0x348] sm:$0xff] }
 0xa40   : > { %3714 = vmatpush.msrb.mxu2 %v3638_v15  ;;  %v3645_v14 = vld [vmem:[#allocation46 + $0x288] sm:$0xff]  ;;  %v3643_v15 = vld [vmem:[#allocation46 + $0x278] sm:$0xff] }
 0xa41   : > { %3729 = vmatpush.msra.mxu3 %v3680_v59  ;;  %3766 = vmatpush.msrb.mxu1 %v3687_v20  ;;  %v3667_v59 = vld [vmem:[#allocation46 + $0x338] sm:$0xff]  ;;  %v3637_v20 = vld [vmem:[#allocation46 + $0x248] sm:$0xff] }
 0xa42   : > { %3715 = vmatpush.msrb.mxu2 %v3636_v21  ;;  %v3635_v21 = vld [vmem:[#allocation46 + $0x238] sm:$0xff] }
 0xa43   : > { %3730 = vmatpush.msra.mxu3 %v3678_v63  ;;  %3767 = vmatpush.msrb.mxu1 %v3685_v26  ;;  %v3665_v63 = vld [vmem:[#allocation46 + $0x328] sm:$0xff] }
 0xa44   : > { %3716 = vmatpush.msrb.mxu2 %v3634_v27  ;;  %v3629_v26 = vld [vmem:[#allocation46 + $0x208] sm:$0xff] }
 0xa45   : > { %3731 = vmatpush.msra.mxu3 %v3676_v4  ;;  %3768 = vmatpush.msrb.mxu1 %v3683_v31  ;;  %v3663_v4 = vld [vmem:[#allocation46 + $0x318] sm:$0xff]  ;;  %v3661_v27 = vld [vmem:[#allocation46 + $0x308] sm:$0xff]  ;;  %v3575_v31 = vld [vmem:[#allocation46 + $0x60] sm:$0xff] }
 0xa46   : > { %3717 = vmatpush.msrb.mxu2 %v3632_v32  ;;  %v3607_v32 = vld [vmem:[#allocation46 + $0x160] sm:$0xff] }
 0xa47   : > { %3769 = vmatpush.msrb.mxu1 %v3681_v35  ;;  %v3571_v35 = vld [vmem:[#allocation46 + $0x40] sm:$0xff] }
 0xa48   : > { %3718 = vmatpush.msrb.mxu2 %v3630_v18  ;;  %v3603_v18 = vld [vmem:[#allocation46 + $0x140] sm:$0xff] }
 0xa49   : > { %3770 = vmatpush.msrb.mxu1 %v3679_v38  ;;  %v3567_v38 = vld [vmem:[#allocation46 + $0x20] sm:$0xff] }
 0xa4a   : > { %3719 = vmatpush.msrb.mxu2 %v3628_v39  ;;  %v3599_v39 = vld [vmem:[#allocation46 + $0x120] sm:$0xff] }
 0xa4b   : > { %3771 = vmatpush.msrb.mxu1 %v3677_v41  ;;  %v3563_v41 = vld [vmem:[#allocation46] sm:$0xff] }
 0xa4d   : > { %3772 = vmatpush.msrb.mxu1 %v3675_v44  ;;  %v3626_v44 = vld [vmem:[#allocation46 + $0x1f8] sm:$0xff] }
 0xaaf   : > { %v3320_v30 = vpop.f32.mrf.mxu0 }
 0xab3   : > { %v3361_v49 = vpop.f32.mrf.mxu1 }
 0xab9   : > { %v3300_v43 = vpop.f32.mrf.mxu3 }
 0xaba   : > { %v3321_v47 = vadd.f32 %v3320_v30, %v3300_v43  ;;  %v3487_v30 = vld [vmem:[#allocation48 + $0x60] sm:$0xff]  ;;  %v3625_v43 = vld [vmem:[#allocation46 + $0x1f0] sm:$0xff] }
 0xabc   : > { %v3364_v53 = vadd.f32 %v3361_v49, %v3321_v47  ;;  %v3623_v47 = vld [vmem:[#allocation46 + $0x1e0] sm:$0xff]  ;;  %v3589_v49 = vld [vmem:[#allocation46 + $0xd0] sm:$0xff] }
 0xabe   : > { %v3369_v57 = vadd.f32 %v6255_v48, %v3364_v53  ;;  %v3673_v48 = vld [vmem:[#allocation46 + $0x368] sm:$0xff]  ;;  %v3587_v53 = vld [vmem:[#allocation46 + $0xc0] sm:$0xff] }
 0xabf   : > { %3773 = vmatpush.msrb.mxu1 %v3673_v48 }
 0xac0   : > { %v3370_v60 = vmax.f32 %v3369_v57, 0.0  ;;  %v3585_v57 = vld [vmem:[#allocation46 + $0xb0] sm:$0xff] }
 0xac1   : > { %3774 = vmatpush.msrb.mxu1 %v3671_v52 }
 0xac2   : > { %v3371_v0 = vadd.f32 %v3370_v60, %v8329_v11  ;;  %v3674_v11 = vld [vmem:[#allocation46 + $0x370] sm:$0xff]  ;;  %v3583_v60 = vld [vmem:[#allocation46 + $0xa0] sm:$0xff] }
 0xac3   : > { %3732 = vmatpush.msra.mxu3 %v3674_v11  ;;  %3775 = vmatpush.msrb.mxu1 %v3669_v56  ;;  %v3655_v11 = vld [vmem:[#allocation46 + $0x2d8] sm:$0xff]  ;;  %v3588_v56 = vld [vmem:[#allocation46 + $0xc8] sm:$0xff] }
 0xac4   : > { %3426 = vmatmul.f32.vlgmr.msra.gmra.mxu2 %v3371_v0  ;;  %3446 = vmatmul.f32.vlgmr.msrb.gmra.mxu3 %v3371_v0 }
 0xac5   : > { %3470 = vmatpush.msra.mxu0 %v3371_v0  ;;  %3733 = vmatpush.msra.mxu3 %v3672_v12  ;;  %v3581_v0 = vld [vmem:[#allocation46 + $0x90] sm:$0xff]  ;;  %v3647_v12 = vld [vmem:[#allocation46 + $0x298] sm:$0xff] }
 0xac6   : > { %5910 = vmatmul.msk.f32.vlgmr.msra.gmra.mxu0 %vm3452_vm8, %v8277_v22  ;;  %3784 = vmatpush.msra.mxu2 %v3593_v42  ;;  %v3595_v42 = vld [vmem:[#allocation46 + $0x100] sm:$0xff] }
 0xac7   : > { %3513 = vmatpush.msrb.mxu0 %v3505_v3  ;;  %3734 = vmatpush.msra.mxu3 %v3670_v17  ;;  %v3659_v3 = vld [vmem:[#allocation46 + $0x2f8] sm:$0xff] }
 0xac8   : > { %3785 = vmatpush.msra.mxu2 %v3591_v45  ;;  %3776 = vmatpush.msrb.mxu1 %v3667_v59  ;;  %v3639_v17 = vld [vmem:[#allocation46 + $0x258] sm:$0xff] }
 0xac9   : > { %3514 = vmatpush.msrb.mxu0 %v3503_v7  ;;  %3735 = vmatpush.msra.mxu3 %v3668_v25  ;;  %v3657_v7 = vld [vmem:[#allocation46 + $0x2e8] sm:$0xff]  ;;  %v3631_v25 = vld [vmem:[#allocation46 + $0x218] sm:$0xff] }
 0xaca   : > { %3786 = vmatpush.msra.mxu2 %v3589_v49  ;;  %3777 = vmatpush.msrb.mxu1 %v3665_v63  ;;  %v3586_v59 = vld [vmem:[#allocation46 + $0xb8] sm:$0xff]  ;;  %v3584_v63 = vld [vmem:[#allocation46 + $0xa8] sm:$0xff] }
 0xacb   : > { %3515 = vmatpush.msrb.mxu0 %v3501_v10  ;;  %3736 = vmatpush.msra.mxu3 %v3666_v29  ;;  %v3649_v10 = vld [vmem:[#allocation46 + $0x2a8] sm:$0xff]  ;;  %v3609_v29 = vld [vmem:[#allocation46 + $0x170] sm:$0xff] }
 0xacc   : > { %3787 = vmatpush.msra.mxu2 %v3587_v53  ;;  %3778 = vmatpush.msrb.mxu1 %v3663_v4 }
 0xacd   : > { %3516 = vmatpush.msrb.mxu0 %v3499_v16  ;;  %3737 = vmatpush.msra.mxu3 %v3664_v34  ;;  %v3641_v16 = vld [vmem:[#allocation46 + $0x268] sm:$0xff]  ;;  %v3605_v34 = vld [vmem:[#allocation46 + $0x150] sm:$0xff] }
 0xace   : > { %3788 = vmatpush.msra.mxu2 %v3585_v57  ;;  %3779 = vmatpush.msrb.mxu1 %v3661_v27  ;;  %v3620_v57 = vld [vmem:[#allocation46 + $0x1c8] sm:$0xff] }
 0xacf   : > { %3517 = vmatpush.msrb.mxu0 %v3497_v23  ;;  %3738 = vmatpush.msra.mxu3 %v3662_v24  ;;  %v3633_v23 = vld [vmem:[#allocation46 + $0x228] sm:$0xff]  ;;  %v3601_v24 = vld [vmem:[#allocation46 + $0x130] sm:$0xff] }
 0xad0   : > { %3789 = vmatpush.msra.mxu2 %v3583_v60  ;;  %v3618_v60 = vld [vmem:[#allocation46 + $0x1b8] sm:$0xff]  ;;  %v3608_v27 = vld [vmem:[#allocation46 + $0x168] sm:$0xff] }
 0xad1   : > { %3518 = vmatpush.msrb.mxu0 %v3495_v28  ;;  %3739 = vmatpush.msra.mxu3 %v3660_v40  ;;  %v3577_v28 = vld [vmem:[#allocation46 + $0x70] sm:$0xff] }
 0xad2   : > { %3790 = vmatpush.msra.mxu2 %v3581_v0  ;;  %v3597_v40 = vld [vmem:[#allocation46 + $0x110] sm:$0xff]  ;;  %v3616_v0 = vld [vmem:[#allocation46 + $0x1a8] sm:$0xff] }
 0xad3   : > { %3519 = vmatpush.msrb.mxu0 %v3493_v33  ;;  %3804 = vmatpush.msrb.mxu3 %v3625_v43  ;;  %v3573_v33 = vld [vmem:[#allocation46 + $0x50] sm:$0xff]  ;;  %v3594_v43 = vld [vmem:[#allocation46 + $0xf8] sm:$0xff] }
 0xad4   : > { %3791 = vmatpush.msra.mxu2 %v3579_v5 }
 0xad5   : > { %3520 = vmatpush.msrb.mxu0 %v3491_v36  ;;  %3805 = vmatpush.msrb.mxu3 %v3623_v47  ;;  %v3569_v36 = vld [vmem:[#allocation46 + $0x30] sm:$0xff]  ;;  %v3624_v47 = vld [vmem:[#allocation46 + $0x1e8] sm:$0xff] }
 0xad6   : > { %3792 = vmatpush.msra.mxu2 %v3577_v28  ;;  %v3891_v28 = vld [vmem:[#allocation46 + $0x4d0] sm:$0xff] }
 0xad7   : > { %3521 = vmatpush.msrb.mxu0 %v3489_v19  ;;  %3806 = vmatpush.msrb.mxu3 %v3621_v51  ;;  %v3565_v19 = vld [vmem:[#allocation46 + $0x10] sm:$0xff]  ;;  %v3622_v51 = vld [vmem:[#allocation46 + $0x1d8] sm:$0xff] }
 0xad8   : > { %3793 = vmatpush.msra.mxu2 %v3575_v31  ;;  %v3574_v31 = vld [vmem:[#allocation46 + $0x58] sm:$0xff] }
 0xad9   : > { %3522 = vmatpush.msrb.mxu0 %v3487_v30  ;;  %3807 = vmatpush.msrb.mxu3 %v3619_v55  ;;  %v3404_v30 = vld [vmem:[%s8606_s6] sm:$0x3] }
 0xada   : > { %3794 = vmatpush.msra.mxu2 %v3573_v33  ;;  %v3406_v48 = vperm.slane %v3404_v30, 0  ;;  %v3407_v49 = vperm.slane %v3404_v30, 1  ;;  %v3889_v33 = vld [vmem:[#allocation46 + $0x4c0] sm:$0xff]  ;;  %v3883_v30 = vld [vmem:[#allocation46 + $0x490] sm:$0xff] }
 0xadb   : > { %3523 = vmatpush.msrb.mxu0 %v3485_v46  ;;  %3808 = vmatpush.msrb.mxu3 %v3617_v13  ;;  %v3592_v46 = vld [vmem:[#allocation46 + $0xe8] sm:$0xff] }
 0xadc   : > { %3795 = vmatpush.msra.mxu2 %v3571_v35  ;;  %v3572_v35 = vld [vmem:[#allocation46 + $0x48] sm:$0xff] }
 0xadd   : > { %3524 = vmatpush.msrb.mxu0 %v3483_v50  ;;  %3809 = vmatpush.msrb.mxu3 %v3615_v62  ;;  %v3590_v50 = vld [vmem:[#allocation46 + $0xd8] sm:$0xff] }
 0xade   : > { %3796 = vmatpush.msra.mxu2 %v3569_v36  ;;  %v3887_v36 = vld [vmem:[#allocation46 + $0x4b0] sm:$0xff] }
 0xadf   : > { %3525 = vmatpush.msrb.mxu0 %v3481_v54  ;;  %3810 = vmatpush.msrb.mxu3 %v3613_v2  ;;  %v3614_v2 = vld [vmem:[#allocation46 + $0x198] sm:$0xff] }
 0xae0   : > { %3797 = vmatpush.msra.mxu2 %v3567_v38  ;;  %v3570_v38 = vld [vmem:[#allocation46 + $0x38] sm:$0xff] }
 0xae1   : > { %3526 = vmatpush.msrb.mxu0 %v3479_v58  ;;  %3811 = vmatpush.msrb.mxu3 %v3611_v6 }
 0xae2   : > { %3798 = vmatpush.msra.mxu2 %v3565_v19  ;;  %v3885_v19 = vld [vmem:[#allocation46 + $0x4a0] sm:$0xff] }
 0xae3   : > { %3527 = vmatpush.msrb.mxu0 %v3477_v61  ;;  %3812 = vmatpush.msrb.mxu3 %v3609_v29  ;;  %v3923_v29 = vld [vmem:[#allocation46 + $0x5d0] sm:$0xff] }
 0xae4   : > { %3799 = vmatpush.msra.mxu2 %v3563_v41  ;;  %v3568_v41 = vld [vmem:[#allocation46 + $0x28] sm:$0xff] }
 0xae5   : > { %3528 = vmatpush.msrb.mxu0 %v3475_v1  ;;  %3813 = vmatpush.msrb.mxu3 %v3607_v32  ;;  %v3582_v1 = vld [vmem:[#allocation46 + $0x98] sm:$0xff] }
 0xae6   : > { %v3606_v32 = vld [vmem:[#allocation46 + $0x158] sm:$0xff] }
 0xae7   : > { %3744 = vmatpush.msra.mxu0 %v3659_v3  ;;  %3814 = vmatpush.msrb.mxu3 %v3605_v34  ;;  %v3921_v34 = vld [vmem:[#allocation46 + $0x5c0] sm:$0xff] }
 0xae9   : > { %3745 = vmatpush.msra.mxu0 %v3657_v7  ;;  %3815 = vmatpush.msrb.mxu3 %v3603_v18  ;;  %v3604_v18 = vld [vmem:[#allocation46 + $0x148] sm:$0xff] }
 0xaeb   : > { %3746 = vmatpush.msra.mxu0 %v3655_v11  ;;  %3816 = vmatpush.msrb.mxu3 %v3601_v24  ;;  %v3919_v24 = vld [vmem:[#allocation46 + $0x5b0] sm:$0xff] }
 0xaed   : > { %3747 = vmatpush.msra.mxu0 %v3653_v8  ;;  %3817 = vmatpush.msrb.mxu3 %v3599_v39  ;;  %v3602_v39 = vld [vmem:[#allocation46 + $0x138] sm:$0xff] }
 0xaef   : > { %3748 = vmatpush.msra.mxu0 %v3651_v9  ;;  %3818 = vmatpush.msrb.mxu3 %v3597_v40  ;;  %v3917_v40 = vld [vmem:[#allocation46 + $0x5a0] sm:$0xff] }
 0xaf1   : > { %3749 = vmatpush.msra.mxu0 %v3649_v10  ;;  %3819 = vmatpush.msrb.mxu3 %v3595_v42  ;;  %v3580_v10 = vld [vmem:[#allocation46 + $0x88] sm:$0xff] }
 0xaf2   : > { %v3600_v42 = vld [vmem:[#allocation46 + $0x128] sm:$0xff] }
 0xaf3   : > { %3750 = vmatpush.msra.mxu0 %v3647_v12  ;;  %v3612_v12 = vld [vmem:[#allocation46 + $0x188] sm:$0xff] }
 0xaf5   : > { %3751 = vmatpush.msra.mxu0 %v3645_v14 }
 0xaf7   : > { %3752 = vmatpush.msra.mxu0 %v3643_v15 }
 0xaf9   : > { %3753 = vmatpush.msra.mxu0 %v3641_v16  ;;  %v3895_v16 = vld [vmem:[#allocation46 + $0x4f0] sm:$0xff] }
 0xafb   : > { %3754 = vmatpush.msra.mxu0 %v3639_v17  ;;  %v3927_v17 = vld [vmem:[#allocation46 + $0x5f0] sm:$0xff] }
 0xafd   : > { %3755 = vmatpush.msra.mxu0 %v3637_v20  ;;  %v3578_v20 = vld [vmem:[#allocation46 + $0x78] sm:$0xff] }
 0xaff   : > { %3756 = vmatpush.msra.mxu0 %v3635_v21  ;;  %v3610_v21 = vld [vmem:[#allocation46 + $0x178] sm:$0xff] }
 0xb01   : > { %3757 = vmatpush.msra.mxu0 %v3633_v23  ;;  %v3893_v23 = vld [vmem:[#allocation46 + $0x4e0] sm:$0xff] }
 0xb03   : > { %3758 = vmatpush.msra.mxu0 %v3631_v25  ;;  %v3925_v25 = vld [vmem:[#allocation46 + $0x5e0] sm:$0xff] }
 0xb05   : > { %3759 = vmatpush.msra.mxu0 %v3629_v26  ;;  %v3576_v26 = vld [vmem:[#allocation46 + $0x68] sm:$0xff] }
 0xb43   : > { %v3472_v45 = vpop.f32.mrf.mxu0 }
 0xb44   : > { %3529 = vmatmul.f32.vlgmr.msrb.gmra.mxu0 %v3472_v45  ;;  %3549 = vmatmul.f32.vlgmr.msra.gmra.mxu1 %v3472_v45  ;;  %v3598_v45 = vld [vmem:[#allocation46 + $0x118] sm:$0xff] }
 0xb45   : > { %3824 = vmatpush.msrb.mxu0 %v3594_v43  ;;  %3844 = vmatpush.msra.mxu1 %v3626_v44  ;;  %v3915_v43 = vld [vmem:[#allocation46 + $0x590] sm:$0xff]  ;;  %v3566_v44 = vld [vmem:[#allocation46 + $0x18] sm:$0xff] }
 0xb47   : > { %3825 = vmatpush.msrb.mxu0 %v3592_v46  ;;  %3845 = vmatpush.msra.mxu1 %v3624_v47  ;;  %v3427_v52 = vpop.f32.mrf.mxu2  ;;  %v3447_v53 = vpop.f32.mrf.mxu3  ;;  %v3881_v46 = vld [vmem:[#allocation46 + $0x480] sm:$0xff] }
 0xb48   : > { %v3428_v54 = vadd.f32 %v3427_v52, %v3406_v48  ;;  %v3448_v55 = vadd.f32 %v3447_v53, %v3407_v49  ;;  %v3913_v47 = vld [vmem:[#allocation46 + $0x580] sm:$0xff]  ;;  %v3564_v48 = vld [vmem:[#allocation46 + $0x8] sm:$0xff]  ;;  %v3896_v52 = vld [vmem:[#allocation46 + $0x4f8] sm:$0xff] }
 0xb49   : > { %3826 = vmatpush.msrb.mxu0 %v3590_v50  ;;  %3846 = vmatpush.msra.mxu1 %v3622_v51  ;;  %v3596_v49 = vld [vmem:[#allocation46 + $0x108] sm:$0xff]  ;;  %v3879_v50 = vld [vmem:[#allocation46 + $0x470] sm:$0xff]  ;;  %v3928_v53 = vld [vmem:[#allocation46 + $0x5f8] sm:$0xff] }
 0xb4a   : > { %v3450_v58 = vmax.f32 %v3428_v54, 0.0  ;;  %v3451_v13 = vmax.f32 %v3448_v55, 0.0  ;;  %v3911_v51 = vld [vmem:[#allocation46 + $0x570] sm:$0xff]  ;;  %v3877_v54 = vld [vmem:[#allocation46 + $0x460] sm:$0xff] }
 0xb4b   : > { %3827 = vmatpush.msrb.mxu0 %v3588_v56  ;;  %3847 = vmatpush.msra.mxu1 %v3620_v57  ;;  %v3909_v55 = vld [vmem:[#allocation46 + $0x560] sm:$0xff]  ;;  %v3894_v56 = vld [vmem:[#allocation46 + $0x4e8] sm:$0xff] }
 0xb4c   : > { %v8342_v61 = vrot.slane %v3450_v58, 7  ;;  %v8344_v62 = vrot.slane %v3451_v13, 7  ;;  %v3926_v57 = vld [vmem:[#allocation46 + $0x5e8] sm:$0xff]  ;;  %v3875_v58 = vld [vmem:[#allocation46 + $0x450] sm:$0xff] }
 0xb4d   : > { %3828 = vmatpush.msrb.mxu0 %v3586_v59  ;;  %3848 = vmatpush.msra.mxu1 %v3618_v60  ;;  %v3907_v13 = vld [vmem:[#allocation46 + $0x550] sm:$0xff]  ;;  %v3892_v59 = vld [vmem:[#allocation46 + $0x4d8] sm:$0xff] }
 0xb4e   : > { %v8348_v3 = vsel %vm2049_vm1, 0.0, %v8342_v61  ;;  %v8352_v4 = vsel %vm2049_vm1, %v8342_v61, 0.0  ;;  %v8356_v5 = vsel %vm2049_vm1, 0.0, %v8344_v62  ;;  %v8360_v6 = vsel %vm2049_vm1, %v8344_v62, 0.0  ;;  %v3924_v60 = vld [vmem:[#allocation46 + $0x5d8] sm:$0xff] }
 0xb4f   : > { %3829 = vmatpush.msrb.mxu0 %v3584_v63  ;;  %3849 = vmatpush.msra.mxu1 %v3616_v0  ;;  %v3696_v7 = vrot.slane %v8348_v3, 1  ;;  %v3697_v11 = vrot.slane %v8352_v4, 1  ;;  %v3699_v8 = vrot.slane %v8356_v5, 1  ;;  %v3700_v9 = vrot.slane %v8360_v6, 1  ;;  %v3905_v63 = vld [vmem:[#allocation46 + $0x540] sm:$0xff]  ;;  %v3871_v0 = vld [vmem:[#allocation46 + $0x430] sm:$0xff] }
 0xb51   : > { %3830 = vmatpush.msrb.mxu0 %v3582_v1  ;;  %3850 = vmatpush.msra.mxu1 %v3614_v2  ;;  %v3698_v14 = vsel %vm2076_vm3, %v3696_v7, %v3697_v11  ;;  %v3701_v15 = vsel %vm2076_vm3, %v3699_v8, %v3700_v9  ;;  %v3903_v1 = vld [vmem:[#allocation46 + $0x530] sm:$0xff]  ;;  %v3888_v2 = vld [vmem:[#allocation46 + $0x4b8] sm:$0xff]  ;;  %v3869_v11 = vld [vmem:[#allocation46 + $0x420] sm:$0xff] }
 0xb52   : > { %3720 = vmatmul.f32.vlgmr.msrb.gmra.mxu2 %v3698_v14  ;;  %3740 = vmatmul.f32.vlgmr.msra.gmra.mxu3 %v3701_v15  ;;  %v3920_v7 = vld [vmem:[#allocation46 + $0x5b8] sm:$0xff]  ;;  %v3901_v8 = vld [vmem:[#allocation46 + $0x520] sm:$0xff]  ;;  %v3886_v9 = vld [vmem:[#allocation46 + $0x4a8] sm:$0xff] }
 0xb53   : > { %3831 = vmatpush.msrb.mxu0 %v3580_v10  ;;  %3851 = vmatpush.msra.mxu1 %v3612_v12  ;;  %v3918_v10 = vld [vmem:[#allocation46 + $0x5a8] sm:$0xff]  ;;  %v3867_v12 = vld [vmem:[#allocation46 + $0x410] sm:$0xff] }
 0xb54   : > { %3760 = vmatmul.f32.vlgmr.msra.gmra.mxu0 %v3698_v14  ;;  %3780 = vmatmul.f32.vlgmr.msrb.gmra.mxu1 %v3701_v15  ;;  %v3899_v14 = vld [vmem:[#allocation46 + $0x510] sm:$0xff]  ;;  %v3884_v15 = vld [vmem:[#allocation46 + $0x498] sm:$0xff] }
 0xb55   : > { %3937 = vmatpush.msrb.mxu2 %v3895_v16  ;;  %3957 = vmatpush.msra.mxu3 %v3927_v17  ;;  %v3916_v16 = vld [vmem:[#allocation46 + $0x598] sm:$0xff]  ;;  %v3865_v17 = vld [vmem:[#allocation46 + $0x400] sm:$0xff] }
 0xb56   : > { %3832 = vmatpush.msrb.mxu0 %v3578_v20  ;;  %3852 = vmatpush.msra.mxu1 %v3610_v21  ;;  %v3897_v20 = vld [vmem:[#allocation46 + $0x500] sm:$0xff]  ;;  %v3929_v21 = vrot.slane %v8348_v3, 2 }
 0xb57   : > { %3938 = vmatpush.msrb.mxu2 %v3893_v23  ;;  %3958 = vmatpush.msra.mxu3 %v3925_v25  ;;  %v3930_v23 = vrot.slane %v8352_v4, 2  ;;  %v3932_v25 = vrot.slane %v8356_v5, 2  ;;  %v3878_v5 = vld [vmem:[#allocation46 + $0x468] sm:$0xff] }
 0xb58   : > { %3833 = vmatpush.msrb.mxu0 %v3576_v26  ;;  %3853 = vmatpush.msra.mxu1 %v3608_v27  ;;  %v3933_v26 = vrot.slane %v8360_v6, 2  ;;  %v3882_v27 = vld [vmem:[#allocation46 + $0x488] sm:$0xff] }
 0xb59   : > { %3939 = vmatpush.msrb.mxu2 %v3891_v28  ;;  %3959 = vmatpush.msra.mxu3 %v3923_v29  ;;  %v3914_v28 = vld [vmem:[#allocation46 + $0x588] sm:$0xff]  ;;  %v3880_v29 = vld [vmem:[#allocation46 + $0x478] sm:$0xff]  ;;  %v3931_v3 = vsel %vm2146_vm4, %v3929_v21, %v3930_v23  ;;  %v4083_v23 = vld [vmem:[#allocation49 + $0x70] sm:$0xff] }
 0xb5a   : > { %3834 = vmatpush.msrb.mxu0 %v3574_v31  ;;  %3854 = vmatpush.msra.mxu1 %v3606_v32  ;;  %v3912_v31 = vld [vmem:[#allocation46 + $0x578] sm:$0xff]  ;;  %v3934_v4 = vsel %vm2146_vm4, %v3932_v25, %v3933_v26  ;;  %v3910_v6 = vld [vmem:[#allocation46 + $0x568] sm:$0xff] }
 0xb5b   : > { %3940 = vmatpush.msrb.mxu2 %v3889_v33  ;;  %3960 = vmatpush.msra.mxu3 %v3921_v34  ;;  %v3876_v32 = vld [vmem:[#allocation46 + $0x458] sm:$0xff]  ;;  %v3874_v34 = vld [vmem:[#allocation46 + $0x448] sm:$0xff] }
 0xb5c   : > { %3835 = vmatpush.msrb.mxu0 %v3572_v35  ;;  %3855 = vmatpush.msra.mxu1 %v3604_v18  ;;  %v3908_v33 = vld [vmem:[#allocation46 + $0x558] sm:$0xff]  ;;  %v3906_v35 = vld [vmem:[#allocation46 + $0x548] sm:$0xff] }
 0xb5d   : > { %5912 = vmatmul.msk.f32.vlgmr.msra.gmra.mxu2 %vm8282_vm7, %v8342_v61  ;;  %5914 = vmatmul.msk.f32.vlgmr.msrb.gmra.mxu3 %vm8282_vm7, %v8344_v62  ;;  %v3872_v18 = vld [vmem:[#allocation46 + $0x438] sm:$0xff] }
 0xb5e   : > { %3941 = vmatpush.msrb.mxu2 %v3887_v36  ;;  %3961 = vmatpush.msra.mxu3 %v3919_v24  ;;  %v3904_v36 = vld [vmem:[#allocation46 + $0x538] sm:$0xff]  ;;  %v3870_v24 = vld [vmem:[#allocation46 + $0x428] sm:$0xff] }
 0xb5f   : > { %3836 = vmatpush.msrb.mxu0 %v3570_v38  ;;  %3856 = vmatpush.msra.mxu1 %v3602_v39  ;;  %v3902_v38 = vld [vmem:[#allocation46 + $0x528] sm:$0xff]  ;;  %v3868_v39 = vld [vmem:[#allocation46 + $0x418] sm:$0xff] }
 0xb60   : > { %3942 = vmatpush.msrb.mxu2 %v3885_v19  ;;  %3962 = vmatpush.msra.mxu3 %v3917_v40  ;;  %v3900_v19 = vld [vmem:[#allocation46 + $0x518] sm:$0xff]  ;;  %v3866_v40 = vld [vmem:[#allocation46 + $0x408] sm:$0xff] }
 0xb61   : > { %3837 = vmatpush.msrb.mxu0 %v3568_v41  ;;  %3857 = vmatpush.msra.mxu1 %v3600_v42  ;;  %v3898_v41 = vld [vmem:[#allocation46 + $0x508] sm:$0xff]  ;;  %v4084_v25 = vld [vmem:[#allocation49 + $0x78] sm:$0xff] }
 0xb62   : > { %3943 = vmatpush.msrb.mxu2 %v3883_v30  ;;  %3963 = vmatpush.msra.mxu3 %v3915_v43 }
 0xb63   : > { %3838 = vmatpush.msrb.mxu0 %v3566_v44  ;;  %3858 = vmatpush.msra.mxu1 %v3598_v45  ;;  %v4099_v45 = vld [vmem:[#allocation49 + $0xf0] sm:$0xff] }
 0xb64   : > { %3944 = vmatpush.msrb.mxu2 %v3881_v46  ;;  %3964 = vmatpush.msra.mxu3 %v3913_v47  ;;  %v4100_v46 = vld [vmem:[#allocation49 + $0xf8] sm:$0xff]  ;;  %v4097_v47 = vld [vmem:[#allocation49 + $0xe0] sm:$0xff] }
 0xb65   : > { %3839 = vmatpush.msrb.mxu0 %v3564_v48  ;;  %3859 = vmatpush.msra.mxu1 %v3596_v49  ;;  %v4098_v48 = vld [vmem:[#allocation49 + $0xe8] sm:$0xff]  ;;  %v4095_v49 = vld [vmem:[#allocation49 + $0xd0] sm:$0xff] }
 0xb66   : > { %5916 = vmatmul.msk.f32.vlgmr.msrb.gmra.mxu0 %vm8282_vm7, %v8342_v61  ;;  %5918 = vmatmul.msk.f32.vlgmr.msra.gmra.mxu1 %vm8282_vm7, %v8344_v62  ;;  %v3873_v61 = vld [vmem:[#allocation46 + $0x440] sm:$0xff]  ;;  %v3922_v62 = vld [vmem:[#allocation46 + $0x5c8] sm:$0xff] }
 0xb67   : > { %3945 = vmatpush.msrb.mxu2 %v3879_v50  ;;  %3965 = vmatpush.msra.mxu3 %v3911_v51  ;;  %v4096_v50 = vld [vmem:[#allocation49 + $0xd8] sm:$0xff] }
 0xb68   : > { %3977 = vmatpush.msra.mxu0 %v3896_v52  ;;  %3997 = vmatpush.msrb.mxu1 %v3928_v53  ;;  %v4093_v53 = vld [vmem:[#allocation49 + $0xc0] sm:$0xff] }
 0xb69   : > { %3946 = vmatpush.msrb.mxu2 %v3877_v54  ;;  %3966 = vmatpush.msra.mxu3 %v3909_v55  ;;  %v4094_v54 = vld [vmem:[#allocation49 + $0xc8] sm:$0xff]  ;;  %v4132_v55 = vld [vmem:[#allocation49 + $0x1f8] sm:$0xff] }
 0xb6a   : > { %3978 = vmatpush.msra.mxu0 %v3894_v56  ;;  %3998 = vmatpush.msrb.mxu1 %v3926_v57  ;;  %v4130_v56 = vld [vmem:[#allocation49 + $0x1e8] sm:$0xff] }
 0xb6b   : > { %3947 = vmatpush.msrb.mxu2 %v3875_v58  ;;  %3967 = vmatpush.msra.mxu3 %v3907_v13  ;;  %v4091_v13 = vld [vmem:[#allocation49 + $0xb0] sm:$0xff] }
 0xb6c   : > { %3979 = vmatpush.msra.mxu0 %v3892_v59  ;;  %3999 = vmatpush.msrb.mxu1 %v3924_v60  ;;  %v4092_v59 = vld [vmem:[#allocation49 + $0xb8] sm:$0xff] }
 0xb6d   : > { %3948 = vmatpush.msrb.mxu2 %v3873_v61  ;;  %3968 = vmatpush.msra.mxu3 %v3905_v63  ;;  %v4128_v61 = vld [vmem:[#allocation49 + $0x1d8] sm:$0xff]  ;;  %v4089_v63 = vld [vmem:[#allocation49 + $0xa0] sm:$0xff] }
 0xb6e   : > { %3980 = vmatpush.msra.mxu0 %v3890_v37  ;;  %4000 = vmatpush.msrb.mxu1 %v3922_v62  ;;  %v4090_v37 = vld [vmem:[#allocation49 + $0xa8] sm:$0xff] }
 0xb6f   : > { %3949 = vmatpush.msrb.mxu2 %v3871_v0  ;;  %3969 = vmatpush.msra.mxu3 %v3903_v1  ;;  %v4126_v0 = vld [vmem:[#allocation49 + $0x1c8] sm:$0xff] }
 0xb70   : > { %3981 = vmatpush.msra.mxu0 %v3888_v2  ;;  %4001 = vmatpush.msrb.mxu1 %v3920_v7  ;;  %v8391_v1 = vld [vmem:[%s8607_s5] sm:$0x3]  ;;  %v4087_v2 = vld [vmem:[#allocation49 + $0x90] sm:$0xff]  ;;  %v4088_v7 = vld [vmem:[#allocation49 + $0x98] sm:$0xff] }
 0xb71   : > { %3950 = vmatpush.msrb.mxu2 %v3869_v11  ;;  %3970 = vmatpush.msra.mxu3 %v3901_v8  ;;  %v4124_v11 = vld [vmem:[#allocation49 + $0x1b8] sm:$0xff] }
 0xb72   : > { %3982 = vmatpush.msra.mxu0 %v3886_v9  ;;  %4002 = vmatpush.msrb.mxu1 %v3918_v10  ;;  %v4085_v10 = vld [vmem:[#allocation49 + $0x80] sm:$0xff] }
 0xb73   : > { %3951 = vmatpush.msrb.mxu2 %v3867_v12  ;;  %3971 = vmatpush.msra.mxu3 %v3899_v14  ;;  %v4086_v12 = vld [vmem:[#allocation49 + $0x88] sm:$0xff] }
 0xb74   : > { %3983 = vmatpush.msra.mxu0 %v3884_v15  ;;  %4003 = vmatpush.msrb.mxu1 %v3916_v16  ;;  %v4021_v16 = vperm.slane %v8391_v1, 0 }
 0xb75   : > { %3952 = vmatpush.msrb.mxu2 %v3865_v17  ;;  %3972 = vmatpush.msra.mxu3 %v3897_v20  ;;  %v4122_v17 = vld [vmem:[#allocation49 + $0x1a8] sm:$0xff] }
 0xb76   : > { %3984 = vmatpush.msra.mxu0 %v3882_v27  ;;  %4004 = vmatpush.msrb.mxu1 %v3914_v28  ;;  %v4120_v27 = vld [vmem:[#allocation49 + $0x198] sm:$0xff]  ;;  %v4081_v28 = vld [vmem:[#allocation49 + $0x60] sm:$0xff] }
 0xb77   : > { %3953 = vmatmul.f32.vlgmr.msrb.gmra.mxu2 %v3931_v3  ;;  %3973 = vmatmul.f32.vlgmr.msra.gmra.mxu3 %v3934_v4 }
 0xb78   : > { %3985 = vmatpush.msra.mxu0 %v3880_v29  ;;  %4005 = vmatpush.msrb.mxu1 %v3912_v31  ;;  %v4082_v29 = vld [vmem:[#allocation49 + $0x68] sm:$0xff] }
 0xb79   : > { %4139 = vmatpush.msrb.mxu3 %v4099_v45  ;;  %v4074_v45 = vld [vmem:[#allocation49 + $0x28] sm:$0xff] }
 0xb7a   : > { %3986 = vmatpush.msra.mxu0 %v3878_v5  ;;  %4006 = vmatpush.msrb.mxu1 %v3910_v6  ;;  %v4079_v5 = vld [vmem:[#allocation49 + $0x50] sm:$0xff] }
 0xb7b   : > { %4140 = vmatpush.msrb.mxu3 %v4097_v47 }
 0xb7c   : > { %3987 = vmatpush.msra.mxu0 %v3876_v32  ;;  %4007 = vmatpush.msrb.mxu1 %v3908_v33  ;;  %v4080_v33 = vld [vmem:[#allocation49 + $0x58] sm:$0xff] }
 0xb7d   : > { %4141 = vmatpush.msrb.mxu3 %v4095_v49  ;;  %v4129_v49 = vld [vmem:[#allocation49 + $0x1e0] sm:$0xff] }
 0xb7e   : > { %3988 = vmatpush.msra.mxu0 %v3874_v34  ;;  %4008 = vmatpush.msrb.mxu1 %v3906_v35  ;;  %v4077_v34 = vld [vmem:[#allocation49 + $0x40] sm:$0xff]  ;;  %v4116_v35 = vld [vmem:[#allocation49 + $0x178] sm:$0xff] }
 0xb7f   : > { %4142 = vmatpush.msrb.mxu3 %v4093_v53  ;;  %v4121_v53 = vld [vmem:[#allocation49 + $0x1a0] sm:$0xff] }
 0xb80   : > { %3989 = vmatpush.msra.mxu0 %v3872_v18  ;;  %4009 = vmatpush.msrb.mxu1 %v3904_v36  ;;  %v4078_v18 = vld [vmem:[#allocation49 + $0x48] sm:$0xff] }
 0xb81   : > { %4143 = vmatpush.msrb.mxu3 %v4091_v13  ;;  %v4114_v13 = vld [vmem:[#allocation49 + $0x168] sm:$0xff] }
 0xb82   : > { %3990 = vmatpush.msra.mxu0 %v3870_v24  ;;  %4010 = vmatpush.msrb.mxu1 %v3902_v38  ;;  %v4075_v38 = vld [vmem:[#allocation49 + $0x30] sm:$0xff] }
 0xb83   : > { %4144 = vmatpush.msrb.mxu3 %v4089_v63  ;;  %v4112_v63 = vld [vmem:[#allocation49 + $0x158] sm:$0xff] }
 0xb84   : > { %3991 = vmatpush.msra.mxu0 %v3868_v39  ;;  %4011 = vmatpush.msrb.mxu1 %v3900_v19 }
 0xb85   : > { %4145 = vmatpush.msrb.mxu3 %v4087_v2  ;;  %v4105_v2 = vld [vmem:[#allocation49 + $0x120] sm:$0xff] }
 0xb86   : > { %3992 = vmatpush.msra.mxu0 %v3866_v40  ;;  %4012 = vmatpush.msrb.mxu1 %v3898_v41  ;;  %v4022_v40 = vperm.slane %v8391_v1, 1  ;;  %v4076_v41 = vld [vmem:[#allocation49 + $0x38] sm:$0xff] }
 0xb87   : > { %3993 = vmatmul.f32.vlgmr.msra.gmra.mxu0 %v3931_v3  ;;  %4013 = vmatmul.f32.vlgmr.msrb.gmra.mxu1 %v3934_v4  ;;  %v4118_v4 = vld [vmem:[#allocation49 + $0x188] sm:$0xff]  ;;  %v4108_v1 = vld [vmem:[#allocation49 + $0x138] sm:$0xff] }
 0xb88   : > { %4179 = vmatpush.msrb.mxu0 %v4100_v46  ;;  %4199 = vmatpush.msra.mxu1 %v4132_v55  ;;  %v4117_v55 = vld [vmem:[#allocation49 + $0x180] sm:$0xff] }
 0xb89   : > { %4146 = vmatpush.msrb.mxu3 %v4085_v10  ;;  %v4102_v10 = vld [vmem:[#allocation49 + $0x108] sm:$0xff] }
 0xb8a   : > { %4180 = vmatpush.msrb.mxu0 %v4098_v48  ;;  %4200 = vmatpush.msra.mxu1 %v4130_v56  ;;  %v4131_v48 = vld [vmem:[#allocation49 + $0x1f0] sm:$0xff] }
 0xb8b   : > { %4147 = vmatpush.msrb.mxu3 %v4083_v23  ;;  %v4115_v56 = vld [vmem:[#allocation49 + $0x170] sm:$0xff]  ;;  %v4328_v23 = vld [vmem:[#allocation51 + $0x2f8] sm:$0xff] }
 0xb8c   : > { %4181 = vmatpush.msrb.mxu0 %v4096_v50  ;;  %4201 = vmatpush.msra.mxu1 %v4128_v61  ;;  %v4127_v50 = vld [vmem:[#allocation49 + $0x1d0] sm:$0xff]  ;;  %v4070_v61 = vld [vmem:[#allocation49 + $0x8] sm:$0xff] }
 0xb8d   : > { %4148 = vmatpush.msrb.mxu3 %v4081_v28  ;;  %v4326_v28 = vld [vmem:[#allocation51 + $0x2e8] sm:$0xff] }
 0xb8e   : > { %4182 = vmatpush.msrb.mxu0 %v4094_v54  ;;  %4202 = vmatpush.msra.mxu1 %v4126_v0  ;;  %v4119_v54 = vld [vmem:[#allocation49 + $0x190] sm:$0xff] }
 0xb8f   : > { %4149 = vmatpush.msrb.mxu3 %v4079_v5  ;;  %v4107_v0 = vld [vmem:[#allocation49 + $0x130] sm:$0xff]  ;;  %v4321_v5 = vld [vmem:[#allocation51 + $0x2c0] sm:$0xff] }
 0xb90   : > { %4183 = vmatpush.msrb.mxu0 %v4092_v59  ;;  %4203 = vmatpush.msra.mxu1 %v4124_v11  ;;  %v4069_v59 = vld [vmem:[#allocation49] sm:$0xff]  ;;  %v4103_v11 = vld [vmem:[#allocation49 + $0x110] sm:$0xff] }
 0xb91   : > { %4150 = vmatpush.msrb.mxu3 %v4077_v34  ;;  %v4319_v34 = vld [vmem:[#allocation51 + $0x2b0] sm:$0xff] }
 0xb92   : > { %4184 = vmatpush.msrb.mxu0 %v4090_v37  ;;  %4204 = vmatpush.msra.mxu1 %v4122_v17  ;;  %v4109_v37 = vld [vmem:[#allocation49 + $0x140] sm:$0xff]  ;;  %v4355_v17 = vld [vmem:[#allocation51 + $0x3d0] sm:$0xff] }
 0xb93   : > { %4151 = vmatpush.msrb.mxu3 %v4075_v38  ;;  %v4317_v38 = vld [vmem:[#allocation51 + $0x2a0] sm:$0xff] }
 0xb94   : > { %4185 = vmatpush.msrb.mxu0 %v4088_v7  ;;  %4205 = vmatpush.msra.mxu1 %v4120_v27  ;;  %v4106_v7 = vld [vmem:[#allocation49 + $0x128] sm:$0xff] }
 0xb95   : > { %v4354_v27 = vld [vmem:[#allocation51 + $0x3c8] sm:$0xff] }
 0xb96   : > { %4186 = vmatpush.msrb.mxu0 %v4086_v12  ;;  %4206 = vmatpush.msra.mxu1 %v4118_v4  ;;  %v4359_v12 = vld [vmem:[#allocation51 + $0x3f0] sm:$0xff]  ;;  %v4352_v4 = vld [vmem:[#allocation51 + $0x3b8] sm:$0xff] }
 0xb98   : > { %4187 = vmatpush.msrb.mxu0 %v4084_v25  ;;  %4207 = vmatpush.msra.mxu1 %v4116_v35  ;;  %v4325_v25 = vld [vmem:[#allocation51 + $0x2e0] sm:$0xff]  ;;  %v4320_v35 = vld [vmem:[#allocation51 + $0x2b8] sm:$0xff] }
 0xb9a   : > { %4188 = vmatpush.msrb.mxu0 %v4082_v29  ;;  %4208 = vmatpush.msra.mxu1 %v4114_v13  ;;  %v4323_v29 = vld [vmem:[#allocation51 + $0x2d0] sm:$0xff]  ;;  %v4309_v13 = vld [vmem:[#allocation51 + $0x260] sm:$0xff] }
 0xb9c   : > { %4189 = vmatpush.msrb.mxu0 %v4080_v33  ;;  %4209 = vmatpush.msra.mxu1 %v4112_v63  ;;  %v4350_v33 = vld [vmem:[#allocation51 + $0x3a8] sm:$0xff]  ;;  %v4308_v63 = vld [vmem:[#allocation51 + $0x258] sm:$0xff] }
 0xb9e   : > { %4190 = vmatpush.msrb.mxu0 %v4078_v18  ;;  %v4347_v18 = vld [vmem:[#allocation51 + $0x390] sm:$0xff] }
 0xba0   : > { %4191 = vmatpush.msrb.mxu0 %v4076_v41  ;;  %v4315_v41 = vld [vmem:[#allocation51 + $0x290] sm:$0xff] }
 0xba2   : > { %4192 = vmatpush.msrb.mxu0 %v4074_v45  ;;  %v4343_v45 = vld [vmem:[#allocation51 + $0x370] sm:$0xff] }
 0xbc1   : > { %v8386_v43 = vpop.f32.mrf.mxu0  ;;  %v8388_v44 = vpop.f32.mrf.mxu1 }
 0xbd1   : > { %v3761_v57 = vpop.f32.mrf.mxu0  ;;  %v3781_v58 = vpop.f32.mrf.mxu1 }
 0xbd2   : > { %v3782_v31 = vadd.f32 %v3781_v58, %v3761_v57  ;;  %v4071_v57 = vld [vmem:[#allocation49 + $0x10] sm:$0xff]  ;;  %v4113_v58 = vld [vmem:[#allocation49 + $0x160] sm:$0xff] }
 0xbd5   : > { %v3721_v42 = vpop.f32.mrf.mxu2  ;;  %v3741_v30 = vpop.f32.mrf.mxu3 }
 0xbd6   : > { %v3742_v60 = vadd.f32 %v3741_v30, %v3721_v42  ;;  %v4073_v42 = vld [vmem:[#allocation49 + $0x20] sm:$0xff] }
 0xbd7   : > { %4152 = vmatpush.msrb.mxu3 %v4073_v42  ;;  %v4316_v42 = vld [vmem:[#allocation51 + $0x298] sm:$0xff] }
 0xbd9   : > { %4153 = vmatpush.msrb.mxu3 %v4071_v57 }
 0xbdb   : > { %4154 = vmatpush.msrb.mxu3 %v4069_v59  ;;  %v4310_v59 = vld [vmem:[#allocation51 + $0x268] sm:$0xff] }
 0xbe0   : > { %v3801_v51 = vpop.f32.mrf.mxu2  ;;  %v3821_v52 = vpop.f32.mrf.mxu3 }
 0xbe1   : > { %v3802_v62 = vadd.f32 %v3801_v51, %v3742_v60  ;;  %v4125_v51 = vld [vmem:[#allocation49 + $0x1c0] sm:$0xff]  ;;  %v4111_v60 = vld [vmem:[#allocation49 + $0x150] sm:$0xff] }
 0xbe3   : > { %v3822_v14 = vadd.f32 %v3821_v52, %v3802_v62  ;;  %v3841_v20 = vpop.f32.mrf.mxu0  ;;  %v3861_v21 = vpop.f32.mrf.mxu1  ;;  %v4123_v52 = vld [vmem:[#allocation49 + $0x1b0] sm:$0xff]  ;;  %v4110_v62 = vld [vmem:[#allocation49 + $0x148] sm:$0xff] }
 0xbe4   : > { %v3842_v6 = vadd.f32 %v3841_v20, %v3782_v31  ;;  %4210 = vmatpush.msra.mxu1 %v4110_v62  ;;  %v4356_v20 = vld [vmem:[#allocation51 + $0x3d8] sm:$0xff]  ;;  %v4333_v62 = vld [vmem:[#allocation51 + $0x320] sm:$0xff] }
 0xbe5   : > { %v4324_v31 = vld [vmem:[#allocation51 + $0x2d8] sm:$0xff] }
 0xbe6   : > { %v3862_v39 = vadd.f32 %v3861_v21, %v3842_v6  ;;  %4211 = vmatpush.msra.mxu1 %v4108_v1  ;;  %v4327_v21 = vld [vmem:[#allocation51 + $0x2f0] sm:$0xff]  ;;  %v4322_v6 = vld [vmem:[#allocation51 + $0x2c8] sm:$0xff]  ;;  %v4305_v1 = vld [vmem:[#allocation51 + $0x240] sm:$0xff] }
 0xbe7   : > { %4367 = vmatpush.msra.mxu3 %v4327_v21  ;;  %v4301_v21 = vld [vmem:[#allocation51 + $0x220] sm:$0xff] }
 0xbe8   : > { %4212 = vmatpush.msra.mxu1 %v4106_v7  ;;  %v4331_v7 = vld [vmem:[#allocation51 + $0x310] sm:$0xff] }
 0xbe9   : > { %4368 = vmatpush.msra.mxu3 %v4325_v25  ;;  %v4293_v25 = vld [vmem:[#allocation51 + $0x1e8] sm:$0xff] }
 0xbeb   : > { %4369 = vmatpush.msra.mxu3 %v4323_v29  ;;  %v4291_v29 = vld [vmem:[#allocation51 + $0x1d8] sm:$0xff] }
 0xbed   : > { %4370 = vmatpush.msra.mxu3 %v4321_v5  ;;  %v4288_v5 = vld [vmem:[#allocation51 + $0x1c0] sm:$0xff] }
 0xbef   : > { %4371 = vmatpush.msra.mxu3 %v4319_v34  ;;  %v4286_v34 = vld [vmem:[#allocation51 + $0x1b0] sm:$0xff] }
 0xbf1   : > { %4372 = vmatpush.msra.mxu3 %v4317_v38  ;;  %v4259_v38 = vld [vmem:[#allocation51 + $0xd8] sm:$0xff] }
 0xbf3   : > { %4373 = vmatpush.msra.mxu3 %v4315_v41  ;;  %v4257_v41 = vld [vmem:[#allocation51 + $0xc8] sm:$0xff] }
 0xbfa   : > { %v3954_v8 = vpop.f32.mrf.mxu2  ;;  %v3974_v9 = vpop.f32.mrf.mxu3 }
 0xbfb   : > { %v3975_v15 = vadd.f32 %v3974_v9, %v3954_v8  ;;  %v4104_v8 = vld [vmem:[#allocation49 + $0x118] sm:$0xff]  ;;  %v4101_v9 = vld [vmem:[#allocation49 + $0x100] sm:$0xff] }
 0xbfc   : > { %4213 = vmatpush.msra.mxu1 %v4104_v8  ;;  %v4303_v8 = vld [vmem:[#allocation51 + $0x230] sm:$0xff] }
 0xbfd   : > { %v4017_v26 = vadd.f32 %v3975_v15, %v3822_v14  ;;  %v4360_v14 = vld [vmem:[#allocation51 + $0x3f8] sm:$0xff]  ;;  %v4357_v15 = vld [vmem:[#allocation51 + $0x3e0] sm:$0xff] }
 0xbfe   : > { %4214 = vmatpush.msra.mxu1 %v4102_v10 }
 0xbff   : > { %v4025_v3 = vadd.f32 %v4021_v16, %v4017_v26  ;;  %v4358_v16 = vld [vmem:[#allocation51 + $0x3e8] sm:$0xff]  ;;  %v4353_v26 = vld [vmem:[#allocation51 + $0x3c0] sm:$0xff] }
 0xc00   : > { %4427 = vmatpush.msrb.mxu1 %v4360_v14  ;;  %v4330_v14 = vld [vmem:[#allocation51 + $0x308] sm:$0xff] }
 0xc01   : > { %v4027_v32 = vmax.f32 %v4025_v3, 0.0  ;;  %v4351_v3 = vld [vmem:[#allocation51 + $0x3b0] sm:$0xff] }
 0xc02   : > { %4428 = vmatpush.msrb.mxu1 %v4358_v16 }
 0xc03   : > { %4044 = vmatpush.msra.mxu2 %v4027_v32  ;;  %v4349_v32 = vld [vmem:[#allocation51 + $0x3a0] sm:$0xff] }
 0xc04   : > { %v3994_v36 = vpop.f32.mrf.mxu0  ;;  %v4014_v24 = vpop.f32.mrf.mxu1  ;;  %5919 = vmatmul.msk.f32.vlgmr.msra.gmra.mxu2 %vm3452_vm8, %v8277_v22  ;;  %4429 = vmatpush.msrb.mxu1 %v4356_v20  ;;  %v4295_v20 = vld [vmem:[#allocation51 + $0x1f8] sm:$0xff] }
 0xc05   : > { %v4015_v19 = vadd.f32 %v4014_v24, %v3994_v36  ;;  %v4348_v36 = vld [vmem:[#allocation51 + $0x398] sm:$0xff]  ;;  %v8400_v24 = vld [vmem:[%s8608_s1] sm:$0x3] }
 0xc06   : > { %4430 = vmatpush.msrb.mxu1 %v4354_v27  ;;  %v4300_v27 = vld [vmem:[#allocation51 + $0x218] sm:$0xff] }
 0xc07   : > { %v4018_v30 = vadd.f32 %v4015_v19, %v3862_v39  ;;  %v4318_v39 = vld [vmem:[#allocation51 + $0x2a8] sm:$0xff]  ;;  %v4345_v19 = vld [vmem:[#allocation51 + $0x380] sm:$0xff] }
 0xc08   : > { %4431 = vmatpush.msrb.mxu1 %v4352_v4  ;;  %v4262_v4 = vld [vmem:[#allocation51 + $0xf0] sm:$0xff] }
 0xc09   : > { %v4026_v46 = vadd.f32 %v4022_v40, %v4018_v30  ;;  %v4346_v40 = vld [vmem:[#allocation51 + $0x388] sm:$0xff]  ;;  %v3509_v30 = vperm.slane %v8400_v24, 0 }
 0xc0a   : > { %4432 = vmatpush.msrb.mxu1 %v4350_v33  ;;  %v4260_v33 = vld [vmem:[#allocation51 + $0xe0] sm:$0xff] }
 0xc0b   : > { %v4028_v47 = vmax.f32 %v4026_v46, 0.0  ;;  %v4344_v46 = vld [vmem:[#allocation51 + $0x378] sm:$0xff] }
 0xc0c   : > { %4433 = vmatpush.msrb.mxu1 %v4348_v36  ;;  %v4258_v36 = vld [vmem:[#allocation51 + $0xd0] sm:$0xff] }
 0xc0d   : > { %4064 = vmatpush.msrb.mxu2 %v4028_v47  ;;  %v4313_v47 = vld [vmem:[#allocation51 + $0x280] sm:$0xff] }
 0xc0e   : > { %5920 = vmatmul.msk.f32.vlgmr.msrb.gmra.mxu2 %vm3452_vm8, %v8277_v22  ;;  %v4072_v22 = vld [vmem:[#allocation49 + $0x18] sm:$0xff]  ;;  %4434 = vmatpush.msrb.mxu1 %v4346_v40  ;;  %v4282_v40 = vld [vmem:[#allocation51 + $0x190] sm:$0xff] }
 0xc0f   : > { %4159 = vmatpush.msra.mxu2 %v4131_v48  ;;  %4193 = vmatpush.msrb.mxu0 %v4072_v22  ;;  %v4314_v48 = vld [vmem:[#allocation51 + $0x288] sm:$0xff] }
 0xc10   : > { %4435 = vmatpush.msrb.mxu1 %v4344_v46  ;;  %4374 = vmatpush.msra.mxu3 %v4313_v47  ;;  %v4338_v22 = vld [vmem:[#allocation51 + $0x348] sm:$0xff]  ;;  %v4255_v46 = vld [vmem:[#allocation51 + $0xb8] sm:$0xff] }
 0xc11   : > { %4160 = vmatpush.msra.mxu2 %v4129_v49  ;;  %4194 = vmatpush.msrb.mxu0 %v4070_v61  ;;  %v4341_v49 = vld [vmem:[#allocation51 + $0x360] sm:$0xff]  ;;  %v4307_v61 = vld [vmem:[#allocation51 + $0x250] sm:$0xff]  ;;  %v4281_v47 = vld [vmem:[#allocation51 + $0x188] sm:$0xff] }
 0xc13   : > { %4161 = vmatpush.msra.mxu2 %v4127_v50  ;;  %4407 = vmatpush.msra.mxu0 %v4328_v23  ;;  %v4342_v50 = vld [vmem:[#allocation51 + $0x368] sm:$0xff] }
 0xc14   : > { %4436 = vmatpush.msrb.mxu1 %v4342_v50  ;;  %v4302_v23 = vld [vmem:[#allocation51 + $0x228] sm:$0xff] }
 0xc15   : > { %4162 = vmatpush.msra.mxu2 %v4125_v51  ;;  %4408 = vmatpush.msra.mxu0 %v4326_v28  ;;  %v4311_v51 = vld [vmem:[#allocation51 + $0x270] sm:$0xff]  ;;  %v4253_v50 = vld [vmem:[#allocation51 + $0xa8] sm:$0xff] }
 0xc16   : > { %4375 = vmatpush.msra.mxu3 %v4311_v51  ;;  %v4290_v28 = vld [vmem:[#allocation51 + $0x1d0] sm:$0xff]  ;;  %v4279_v51 = vld [vmem:[#allocation51 + $0x178] sm:$0xff] }
 0xc17   : > { %4163 = vmatpush.msra.mxu2 %v4123_v52  ;;  %4409 = vmatpush.msra.mxu0 %v4324_v31  ;;  %v4312_v52 = vld [vmem:[#allocation51 + $0x278] sm:$0xff]  ;;  %v4297_v31 = vld [vmem:[#allocation51 + $0x200] sm:$0xff] }
 0xc18   : > { %4376 = vmatpush.msra.mxu3 %v4309_v13  ;;  %v4275_v13 = vld [vmem:[#allocation51 + $0x158] sm:$0xff] }
 0xc19   : > { %4164 = vmatpush.msra.mxu2 %v4121_v53  ;;  %4410 = vmatpush.msra.mxu0 %v4322_v6  ;;  %v3531_v53 = vadd.f32 %v8386_v43, %v3509_v30  ;;  %v4335_v43 = vld [vmem:[#allocation51 + $0x330] sm:$0xff]  ;;  %v4263_v6 = vld [vmem:[#allocation51 + $0xf8] sm:$0xff] }
 0xc1a   : > { %4377 = vmatpush.msra.mxu3 %v4307_v61  ;;  %v4254_v30 = vld [vmem:[#allocation51 + $0xb0] sm:$0xff]  ;;  %v4273_v61 = vld [vmem:[#allocation51 + $0x148] sm:$0xff] }
 0xc1b   : > { %4165 = vmatpush.msra.mxu2 %v4119_v54  ;;  %4411 = vmatpush.msra.mxu0 %v4320_v35  ;;  %v4339_v54 = vld [vmem:[#allocation51 + $0x350] sm:$0xff]  ;;  %v4261_v35 = vld [vmem:[#allocation51 + $0xe8] sm:$0xff] }
 0xc1c   : > { %4378 = vmatpush.msra.mxu3 %v4305_v1  ;;  %v4242_v1 = vld [vmem:[#allocation51 + $0x50] sm:$0xff] }
 0xc1d   : > { %4166 = vmatpush.msra.mxu2 %v4117_v55  ;;  %4412 = vmatpush.msra.mxu0 %v4318_v39  ;;  %v4340_v55 = vld [vmem:[#allocation51 + $0x358] sm:$0xff]  ;;  %v4285_v39 = vld [vmem:[#allocation51 + $0x1a8] sm:$0xff] }
 0xc1e   : > { %4437 = vmatpush.msrb.mxu1 %v4340_v55  ;;  %4379 = vmatpush.msra.mxu3 %v4303_v8  ;;  %v4277_v55 = vld [vmem:[#allocation51 + $0x168] sm:$0xff]  ;;  %v4240_v8 = vld [vmem:[#allocation51 + $0x40] sm:$0xff] }
 0xc1f   : > { %4167 = vmatpush.msra.mxu2 %v4115_v56  ;;  %4413 = vmatpush.msra.mxu0 %v4316_v42  ;;  %v4283_v42 = vld [vmem:[#allocation51 + $0x198] sm:$0xff] }
 0xc20   : > { %4438 = vmatpush.msrb.mxu1 %v4338_v22  ;;  %4380 = vmatpush.msra.mxu3 %v4301_v21  ;;  %v4249_v22 = vld [vmem:[#allocation51 + $0x88] sm:$0xff]  ;;  %v4236_v21 = vld [vmem:[#allocation51 + $0x20] sm:$0xff] }
 0xc21   : > { %4168 = vmatpush.msra.mxu2 %v4113_v58  ;;  %4414 = vmatpush.msra.mxu0 %v4314_v48  ;;  %v4337_v58 = vld [vmem:[#allocation51 + $0x340] sm:$0xff] }
 0xc22   : > { %v4252_v48 = vld [vmem:[#allocation51 + $0xa0] sm:$0xff] }
 0xc23   : > { %4169 = vmatpush.msra.mxu2 %v4111_v60  ;;  %4415 = vmatpush.msra.mxu0 %v4312_v52  ;;  %v4336_v60 = vld [vmem:[#allocation51 + $0x338] sm:$0xff]  ;;  %v4250_v52 = vld [vmem:[#allocation51 + $0x90] sm:$0xff] }
 0xc24   : > { %4439 = vmatpush.msrb.mxu1 %v4336_v60  ;;  %v4247_v60 = vld [vmem:[#allocation51 + $0x78] sm:$0xff] }
 0xc25   : > { %4170 = vmatpush.msra.mxu2 %v4109_v37  ;;  %v3510_v37 = vperm.slane %v8400_v24, 1  ;;  %4416 = vmatpush.msra.mxu0 %v4310_v59  ;;  %v4284_v24 = vld [vmem:[#allocation51 + $0x1a0] sm:$0xff]  ;;  %v4246_v59 = vld [vmem:[#allocation51 + $0x70] sm:$0xff] }
 0xc27   : > { %4171 = vmatpush.msra.mxu2 %v4107_v0  ;;  %v4334_v0 = vld [vmem:[#allocation51 + $0x328] sm:$0xff]  ;;  %4417 = vmatpush.msra.mxu0 %v4308_v63  ;;  %v3551_v10 = vadd.f32 %v8388_v44, %v3510_v37  ;;  %v4292_v44 = vld [vmem:[#allocation51 + $0x1e0] sm:$0xff]  ;;  %v4270_v37 = vld [vmem:[#allocation51 + $0x130] sm:$0xff] }
 0xc28   : > { %4440 = vmatpush.msrb.mxu1 %v4334_v0  ;;  %v4244_v63 = vld [vmem:[#allocation51 + $0x60] sm:$0xff]  ;;  %v4271_v0 = vld [vmem:[#allocation51 + $0x138] sm:$0xff] }
 0xc29   : > { %4172 = vmatpush.msra.mxu2 %v4105_v2  ;;  %v4306_v2 = vld [vmem:[#allocation51 + $0x248] sm:$0xff] }
 0xc2a   : > { %4418 = vmatpush.msra.mxu0 %v4306_v2  ;;  %v4268_v2 = vld [vmem:[#allocation51 + $0x120] sm:$0xff] }
 0xc2b   : > { %4173 = vmatpush.msra.mxu2 %v4103_v11  ;;  %v4332_v11 = vld [vmem:[#allocation51 + $0x318] sm:$0xff] }
 0xc2c   : > { %4441 = vmatpush.msrb.mxu1 %v4332_v11  ;;  %v4269_v11 = vld [vmem:[#allocation51 + $0x128] sm:$0xff] }
 0xc2d   : > { %4174 = vmatpush.msra.mxu2 %v4101_v9  ;;  %v4304_v9 = vld [vmem:[#allocation51 + $0x238] sm:$0xff] }
 0xc2e   : > { %4419 = vmatpush.msra.mxu0 %v4304_v9  ;;  %4442 = vmatpush.msrb.mxu1 %v4330_v14  ;;  %v4266_v9 = vld [vmem:[#allocation51 + $0x110] sm:$0xff] }
 0xc2f   : > { %4387 = vmatpush.msrb.mxu2 %v4359_v12  ;;  %v4329_v12 = vld [vmem:[#allocation51 + $0x300] sm:$0xff]  ;;  %v4238_v14 = vld [vmem:[#allocation51 + $0x30] sm:$0xff] }
 0xc30   : > { %4420 = vmatpush.msra.mxu0 %v4302_v23  ;;  %v4237_v23 = vld [vmem:[#allocation51 + $0x28] sm:$0xff] }
 0xc31   : > { %4388 = vmatpush.msrb.mxu2 %v4357_v15 }
 0xc32   : > { %4421 = vmatpush.msra.mxu0 %v4300_v27  ;;  %v4233_v27 = vld [vmem:[#allocation51 + $0x8] sm:$0xff] }
 0xc33   : > { %4389 = vmatpush.msrb.mxu2 %v4355_v17  ;;  %v4294_v17 = vld [vmem:[#allocation51 + $0x1f0] sm:$0xff] }
 0xc35   : > { %4390 = vmatpush.msrb.mxu2 %v4353_v26  ;;  %v4299_v26 = vld [vmem:[#allocation51 + $0x210] sm:$0xff] }
 0xc36   : > { %4381 = vmatpush.msra.mxu3 %v4299_v26  ;;  %v4232_v26 = vld [vmem:[#allocation51] sm:$0xff] }
 0xc37   : > { %4391 = vmatpush.msrb.mxu2 %v4351_v3  ;;  %v4298_v3 = vld [vmem:[#allocation51 + $0x208] sm:$0xff] }
 0xc38   : > { %4382 = vmatpush.msra.mxu3 %v4297_v31  ;;  %4422 = vmatpush.msra.mxu0 %v4298_v3 }
 0xc39   : > { %4392 = vmatpush.msrb.mxu2 %v4349_v32  ;;  %v4289_v32 = vld [vmem:[#allocation51 + $0x1c8] sm:$0xff] }
 0xc3b   : > { %4393 = vmatpush.msrb.mxu2 %v4347_v18  ;;  %v4287_v18 = vld [vmem:[#allocation51 + $0x1b8] sm:$0xff] }
 0xc3d   : > { %4394 = vmatpush.msrb.mxu2 %v4345_v19  ;;  %v4256_v19 = vld [vmem:[#allocation51 + $0xc0] sm:$0xff] }
 0xc3f   : > { %4395 = vmatpush.msrb.mxu2 %v4343_v45  ;;  %v4280_v45 = vld [vmem:[#allocation51 + $0x180] sm:$0xff] }
 0xc41   : > { %4396 = vmatpush.msrb.mxu2 %v4341_v49  ;;  %v4278_v49 = vld [vmem:[#allocation51 + $0x170] sm:$0xff] }
 0xc43   : > { %4397 = vmatpush.msrb.mxu2 %v4339_v54  ;;  %v4251_v54 = vld [vmem:[#allocation51 + $0x98] sm:$0xff] }
 0xc45   : > { %4398 = vmatpush.msrb.mxu2 %v4337_v58  ;;  %v4274_v58 = vld [vmem:[#allocation51 + $0x150] sm:$0xff] }
 0xc47   : > { %4399 = vmatpush.msrb.mxu2 %v4335_v43  ;;  %v4272_v43 = vld [vmem:[#allocation51 + $0x140] sm:$0xff] }
 0xc49   : > { %4400 = vmatpush.msrb.mxu2 %v4333_v62  ;;  %v4245_v62 = vld [vmem:[#allocation51 + $0x68] sm:$0xff] }
 0xc4b   : > { %4401 = vmatpush.msrb.mxu2 %v4331_v7  ;;  %v4243_v7 = vld [vmem:[#allocation51 + $0x58] sm:$0xff] }
 0xc4d   : > { %4402 = vmatpush.msrb.mxu2 %v4329_v12  ;;  %v4267_v12 = vld [vmem:[#allocation51 + $0x118] sm:$0xff] }
 0xc87   : > { %v4046_v56 = vpop.f32.mrf.mxu2 }
 0xc88   : > { %v8404_v57 = vadd.f32 %v4046_v56, %v3531_v53  ;;  %v4276_v53 = vld [vmem:[#allocation51 + $0x160] sm:$0xff] }
 0xc89   : > { %v4248_v56 = vld [vmem:[#allocation51 + $0x80] sm:$0xff] }
 0xc8a   : > { %4155 = vmatmul.f32.vlgmr.msrb.gmra.mxu3 %v8404_v57  ;;  %4195 = vmatmul.f32.vlgmr.msrb.gmra.mxu0 %v8404_v57 }
 0xc8b   : > { %4447 = vmatpush.msrb.mxu3 %v4262_v4  ;;  %4487 = vmatpush.msrb.mxu0 %v4263_v6 }
 0xc8d   : > { %4448 = vmatpush.msrb.mxu3 %v4260_v33  ;;  %4488 = vmatpush.msrb.mxu0 %v4261_v35 }
 0xc8f   : > { %4449 = vmatpush.msrb.mxu3 %v4258_v36  ;;  %4489 = vmatpush.msrb.mxu0 %v4259_v38 }
 0xc91   : > { %v4066_v15 = vpop.f32.mrf.mxu2  ;;  %4450 = vmatpush.msrb.mxu3 %v4256_v19  ;;  %4490 = vmatpush.msrb.mxu0 %v4257_v41  ;;  %v4591_v41 = vld [vmem:[#allocation51 + $0x5f8] sm:$0xff] }
 0xc92   : > { %v8410_v16 = vadd.f32 %v4066_v15, %v3551_v10  ;;  %v4241_v10 = vld [vmem:[#allocation51 + $0x48] sm:$0xff]  ;;  %v4264_v15 = vld [vmem:[#allocation51 + $0x100] sm:$0xff] }
 0xc93   : > { %4451 = vmatpush.msrb.mxu3 %v4254_v30  ;;  %4491 = vmatpush.msrb.mxu0 %v4255_v46  ;;  %v4588_v30 = vld [vmem:[#allocation51 + $0x5e0] sm:$0xff] }
 0xc94   : > { %4175 = vmatmul.f32.vlgmr.msra.gmra.mxu2 %v8410_v16  ;;  %4215 = vmatmul.f32.vlgmr.msra.gmra.mxu1 %v8410_v16 }
 0xc95   : > { %4467 = vmatpush.msra.mxu2 %v4294_v17  ;;  %4507 = vmatpush.msra.mxu1 %v4295_v20  ;;  %v4239_v17 = vld [vmem:[#allocation51 + $0x38] sm:$0xff]  ;;  %v4265_v20 = vld [vmem:[#allocation51 + $0x108] sm:$0xff] }
 0xc96   : > { %4452 = vmatpush.msrb.mxu3 %v4252_v48  ;;  %4492 = vmatpush.msrb.mxu0 %v4253_v50  ;;  %v4587_v48 = vld [vmem:[#allocation51 + $0x5d8] sm:$0xff] }
 0xc97   : > { %4468 = vmatpush.msra.mxu2 %v4292_v44  ;;  %4508 = vmatpush.msra.mxu1 %v4293_v25  ;;  %v4234_v44 = vld [vmem:[#allocation51 + $0x10] sm:$0xff]  ;;  %v4235_v25 = vld [vmem:[#allocation51 + $0x18] sm:$0xff] }
 0xc98   : > { %4453 = vmatpush.msrb.mxu3 %v4250_v52  ;;  %4493 = vmatpush.msrb.mxu0 %v4251_v54  ;;  %v4584_v52 = vld [vmem:[#allocation51 + $0x5c0] sm:$0xff]  ;;  %v4585_v54 = vld [vmem:[#allocation51 + $0x5c8] sm:$0xff] }
 0xc99   : > { %4469 = vmatpush.msra.mxu2 %v4290_v28  ;;  %4509 = vmatpush.msra.mxu1 %v4291_v29  ;;  %v4133_v28 = vld [vmem:[%s8609_s3] sm:$0x3] }
 0xc9a   : > { %4454 = vmatpush.msrb.mxu3 %v4248_v56  ;;  %4494 = vmatpush.msrb.mxu0 %v4249_v22  ;;  %v4136_v29 = vperm.slane %v4133_v28, 1  ;;  %v4582_v56 = vld [vmem:[#allocation51 + $0x5b0] sm:$0xff]  ;;  %v4583_v22 = vld [vmem:[#allocation51 + $0x5b8] sm:$0xff] }
 0xc9b   : > { %4470 = vmatpush.msra.mxu2 %v4288_v5  ;;  %4510 = vmatpush.msra.mxu1 %v4289_v32  ;;  %v4135_v5 = vperm.slane %v4133_v28, 0  ;;  %v4569_v28 = vld [vmem:[#allocation51 + $0x548] sm:$0xff] }
 0xc9c   : > { %4455 = vmatpush.msrb.mxu3 %v4246_v59  ;;  %4495 = vmatpush.msrb.mxu0 %v4247_v60  ;;  %v4580_v59 = vld [vmem:[#allocation51 + $0x5a0] sm:$0xff]  ;;  %v4581_v60 = vld [vmem:[#allocation51 + $0x5a8] sm:$0xff] }
 0xc9d   : > { %4471 = vmatpush.msra.mxu2 %v4286_v34  ;;  %4511 = vmatpush.msra.mxu1 %v4287_v18 }
 0xc9e   : > { %4456 = vmatpush.msrb.mxu3 %v4244_v63  ;;  %4496 = vmatpush.msrb.mxu0 %v4245_v62  ;;  %v4578_v63 = vld [vmem:[#allocation51 + $0x590] sm:$0xff]  ;;  %v4579_v62 = vld [vmem:[#allocation51 + $0x598] sm:$0xff] }
 0xc9f   : > { %4472 = vmatpush.msra.mxu2 %v4284_v24  ;;  %4512 = vmatpush.msra.mxu1 %v4285_v39 }
 0xca0   : > { %4457 = vmatpush.msrb.mxu3 %v4242_v1  ;;  %4497 = vmatpush.msrb.mxu0 %v4243_v7  ;;  %v4576_v1 = vld [vmem:[#allocation51 + $0x580] sm:$0xff]  ;;  %v4577_v7 = vld [vmem:[#allocation51 + $0x588] sm:$0xff] }
 0xca1   : > { %4473 = vmatpush.msra.mxu2 %v4282_v40  ;;  %4513 = vmatpush.msra.mxu1 %v4283_v42  ;;  %v4590_v40 = vld [vmem:[#allocation51 + $0x5f0] sm:$0xff] }
 0xca2   : > { %4458 = vmatpush.msrb.mxu3 %v4240_v8  ;;  %4498 = vmatpush.msrb.mxu0 %v4241_v10  ;;  %v4574_v8 = vld [vmem:[#allocation51 + $0x570] sm:$0xff]  ;;  %v4575_v10 = vld [vmem:[#allocation51 + $0x578] sm:$0xff] }
 0xca3   : > { %4474 = vmatpush.msra.mxu2 %v4280_v45  ;;  %4514 = vmatpush.msra.mxu1 %v4281_v47  ;;  %v4589_v45 = vld [vmem:[#allocation51 + $0x5e8] sm:$0xff]  ;;  %v4586_v47 = vld [vmem:[#allocation51 + $0x5d0] sm:$0xff] }
 0xca4   : > { %4459 = vmatpush.msrb.mxu3 %v4238_v14  ;;  %4499 = vmatpush.msrb.mxu0 %v4239_v17  ;;  %v4572_v14 = vld [vmem:[#allocation51 + $0x560] sm:$0xff]  ;;  %v4573_v17 = vld [vmem:[#allocation51 + $0x568] sm:$0xff] }
 0xca5   : > { %4475 = vmatpush.msra.mxu2 %v4278_v49  ;;  %4515 = vmatpush.msra.mxu1 %v4279_v51  ;;  %v4558_v51 = vld [vmem:[#allocation51 + $0x4f0] sm:$0xff] }
 0xca6   : > { %4460 = vmatpush.msrb.mxu3 %v4236_v21  ;;  %4500 = vmatpush.msrb.mxu0 %v4237_v23  ;;  %v4570_v21 = vld [vmem:[#allocation51 + $0x550] sm:$0xff]  ;;  %v4545_v23 = vld [vmem:[#allocation51 + $0x488] sm:$0xff] }
 0xca7   : > { %4476 = vmatpush.msra.mxu2 %v4276_v53  ;;  %4516 = vmatpush.msra.mxu1 %v4277_v55  ;;  %v4559_v53 = vld [vmem:[#allocation51 + $0x4f8] sm:$0xff]  ;;  %v4556_v55 = vld [vmem:[#allocation51 + $0x4e0] sm:$0xff] }
 0xca8   : > { %4461 = vmatpush.msrb.mxu3 %v4234_v44  ;;  %4501 = vmatpush.msrb.mxu0 %v4235_v25  ;;  %v4571_v44 = vld [vmem:[#allocation51 + $0x558] sm:$0xff]  ;;  %v4542_v25 = vld [vmem:[#allocation51 + $0x470] sm:$0xff] }
 0xca9   : > { %4477 = vmatpush.msra.mxu2 %v4274_v58  ;;  %4517 = vmatpush.msra.mxu1 %v4275_v13  ;;  %v4557_v58 = vld [vmem:[#allocation51 + $0x4e8] sm:$0xff]  ;;  %v4554_v13 = vld [vmem:[#allocation51 + $0x4d0] sm:$0xff] }
 0xcaa   : > { %4462 = vmatpush.msrb.mxu3 %v4232_v26  ;;  %4502 = vmatpush.msrb.mxu0 %v4233_v27  ;;  %v4568_v26 = vld [vmem:[#allocation51 + $0x540] sm:$0xff]  ;;  %v4543_v27 = vld [vmem:[#allocation51 + $0x478] sm:$0xff] }
 0xcab   : > { %4478 = vmatpush.msra.mxu2 %v4272_v43  ;;  %4518 = vmatpush.msra.mxu1 %v4273_v61  ;;  %v4555_v43 = vld [vmem:[#allocation51 + $0x4d8] sm:$0xff]  ;;  %v4552_v61 = vld [vmem:[#allocation51 + $0x4c0] sm:$0xff] }
 0xcad   : > { %4479 = vmatpush.msra.mxu2 %v4270_v37  ;;  %4519 = vmatpush.msra.mxu1 %v4271_v0  ;;  %v4553_v37 = vld [vmem:[#allocation51 + $0x4c8] sm:$0xff]  ;;  %v4550_v0 = vld [vmem:[#allocation51 + $0x4b0] sm:$0xff] }
 0xcaf   : > { %4480 = vmatpush.msra.mxu2 %v4268_v2  ;;  %4520 = vmatpush.msra.mxu1 %v4269_v11  ;;  %v4551_v2 = vld [vmem:[#allocation51 + $0x4b8] sm:$0xff]  ;;  %v4548_v11 = vld [vmem:[#allocation51 + $0x4a0] sm:$0xff] }
 0xcb1   : > { %4481 = vmatpush.msra.mxu2 %v4266_v9  ;;  %4521 = vmatpush.msra.mxu1 %v4267_v12  ;;  %v4549_v9 = vld [vmem:[#allocation51 + $0x4a8] sm:$0xff]  ;;  %v4546_v12 = vld [vmem:[#allocation51 + $0x490] sm:$0xff] }
 0xcb3   : > { %4482 = vmatpush.msra.mxu2 %v4264_v15  ;;  %4522 = vmatpush.msra.mxu1 %v4265_v20  ;;  %v4547_v15 = vld [vmem:[#allocation51 + $0x498] sm:$0xff]  ;;  %v4544_v20 = vld [vmem:[#allocation51 + $0x480] sm:$0xff] }
 0xd07   : > { %v4196_v31 = vpop.f32.mrf.mxu0 }
 0xd08   : > { %v4197_v3 = vadd.f32 %v4196_v31, %v4136_v29  ;;  %v4540_v29 = vld [vmem:[#allocation51 + $0x460] sm:$0xff]  ;;  %v4566_v31 = vld [vmem:[#allocation51 + $0x530] sm:$0xff] }
 0xd0d   : > { %v4156_v32 = vpop.f32.mrf.mxu3 }
 0xd0e   : > { %v4157_v34 = vadd.f32 %v4156_v32, %v4135_v5  ;;  %v4538_v5 = vld [vmem:[#allocation51 + $0x450] sm:$0xff]  ;;  %v4539_v32 = vld [vmem:[#allocation51 + $0x458] sm:$0xff] }
 0xd11   : > { %v4216_v4 = vpop.f32.mrf.mxu1 }
 0xd12   : > { %v4217_v6 = vadd.f32 %v4216_v4, %v4197_v3  ;;  %v4541_v3 = vld [vmem:[#allocation51 + $0x468] sm:$0xff]  ;;  %v4567_v4 = vld [vmem:[#allocation51 + $0x538] sm:$0xff] }
 0xd14   : > { %v4220_v33 = vmax.f32 %v4217_v6, 0.0  ;;  %v4564_v6 = vld [vmem:[#allocation51 + $0x520] sm:$0xff] }
 0xd16   : > { %v4224_v35 = vrot.slane %v4220_v33, 7  ;;  %v4565_v33 = vld [vmem:[#allocation51 + $0x528] sm:$0xff] }
 0xd17   : > { %v4176_v18 = vpop.f32.mrf.mxu2 }
 0xd18   : > { %v4228_v36 = vsel %vm2049_vm1, 0.0, %v4224_v35  ;;  %v4177_v24 = vadd.f32 %v4176_v18, %v4157_v34  ;;  %v4536_v34 = vld [vmem:[#allocation51 + $0x440] sm:$0xff]  ;;  %v4562_v35 = vld [vmem:[#allocation51 + $0x510] sm:$0xff]  ;;  %v4537_v18 = vld [vmem:[#allocation51 + $0x448] sm:$0xff] }
 0xd19   : > { %v8417_v38 = vsel %vm4229_vm9, %v4228_v36, 0.0 }
 0xd1a   : > { %v4364_v39 = vrot.slane %v8417_v38, 1  ;;  %v4219_v19 = vmax.f32 %v4177_v24, 0.0  ;;  %v4534_v24 = vld [vmem:[#allocation51 + $0x430] sm:$0xff] }
 0xd1c   : > { %v4223_v42 = vrot.slane %v4219_v19, 7  ;;  %4403 = vmatmul.f32.vlgmr.msrb.gmra.mxu2 %v4364_v39  ;;  %4443 = vmatmul.f32.vlgmr.msrb.gmra.mxu1 %v4364_v39  ;;  %v4560_v39 = vld [vmem:[#allocation51 + $0x500] sm:$0xff]  ;;  %v4535_v19 = vld [vmem:[#allocation51 + $0x438] sm:$0xff] }
 0xd1d   : > { %4616 = vmatpush.msrb.mxu2 %v4590_v40  ;;  %4656 = vmatpush.msrb.mxu1 %v4591_v41  ;;  %v4561_v40 = vld [vmem:[#allocation51 + $0x508] sm:$0xff]  ;;  %v4593_v41 = vrot.slane %v8417_v38, 2  ;;  %v4752_v38 = vld [vmem:[#allocation52 + $0x1f0] sm:$0xff] }
 0xd1e   : > { %v4227_v46 = vsel %vm2049_vm1, 0.0, %v4223_v42  ;;  %v4532_v42 = vld [vmem:[#allocation51 + $0x420] sm:$0xff] }
 0xd1f   : > { %v8422_v49 = vsel %vm4229_vm9, %v4227_v46, 0.0  ;;  %4617 = vmatpush.msrb.mxu2 %v4588_v30  ;;  %4657 = vmatpush.msrb.mxu1 %v4589_v45  ;;  %v4533_v30 = vld [vmem:[#allocation51 + $0x428] sm:$0xff]  ;;  %v4530_v45 = vld [vmem:[#allocation51 + $0x410] sm:$0xff] }
 0xd20   : > { %v4363_v50 = vrot.slane %v8422_v49, 1 }
 0xd21   : > { %4618 = vmatpush.msrb.mxu2 %v4586_v47  ;;  %4658 = vmatpush.msrb.mxu1 %v4587_v48  ;;  %v4528_v47 = vld [vmem:[#allocation51 + $0x400] sm:$0xff]  ;;  %v4529_v48 = vld [vmem:[#allocation51 + $0x408] sm:$0xff] }
 0xd22   : > { %4383 = vmatmul.f32.vlgmr.msra.gmra.mxu3 %v4363_v50  ;;  %4423 = vmatmul.f32.vlgmr.msra.gmra.mxu0 %v4363_v50  ;;  %v4592_v50 = vrot.slane %v8422_v49, 2  ;;  %v4747_v49 = vld [vmem:[#allocation52 + $0x1c8] sm:$0xff] }
 0xd23   : > { %4596 = vmatpush.msra.mxu3 %v4558_v51  ;;  %4619 = vmatpush.msrb.mxu2 %v4584_v52  ;;  %v4753_v51 = vld [vmem:[#allocation52 + $0x1f8] sm:$0xff]  ;;  %v4750_v52 = vld [vmem:[#allocation52 + $0x1e0] sm:$0xff] }
 0xd24   : > { %4636 = vmatpush.msra.mxu0 %v4559_v53  ;;  %4659 = vmatpush.msrb.mxu1 %v4585_v54  ;;  %v4751_v53 = vld [vmem:[#allocation52 + $0x1e8] sm:$0xff]  ;;  %v4748_v54 = vld [vmem:[#allocation52 + $0x1d0] sm:$0xff] }
 0xd25   : > { %5922 = vmatmul.msk.f32.vlgmr.msra.gmra.mxu2 %vm4229_vm9, %v4228_v36  ;;  %5924 = vmatmul.msk.f32.vlgmr.msra.gmra.mxu1 %vm4229_vm9, %v4228_v36  ;;  %v4563_v36 = vld [vmem:[#allocation51 + $0x518] sm:$0xff] }
 0xd26   : > { %4597 = vmatpush.msra.mxu3 %v4556_v55  ;;  %4620 = vmatpush.msrb.mxu2 %v4582_v56  ;;  %v4749_v55 = vld [vmem:[#allocation52 + $0x1d8] sm:$0xff]  ;;  %v4720_v56 = vld [vmem:[#allocation52 + $0xf0] sm:$0xff] }
 0xd27   : > { %4637 = vmatpush.msra.mxu0 %v4557_v58  ;;  %4660 = vmatpush.msrb.mxu1 %v4583_v22  ;;  %v4746_v58 = vld [vmem:[#allocation52 + $0x1c0] sm:$0xff]  ;;  %v4721_v22 = vld [vmem:[#allocation52 + $0xf8] sm:$0xff] }
 0xd28   : > { %4598 = vmatpush.msra.mxu3 %v4554_v13  ;;  %4621 = vmatpush.msrb.mxu2 %v4580_v59  ;;  %v4718_v13 = vld [vmem:[#allocation52 + $0xe0] sm:$0xff]  ;;  %v4744_v59 = vld [vmem:[#allocation52 + $0x1b0] sm:$0xff] }
 0xd29   : > { %4638 = vmatpush.msra.mxu0 %v4555_v43  ;;  %4661 = vmatpush.msrb.mxu1 %v4581_v60  ;;  %v4719_v43 = vld [vmem:[#allocation52 + $0xe8] sm:$0xff]  ;;  %v4745_v60 = vld [vmem:[#allocation52 + $0x1b8] sm:$0xff] }
 0xd2a   : > { %4599 = vmatpush.msra.mxu3 %v4552_v61  ;;  %4622 = vmatpush.msrb.mxu2 %v4578_v63  ;;  %v4716_v61 = vld [vmem:[#allocation52 + $0xd0] sm:$0xff]  ;;  %v4742_v63 = vld [vmem:[#allocation52 + $0x1a0] sm:$0xff] }
 0xd2b   : > { %4639 = vmatpush.msra.mxu0 %v4553_v37  ;;  %4662 = vmatpush.msrb.mxu1 %v4579_v62  ;;  %v4717_v37 = vld [vmem:[#allocation52 + $0xd8] sm:$0xff]  ;;  %v4743_v62 = vld [vmem:[#allocation52 + $0x1a8] sm:$0xff] }
 0xd2c   : > { %5921 = vmatmul.msk.f32.vlgmr.msrb.gmra.mxu3 %vm4229_vm9, %v4227_v46  ;;  %5923 = vmatmul.msk.f32.vlgmr.msrb.gmra.mxu0 %vm4229_vm9, %v4227_v46  ;;  %v4531_v46 = vld [vmem:[#allocation51 + $0x418] sm:$0xff] }
 0xd2d   : > { %4600 = vmatpush.msra.mxu3 %v4550_v0  ;;  %4623 = vmatpush.msrb.mxu2 %v4576_v1  ;;  %v4714_v0 = vld [vmem:[#allocation52 + $0xc0] sm:$0xff]  ;;  %v4715_v1 = vld [vmem:[#allocation52 + $0xc8] sm:$0xff] }
 0xd2e   : > { %4640 = vmatpush.msra.mxu0 %v4551_v2  ;;  %4663 = vmatpush.msrb.mxu1 %v4577_v7  ;;  %v4740_v2 = vld [vmem:[#allocation52 + $0x190] sm:$0xff]  ;;  %v4741_v7 = vld [vmem:[#allocation52 + $0x198] sm:$0xff] }
 0xd2f   : > { %4601 = vmatpush.msra.mxu3 %v4548_v11  ;;  %4624 = vmatpush.msrb.mxu2 %v4574_v8  ;;  %v4712_v11 = vld [vmem:[#allocation52 + $0xb0] sm:$0xff]  ;;  %v4738_v8 = vld [vmem:[#allocation52 + $0x180] sm:$0xff] }
 0xd30   : > { %4641 = vmatpush.msra.mxu0 %v4549_v9  ;;  %4664 = vmatpush.msrb.mxu1 %v4575_v10  ;;  %v4713_v9 = vld [vmem:[#allocation52 + $0xb8] sm:$0xff]  ;;  %v4739_v10 = vld [vmem:[#allocation52 + $0x188] sm:$0xff] }
 0xd31   : > { %4602 = vmatpush.msra.mxu3 %v4546_v12  ;;  %4625 = vmatpush.msrb.mxu2 %v4572_v14  ;;  %v4710_v12 = vld [vmem:[#allocation52 + $0xa0] sm:$0xff]  ;;  %v4736_v14 = vld [vmem:[#allocation52 + $0x170] sm:$0xff] }
 0xd32   : > { %4642 = vmatpush.msra.mxu0 %v4547_v15  ;;  %4665 = vmatpush.msrb.mxu1 %v4573_v17  ;;  %v4711_v15 = vld [vmem:[#allocation52 + $0xa8] sm:$0xff]  ;;  %v4737_v17 = vld [vmem:[#allocation52 + $0x178] sm:$0xff] }
 0xd33   : > { %4603 = vmatpush.msra.mxu3 %v4544_v20  ;;  %4626 = vmatpush.msrb.mxu2 %v4570_v21  ;;  %v4708_v20 = vld [vmem:[#allocation52 + $0x90] sm:$0xff]  ;;  %v4734_v21 = vld [vmem:[#allocation52 + $0x160] sm:$0xff] }
 0xd34   : > { %4643 = vmatpush.msra.mxu0 %v4545_v23  ;;  %4666 = vmatpush.msrb.mxu1 %v4571_v44  ;;  %v4709_v23 = vld [vmem:[#allocation52 + $0x98] sm:$0xff]  ;;  %v4735_v44 = vld [vmem:[#allocation52 + $0x168] sm:$0xff] }
 0xd35   : > { %4604 = vmatpush.msra.mxu3 %v4542_v25  ;;  %4627 = vmatpush.msrb.mxu2 %v4568_v26  ;;  %v4706_v25 = vld [vmem:[#allocation52 + $0x80] sm:$0xff]  ;;  %v4732_v26 = vld [vmem:[#allocation52 + $0x150] sm:$0xff] }
 0xd36   : > { %4644 = vmatpush.msra.mxu0 %v4543_v27  ;;  %4667 = vmatpush.msrb.mxu1 %v4569_v28  ;;  %v4707_v27 = vld [vmem:[#allocation52 + $0x88] sm:$0xff]  ;;  %v4733_v28 = vld [vmem:[#allocation52 + $0x158] sm:$0xff] }
 0xd37   : > { %4605 = vmatpush.msra.mxu3 %v4540_v29  ;;  %4628 = vmatpush.msrb.mxu2 %v4566_v31  ;;  %v4704_v29 = vld [vmem:[#allocation52 + $0x70] sm:$0xff]  ;;  %v4730_v31 = vld [vmem:[#allocation52 + $0x140] sm:$0xff] }
 0xd38   : > { %4645 = vmatpush.msra.mxu0 %v4541_v3  ;;  %4668 = vmatpush.msrb.mxu1 %v4567_v4  ;;  %v4705_v3 = vld [vmem:[#allocation52 + $0x78] sm:$0xff]  ;;  %v4731_v4 = vld [vmem:[#allocation52 + $0x148] sm:$0xff] }
 0xd39   : > { %4606 = vmatpush.msra.mxu3 %v4538_v5  ;;  %4629 = vmatpush.msrb.mxu2 %v4564_v6  ;;  %v4702_v5 = vld [vmem:[#allocation52 + $0x60] sm:$0xff]  ;;  %v4728_v6 = vld [vmem:[#allocation52 + $0x130] sm:$0xff] }
 0xd3a   : > { %4646 = vmatpush.msra.mxu0 %v4539_v32  ;;  %4669 = vmatpush.msrb.mxu1 %v4565_v33  ;;  %v4703_v32 = vld [vmem:[#allocation52 + $0x68] sm:$0xff]  ;;  %v4729_v33 = vld [vmem:[#allocation52 + $0x138] sm:$0xff] }
 0xd3b   : > { %4607 = vmatpush.msra.mxu3 %v4536_v34  ;;  %4630 = vmatpush.msrb.mxu2 %v4562_v35  ;;  %v4700_v34 = vld [vmem:[#allocation52 + $0x50] sm:$0xff]  ;;  %v4726_v35 = vld [vmem:[#allocation52 + $0x120] sm:$0xff] }
 0xd3c   : > { %4647 = vmatpush.msra.mxu0 %v4537_v18  ;;  %4670 = vmatpush.msrb.mxu1 %v4563_v36  ;;  %v4701_v18 = vld [vmem:[#allocation52 + $0x58] sm:$0xff]  ;;  %v4727_v36 = vld [vmem:[#allocation52 + $0x128] sm:$0xff] }
 0xd3d   : > { %4608 = vmatpush.msra.mxu3 %v4534_v24  ;;  %4631 = vmatpush.msrb.mxu2 %v4560_v39  ;;  %v4698_v24 = vld [vmem:[#allocation52 + $0x40] sm:$0xff]  ;;  %v4724_v39 = vld [vmem:[#allocation52 + $0x110] sm:$0xff] }
 0xd3e   : > { %4648 = vmatpush.msra.mxu0 %v4535_v19  ;;  %4671 = vmatpush.msrb.mxu1 %v4561_v40  ;;  %v4699_v19 = vld [vmem:[#allocation52 + $0x48] sm:$0xff]  ;;  %v4725_v40 = vld [vmem:[#allocation52 + $0x118] sm:$0xff] }
 0xd3f   : > { %4632 = vmatmul.f32.vlgmr.msrb.gmra.mxu2 %v4593_v41  ;;  %4672 = vmatmul.f32.vlgmr.msrb.gmra.mxu1 %v4593_v41  ;;  %v4696_v41 = vld [vmem:[#allocation52 + $0x30] sm:$0xff] }
 0xd40   : > { %4609 = vmatpush.msra.mxu3 %v4532_v42  ;;  %4649 = vmatpush.msra.mxu0 %v4533_v30  ;;  %v4722_v42 = vld [vmem:[#allocation52 + $0x100] sm:$0xff]  ;;  %v4697_v30 = vld [vmem:[#allocation52 + $0x38] sm:$0xff] }
 0xd41   : > { %4780 = vmatpush.msra.mxu2 %v4752_v38  ;;  %4820 = vmatpush.msra.mxu1 %v4753_v51 }
 0xd42   : > { %4610 = vmatpush.msra.mxu3 %v4530_v45  ;;  %4650 = vmatpush.msra.mxu0 %v4531_v46  ;;  %v4723_v45 = vld [vmem:[#allocation52 + $0x108] sm:$0xff]  ;;  %v4694_v46 = vld [vmem:[#allocation52 + $0x20] sm:$0xff] }
 0xd43   : > { %4781 = vmatpush.msra.mxu2 %v4750_v52  ;;  %4821 = vmatpush.msra.mxu1 %v4751_v53  ;;  %v4690_v52 = vld [vmem:[#allocation52] sm:$0xff]  ;;  %v4691_v53 = vld [vmem:[#allocation52 + $0x8] sm:$0xff] }
 0xd44   : > { %4611 = vmatpush.msra.mxu3 %v4528_v47  ;;  %4651 = vmatpush.msra.mxu0 %v4529_v48  ;;  %v4695_v47 = vld [vmem:[#allocation52 + $0x28] sm:$0xff]  ;;  %v4692_v48 = vld [vmem:[#allocation52 + $0x10] sm:$0xff] }
 0xd45   : > { %4612 = vmatmul.f32.vlgmr.msra.gmra.mxu3 %v4592_v50  ;;  %4652 = vmatmul.f32.vlgmr.msra.gmra.mxu0 %v4592_v50  ;;  %v4693_v50 = vld [vmem:[#allocation52 + $0x18] sm:$0xff] }
 0xd46   : > { %4782 = vmatpush.msra.mxu2 %v4748_v54  ;;  %4822 = vmatpush.msra.mxu1 %v4749_v55  ;;  %v4979_v54 = vld [vmem:[#allocation54 + $0x3f0] sm:$0xff]  ;;  %v4980_v55 = vld [vmem:[#allocation54 + $0x3f8] sm:$0xff] }
 0xd47   : > { %4760 = vmatpush.msrb.mxu3 %v4720_v56  ;;  %4800 = vmatpush.msrb.mxu0 %v4721_v22  ;;  %v4977_v56 = vld [vmem:[#allocation54 + $0x3e0] sm:$0xff]  ;;  %v4975_v22 = vld [vmem:[#allocation54 + $0x3d0] sm:$0xff] }
 0xd48   : > { %4783 = vmatpush.msra.mxu2 %v4746_v58  ;;  %4823 = vmatpush.msra.mxu1 %v4747_v49  ;;  %v4978_v58 = vld [vmem:[#allocation54 + $0x3e8] sm:$0xff]  ;;  %v4976_v49 = vld [vmem:[#allocation54 + $0x3d8] sm:$0xff] }
 0xd49   : > { %4761 = vmatpush.msrb.mxu3 %v4718_v13  ;;  %4801 = vmatpush.msrb.mxu0 %v4719_v43  ;;  %v4947_v13 = vld [vmem:[#allocation54 + $0x2f0] sm:$0xff] }
 0xd4a   : > { %4784 = vmatpush.msra.mxu2 %v4744_v59  ;;  %4824 = vmatpush.msra.mxu1 %v4745_v60  ;;  %v4948_v59 = vld [vmem:[#allocation54 + $0x2f8] sm:$0xff] }
 0xd4b   : > { %4762 = vmatpush.msrb.mxu3 %v4716_v61  ;;  %4802 = vmatpush.msrb.mxu0 %v4717_v37  ;;  %v4945_v61 = vld [vmem:[#allocation54 + $0x2e0] sm:$0xff]  ;;  %v4974_v37 = vld [vmem:[#allocation54 + $0x3c8] sm:$0xff] }
 0xd4c   : > { %4785 = vmatpush.msra.mxu2 %v4742_v63  ;;  %4825 = vmatpush.msra.mxu1 %v4743_v62  ;;  %v4973_v63 = vld [vmem:[#allocation54 + $0x3c0] sm:$0xff]  ;;  %v4946_v62 = vld [vmem:[#allocation54 + $0x2e8] sm:$0xff] }
 0xd4d   : > { %4763 = vmatpush.msrb.mxu3 %v4714_v0  ;;  %4803 = vmatpush.msrb.mxu0 %v4715_v1  ;;  %v4943_v0 = vld [vmem:[#allocation54 + $0x2d0] sm:$0xff]  ;;  %v4944_v1 = vld [vmem:[#allocation54 + $0x2d8] sm:$0xff] }
 0xd4e   : > { %4786 = vmatpush.msra.mxu2 %v4740_v2  ;;  %4826 = vmatpush.msra.mxu1 %v4741_v7  ;;  %v4971_v2 = vld [vmem:[#allocation54 + $0x3b0] sm:$0xff]  ;;  %v4972_v7 = vld [vmem:[#allocation54 + $0x3b8] sm:$0xff] }
 0xd4f   : > { %4764 = vmatpush.msrb.mxu3 %v4712_v11  ;;  %4804 = vmatpush.msrb.mxu0 %v4713_v9  ;;  %v4941_v9 = vld [vmem:[#allocation54 + $0x2c0] sm:$0xff] }
 0xd50   : > { %4787 = vmatpush.msra.mxu2 %v4738_v8  ;;  %4827 = vmatpush.msra.mxu1 %v4739_v10  ;;  %v4942_v10 = vld [vmem:[#allocation54 + $0x2c8] sm:$0xff] }
 0xd51   : > { %4765 = vmatpush.msrb.mxu3 %v4710_v12  ;;  %4805 = vmatpush.msrb.mxu0 %v4711_v15  ;;  %v4969_v12 = vld [vmem:[#allocation54 + $0x3a0] sm:$0xff]  ;;  %v4939_v15 = vld [vmem:[#allocation54 + $0x2b0] sm:$0xff] }
 0xd52   : > { %4788 = vmatpush.msra.mxu2 %v4736_v14  ;;  %4828 = vmatpush.msra.mxu1 %v4737_v17  ;;  %v4970_v14 = vld [vmem:[#allocation54 + $0x3a8] sm:$0xff]  ;;  %v4940_v17 = vld [vmem:[#allocation54 + $0x2b8] sm:$0xff] }
 0xd53   : > { %4766 = vmatpush.msrb.mxu3 %v4708_v20  ;;  %4806 = vmatpush.msrb.mxu0 %v4709_v23  ;;  %v4968_v23 = vld [vmem:[#allocation54 + $0x398] sm:$0xff] }
 0xd54   : > { %4789 = vmatpush.msra.mxu2 %v4734_v21  ;;  %4829 = vmatpush.msra.mxu1 %v4735_v44  ;;  %v4967_v21 = vld [vmem:[#allocation54 + $0x390] sm:$0xff]  ;;  %v4937_v44 = vld [vmem:[#allocation54 + $0x2a0] sm:$0xff] }
 0xd55   : > { %4767 = vmatpush.msrb.mxu3 %v4706_v25  ;;  %4807 = vmatpush.msrb.mxu0 %v4707_v27  ;;  %v4938_v25 = vld [vmem:[#allocation54 + $0x2a8] sm:$0xff]  ;;  %v4965_v27 = vld [vmem:[#allocation54 + $0x380] sm:$0xff] }
 0xd56   : > { %4790 = vmatpush.msra.mxu2 %v4732_v26  ;;  %4830 = vmatpush.msra.mxu1 %v4733_v28  ;;  %v4966_v28 = vld [vmem:[#allocation54 + $0x388] sm:$0xff] }
 0xd57   : > { %4768 = vmatpush.msrb.mxu3 %v4704_v29  ;;  %4808 = vmatpush.msrb.mxu0 %v4705_v3  ;;  %v8434_v3 = vld [vmem:[%s8610_s22] sm:$0x3] }
 0xd58   : > { %4791 = vmatpush.msra.mxu2 %v4730_v31  ;;  %4831 = vmatpush.msra.mxu1 %v4731_v4  ;;  %v4935_v4 = vld [vmem:[#allocation54 + $0x290] sm:$0xff] }
 0xd59   : > { %4769 = vmatpush.msrb.mxu3 %v4702_v5  ;;  %4809 = vmatpush.msrb.mxu0 %v4703_v32  ;;  %v4936_v5 = vld [vmem:[#allocation54 + $0x298] sm:$0xff] }
 0xd5a   : > { %4792 = vmatpush.msra.mxu2 %v4728_v6  ;;  %4832 = vmatpush.msra.mxu1 %v4729_v33  ;;  %v4963_v6 = vld [vmem:[#allocation54 + $0x370] sm:$0xff]  ;;  %v4964_v32 = vld [vmem:[#allocation54 + $0x378] sm:$0xff] }
 0xd5b   : > { %4770 = vmatpush.msrb.mxu3 %v4700_v34  ;;  %4810 = vmatpush.msrb.mxu0 %v4701_v18  ;;  %v4934_v18 = vld [vmem:[#allocation54 + $0x288] sm:$0xff] }
 0xd5c   : > { %4793 = vmatpush.msra.mxu2 %v4726_v35  ;;  %4833 = vmatpush.msra.mxu1 %v4727_v36  ;;  %v4933_v35 = vld [vmem:[#allocation54 + $0x280] sm:$0xff] }
 0xd5d   : > { %4771 = vmatpush.msrb.mxu3 %v4698_v24  ;;  %4811 = vmatpush.msrb.mxu0 %v4699_v19  ;;  %v4681_v19 = vperm.slane %v8434_v3, 1 }
 0xd5e   : > { %4794 = vmatpush.msra.mxu2 %v4724_v39  ;;  %4834 = vmatpush.msra.mxu1 %v4725_v40  ;;  %v4961_v40 = vld [vmem:[#allocation54 + $0x360] sm:$0xff] }
 0xd5f   : > { %4772 = vmatpush.msrb.mxu3 %v4696_v41  ;;  %4812 = vmatpush.msrb.mxu0 %v4697_v30  ;;  %v4962_v41 = vld [vmem:[#allocation54 + $0x368] sm:$0xff]  ;;  %v4932_v30 = vld [vmem:[#allocation54 + $0x278] sm:$0xff] }
 0xd60   : > { %4795 = vmatpush.msra.mxu2 %v4722_v42  ;;  %4835 = vmatpush.msra.mxu1 %v4723_v45  ;;  %v4931_v42 = vld [vmem:[#allocation54 + $0x270] sm:$0xff] }
 0xd61   : > { %4773 = vmatpush.msrb.mxu3 %v4694_v46  ;;  %4813 = vmatpush.msrb.mxu0 %v4695_v47  ;;  %v4959_v47 = vld [vmem:[#allocation54 + $0x350] sm:$0xff] }
 0xd62   : > { %5007 = vmatpush.msrb.mxu2 %v4979_v54  ;;  %5047 = vmatpush.msrb.mxu1 %v4980_v55 }
 0xd63   : > { %4774 = vmatpush.msrb.mxu3 %v4692_v48  ;;  %4814 = vmatpush.msrb.mxu0 %v4693_v50  ;;  %v4960_v48 = vld [vmem:[#allocation54 + $0x358] sm:$0xff]  ;;  %v4929_v50 = vld [vmem:[#allocation54 + $0x260] sm:$0xff] }
 0xd64   : > { %5008 = vmatpush.msrb.mxu2 %v4977_v56  ;;  %5048 = vmatpush.msrb.mxu1 %v4978_v58  ;;  %v4927_v56 = vld [vmem:[#allocation54 + $0x250] sm:$0xff]  ;;  %v4928_v58 = vld [vmem:[#allocation54 + $0x258] sm:$0xff] }
 0xd65   : > { %4775 = vmatpush.msrb.mxu3 %v4690_v52  ;;  %4815 = vmatpush.msrb.mxu0 %v4691_v53  ;;  %v4957_v52 = vld [vmem:[#allocation54 + $0x340] sm:$0xff]  ;;  %v4958_v53 = vld [vmem:[#allocation54 + $0x348] sm:$0xff] }
 0xd66   : > { %5009 = vmatpush.msrb.mxu2 %v4975_v22  ;;  %5049 = vmatpush.msrb.mxu1 %v4976_v49 }
 0xd67   : > { %4987 = vmatpush.msra.mxu3 %v4947_v13  ;;  %5027 = vmatpush.msra.mxu0 %v4948_v59  ;;  %v4680_v59 = vperm.slane %v8434_v3, 0  ;;  %v4908_v3 = vld [vmem:[#allocation54 + $0x1c0] sm:$0xff] }
 0xd68   : > { %5010 = vmatpush.msrb.mxu2 %v4973_v63  ;;  %5050 = vmatpush.msrb.mxu1 %v4974_v37  ;;  %v4953_v37 = vld [vmem:[#allocation54 + $0x320] sm:$0xff] }
 0xd69   : > { %4988 = vmatpush.msra.mxu3 %v4945_v61  ;;  %5028 = vmatpush.msra.mxu0 %v4946_v62  ;;  %v4954_v62 = vld [vmem:[#allocation54 + $0x328] sm:$0xff] }
 0xd6a   : > { %5011 = vmatpush.msrb.mxu2 %v4971_v2  ;;  %5051 = vmatpush.msrb.mxu1 %v4972_v7  ;;  %v4951_v7 = vld [vmem:[#allocation54 + $0x310] sm:$0xff] }
 0xd6b   : > { %4989 = vmatpush.msra.mxu3 %v4943_v0  ;;  %5029 = vmatpush.msra.mxu0 %v4944_v1  ;;  %v4925_v0 = vld [vmem:[#allocation54 + $0x240] sm:$0xff]  ;;  %v4926_v1 = vld [vmem:[#allocation54 + $0x248] sm:$0xff] }
 0xd6c   : > { %5012 = vmatpush.msrb.mxu2 %v4969_v12  ;;  %5052 = vmatpush.msrb.mxu1 %v4970_v14  ;;  %v4950_v12 = vld [vmem:[#allocation54 + $0x308] sm:$0xff] }
 0xd6d   : > { %4990 = vmatpush.msra.mxu3 %v4941_v9  ;;  %5030 = vmatpush.msra.mxu0 %v4942_v10  ;;  %v4949_v10 = vld [vmem:[#allocation54 + $0x300] sm:$0xff] }
 0xd6e   : > { %5013 = vmatpush.msrb.mxu2 %v4967_v21  ;;  %5053 = vmatpush.msrb.mxu1 %v4968_v23  ;;  %v4922_v21 = vld [vmem:[#allocation54 + $0x228] sm:$0xff]  ;;  %v4912_v23 = vld [vmem:[#allocation54 + $0x1e0] sm:$0xff] }
 0xd6f   : > { %4991 = vmatpush.msra.mxu3 %v4939_v15  ;;  %5031 = vmatpush.msra.mxu0 %v4940_v17  ;;  %v4914_v15 = vld [vmem:[#allocation54 + $0x1f0] sm:$0xff]  ;;  %v4915_v17 = vld [vmem:[#allocation54 + $0x1f8] sm:$0xff] }
 0xd70   : > { %5014 = vmatpush.msrb.mxu2 %v4965_v27  ;;  %5054 = vmatpush.msrb.mxu1 %v4966_v28  ;;  %v4911_v27 = vld [vmem:[#allocation54 + $0x1d8] sm:$0xff]  ;;  %v4917_v28 = vld [vmem:[#allocation54 + $0x200] sm:$0xff] }
 0xd71   : > { %4992 = vmatpush.msra.mxu3 %v4937_v44  ;;  %5032 = vmatpush.msra.mxu0 %v4938_v25  ;;  %v4913_v44 = vld [vmem:[#allocation54 + $0x1e8] sm:$0xff]  ;;  %v4919_v25 = vld [vmem:[#allocation54 + $0x210] sm:$0xff] }
 0xd72   : > { %5015 = vmatpush.msrb.mxu2 %v4963_v6  ;;  %5055 = vmatpush.msrb.mxu1 %v4964_v32  ;;  %v4880_v6 = vld [vmem:[#allocation54 + $0xe0] sm:$0xff]  ;;  %v4906_v32 = vld [vmem:[#allocation54 + $0x1b0] sm:$0xff] }
 0xd73   : > { %4993 = vmatpush.msra.mxu3 %v4935_v4  ;;  %5033 = vmatpush.msra.mxu0 %v4936_v5  ;;  %v4883_v4 = vld [vmem:[#allocation54 + $0xf8] sm:$0xff]  ;;  %v4909_v5 = vld [vmem:[#allocation54 + $0x1c8] sm:$0xff] }
 0xd74   : > { %5016 = vmatpush.msrb.mxu2 %v4961_v40  ;;  %5056 = vmatpush.msrb.mxu1 %v4962_v41  ;;  %v4877_v40 = vld [vmem:[#allocation54 + $0xc8] sm:$0xff]  ;;  %v4903_v41 = vld [vmem:[#allocation54 + $0x198] sm:$0xff] }
 0xd75   : > { %4994 = vmatpush.msra.mxu3 %v4933_v35  ;;  %5034 = vmatpush.msra.mxu0 %v4934_v18  ;;  %v4878_v35 = vld [vmem:[#allocation54 + $0xd0] sm:$0xff]  ;;  %v4904_v18 = vld [vmem:[#allocation54 + $0x1a0] sm:$0xff] }
 0xd76   : > { %5017 = vmatpush.msrb.mxu2 %v4959_v47  ;;  %5057 = vmatpush.msrb.mxu1 %v4960_v48  ;;  %v4872_v47 = vld [vmem:[#allocation54 + $0xa0] sm:$0xff]  ;;  %v4898_v48 = vld [vmem:[#allocation54 + $0x170] sm:$0xff] }
 0xd77   : > { %4995 = vmatpush.msra.mxu3 %v4931_v42  ;;  %5035 = vmatpush.msra.mxu0 %v4932_v30  ;;  %v4874_v42 = vld [vmem:[#allocation54 + $0xb0] sm:$0xff]  ;;  %v4900_v30 = vld [vmem:[#allocation54 + $0x180] sm:$0xff] }
 0xd78   : > { %5018 = vmatpush.msrb.mxu2 %v4957_v52  ;;  %5058 = vmatpush.msrb.mxu1 %v4958_v53  ;;  %v4896_v52 = vld [vmem:[#allocation54 + $0x160] sm:$0xff]  ;;  %v4871_v53 = vld [vmem:[#allocation54 + $0x98] sm:$0xff] }
 0xd79   : > { %4996 = vmatpush.msra.mxu3 %v4929_v50  ;;  %v4873_v50 = vld [vmem:[#allocation54 + $0xa8] sm:$0xff] }
 0xd7b   : > { %4997 = vmatpush.msra.mxu3 %v4927_v56  ;;  %v4894_v56 = vld [vmem:[#allocation54 + $0x150] sm:$0xff] }
 0xd7d   : > { %4998 = vmatpush.msra.mxu3 %v4925_v0  ;;  %v4862_v0 = vld [vmem:[#allocation54 + $0x50] sm:$0xff] }
 0xd99   : > { %v4444_v38 = vpop.f32.mrf.mxu1 }
 0xd9f   : > { %v4424_v51 = vpop.f32.mrf.mxu0  ;;  %v8431_v43 = vpop.f32.mrf.mxu2 }
 0xda0   : > { %v4445_v20 = vadd.f32 %v4444_v38, %v4424_v51  ;;  %v4930_v38 = vld [vmem:[#allocation54 + $0x268] sm:$0xff] }
 0xda1   : > { %5036 = vmatpush.msra.mxu0 %v4930_v38  ;;  %v4899_v38 = vld [vmem:[#allocation54 + $0x178] sm:$0xff] }
 0xda2   : > { %v4524_v11 = vpop.f32.mrf.mxu1 }
 0xda3   : > { %5037 = vmatpush.msra.mxu0 %v4928_v58  ;;  %v4869_v58 = vld [vmem:[#allocation54 + $0x88] sm:$0xff] }
 0xda5   : > { %v4384_v60 = vpop.f32.mrf.mxu3  ;;  %5038 = vmatpush.msra.mxu0 %v4926_v1  ;;  %v4888_v1 = vld [vmem:[#allocation54 + $0x120] sm:$0xff] }
 0xda6   : > { %v4405_v36 = vadd.f32 %v8431_v43, %v4384_v60  ;;  %v4955_v43 = vld [vmem:[#allocation54 + $0x330] sm:$0xff]  ;;  %v4956_v60 = vld [vmem:[#allocation54 + $0x338] sm:$0xff] }
 0xda7   : > { %5019 = vmatpush.msrb.mxu2 %v4955_v43  ;;  %5059 = vmatpush.msrb.mxu1 %v4956_v60  ;;  %v4893_v43 = vld [vmem:[#allocation54 + $0x148] sm:$0xff]  ;;  %v4864_v60 = vld [vmem:[#allocation54 + $0x60] sm:$0xff] }
 0xda8   : > { %v4484_v29 = vpop.f32.mrf.mxu2 }
 0xda9   : > { %v4504_v8 = vpop.f32.mrf.mxu0  ;;  %5020 = vmatpush.msrb.mxu2 %v4953_v37  ;;  %5060 = vmatpush.msrb.mxu1 %v4954_v62  ;;  %v4865_v37 = vld [vmem:[#allocation54 + $0x68] sm:$0xff]  ;;  %v4891_v62 = vld [vmem:[#allocation54 + $0x138] sm:$0xff] }
 0xdaa   : > { %v4505_v26 = vadd.f32 %v4504_v8, %v4445_v20  ;;  %v4924_v8 = vld [vmem:[#allocation54 + $0x238] sm:$0xff]  ;;  %v4921_v20 = vld [vmem:[#allocation54 + $0x220] sm:$0xff] }
 0xdab   : > { %5021 = vmatpush.msrb.mxu2 %v4951_v7  ;;  %5039 = vmatpush.msra.mxu0 %v4924_v8  ;;  %v4889_v7 = vld [vmem:[#allocation54 + $0x128] sm:$0xff] }
 0xdac   : > { %v4525_v24 = vadd.f32 %v4524_v11, %v4505_v26  ;;  %v4952_v11 = vld [vmem:[#allocation54 + $0x318] sm:$0xff]  ;;  %v4861_v8 = vld [vmem:[#allocation54 + $0x48] sm:$0xff] }
 0xdad   : > { %5061 = vmatpush.msrb.mxu1 %v4952_v11  ;;  %5022 = vmatpush.msrb.mxu2 %v4949_v10  ;;  %v4920_v26 = vld [vmem:[#allocation54 + $0x218] sm:$0xff]  ;;  %v4860_v11 = vld [vmem:[#allocation54 + $0x40] sm:$0xff]  ;;  %v4858_v10 = vld [vmem:[#allocation54 + $0x30] sm:$0xff] }
 0xdae   : > { %5040 = vmatpush.msra.mxu0 %v4922_v21  ;;  %v4857_v21 = vld [vmem:[#allocation54 + $0x28] sm:$0xff] }
 0xdaf   : > { %v4464_v31 = vpop.f32.mrf.mxu3  ;;  %5062 = vmatpush.msrb.mxu1 %v4950_v12  ;;  %v4884_v12 = vld [vmem:[#allocation54 + $0x100] sm:$0xff] }
 0xdb0   : > { %v4465_v45 = vadd.f32 %v4464_v31, %v4405_v36  ;;  %5041 = vmatpush.msra.mxu0 %v4920_v26  ;;  %v4882_v31 = vld [vmem:[#allocation54 + $0xf0] sm:$0xff]  ;;  %v4879_v36 = vld [vmem:[#allocation54 + $0xd8] sm:$0xff]  ;;  %v4853_v26 = vld [vmem:[#allocation54 + $0x8] sm:$0xff] }
 0xdb2   : > { %v4485_v22 = vadd.f32 %v4484_v29, %v4465_v45  ;;  %v4918_v29 = vld [vmem:[#allocation54 + $0x208] sm:$0xff]  ;;  %v4875_v45 = vld [vmem:[#allocation54 + $0xb8] sm:$0xff] }
 0xdb3   : > { %5042 = vmatpush.msra.mxu0 %v4918_v29 }
 0xdbc   : > { %v4673_v33 = vpop.f32.mrf.mxu1 }
 0xdc2   : > { %v4653_v34 = vpop.f32.mrf.mxu0  ;;  %v4633_v54 = vpop.f32.mrf.mxu2 }
 0xdc3   : > { %v4674_v39 = vadd.f32 %v4673_v33, %v4653_v34  ;;  %v4881_v33 = vld [vmem:[#allocation54 + $0xe8] sm:$0xff]  ;;  %v4907_v34 = vld [vmem:[#allocation54 + $0x1b8] sm:$0xff] }
 0xdc5   : > { %v4677_v46 = vadd.f32 %v4674_v39, %v4525_v24  ;;  %v4905_v24 = vld [vmem:[#allocation54 + $0x1a8] sm:$0xff]  ;;  %v4876_v39 = vld [vmem:[#allocation54 + $0xc0] sm:$0xff] }
 0xdc7   : > { %v4685_v51 = vadd.f32 %v4681_v19, %v4677_v46  ;;  %v4902_v19 = vld [vmem:[#allocation54 + $0x190] sm:$0xff]  ;;  %v4901_v46 = vld [vmem:[#allocation54 + $0x188] sm:$0xff] }
 0xdc8   : > { %v4613_v55 = vpop.f32.mrf.mxu3 }
 0xdc9   : > { %v4687_v49 = vmax.f32 %v4685_v51, 0.0  ;;  %v4634_v13 = vadd.f32 %v4633_v54, %v4613_v55  ;;  %v4870_v51 = vld [vmem:[#allocation54 + $0x90] sm:$0xff]  ;;  %v4897_v54 = vld [vmem:[#allocation54 + $0x168] sm:$0xff]  ;;  %v4868_v55 = vld [vmem:[#allocation54 + $0x80] sm:$0xff] }
 0xdcb   : > { %v8440_v61 = vadd.f32 %v4687_v49, %v8410_v16  ;;  %v4676_v63 = vadd.f32 %v4634_v13, %v4485_v22  ;;  %v4923_v16 = vld [vmem:[#allocation54 + $0x230] sm:$0xff]  ;;  %v4895_v22 = vld [vmem:[#allocation54 + $0x158] sm:$0xff]  ;;  %v4892_v13 = vld [vmem:[#allocation54 + $0x140] sm:$0xff] }
 0xdcc   : > { %4999 = vmatpush.msra.mxu3 %v4923_v16  ;;  %v4866_v49 = vld [vmem:[#allocation54 + $0x70] sm:$0xff] }
 0xdcd   : > { %v4684_v2 = vadd.f32 %v4680_v59, %v4676_v63  ;;  %4796 = vmatmul.f32.vlgmr.msra.gmra.mxu2 %v8440_v61  ;;  %4836 = vmatmul.f32.vlgmr.msra.gmra.mxu1 %v8440_v61  ;;  %v4867_v59 = vld [vmem:[#allocation54 + $0x78] sm:$0xff]  ;;  %v4890_v63 = vld [vmem:[#allocation54 + $0x130] sm:$0xff] }
 0xdce   : > { %5087 = vmatpush.msra.mxu2 %v4914_v15  ;;  %5127 = vmatpush.msra.mxu1 %v4915_v17  ;;  %v4886_v16 = vld [vmem:[#allocation54 + $0x110] sm:$0xff]  ;;  %v4859_v15 = vld [vmem:[#allocation54 + $0x38] sm:$0xff]  ;;  %v4885_v17 = vld [vmem:[#allocation54 + $0x108] sm:$0xff] }
 0xdcf   : > { %v4686_v9 = vmax.f32 %v4684_v2, 0.0  ;;  %5000 = vmatpush.msra.mxu3 %v4921_v20  ;;  %v4863_v2 = vld [vmem:[#allocation54 + $0x58] sm:$0xff]  ;;  %v4856_v20 = vld [vmem:[#allocation54 + $0x20] sm:$0xff] }
 0xdd0   : > { %5088 = vmatpush.msra.mxu2 %v4912_v23  ;;  %5128 = vmatpush.msra.mxu1 %v4913_v44  ;;  %v4854_v23 = vld [vmem:[#allocation54 + $0x10] sm:$0xff]  ;;  %v4855_v44 = vld [vmem:[#allocation54 + $0x18] sm:$0xff] }
 0xdd1   : > { %v8445_v14 = vadd.f32 %v4686_v9, %v8404_v57  ;;  %v4910_v57 = vld [vmem:[#allocation54 + $0x1d0] sm:$0xff]  ;;  %5001 = vmatpush.msra.mxu3 %v4919_v25  ;;  %v4887_v9 = vld [vmem:[#allocation54 + $0x118] sm:$0xff]  ;;  %v4852_v25 = vld [vmem:[#allocation54] sm:$0xff] }
 0xdd2   : > { %5089 = vmatpush.msra.mxu2 %v4910_v57  ;;  %5129 = vmatpush.msra.mxu1 %v4911_v27  ;;  %v4754_v57 = vld [vmem:[%s8611_s10] sm:$0x3] }
 0xdd3   : > { %4776 = vmatmul.f32.vlgmr.msrb.gmra.mxu3 %v8445_v14  ;;  %4816 = vmatmul.f32.vlgmr.msrb.gmra.mxu0 %v8445_v14  ;;  %v4757_v27 = vperm.slane %v4754_v57, 1 }
 0xdd4   : > { %5002 = vmatpush.msra.mxu3 %v4917_v28  ;;  %5090 = vmatpush.msra.mxu2 %v4908_v3 }
 0xdd5   : > { %5107 = vmatpush.msrb.mxu0 %v4883_v4  ;;  %5130 = vmatpush.msra.mxu1 %v4909_v5  ;;  %v4756_v4 = vperm.slane %v4754_v57, 0  ;;  %v5189_v57 = vld [vmem:[#allocation54 + $0x548] sm:$0xff] }
 0xdd6   : > { %5067 = vmatpush.msrb.mxu3 %v4882_v31  ;;  %5091 = vmatpush.msra.mxu2 %v4906_v32 }
 0xdd7   : > { %5108 = vmatpush.msrb.mxu0 %v4881_v33  ;;  %5131 = vmatpush.msra.mxu1 %v4907_v34 }
 0xdd8   : > { %5068 = vmatpush.msrb.mxu3 %v4880_v6  ;;  %5092 = vmatpush.msra.mxu2 %v4904_v18 }
 0xdd9   : > { %5109 = vmatpush.msrb.mxu0 %v4879_v36  ;;  %5132 = vmatpush.msra.mxu1 %v4905_v24 }
 0xdda   : > { %5069 = vmatpush.msrb.mxu3 %v4878_v35  ;;  %5093 = vmatpush.msra.mxu2 %v4902_v19  ;;  %v5210_v19 = vld [vmem:[#allocation54 + $0x5f0] sm:$0xff] }
 0xddb   : > { %5110 = vmatpush.msrb.mxu0 %v4877_v40  ;;  %5133 = vmatpush.msra.mxu1 %v4903_v41  ;;  %v5211_v40 = vld [vmem:[#allocation54 + $0x5f8] sm:$0xff] }
 0xddc   : > { %5070 = vmatpush.msrb.mxu3 %v4876_v39  ;;  %5094 = vmatpush.msra.mxu2 %v4900_v30  ;;  %v5209_v30 = vld [vmem:[#allocation54 + $0x5e8] sm:$0xff] }
 0xddd   : > { %5111 = vmatpush.msrb.mxu0 %v4875_v45  ;;  %5134 = vmatpush.msra.mxu1 %v4901_v46  ;;  %v5206_v46 = vld [vmem:[#allocation54 + $0x5d0] sm:$0xff] }
 0xdde   : > { %5071 = vmatpush.msrb.mxu3 %v4874_v42  ;;  %5095 = vmatpush.msra.mxu2 %v4898_v48  ;;  %v5208_v42 = vld [vmem:[#allocation54 + $0x5e0] sm:$0xff] }
 0xddf   : > { %5112 = vmatpush.msrb.mxu0 %v4873_v50  ;;  %5135 = vmatpush.msra.mxu1 %v4899_v38  ;;  %v5178_v38 = vld [vmem:[#allocation54 + $0x4f0] sm:$0xff] }
 0xde0   : > { %5072 = vmatpush.msrb.mxu3 %v4872_v47  ;;  %5096 = vmatpush.msra.mxu2 %v4896_v52  ;;  %v5207_v47 = vld [vmem:[#allocation54 + $0x5d8] sm:$0xff] }
 0xde1   : > { %5113 = vmatpush.msrb.mxu0 %v4871_v53  ;;  %5136 = vmatpush.msra.mxu1 %v4897_v54  ;;  %v5179_v52 = vld [vmem:[#allocation54 + $0x4f8] sm:$0xff]  ;;  %v5205_v53 = vld [vmem:[#allocation54 + $0x5c8] sm:$0xff]  ;;  %v5176_v54 = vld [vmem:[#allocation54 + $0x4e0] sm:$0xff] }
 0xde2   : > { %5073 = vmatpush.msrb.mxu3 %v4870_v51  ;;  %5097 = vmatpush.msra.mxu2 %v4894_v56  ;;  %v5204_v51 = vld [vmem:[#allocation54 + $0x5c0] sm:$0xff]  ;;  %v5177_v56 = vld [vmem:[#allocation54 + $0x4e8] sm:$0xff] }
 0xde3   : > { %5114 = vmatpush.msrb.mxu0 %v4869_v58  ;;  %5137 = vmatpush.msra.mxu1 %v4895_v22  ;;  %v5203_v58 = vld [vmem:[#allocation54 + $0x5b8] sm:$0xff]  ;;  %v5174_v22 = vld [vmem:[#allocation54 + $0x4d0] sm:$0xff] }
 0xde4   : > { %5074 = vmatpush.msrb.mxu3 %v4868_v55  ;;  %5098 = vmatpush.msra.mxu2 %v4892_v13  ;;  %v5202_v55 = vld [vmem:[#allocation54 + $0x5b0] sm:$0xff]  ;;  %v5175_v13 = vld [vmem:[#allocation54 + $0x4d8] sm:$0xff] }
 0xde5   : > { %5115 = vmatpush.msrb.mxu0 %v4867_v59  ;;  %5138 = vmatpush.msra.mxu1 %v4893_v43  ;;  %v5201_v59 = vld [vmem:[#allocation54 + $0x5a8] sm:$0xff]  ;;  %v5172_v43 = vld [vmem:[#allocation54 + $0x4c0] sm:$0xff] }
 0xde6   : > { %5075 = vmatpush.msrb.mxu3 %v4866_v49  ;;  %5099 = vmatpush.msra.mxu2 %v4890_v63  ;;  %v5200_v49 = vld [vmem:[#allocation54 + $0x5a0] sm:$0xff]  ;;  %v5173_v63 = vld [vmem:[#allocation54 + $0x4c8] sm:$0xff] }
 0xde7   : > { %5116 = vmatpush.msrb.mxu0 %v4865_v37  ;;  %5139 = vmatpush.msra.mxu1 %v4891_v62  ;;  %v5199_v37 = vld [vmem:[#allocation54 + $0x598] sm:$0xff]  ;;  %v5170_v62 = vld [vmem:[#allocation54 + $0x4b0] sm:$0xff] }
 0xde8   : > { %5076 = vmatpush.msrb.mxu3 %v4864_v60  ;;  %5100 = vmatpush.msra.mxu2 %v4888_v1  ;;  %v5198_v60 = vld [vmem:[#allocation54 + $0x590] sm:$0xff]  ;;  %v5171_v1 = vld [vmem:[#allocation54 + $0x4b8] sm:$0xff] }
 0xde9   : > { %5117 = vmatpush.msrb.mxu0 %v4863_v2  ;;  %5140 = vmatpush.msra.mxu1 %v4889_v7  ;;  %v5197_v2 = vld [vmem:[#allocation54 + $0x588] sm:$0xff]  ;;  %v5168_v7 = vld [vmem:[#allocation54 + $0x4a0] sm:$0xff] }
 0xdea   : > { %5077 = vmatpush.msrb.mxu3 %v4862_v0  ;;  %5101 = vmatpush.msra.mxu2 %v4886_v16  ;;  %v5196_v0 = vld [vmem:[#allocation54 + $0x580] sm:$0xff]  ;;  %v5169_v16 = vld [vmem:[#allocation54 + $0x4a8] sm:$0xff] }
 0xdeb   : > { %5118 = vmatpush.msrb.mxu0 %v4861_v8  ;;  %5141 = vmatpush.msra.mxu1 %v4887_v9  ;;  %v5195_v8 = vld [vmem:[#allocation54 + $0x578] sm:$0xff]  ;;  %v5166_v9 = vld [vmem:[#allocation54 + $0x490] sm:$0xff] }
 0xdec   : > { %5078 = vmatpush.msrb.mxu3 %v4860_v11  ;;  %5102 = vmatpush.msra.mxu2 %v4884_v12  ;;  %v5194_v11 = vld [vmem:[#allocation54 + $0x570] sm:$0xff]  ;;  %v5167_v12 = vld [vmem:[#allocation54 + $0x498] sm:$0xff] }
 0xded   : > { %5119 = vmatpush.msrb.mxu0 %v4859_v15  ;;  %5142 = vmatpush.msra.mxu1 %v4885_v17  ;;  %v5193_v15 = vld [vmem:[#allocation54 + $0x568] sm:$0xff]  ;;  %v5164_v17 = vld [vmem:[#allocation54 + $0x480] sm:$0xff] }
 0xdee   : > { %5079 = vmatpush.msrb.mxu3 %v4858_v10  ;;  %v5192_v10 = vld [vmem:[#allocation54 + $0x560] sm:$0xff] }
 0xdef   : > { %5120 = vmatpush.msrb.mxu0 %v4857_v21  ;;  %v5165_v21 = vld [vmem:[#allocation54 + $0x488] sm:$0xff] }
 0xdf0   : > { %5080 = vmatpush.msrb.mxu3 %v4856_v20  ;;  %v5190_v20 = vld [vmem:[#allocation54 + $0x550] sm:$0xff] }
 0xdf1   : > { %5121 = vmatpush.msrb.mxu0 %v4855_v44  ;;  %v5162_v44 = vld [vmem:[#allocation54 + $0x470] sm:$0xff] }
 0xdf2   : > { %5081 = vmatpush.msrb.mxu3 %v4854_v23  ;;  %v5191_v23 = vld [vmem:[#allocation54 + $0x558] sm:$0xff] }
 0xdf3   : > { %5122 = vmatpush.msrb.mxu0 %v4853_v26  ;;  %v5163_v26 = vld [vmem:[#allocation54 + $0x478] sm:$0xff] }
 0xdf4   : > { %5082 = vmatpush.msrb.mxu3 %v4852_v25  ;;  %v5188_v25 = vld [vmem:[#allocation54 + $0x540] sm:$0xff] }
 0xe4a   : > { %v4837_v31 = vpop.f32.mrf.mxu1 }
 0xe50   : > { %v4817_v28 = vpop.f32.mrf.mxu0  ;;  %v4797_v34 = vpop.f32.mrf.mxu2 }
 0xe51   : > { %v4818_v29 = vadd.f32 %v4817_v28, %v4757_v27  ;;  %v5160_v27 = vld [vmem:[#allocation54 + $0x460] sm:$0xff]  ;;  %v5186_v28 = vld [vmem:[#allocation54 + $0x530] sm:$0xff] }
 0xe53   : > { %v4838_v3 = vadd.f32 %v4837_v31, %v4818_v29  ;;  %v5161_v29 = vld [vmem:[#allocation54 + $0x468] sm:$0xff]  ;;  %v5187_v31 = vld [vmem:[#allocation54 + $0x538] sm:$0xff] }
 0xe55   : > { %v4841_v5 = vmax.f32 %v4838_v3, 0.0  ;;  %v5158_v3 = vld [vmem:[#allocation54 + $0x450] sm:$0xff] }
 0xe56   : > { %v4777_v6 = vpop.f32.mrf.mxu3 }
 0xe57   : > { %v4845_v32 = vrot.slane %v4841_v5, 7  ;;  %v4778_v33 = vadd.f32 %v4777_v6, %v4756_v4  ;;  %v5184_v4 = vld [vmem:[#allocation54 + $0x520] sm:$0xff]  ;;  %v5159_v5 = vld [vmem:[#allocation54 + $0x458] sm:$0xff]  ;;  %v5185_v6 = vld [vmem:[#allocation54 + $0x528] sm:$0xff] }
 0xe59   : > { %v4849_v35 = vsel %vm2049_vm1, 0.0, %v4845_v32  ;;  %v4798_v18 = vadd.f32 %v4797_v34, %v4778_v33  ;;  %v5156_v32 = vld [vmem:[#allocation54 + $0x440] sm:$0xff]  ;;  %v5182_v33 = vld [vmem:[#allocation54 + $0x510] sm:$0xff]  ;;  %v5157_v34 = vld [vmem:[#allocation54 + $0x448] sm:$0xff] }
 0xe5a   : > { %v8452_v36 = vsel %vm4229_vm9, %v4849_v35, 0.0 }
 0xe5b   : > { %v4840_v24 = vmax.f32 %v4798_v18, 0.0  ;;  %v4984_v39 = vrot.slane %v8452_v36, 1  ;;  %v5154_v18 = vld [vmem:[#allocation54 + $0x430] sm:$0xff] }
 0xe5d   : > { %v4844_v41 = vrot.slane %v4840_v24, 7  ;;  %5023 = vmatmul.f32.vlgmr.msrb.gmra.mxu2 %v4984_v39  ;;  %5063 = vmatmul.f32.vlgmr.msrb.gmra.mxu1 %v4984_v39  ;;  %v5180_v24 = vld [vmem:[#allocation54 + $0x500] sm:$0xff]  ;;  %v5155_v39 = vld [vmem:[#allocation54 + $0x438] sm:$0xff] }
 0xe5e   : > { %5236 = vmatpush.msrb.mxu2 %v5210_v19  ;;  %5276 = vmatpush.msrb.mxu1 %v5211_v40  ;;  %v5181_v19 = vld [vmem:[#allocation54 + $0x508] sm:$0xff]  ;;  %v5213_v40 = vrot.slane %v8452_v36, 2 }
 0xe5f   : > { %v4848_v45 = vsel %vm2049_vm1, 0.0, %v4844_v41  ;;  %v5152_v41 = vld [vmem:[#allocation54 + $0x420] sm:$0xff] }
 0xe60   : > { %v8457_v48 = vsel %vm4229_vm9, %v4848_v45, 0.0  ;;  %5237 = vmatpush.msrb.mxu2 %v5208_v42  ;;  %5277 = vmatpush.msrb.mxu1 %v5209_v30  ;;  %v5153_v42 = vld [vmem:[#allocation54 + $0x428] sm:$0xff]  ;;  %v5150_v30 = vld [vmem:[#allocation54 + $0x410] sm:$0xff] }
 0xe61   : > { %v4983_v50 = vrot.slane %v8457_v48, 1 }
 0xe62   : > { %5238 = vmatpush.msrb.mxu2 %v5206_v46  ;;  %5278 = vmatpush.msrb.mxu1 %v5207_v47  ;;  %v5148_v46 = vld [vmem:[#allocation54 + $0x400] sm:$0xff]  ;;  %v5149_v47 = vld [vmem:[#allocation54 + $0x408] sm:$0xff] }
 0xe63   : > { %5003 = vmatmul.f32.vlgmr.msra.gmra.mxu3 %v4983_v50  ;;  %5043 = vmatmul.f32.vlgmr.msra.gmra.mxu0 %v4983_v50  ;;  %v5212_v50 = vrot.slane %v8457_v48, 2 }
 0xe64   : > { %5216 = vmatpush.msra.mxu3 %v5178_v38  ;;  %5239 = vmatpush.msrb.mxu2 %v5204_v51 }
 0xe65   : > { %5256 = vmatpush.msra.mxu0 %v5179_v52  ;;  %5279 = vmatpush.msrb.mxu1 %v5205_v53 }
 0xe66   : > { %5926 = vmatmul.msk.f32.vlgmr.msra.gmra.mxu2 %vm4229_vm9, %v4849_v35  ;;  %5928 = vmatmul.msk.f32.vlgmr.msra.gmra.mxu1 %vm4229_vm9, %v4849_v35  ;;  %v5183_v35 = vld [vmem:[#allocation54 + $0x518] sm:$0xff] }
 0xe67   : > { %5217 = vmatpush.msra.mxu3 %v5176_v54  ;;  %5240 = vmatpush.msrb.mxu2 %v5202_v55 }
 0xe68   : > { %5257 = vmatpush.msra.mxu0 %v5177_v56  ;;  %5280 = vmatpush.msrb.mxu1 %v5203_v58 }
 0xe69   : > { %5218 = vmatpush.msra.mxu3 %v5174_v22  ;;  %5241 = vmatpush.msrb.mxu2 %v5200_v49  ;;  %v5298_v49 = vld [vmem:[%s7642_s25] sm:$0x3] }
 0xe6a   : > { %5258 = vmatpush.msra.mxu0 %v5175_v13  ;;  %5281 = vmatpush.msrb.mxu1 %v5201_v59 }
 0xe6b   : > { %5219 = vmatpush.msra.mxu3 %v5172_v43  ;;  %5242 = vmatpush.msrb.mxu2 %v5198_v60 }
 0xe6c   : > { %5259 = vmatpush.msra.mxu0 %v5173_v63  ;;  %5282 = vmatpush.msrb.mxu1 %v5199_v37  ;;  %v5301_v63 = vperm.slane %v5298_v49, 1 }
 0xe6d   : > { %5925 = vmatmul.msk.f32.vlgmr.msrb.gmra.mxu3 %vm4229_vm9, %v4848_v45  ;;  %5927 = vmatmul.msk.f32.vlgmr.msrb.gmra.mxu0 %vm4229_vm9, %v4848_v45  ;;  %v5151_v45 = vld [vmem:[#allocation54 + $0x418] sm:$0xff] }
 0xe6e   : > { %5220 = vmatpush.msra.mxu3 %v5170_v62  ;;  %5243 = vmatpush.msrb.mxu2 %v5196_v0 }
 0xe6f   : > { %5260 = vmatpush.msra.mxu0 %v5171_v1  ;;  %5283 = vmatpush.msrb.mxu1 %v5197_v2 }
 0xe70   : > { %5221 = vmatpush.msra.mxu3 %v5168_v7  ;;  %5244 = vmatpush.msrb.mxu2 %v5194_v11 }
 0xe71   : > { %5261 = vmatpush.msra.mxu0 %v5169_v16  ;;  %5284 = vmatpush.msrb.mxu1 %v5195_v8  ;;  %v5300_v8 = vperm.slane %v5298_v49, 0 }
 0xe72   : > { %5222 = vmatpush.msra.mxu3 %v5166_v9  ;;  %5245 = vmatpush.msrb.mxu2 %v5192_v10 }
 0xe73   : > { %5262 = vmatpush.msra.mxu0 %v5167_v12  ;;  %5285 = vmatpush.msrb.mxu1 %v5193_v15 }
 0xe74   : > { %5223 = vmatpush.msra.mxu3 %v5164_v17  ;;  %5246 = vmatpush.msrb.mxu2 %v5190_v20 }
 0xe75   : > { %5263 = vmatpush.msra.mxu0 %v5165_v21  ;;  %5286 = vmatpush.msrb.mxu1 %v5191_v23 }
 0xe76   : > { %5224 = vmatpush.msra.mxu3 %v5162_v44  ;;  %5247 = vmatpush.msrb.mxu2 %v5188_v25 }
 0xe77   : > { %5264 = vmatpush.msra.mxu0 %v5163_v26  ;;  %5287 = vmatpush.msrb.mxu1 %v5189_v57 }
 0xe78   : > { %5225 = vmatpush.msra.mxu3 %v5160_v27  ;;  %5248 = vmatpush.msrb.mxu2 %v5186_v28 }
 0xe79   : > { %5265 = vmatpush.msra.mxu0 %v5161_v29  ;;  %5288 = vmatpush.msrb.mxu1 %v5187_v31 }
 0xe7a   : > { %5226 = vmatpush.msra.mxu3 %v5158_v3  ;;  %5249 = vmatpush.msrb.mxu2 %v5184_v4 }
 0xe7b   : > { %5266 = vmatpush.msra.mxu0 %v5159_v5  ;;  %5289 = vmatpush.msrb.mxu1 %v5185_v6 }
 0xe7c   : > { %5227 = vmatpush.msra.mxu3 %v5156_v32  ;;  %5250 = vmatpush.msrb.mxu2 %v5182_v33 }
 0xe7d   : > { %5267 = vmatpush.msra.mxu0 %v5157_v34  ;;  %5290 = vmatpush.msrb.mxu1 %v5183_v35 }
 0xe7e   : > { %5228 = vmatpush.msra.mxu3 %v5154_v18  ;;  %5251 = vmatpush.msrb.mxu2 %v5180_v24 }
 0xe7f   : > { %5268 = vmatpush.msra.mxu0 %v5155_v39  ;;  %5291 = vmatpush.msrb.mxu1 %v5181_v19 }
 0xe80   : > { %5252 = vmatmul.f32.vlgmr.msrb.gmra.mxu2 %v5213_v40  ;;  %5292 = vmatmul.f32.vlgmr.msrb.gmra.mxu1 %v5213_v40 }
 0xe81   : > { %5229 = vmatpush.msra.mxu3 %v5152_v41  ;;  %5269 = vmatpush.msra.mxu0 %v5153_v42 }
 0xe83   : > { %5230 = vmatpush.msra.mxu3 %v5150_v30  ;;  %5270 = vmatpush.msra.mxu0 %v5151_v45 }
 0xe85   : > { %5231 = vmatpush.msra.mxu3 %v5148_v46  ;;  %5271 = vmatpush.msra.mxu0 %v5149_v47 }
 0xe86   : > { %5232 = vmatmul.f32.vlgmr.msra.gmra.mxu3 %v5212_v50  ;;  %5272 = vmatmul.f32.vlgmr.msra.gmra.mxu0 %v5212_v50 }
 0xeda   : > { %v5064_v36 = vpop.f32.mrf.mxu1 }
 0xee0   : > { %v5044_v38 = vpop.f32.mrf.mxu0  ;;  %v5024_v51 = vpop.f32.mrf.mxu2 }
 0xee1   : > { %v5065_v55 = vadd.f32 %v5064_v36, %v5044_v38 }
 0xee3   : > { %v5144_v53 = vpop.f32.mrf.mxu1 }
 0xee6   : > { %v5004_v52 = vpop.f32.mrf.mxu3 }
 0xee7   : > { %v5025_v43 = vadd.f32 %v5024_v51, %v5004_v52 }
 0xee9   : > { %v5104_v58 = vpop.f32.mrf.mxu2 }
 0xeea   : > { %v5124_v54 = vpop.f32.mrf.mxu0 }
 0xeeb   : > { %v5125_v56 = vadd.f32 %v5124_v54, %v5065_v55 }
 0xeed   : > { %v5145_v60 = vadd.f32 %v5144_v53, %v5125_v56 }
 0xef0   : > { %v5084_v22 = vpop.f32.mrf.mxu3 }
 0xef1   : > { %v5085_v37 = vadd.f32 %v5084_v22, %v5025_v43 }
 0xef3   : > { %v5105_v7 = vadd.f32 %v5104_v58, %v5085_v37 }
 0xefd   : > { %v5293_v13 = vpop.f32.mrf.mxu1 }
 0xf03   : > { %v5273_v59 = vpop.f32.mrf.mxu0  ;;  %v5253_v1 = vpop.f32.mrf.mxu2 }
 0xf04   : > { %v5294_v48 = vadd.f32 %v5293_v13, %v5273_v59 }
 0xf06   : > { %v5297_v62 = vadd.f32 %v5294_v48, %v5145_v60 }
 0xf08   : > { %v5305_v0 = vadd.f32 %v5301_v63, %v5297_v62 }
 0xf09   : > { %v5233_v2 = vpop.f32.mrf.mxu3 }
 0xf0a   : > { %v5307_v11 = vmax.f32 %v5305_v0, 0.0  ;;  %v5254_v16 = vadd.f32 %v5253_v1, %v5233_v2 }
 0xf0c   : > { %v5296_v9 = vadd.f32 %v5254_v16, %v5105_v7  ;;  %v5309_v10 = vadd.f32 %v5307_v11, %v8440_v61 }
 0xf0e   : > { %v5304_v12 = vadd.f32 %v5300_v8, %v5296_v9  ;;  %v5312_v17 = vrot.slane %v5309_v10, 4 }
 0xf10   : > { %v5306_v15 = vmax.f32 %v5304_v12, 0.0 }
 0xf12   : > { %v5308_v20 = vadd.f32 %v5306_v15, %v8445_v14 }
 0xf14   : > { %v5314_v21 = vsel %vm5313_vm10, %v5308_v20, %v5312_v17 }
 0xf15   : > { %5316 = vst [vmem:[%s1993_s11] sm:$0xff] %v5314_v21 }
 0xf16 PF: > { %s8612_s0 = sld [smem:[#allocation111_spill]] }
 0xf1c   : > { %s126_s0 = sadd.s32 1, %s8612_s0  }
 0xf1d   : > { %p123_p3 = scmp.ge.s32.totalorder %s126_s0, 4  }
 0xf1f   :  { %125 = sbr.rel (!%p123_p3) target bundleno = 106 (0x6a), region = 459 }
 0xf24   :  { %5352 = vsyncpa [#allocation3], 1 }
 0xf25   :  { %5354 = vsyncpa [#allocation3 + $0x1], 1 }
 0xf26   :  { %5355 = vsyncpa [#allocation5], 1 }
 0xf27   :  { %5356 = vsyncpa [#allocation8], 1 }
 0xf28   :  { %5357 = vsyncpa [#allocation11], 1 }
 0xf29   :  { %5358 = vsyncpa [#allocation14], 1 }
 0xf2a   :  { %5359 = vsyncpa [#allocation17], 1 }
 0xf2b   :  { %5360 = vsyncpa [#allocation20], 1 }
 0xf2c   :  { %5361 = vsyncpa [#allocation23], 1 }
 0xf2d   :  { %5362 = vsyncpa [#allocation26], 1 }
 0xf2e   :  { %5363 = vsyncpa [#allocation29], 1 }
 0xf2f   :  { %5364 = vsyncpa [#allocation32], 1 }
 0xf30   :  { %5365 = vsyncpa [#allocation35], 1 }
 0xf31   :  { %5366 = vsyncpa [#allocation38], 1 }
 0xf32   :  { %5367 = vsyncpa [#allocation41], 1 }
 0xf33   :  { %5368 = vsyncpa [#allocation44], 1 }
 0xf34   :  { %5369 = vsyncpa [#allocation47], 1 }
 0xf35   :  { %5370 = vsyncpa [#allocation50], 1 }
 0xf36   :  { %5371 = vsyncpa [#allocation53], 1 }

</bundles_post_ra>
